<compile_context>
chip_gen: v7x
topology: tpu7x:2x2x1
jax: 0.10.0
libtpu: 0.0.40
codegen_flags: <defaults>
</compile_context>

<pallas_src>
import math

import numpy as np

import jax
import jax.numpy as jnp
from jax.experimental import pallas as pl
from jax.experimental.pallas import tpu as pltpu

_SQRT_2_OVER_PI = 0.7978845608028654

# Model geometry (fixed by the module with L_c=1, dim_1=39, dim_2=16).
_H, _W = 39, 16            # image dims
_C = 16                    # encoder conv channels
_HP, _WP = 19, 8           # pooled dims (AvgPool 2x2, floor mode)
_NLANE = _C * _W           # 256   (H, C*W) conv-activation layout
_NPOOL = _C * _WP          # 128   (Hp, C*Wp) pooled layout (lane dense)
_DPOST = _HP * _NPOOL      # 2432  dim_post_encoder
_DRED = 32                 # dim_reduced
_K = 32                    # solver hidden width


def _gelu(x):
    # TODO(synk): PyTorch nn.GELU() defaults to the exact erf GELU; Mosaic has no erf
    # lowering, so the tanh approximation is used (|diff| ~1e-3).
    return 0.5 * x * (1.0 + jnp.tanh(_SQRT_2_OVER_PI * (x + 0.044715 * x * x * x)))


def _ln_rows(y, eps=1e-5):
    # LayerNorm over the last axis (biased variance, like torch).
    mu = jnp.mean(y, axis=-1, keepdims=True)
    var = jnp.mean((y - mu) ** 2, axis=-1, keepdims=True)
    return (y - mu) * jax.lax.rsqrt(var + eps)


# ---------------------------------------------------------------------------
# Kernel 1: fused Solver MLP (5 x [Linear + LayerNorm + GELU] in one body)
# ---------------------------------------------------------------------------

def _solver_kernel(x_ref, w0_ref, wr_ref, b_ref, g_ref, bt_ref, o_ref):
    def block(y, i):
        y = y + b_ref[i:i + 1, :]
        y = _ln_rows(y) * g_ref[i:i + 1, :] + bt_ref[i:i + 1, :]
        return _gelu(y)

    h = block(jnp.dot(x_ref[...], w0_ref[...],
                      preferred_element_type=jnp.float32), 0)
    for i in range(4):
        h = block(jnp.dot(h, wr_ref[i], preferred_element_type=jnp.float32), i + 1)
    o_ref[...] = h.astype(o_ref.dtype)


def solver_forward(par, sw):
    w0, wr, b, g, bt = sw
    B = par.shape[0]
    D = wr.shape[-1]
    vmem = pl.BlockSpec(memory_space=pltpu.MemorySpace.VMEM)
    return pl.pallas_call(
        _solver_kernel,
        out_shape=jax.ShapeDtypeStruct((B, D), jnp.float32),
        in_specs=[vmem] * 6,
        out_specs=vmem,
    )(par, w0, wr, b, g, bt)


# ---------------------------------------------------------------------------
# Kernel 2: fused conv autoencoder (encoder + decoder, all in VMEM)
# ---------------------------------------------------------------------------

def _autoenc_kernel(
    x_ref,        # (B, 39, 16)   input images
    menc_ref,     # (3, 16, 256)  Conv2d(1,16,3,1,1) as 3 per-kh matmul matrices
    encb_ref,     # (1, 256)      conv bias (lane layout c*16+w)
    gly_ref,      # (39, 256)     LayerNorm([16,39,16]) gamma in (H, C*W) layout
    bly_ref,      # (39, 256)     LayerNorm([16,39,16]) beta
    ph_ref,       # (19, 39)      AvgPool(2,2) row-combining matrix (0.5 entries)
    pw_ref,       # (256, 128)    AvgPool(2,2) lane-combining matrix (0.5 entries)
    wfe_ref,      # (2432, 32)    encoder Linear weight (rows in h*128+c*8+w order)
    bfe_ref,      # (1, 32)
    gfe_ref,      # (1, 32)
    tfe_ref,      # (1, 32)
    wfd_ref,      # (32, 2432)    decoder Linear weight (cols in h*128+c*8+w order)
    bfd_ref,      # (1, 2432)
    gfd_ref,      # (1, 2432)
    tfd_ref,      # (1, 2432)
    rpad_ref,     # (3, 39, 19)   nearest-upsample row replication + H zero pad, per kh
    vdec_ref,     # (3, 128, 16)  W-upsample expansion @ flipped ConvT weights, per kh
    bdec_ref,     # (1, 1)        ConvTranspose bias
    enc_out_ref,  # (B, 32)       output_encoder
    dec_out_ref,  # (B, 39, 16)   output_decoder
    xpad_ref,     # scratch (41, 16)   H-padded conv input
    flat_ref,     # scratch (1, 2432)  flattened pooled map / decoder FC output
    s_ref,        # scratch (19, 128)  pooled / unflattened spatial map
):
    B = x_ref.shape[0]

    # Zero the H-padding rows once (kept zero across batch iterations).
    xpad_ref[0:1, :] = jnp.zeros((1, _W), jnp.float32)
    xpad_ref[_H + 1:_H + 2, :] = jnp.zeros((1, _W), jnp.float32)

    for b in range(B):
        # ----------------------------- encoder -----------------------------
        # Conv2d(1,16,3,stride=1,pad=1) as 3 MXU matmuls; output layout (39, 256).
        xpad_ref[1:_H + 1, :] = x_ref[b]
        y = jnp.zeros((_H, _NLANE), jnp.float32)
        for kh in range(3):
            y = y + jnp.dot(xpad_ref[kh:kh + _H, :], menc_ref[kh],
                            preferred_element_type=jnp.float32)
        y = y + encb_ref[...]

        # LayerNorm over [C,H,W] (all 16*39*16 elements) + affine + GELU.
        mu = jnp.mean(jnp.mean(y, axis=-1, keepdims=True), axis=0, keepdims=True)
        var = jnp.mean(jnp.mean((y - mu) ** 2, axis=-1, keepdims=True),
                       axis=0, keepdims=True)
        y = (y - mu) * jax.lax.rsqrt(var + 1e-5) * gly_ref[...] + bly_ref[...]
        y = _gelu(y)

        # AvgPool2d(2,2) as two matmuls with constant 0.5 matrices -> (19, 128).
        yp = jnp.dot(jnp.dot(ph_ref[...], y, preferred_element_type=jnp.float32),
                     pw_ref[...], preferred_element_type=jnp.float32)

        # Flatten to a lane-dense (1, 2432) row: 19 aligned 128-lane tile copies.
        s_ref[...] = yp
        for h in range(_HP):
            flat_ref[0:1, h * _NPOOL:(h + 1) * _NPOOL] = s_ref[h:h + 1, :]

        # Linear(2432, 32) + LayerNorm(32) + GELU.
        e = jnp.dot(flat_ref[...], wfe_ref[...], preferred_element_type=jnp.float32)
        e = _gelu(_ln_rows(e + bfe_ref[...]) * gfe_ref[...] + tfe_ref[...])
        enc_out_ref[b:b + 1, :] = e.astype(enc_out_ref.dtype)

        # ----------------------------- decoder -----------------------------
        # Linear(32, 2432) + LayerNorm(2432) + GELU.
        d = jnp.dot(e, wfd_ref[...], preferred_element_type=jnp.float32)
        d = _gelu(_ln_rows(d + bfd_ref[...]) * gfd_ref[...] + tfd_ref[...])

        # Unflatten(1, (16,19,8)): repack the flat row into (19, 128) spatial form.
        flat_ref[...] = d
        for h in range(_HP):
            s_ref[h:h + 1, :] = flat_ref[0:1, h * _NPOOL:(h + 1) * _NPOOL]
        s = s_ref[...]

        # Upsample(size=(39,16), nearest) + ConvTranspose2d(16,1,3,1,1):
        # per kernel-row kh, two MXU matmuls (row replication, then channel+W reduce).
        o = jnp.zeros((_H, _W), jnp.float32)
        for kh in range(3):
            zrows = jnp.dot(rpad_ref[kh], s, preferred_element_type=jnp.float32)
            o = o + jnp.dot(zrows, vdec_ref[kh], preferred_element_type=jnp.float32)
        o = o + bdec_ref[...]
        dec_out_ref[b] = o.astype(dec_out_ref.dtype)


def autoenc_forward(x, aw):
    B = x.shape[0]
    vmem = pl.BlockSpec(memory_space=pltpu.MemorySpace.VMEM)
    return pl.pallas_call(
        _autoenc_kernel,
        out_shape=(jax.ShapeDtypeStruct((B, _DRED), jnp.float32),
                   jax.ShapeDtypeStruct((B, _H, _W), jnp.float32)),
        in_specs=[vmem] * (1 + len(aw)),
        out_specs=(vmem, vmem),
        scratch_shapes=[
            pltpu.VMEM((_H + 2, _W), jnp.float32),
            pltpu.VMEM((1, _DPOST), jnp.float32),
            pltpu.VMEM((_HP, _NPOOL), jnp.float32),
        ],
    )(x, *aw)


# ---------------------------------------------------------------------------
# Parameters: deterministic PyTorch-style init, rearranged into kernel layouts.
# ---------------------------------------------------------------------------

def _uniform(key, shape, bound):
    return jax.random.uniform(key, shape, jnp.float32, -bound, bound)


def init_params(key):
    keys = jax.random.split(key, 8)

    # ---- solver: Linear(3,K) + 3x Linear(K,K) + Linear(K,dim_reduced), each +LN+GELU
    sk = jax.random.split(keys[0], 10)
    b0 = 1.0 / math.sqrt(3.0)
    bk = 1.0 / math.sqrt(float(_K))
    w0 = _uniform(sk[0], (3, _K), b0)
    bs = [_uniform(sk[1], (_K,), b0)]
    ws = []
    for i in range(4):
        ws.append(_uniform(sk[2 + 2 * i], (_K, _K), bk))
        bs.append(_uniform(sk[3 + 2 * i], (_K,), bk))
    solver = (w0, jnp.stack(ws), jnp.stack(bs),
              jnp.ones((5, _K), jnp.float32), jnp.zeros((5, _K), jnp.float32))

    # ---- encoder Conv2d(1, 16, 3, 1, 1): build per-kh (16, 256) matmul matrices
    #      M[kh][w_in, co*16+w_out] = W_conv[co, 0, kh, kw], kw = w_in - w_out + 1
    ck = jax.random.split(keys[1], 2)
    cb = 1.0 / math.sqrt(9.0)
    w_conv = np.asarray(_uniform(ck[0], (16, 1, 3, 3), cb))
    b_conv = np.asarray(_uniform(ck[1], (16,), cb))
    menc = np.zeros((3, 16, _NLANE), np.float32)
    for kh in range(3):
        for co in range(16):
            for wo in range(16):
                for kw in range(3):
                    wi = wo + kw - 1
                    if 0 <= wi < 16:
                        menc[kh, wi, co * 16 + wo] = w_conv[co, 0, kh, kw]
    encb = np.repeat(b_conv, 16)[None, :].astype(np.float32)           # (1,256)

    # LayerNorm([16,39,16]) affine, rearranged to the (H, C*W) activation layout.
    gly = np.ones((16, _H, _W), np.float32).transpose(1, 0, 2).reshape(_H, _NLANE)
    bly = np.zeros((_H, _NLANE), np.float32)

    # AvgPool2d(2,2) (floor mode: row 38 dropped) as constant matrices.
    ph = np.zeros((_HP, _H), np.float32)
    for hp in range(_HP):
        ph[hp, 2 * hp] = 0.5
        ph[hp, 2 * hp + 1] = 0.5
    pw = np.zeros((_NLANE, _NPOOL), np.float32)
    for c in range(16):
        for wp in range(_WP):
            pw[c * 16 + 2 * wp, c * 8 + wp] = 0.5
            pw[c * 16 + 2 * wp + 1, c * 8 + wp] = 0.5

    # ---- encoder Linear(2432, 32): generated in torch (c,h,w) flatten order, then
    #      permuted to the kernel's (h, c, w) = h*128 + c*8 + w row order.
    fk = jax.random.split(keys[2], 2)
    fb = 1.0 / math.sqrt(float(_DPOST))
    wfe_t = np.asarray(_uniform(fk[0], (_DPOST, _DRED), fb))
    wfe = wfe_t.reshape(16, _HP, _WP, _DRED).transpose(1, 0, 2, 3).reshape(_DPOST, _DRED)
    bfe = np.asarray(_uniform(fk[1], (_DRED,), fb))[None, :]
    gfe = np.ones((1, _DRED), np.float32)
    tfe = np.zeros((1, _DRED), np.float32)

    # ---- decoder Linear(32, 2432): output columns permuted to (h, c, w) order.
    dk = jax.random.split(keys[3], 2)
    db = 1.0 / math.sqrt(float(_DRED))
    wfd_t = np.asarray(_uniform(dk[0], (_DRED, _DPOST), db))           # cols: c*152+h*8+w
    wfd = wfd_t.reshape(_DRED, 16, _HP, _WP).transpose(0, 2, 1, 3).reshape(_DRED, _DPOST)
    perm = lambda v: v.reshape(16, _HP, _WP).transpose(1, 0, 2).reshape(_DPOST)
    bfd = perm(np.asarray(_uniform(dk[1], (_DPOST,), db)))[None, :]
    gfd = np.ones((1, _DPOST), np.float32)
    tfd = np.zeros((1, _DPOST), np.float32)

    # ---- decoder ConvTranspose2d(16, 1, 3, 1, 1), torch weight layout (in, out, kh, kw)
    tk = jax.random.split(keys[4], 2)
    tb = 1.0 / math.sqrt(16.0 * 9.0)
    w_ct = np.asarray(_uniform(tk[0], (16, 1, 3, 3), tb))
    b_ct = np.asarray(_uniform(tk[1], (1,), tb))
    wf = np.ascontiguousarray(w_ct[:, 0, ::-1, ::-1])   # equivalent conv kernel (16,3,3)

    # nearest-upsample (19 -> 39 rows) replication with H zero-padding, per kh window.
    full = np.zeros((_H + 2, _HP), np.float32)
    for r in range(1, _H + 1):
        full[r, ((r - 1) * _HP) // _H] = 1.0
    rpad = np.zeros((3, _H, _HP), np.float32)
    for kh in range(3):
        rpad[kh] = full[kh:kh + _H]

    # lane expansion (8 -> 16 nearest in W) folded with the flipped ConvT weights.
    u = np.zeros((_NPOOL, _NLANE), np.float32)
    for c in range(16):
        for ws_ in range(_WP):
            u[c * 8 + ws_, c * 16 + 2 * ws_] = 1.0
            u[c * 8 + ws_, c * 16 + 2 * ws_ + 1] = 1.0
    vdec = np.zeros((3, _NPOOL, _W), np.float32)
    for kh in range(3):
        nmat = np.zeros((_NLANE, _W), np.float32)
        for c in range(16):
            for W in range(16):
                for wo in range(16):
                    kw = W - wo + 1
                    if 0 <= kw < 3:
                        nmat[c * 16 + W, wo] = wf[c, kh, kw]
        vdec[kh] = u @ nmat
    bdec = b_ct.reshape(1, 1).astype(np.float32)

    autoenc = tuple(jnp.asarray(a, jnp.float32) for a in (
        menc, encb, gly, bly, ph, pw,
        wfe, bfe, gfe, tfe,
        wfd, bfd, gfd, tfd,
        rpad, vdec, bdec))

    return {'solver': solver, 'autoenc': autoenc}


# ---------------------------------------------------------------------------
# Forward pass (matches SolverPlusConvAutoencoder.forward): 2 pallas_calls total.
# ---------------------------------------------------------------------------

def forward(params, par, out):
    output_solver = solver_forward(par, params['solver'])
    output_encoder, output_decoder = autoenc_forward(out, params['autoenc'])
    return output_solver, output_encoder, output_decoder


if __name__ == "__main__":
    key = jax.random.PRNGKey(0)
    k_par, k_out, k_params = jax.random.split(key, 3)

    B = 2
    par = jax.random.normal(k_par, (B, 3), jnp.float32)
    out = jax.random.normal(k_out, (B, _H, _W), jnp.float32)
    params = init_params(k_params)

    fwd = jax.jit(forward)
    sol, enc, dec = fwd(params, par, out)
    jax.block_until_ready((sol, enc, dec))

    assert sol.shape == (B, _DRED)
    assert enc.shape == (B, _DRED)
    assert dec.shape == (B, _H, _W)
    print("KERNEL_OK")
</pallas_src>

<mosaic_0001>
module attributes {stable_mosaic.version = 11 : i64} {
  func.func @_solver_kernel(%arg0: memref<2x3xf32, #tpu.memory_space<vmem>>, %arg1: memref<3x32xf32, #tpu.memory_space<vmem>>, %arg2: memref<4x32x32xf32, #tpu.memory_space<vmem>>, %arg3: memref<5x32xf32, #tpu.memory_space<vmem>>, %arg4: memref<5x32xf32, #tpu.memory_space<vmem>>, %arg5: memref<5x32xf32, #tpu.memory_space<vmem>>, %arg6: memref<2x32xf32, #tpu.memory_space<vmem>>) attributes {dimension_semantics = [], scalar_prefetch = 0 : i64, scratch_operands = 0 : i64, tpu.core_type = #tpu.core_type<tc>} {
    %c0 = arith.constant 0 : index
    %c0_0 = arith.constant 0 : index
    %0 = vector.load %arg0[%c0, %c0_0] : memref<2x3xf32, #tpu.memory_space<vmem>>, vector<2x3xf32>
    %c0_1 = arith.constant 0 : index
    %c0_2 = arith.constant 0 : index
    %1 = vector.load %arg1[%c0_1, %c0_2] : memref<3x32xf32, #tpu.memory_space<vmem>>, vector<3x32xf32>
    %cst = arith.constant dense<0.000000e+00> : vector<2x32xf32>
    %2 = tpu.matmul %0, %1, %cst {dimension_numbers = #tpu.dot_dimension_numbers<[1], [0], [0], [1], [0, 0, 1, 1], [], []>} : vector<2x3xf32>, vector<3x32xf32>, vector<2x32xf32> -> vector<2x32xf32>
    %c0_3 = arith.constant 0 : index
    %c0_4 = arith.constant 0 : index
    %3 = vector.load %arg3[%c0_3, %c0_4] : memref<5x32xf32, #tpu.memory_space<vmem>>, vector<1x32xf32>
    %4 = vector.broadcast %3 : vector<1x32xf32> to vector<2x32xf32>
    %5 = arith.addf %2, %4 : vector<2x32xf32>
    %cst_5 = arith.constant dense<0.000000e+00> : vector<2xf32>
    %6 = vector.multi_reduction <add>, %5, %cst_5 [1] : vector<2x32xf32> to vector<2xf32>
    %7 = vector.shape_cast %6 : vector<2xf32> to vector<2x1xf32>
    %cst_6 = arith.constant 3.200000e+01 : f32
    %8 = vector.broadcast %cst_6 : f32 to vector<2x1xf32>
    %9 = arith.divf %7, %8 : vector<2x1xf32>
    %10 = vector.broadcast %9 : vector<2x1xf32> to vector<2x32xf32>
    %11 = arith.subf %5, %10 : vector<2x32xf32>
    %12 = arith.mulf %11, %11 : vector<2x32xf32>
    %cst_7 = arith.constant dense<0.000000e+00> : vector<2xf32>
    %13 = vector.multi_reduction <add>, %12, %cst_7 [1] : vector<2x32xf32> to vector<2xf32>
    %14 = vector.shape_cast %13 : vector<2xf32> to vector<2x1xf32>
    %cst_8 = arith.constant 3.200000e+01 : f32
    %15 = vector.broadcast %cst_8 : f32 to vector<2x1xf32>
    %16 = arith.divf %14, %15 : vector<2x1xf32>
    %17 = vector.broadcast %9 : vector<2x1xf32> to vector<2x32xf32>
    %18 = arith.subf %5, %17 : vector<2x32xf32>
    %cst_9 = arith.constant 9.99999974E-6 : f32
    %19 = vector.broadcast %cst_9 : f32 to vector<2x1xf32>
    %20 = arith.addf %16, %19 : vector<2x1xf32>
    %21 = math.rsqrt %20 : vector<2x1xf32>
    %22 = vector.broadcast %21 : vector<2x1xf32> to vector<2x32xf32>
    %23 = arith.mulf %18, %22 : vector<2x32xf32>
    %c0_10 = arith.constant 0 : index
    %c0_11 = arith.constant 0 : index
    %24 = vector.load %arg4[%c0_10, %c0_11] : memref<5x32xf32, #tpu.memory_space<vmem>>, vector<1x32xf32>
    %25 = vector.broadcast %24 : vector<1x32xf32> to vector<2x32xf32>
    %26 = arith.mulf %23, %25 : vector<2x32xf32>
    %c0_12 = arith.constant 0 : index
    %c0_13 = arith.constant 0 : index
    %27 = vector.load %arg5[%c0_12, %c0_13] : memref<5x32xf32, #tpu.memory_space<vmem>>, vector<1x32xf32>
    %28 = vector.broadcast %27 : vector<1x32xf32> to vector<2x32xf32>
    %29 = arith.addf %26, %28 : vector<2x32xf32>
    %cst_14 = arith.constant 5.000000e-01 : f32
    %30 = vector.broadcast %cst_14 : f32 to vector<2x32xf32>
    %31 = arith.mulf %30, %29 : vector<2x32xf32>
    %cst_15 = arith.constant 4.471500e-02 : f32
    %32 = vector.broadcast %cst_15 : f32 to vector<2x32xf32>
    %33 = arith.mulf %32, %29 : vector<2x32xf32>
    %34 = arith.mulf %33, %29 : vector<2x32xf32>
    %35 = arith.mulf %34, %29 : vector<2x32xf32>
    %36 = arith.addf %29, %35 : vector<2x32xf32>
    %cst_16 = arith.constant 0.797884583 : f32
    %37 = vector.broadcast %cst_16 : f32 to vector<2x32xf32>
    %38 = arith.mulf %37, %36 : vector<2x32xf32>
    %39 = math.tanh %38 : vector<2x32xf32>
    %cst_17 = arith.constant 1.000000e+00 : f32
    %40 = vector.broadcast %cst_17 : f32 to vector<2x32xf32>
    %41 = arith.addf %40, %39 : vector<2x32xf32>
    %42 = arith.mulf %31, %41 : vector<2x32xf32>
    %c0_18 = arith.constant 0 : index
    %c0_19 = arith.constant 0 : index
    %c0_20 = arith.constant 0 : index
    %43 = vector.load %arg2[%c0_18, %c0_19, %c0_20] : memref<4x32x32xf32, #tpu.memory_space<vmem>>, vector<1x32x32xf32>
    %44 = vector.shape_cast %43 : vector<1x32x32xf32> to vector<32x32xf32>
    %cst_21 = arith.constant dense<0.000000e+00> : vector<2x32xf32>
    %45 = tpu.matmul %42, %44, %cst_21 {dimension_numbers = #tpu.dot_dimension_numbers<[1], [0], [0], [1], [0, 0, 1, 1], [], []>} : vector<2x32xf32>, vector<32x32xf32>, vector<2x32xf32> -> vector<2x32xf32>
    %c1 = arith.constant 1 : index
    %c0_22 = arith.constant 0 : index
    %46 = vector.load %arg3[%c1, %c0_22] : memref<5x32xf32, #tpu.memory_space<vmem>>, vector<1x32xf32>
    %47 = vector.broadcast %46 : vector<1x32xf32> to vector<2x32xf32>
    %48 = arith.addf %45, %47 : vector<2x32xf32>
    %cst_23 = arith.constant dense<0.000000e+00> : vector<2xf32>
    %49 = vector.multi_reduction <add>, %48, %cst_23 [1] : vector<2x32xf32> to vector<2xf32>
    %50 = vector.shape_cast %49 : vector<2xf32> to vector<2x1xf32>
    %cst_24 = arith.constant 3.200000e+01 : f32
    %51 = vector.broadcast %cst_24 : f32 to vector<2x1xf32>
    %52 = arith.divf %50, %51 : vector<2x1xf32>
    %53 = vector.broadcast %52 : vector<2x1xf32> to vector<2x32xf32>
    %54 = arith.subf %48, %53 : vector<2x32xf32>
    %55 = arith.mulf %54, %54 : vector<2x32xf32>
    %cst_25 = arith.constant dense<0.000000e+00> : vector<2xf32>
    %56 = vector.multi_reduction <add>, %55, %cst_25 [1] : vector<2x32xf32> to vector<2xf32>
    %57 = vector.shape_cast %56 : vector<2xf32> to vector<2x1xf32>
    %cst_26 = arith.constant 3.200000e+01 : f32
    %58 = vector.broadcast %cst_26 : f32 to vector<2x1xf32>
    %59 = arith.divf %57, %58 : vector<2x1xf32>
    %60 = vector.broadcast %52 : vector<2x1xf32> to vector<2x32xf32>
    %61 = arith.subf %48, %60 : vector<2x32xf32>
    %cst_27 = arith.constant 9.99999974E-6 : f32
    %62 = vector.broadcast %cst_27 : f32 to vector<2x1xf32>
    %63 = arith.addf %59, %62 : vector<2x1xf32>
    %64 = math.rsqrt %63 : vector<2x1xf32>
    %65 = vector.broadcast %64 : vector<2x1xf32> to vector<2x32xf32>
    %66 = arith.mulf %61, %65 : vector<2x32xf32>
    %c1_28 = arith.constant 1 : index
    %c0_29 = arith.constant 0 : index
    %67 = vector.load %arg4[%c1_28, %c0_29] : memref<5x32xf32, #tpu.memory_space<vmem>>, vector<1x32xf32>
    %68 = vector.broadcast %67 : vector<1x32xf32> to vector<2x32xf32>
    %69 = arith.mulf %66, %68 : vector<2x32xf32>
    %c1_30 = arith.constant 1 : index
    %c0_31 = arith.constant 0 : index
    %70 = vector.load %arg5[%c1_30, %c0_31] : memref<5x32xf32, #tpu.memory_space<vmem>>, vector<1x32xf32>
    %71 = vector.broadcast %70 : vector<1x32xf32> to vector<2x32xf32>
    %72 = arith.addf %69, %71 : vector<2x32xf32>
    %cst_32 = arith.constant 5.000000e-01 : f32
    %73 = vector.broadcast %cst_32 : f32 to vector<2x32xf32>
    %74 = arith.mulf %73, %72 : vector<2x32xf32>
    %cst_33 = arith.constant 4.471500e-02 : f32
    %75 = vector.broadcast %cst_33 : f32 to vector<2x32xf32>
    %76 = arith.mulf %75, %72 : vector<2x32xf32>
    %77 = arith.mulf %76, %72 : vector<2x32xf32>
    %78 = arith.mulf %77, %72 : vector<2x32xf32>
    %79 = arith.addf %72, %78 : vector<2x32xf32>
    %cst_34 = arith.constant 0.797884583 : f32
    %80 = vector.broadcast %cst_34 : f32 to vector<2x32xf32>
    %81 = arith.mulf %80, %79 : vector<2x32xf32>
    %82 = math.tanh %81 : vector<2x32xf32>
    %cst_35 = arith.constant 1.000000e+00 : f32
    %83 = vector.broadcast %cst_35 : f32 to vector<2x32xf32>
    %84 = arith.addf %83, %82 : vector<2x32xf32>
    %85 = arith.mulf %74, %84 : vector<2x32xf32>
    %c1_36 = arith.constant 1 : index
    %c0_37 = arith.constant 0 : index
    %c0_38 = arith.constant 0 : index
    %86 = vector.load %arg2[%c1_36, %c0_37, %c0_38] : memref<4x32x32xf32, #tpu.memory_space<vmem>>, vector<1x32x32xf32>
    %87 = vector.shape_cast %86 : vector<1x32x32xf32> to vector<32x32xf32>
    %cst_39 = arith.constant dense<0.000000e+00> : vector<2x32xf32>
    %88 = tpu.matmul %85, %87, %cst_39 {dimension_numbers = #tpu.dot_dimension_numbers<[1], [0], [0], [1], [0, 0, 1, 1], [], []>} : vector<2x32xf32>, vector<32x32xf32>, vector<2x32xf32> -> vector<2x32xf32>
    %c2 = arith.constant 2 : index
    %c0_40 = arith.constant 0 : index
    %89 = vector.load %arg3[%c2, %c0_40] : memref<5x32xf32, #tpu.memory_space<vmem>>, vector<1x32xf32>
    %90 = vector.broadcast %89 : vector<1x32xf32> to vector<2x32xf32>
    %91 = arith.addf %88, %90 : vector<2x32xf32>
    %cst_41 = arith.constant dense<0.000000e+00> : vector<2xf32>
    %92 = vector.multi_reduction <add>, %91, %cst_41 [1] : vector<2x32xf32> to vector<2xf32>
    %93 = vector.shape_cast %92 : vector<2xf32> to vector<2x1xf32>
    %cst_42 = arith.constant 3.200000e+01 : f32
    %94 = vector.broadcast %cst_42 : f32 to vector<2x1xf32>
    %95 = arith.divf %93, %94 : vector<2x1xf32>
    %96 = vector.broadcast %95 : vector<2x1xf32> to vector<2x32xf32>
    %97 = arith.subf %91, %96 : vector<2x32xf32>
    %98 = arith.mulf %97, %97 : vector<2x32xf32>
    %cst_43 = arith.constant dense<0.000000e+00> : vector<2xf32>
    %99 = vector.multi_reduction <add>, %98, %cst_43 [1] : vector<2x32xf32> to vector<2xf32>
    %100 = vector.shape_cast %99 : vector<2xf32> to vector<2x1xf32>
    %cst_44 = arith.constant 3.200000e+01 : f32
    %101 = vector.broadcast %cst_44 : f32 to vector<2x1xf32>
    %102 = arith.divf %100, %101 : vector<2x1xf32>
    %103 = vector.broadcast %95 : vector<2x1xf32> to vector<2x32xf32>
    %104 = arith.subf %91, %103 : vector<2x32xf32>
    %cst_45 = arith.constant 9.99999974E-6 : f32
    %105 = vector.broadcast %cst_45 : f32 to vector<2x1xf32>
    %106 = arith.addf %102, %105 : vector<2x1xf32>
    %107 = math.rsqrt %106 : vector<2x1xf32>
    %108 = vector.broadcast %107 : vector<2x1xf32> to vector<2x32xf32>
    %109 = arith.mulf %104, %108 : vector<2x32xf32>
    %c2_46 = arith.constant 2 : index
    %c0_47 = arith.constant 0 : index
    %110 = vector.load %arg4[%c2_46, %c0_47] : memref<5x32xf32, #tpu.memory_space<vmem>>, vector<1x32xf32>
    %111 = vector.broadcast %110 : vector<1x32xf32> to vector<2x32xf32>
    %112 = arith.mulf %109, %111 : vector<2x32xf32>
    %c2_48 = arith.constant 2 : index
    %c0_49 = arith.constant 0 : index
    %113 = vector.load %arg5[%c2_48, %c0_49] : memref<5x32xf32, #tpu.memory_space<vmem>>, vector<1x32xf32>
    %114 = vector.broadcast %113 : vector<1x32xf32> to vector<2x32xf32>
    %115 = arith.addf %112, %114 : vector<2x32xf32>
    %cst_50 = arith.constant 5.000000e-01 : f32
    %116 = vector.broadcast %cst_50 : f32 to vector<2x32xf32>
    %117 = arith.mulf %116, %115 : vector<2x32xf32>
    %cst_51 = arith.constant 4.471500e-02 : f32
    %118 = vector.broadcast %cst_51 : f32 to vector<2x32xf32>
    %119 = arith.mulf %118, %115 : vector<2x32xf32>
    %120 = arith.mulf %119, %115 : vector<2x32xf32>
    %121 = arith.mulf %120, %115 : vector<2x32xf32>
    %122 = arith.addf %115, %121 : vector<2x32xf32>
    %cst_52 = arith.constant 0.797884583 : f32
    %123 = vector.broadcast %cst_52 : f32 to vector<2x32xf32>
    %124 = arith.mulf %123, %122 : vector<2x32xf32>
    %125 = math.tanh %124 : vector<2x32xf32>
    %cst_53 = arith.constant 1.000000e+00 : f32
    %126 = vector.broadcast %cst_53 : f32 to vector<2x32xf32>
    %127 = arith.addf %126, %125 : vector<2x32xf32>
    %128 = arith.mulf %117, %127 : vector<2x32xf32>
    %c2_54 = arith.constant 2 : index
    %c0_55 = arith.constant 0 : index
    %c0_56 = arith.constant 0 : index
    %129 = vector.load %arg2[%c2_54, %c0_55, %c0_56] : memref<4x32x32xf32, #tpu.memory_space<vmem>>, vector<1x32x32xf32>
    %130 = vector.shape_cast %129 : vector<1x32x32xf32> to vector<32x32xf32>
    %cst_57 = arith.constant dense<0.000000e+00> : vector<2x32xf32>
    %131 = tpu.matmul %128, %130, %cst_57 {dimension_numbers = #tpu.dot_dimension_numbers<[1], [0], [0], [1], [0, 0, 1, 1], [], []>} : vector<2x32xf32>, vector<32x32xf32>, vector<2x32xf32> -> vector<2x32xf32>
    %c3 = arith.constant 3 : index
    %c0_58 = arith.constant 0 : index
    %132 = vector.load %arg3[%c3, %c0_58] : memref<5x32xf32, #tpu.memory_space<vmem>>, vector<1x32xf32>
    %133 = vector.broadcast %132 : vector<1x32xf32> to vector<2x32xf32>
    %134 = arith.addf %131, %133 : vector<2x32xf32>
    %cst_59 = arith.constant dense<0.000000e+00> : vector<2xf32>
    %135 = vector.multi_reduction <add>, %134, %cst_59 [1] : vector<2x32xf32> to vector<2xf32>
    %136 = vector.shape_cast %135 : vector<2xf32> to vector<2x1xf32>
    %cst_60 = arith.constant 3.200000e+01 : f32
    %137 = vector.broadcast %cst_60 : f32 to vector<2x1xf32>
    %138 = arith.divf %136, %137 : vector<2x1xf32>
    %139 = vector.broadcast %138 : vector<2x1xf32> to vector<2x32xf32>
    %140 = arith.subf %134, %139 : vector<2x32xf32>
    %141 = arith.mulf %140, %140 : vector<2x32xf32>
    %cst_61 = arith.constant dense<0.000000e+00> : vector<2xf32>
    %142 = vector.multi_reduction <add>, %141, %cst_61 [1] : vector<2x32xf32> to vector<2xf32>
    %143 = vector.shape_cast %142 : vector<2xf32> to vector<2x1xf32>
    %cst_62 = arith.constant 3.200000e+01 : f32
    %144 = vector.broadcast %cst_62 : f32 to vector<2x1xf32>
    %145 = arith.divf %143, %144 : vector<2x1xf32>
    %146 = vector.broadcast %138 : vector<2x1xf32> to vector<2x32xf32>
    %147 = arith.subf %134, %146 : vector<2x32xf32>
    %cst_63 = arith.constant 9.99999974E-6 : f32
    %148 = vector.broadcast %cst_63 : f32 to vector<2x1xf32>
    %149 = arith.addf %145, %148 : vector<2x1xf32>
    %150 = math.rsqrt %149 : vector<2x1xf32>
    %151 = vector.broadcast %150 : vector<2x1xf32> to vector<2x32xf32>
    %152 = arith.mulf %147, %151 : vector<2x32xf32>
    %c3_64 = arith.constant 3 : index
    %c0_65 = arith.constant 0 : index
    %153 = vector.load %arg4[%c3_64, %c0_65] : memref<5x32xf32, #tpu.memory_space<vmem>>, vector<1x32xf32>
    %154 = vector.broadcast %153 : vector<1x32xf32> to vector<2x32xf32>
    %155 = arith.mulf %152, %154 : vector<2x32xf32>
    %c3_66 = arith.constant 3 : index
    %c0_67 = arith.constant 0 : index
    %156 = vector.load %arg5[%c3_66, %c0_67] : memref<5x32xf32, #tpu.memory_space<vmem>>, vector<1x32xf32>
    %157 = vector.broadcast %156 : vector<1x32xf32> to vector<2x32xf32>
    %158 = arith.addf %155, %157 : vector<2x32xf32>
    %cst_68 = arith.constant 5.000000e-01 : f32
    %159 = vector.broadcast %cst_68 : f32 to vector<2x32xf32>
    %160 = arith.mulf %159, %158 : vector<2x32xf32>
    %cst_69 = arith.constant 4.471500e-02 : f32
    %161 = vector.broadcast %cst_69 : f32 to vector<2x32xf32>
    %162 = arith.mulf %161, %158 : vector<2x32xf32>
    %163 = arith.mulf %162, %158 : vector<2x32xf32>
    %164 = arith.mulf %163, %158 : vector<2x32xf32>
    %165 = arith.addf %158, %164 : vector<2x32xf32>
    %cst_70 = arith.constant 0.797884583 : f32
    %166 = vector.broadcast %cst_70 : f32 to vector<2x32xf32>
    %167 = arith.mulf %166, %165 : vector<2x32xf32>
    %168 = math.tanh %167 : vector<2x32xf32>
    %cst_71 = arith.constant 1.000000e+00 : f32
    %169 = vector.broadcast %cst_71 : f32 to vector<2x32xf32>
    %170 = arith.addf %169, %168 : vector<2x32xf32>
    %171 = arith.mulf %160, %170 : vector<2x32xf32>
    %c3_72 = arith.constant 3 : index
    %c0_73 = arith.constant 0 : index
    %c0_74 = arith.constant 0 : index
    %172 = vector.load %arg2[%c3_72, %c0_73, %c0_74] : memref<4x32x32xf32, #tpu.memory_space<vmem>>, vector<1x32x32xf32>
    %173 = vector.shape_cast %172 : vector<1x32x32xf32> to vector<32x32xf32>
    %cst_75 = arith.constant dense<0.000000e+00> : vector<2x32xf32>
    %174 = tpu.matmul %171, %173, %cst_75 {dimension_numbers = #tpu.dot_dimension_numbers<[1], [0], [0], [1], [0, 0, 1, 1], [], []>} : vector<2x32xf32>, vector<32x32xf32>, vector<2x32xf32> -> vector<2x32xf32>
    %c4 = arith.constant 4 : index
    %c0_76 = arith.constant 0 : index
    %175 = vector.load %arg3[%c4, %c0_76] : memref<5x32xf32, #tpu.memory_space<vmem>>, vector<1x32xf32>
    %176 = vector.broadcast %175 : vector<1x32xf32> to vector<2x32xf32>
    %177 = arith.addf %174, %176 : vector<2x32xf32>
    %cst_77 = arith.constant dense<0.000000e+00> : vector<2xf32>
    %178 = vector.multi_reduction <add>, %177, %cst_77 [1] : vector<2x32xf32> to vector<2xf32>
    %179 = vector.shape_cast %178 : vector<2xf32> to vector<2x1xf32>
    %cst_78 = arith.constant 3.200000e+01 : f32
    %180 = vector.broadcast %cst_78 : f32 to vector<2x1xf32>
    %181 = arith.divf %179, %180 : vector<2x1xf32>
    %182 = vector.broadcast %181 : vector<2x1xf32> to vector<2x32xf32>
    %183 = arith.subf %177, %182 : vector<2x32xf32>
    %184 = arith.mulf %183, %183 : vector<2x32xf32>
    %cst_79 = arith.constant dense<0.000000e+00> : vector<2xf32>
    %185 = vector.multi_reduction <add>, %184, %cst_79 [1] : vector<2x32xf32> to vector<2xf32>
    %186 = vector.shape_cast %185 : vector<2xf32> to vector<2x1xf32>
    %cst_80 = arith.constant 3.200000e+01 : f32
    %187 = vector.broadcast %cst_80 : f32 to vector<2x1xf32>
    %188 = arith.divf %186, %187 : vector<2x1xf32>
    %189 = vector.broadcast %181 : vector<2x1xf32> to vector<2x32xf32>
    %190 = arith.subf %177, %189 : vector<2x32xf32>
    %cst_81 = arith.constant 9.99999974E-6 : f32
    %191 = vector.broadcast %cst_81 : f32 to vector<2x1xf32>
    %192 = arith.addf %188, %191 : vector<2x1xf32>
    %193 = math.rsqrt %192 : vector<2x1xf32>
    %194 = vector.broadcast %193 : vector<2x1xf32> to vector<2x32xf32>
    %195 = arith.mulf %190, %194 : vector<2x32xf32>
    %c4_82 = arith.constant 4 : index
    %c0_83 = arith.constant 0 : index
    %196 = vector.load %arg4[%c4_82, %c0_83] : memref<5x32xf32, #tpu.memory_space<vmem>>, vector<1x32xf32>
    %197 = vector.broadcast %196 : vector<1x32xf32> to vector<2x32xf32>
    %198 = arith.mulf %195, %197 : vector<2x32xf32>
    %c4_84 = arith.constant 4 : index
    %c0_85 = arith.constant 0 : index
    %199 = vector.load %arg5[%c4_84, %c0_85] : memref<5x32xf32, #tpu.memory_space<vmem>>, vector<1x32xf32>
    %200 = vector.broadcast %199 : vector<1x32xf32> to vector<2x32xf32>
    %201 = arith.addf %198, %200 : vector<2x32xf32>
    %cst_86 = arith.constant 5.000000e-01 : f32
    %202 = vector.broadcast %cst_86 : f32 to vector<2x32xf32>
    %203 = arith.mulf %202, %201 : vector<2x32xf32>
    %cst_87 = arith.constant 4.471500e-02 : f32
    %204 = vector.broadcast %cst_87 : f32 to vector<2x32xf32>
    %205 = arith.mulf %204, %201 : vector<2x32xf32>
    %206 = arith.mulf %205, %201 : vector<2x32xf32>
    %207 = arith.mulf %206, %201 : vector<2x32xf32>
    %208 = arith.addf %201, %207 : vector<2x32xf32>
    %cst_88 = arith.constant 0.797884583 : f32
    %209 = vector.broadcast %cst_88 : f32 to vector<2x32xf32>
    %210 = arith.mulf %209, %208 : vector<2x32xf32>
    %211 = math.tanh %210 : vector<2x32xf32>
    %cst_89 = arith.constant 1.000000e+00 : f32
    %212 = vector.broadcast %cst_89 : f32 to vector<2x32xf32>
    %213 = arith.addf %212, %211 : vector<2x32xf32>
    %214 = arith.mulf %203, %213 : vector<2x32xf32>
    %c0_90 = arith.constant 0 : index
    %c0_91 = arith.constant 0 : index
    %215 = vector.load %arg6[%c0_90, %c0_91] : memref<2x32xf32, #tpu.memory_space<vmem>>, vector<2x32xf32>
    tpu.vector_store %arg6[%c0_90, %c0_91], %214 {strides = array<i32>} : memref<2x32xf32, #tpu.memory_space<vmem>>, vector<2x32xf32>,
    return
  }
}

module attributes {stable_mosaic.version = 11 : i64} {
  func.func @_autoenc_kernel(%arg0: memref<2x39x16xf32, #tpu.memory_space<vmem>>, %arg1: memref<3x16x256xf32, #tpu.memory_space<vmem>>, %arg2: memref<1x256xf32, #tpu.memory_space<vmem>>, %arg3: memref<39x256xf32, #tpu.memory_space<vmem>>, %arg4: memref<39x256xf32, #tpu.memory_space<vmem>>, %arg5: memref<19x39xf32, #tpu.memory_space<vmem>>, %arg6: memref<256x128xf32, #tpu.memory_space<vmem>>, %arg7: memref<2432x32xf32, #tpu.memory_space<vmem>>, %arg8: memref<1x32xf32, #tpu.memory_space<vmem>>, %arg9: memref<1x32xf32, #tpu.memory_space<vmem>>, %arg10: memref<1x32xf32, #tpu.memory_space<vmem>>, %arg11: memref<32x2432xf32, #tpu.memory_space<vmem>>, %arg12: memref<1x2432xf32, #tpu.memory_space<vmem>>, %arg13: memref<1x2432xf32, #tpu.memory_space<vmem>>, %arg14: memref<1x2432xf32, #tpu.memory_space<vmem>>, %arg15: memref<3x39x19xf32, #tpu.memory_space<vmem>>, %arg16: memref<3x128x16xf32, #tpu.memory_space<vmem>>, %arg17: memref<1x1xf32, #tpu.memory_space<vmem>>, %arg18: memref<2x32xf32, #tpu.memory_space<vmem>>, %arg19: memref<2x39x16xf32, #tpu.memory_space<vmem>>, %arg20: memref<41x16xf32, #tpu.memory_space<vmem>>, %arg21: memref<1x2432xf32, #tpu.memory_space<vmem>>, %arg22: memref<19x128xf32, #tpu.memory_space<vmem>>) attributes {dimension_semantics = [], scalar_prefetch = 0 : i64, scratch_operands = 3 : i64, tpu.core_type = #tpu.core_type<tc>} {
    %cst = arith.constant 0.000000e+00 : f32
    %0 = vector.broadcast %cst : f32 to vector<1x16xf32>
    %c0 = arith.constant 0 : index
    %c0_0 = arith.constant 0 : index
    %1 = vector.load %arg20[%c0, %c0_0] : memref<41x16xf32, #tpu.memory_space<vmem>>, vector<1x16xf32>
    tpu.vector_store %arg20[%c0, %c0_0], %0 {strides = array<i32>} : memref<41x16xf32, #tpu.memory_space<vmem>>, vector<1x16xf32>,
    %cst_1 = arith.constant 0.000000e+00 : f32
    %2 = vector.broadcast %cst_1 : f32 to vector<1x16xf32>
    %c40 = arith.constant 40 : index
    %c0_2 = arith.constant 0 : index
    %3 = vector.load %arg20[%c40, %c0_2] : memref<41x16xf32, #tpu.memory_space<vmem>>, vector<1x16xf32>
    tpu.vector_store %arg20[%c40, %c0_2], %2 {strides = array<i32>} : memref<41x16xf32, #tpu.memory_space<vmem>>, vector<1x16xf32>,
    %c0_3 = arith.constant 0 : index
    %c0_4 = arith.constant 0 : index
    %c0_5 = arith.constant 0 : index
    %4 = vector.load %arg0[%c0_3, %c0_4, %c0_5] : memref<2x39x16xf32, #tpu.memory_space<vmem>>, vector<1x39x16xf32>
    %5 = vector.shape_cast %4 : vector<1x39x16xf32> to vector<39x16xf32>
    %c1 = arith.constant 1 : index
    %c0_6 = arith.constant 0 : index
    %6 = vector.load %arg20[%c1, %c0_6] : memref<41x16xf32, #tpu.memory_space<vmem>>, vector<39x16xf32>
    tpu.vector_store %arg20[%c1, %c0_6], %5 {strides = array<i32>} : memref<41x16xf32, #tpu.memory_space<vmem>>, vector<39x16xf32>,
    %cst_7 = arith.constant 0.000000e+00 : f32
    %7 = vector.broadcast %cst_7 : f32 to vector<39x256xf32>
    %c0_8 = arith.constant 0 : index
    %c0_9 = arith.constant 0 : index
    %8 = vector.load %arg20[%c0_8, %c0_9] : memref<41x16xf32, #tpu.memory_space<vmem>>, vector<39x16xf32>
    %c0_10 = arith.constant 0 : index
    %c0_11 = arith.constant 0 : index
    %c0_12 = arith.constant 0 : index
    %9 = vector.load %arg1[%c0_10, %c0_11, %c0_12] : memref<3x16x256xf32, #tpu.memory_space<vmem>>, vector<1x16x256xf32>
    %10 = vector.shape_cast %9 : vector<1x16x256xf32> to vector<16x256xf32>
    %cst_13 = arith.constant dense<0.000000e+00> : vector<39x256xf32>
    %11 = tpu.matmul %8, %10, %cst_13 {dimension_numbers = #tpu.dot_dimension_numbers<[1], [0], [0], [1], [0, 0, 1, 1], [], []>} : vector<39x16xf32>, vector<16x256xf32>, vector<39x256xf32> -> vector<39x256xf32>
    %12 = arith.addf %7, %11 : vector<39x256xf32>
    %c1_14 = arith.constant 1 : index
    %c0_15 = arith.constant 0 : index
    %13 = vector.load %arg20[%c1_14, %c0_15] : memref<41x16xf32, #tpu.memory_space<vmem>>, vector<39x16xf32>
    %c1_16 = arith.constant 1 : index
    %c0_17 = arith.constant 0 : index
    %c0_18 = arith.constant 0 : index
    %14 = vector.load %arg1[%c1_16, %c0_17, %c0_18] : memref<3x16x256xf32, #tpu.memory_space<vmem>>, vector<1x16x256xf32>
    %15 = vector.shape_cast %14 : vector<1x16x256xf32> to vector<16x256xf32>
    %cst_19 = arith.constant dense<0.000000e+00> : vector<39x256xf32>
    %16 = tpu.matmul %13, %15, %cst_19 {dimension_numbers = #tpu.dot_dimension_numbers<[1], [0], [0], [1], [0, 0, 1, 1], [], []>} : vector<39x16xf32>, vector<16x256xf32>, vector<39x256xf32> -> vector<39x256xf32>
    %17 = arith.addf %12, %16 : vector<39x256xf32>
    %c2 = arith.constant 2 : index
    %c0_20 = arith.constant 0 : index
    %18 = vector.load %arg20[%c2, %c0_20] : memref<41x16xf32, #tpu.memory_space<vmem>>, vector<39x16xf32>
    %c2_21 = arith.constant 2 : index
    %c0_22 = arith.constant 0 : index
    %c0_23 = arith.constant 0 : index
    %19 = vector.load %arg1[%c2_21, %c0_22, %c0_23] : memref<3x16x256xf32, #tpu.memory_space<vmem>>, vector<1x16x256xf32>
    %20 = vector.shape_cast %19 : vector<1x16x256xf32> to vector<16x256xf32>
    %cst_24 = arith.constant dense<0.000000e+00> : vector<39x256xf32>
    %21 = tpu.matmul %18, %20, %cst_24 {dimension_numbers = #tpu.dot_dimension_numbers<[1], [0], [0], [1], [0, 0, 1, 1], [], []>} : vector<39x16xf32>, vector<16x256xf32>, vector<39x256xf32> -> vector<39x256xf32>
    %22 = arith.addf %17, %21 : vector<39x256xf32>
    %c0_25 = arith.constant 0 : index
    %c0_26 = arith.constant 0 : index
    %23 = vector.load %arg2[%c0_25, %c0_26] : memref<1x256xf32, #tpu.memory_space<vmem>>, vector<1x256xf32>
    %24 = vector.broadcast %23 : vector<1x256xf32> to vector<39x256xf32>
    %25 = arith.addf %22, %24 : vector<39x256xf32>
    %cst_27 = arith.constant dense<0.000000e+00> : vector<39xf32>
    %26 = vector.multi_reduction <add>, %25, %cst_27 [1] : vector<39x256xf32> to vector<39xf32>
    %27 = vector.shape_cast %26 : vector<39xf32> to vector<39x1xf32>
    %cst_28 = arith.constant 2.560000e+02 : f32
    %28 = vector.broadcast %cst_28 : f32 to vector<39x1xf32>
    %29 = arith.divf %27, %28 : vector<39x1xf32>
    %cst_29 = arith.constant dense<0.000000e+00> : vector<1xf32>
    %30 = vector.multi_reduction <add>, %29, %cst_29 [0] : vector<39x1xf32> to vector<1xf32>
    %31 = vector.shape_cast %30 : vector<1xf32> to vector<1x1xf32>
    %cst_30 = arith.constant 3.900000e+01 : f32
    %32 = vector.broadcast %cst_30 : f32 to vector<1x1xf32>
    %33 = arith.divf %31, %32 : vector<1x1xf32>
    %34 = vector.broadcast %33 : vector<1x1xf32> to vector<39x256xf32>
    %35 = arith.subf %25, %34 : vector<39x256xf32>
    %36 = arith.mulf %35, %35 : vector<39x256xf32>
    %cst_31 = arith.constant dense<0.000000e+00> : vector<39xf32>
    %37 = vector.multi_reduction <add>, %36, %cst_31 [1] : vector<39x256xf32> to vector<39xf32>
    %38 = vector.shape_cast %37 : vector<39xf32> to vector<39x1xf32>
    %cst_32 = arith.constant 2.560000e+02 : f32
    %39 = vector.broadcast %cst_32 : f32 to vector<39x1xf32>
    %40 = arith.divf %38, %39 : vector<39x1xf32>
    %cst_33 = arith.constant dense<0.000000e+00> : vector<1xf32>
    %41 = vector.multi_reduction <add>, %40, %cst_33 [0] : vector<39x1xf32> to vector<1xf32>
    %42 = vector.shape_cast %41 : vector<1xf32> to vector<1x1xf32>
    %cst_34 = arith.constant 3.900000e+01 : f32
    %43 = vector.broadcast %cst_34 : f32 to vector<1x1xf32>
    %44 = arith.divf %42, %43 : vector<1x1xf32>
    %45 = vector.broadcast %33 : vector<1x1xf32> to vector<39x256xf32>
    %46 = arith.subf %25, %45 : vector<39x256xf32>
    %cst_35 = arith.constant 9.99999974E-6 : f32
    %47 = vector.broadcast %cst_35 : f32 to vector<1x1xf32>
    %48 = arith.addf %44, %47 : vector<1x1xf32>
    %49 = math.rsqrt %48 : vector<1x1xf32>
    %50 = vector.broadcast %49 : vector<1x1xf32> to vector<39x256xf32>
    %51 = arith.mulf %46, %50 : vector<39x256xf32>
    %c0_36 = arith.constant 0 : index
    %c0_37 = arith.constant 0 : index
    %52 = vector.load %arg3[%c0_36, %c0_37] : memref<39x256xf32, #tpu.memory_space<vmem>>, vector<39x256xf32>
    %53 = arith.mulf %51, %52 : vector<39x256xf32>
    %c0_38 = arith.constant 0 : index
    %c0_39 = arith.constant 0 : index
    %54 = vector.load %arg4[%c0_38, %c0_39] : memref<39x256xf32, #tpu.memory_space<vmem>>, vector<39x256xf32>
    %55 = arith.addf %53, %54 : vector<39x256xf32>
    %cst_40 = arith.constant 5.000000e-01 : f32
    %56 = vector.broadcast %cst_40 : f32 to vector<39x256xf32>
    %57 = arith.mulf %56, %55 : vector<39x256xf32>
    %cst_41 = arith.constant 4.471500e-02 : f32
    %58 = vector.broadcast %cst_41 : f32 to vector<39x256xf32>
    %59 = arith.mulf %58, %55 : vector<39x256xf32>
    %60 = arith.mulf %59, %55 : vector<39x256xf32>
    %61 = arith.mulf %60, %55 : vector<39x256xf32>
    %62 = arith.addf %55, %61 : vector<39x256xf32>
    %cst_42 = arith.constant 0.797884583 : f32
    %63 = vector.broadcast %cst_42 : f32 to vector<39x256xf32>
    %64 = arith.mulf %63, %62 : vector<39x256xf32>
    %65 = math.tanh %64 : vector<39x256xf32>
    %cst_43 = arith.constant 1.000000e+00 : f32
    %66 = vector.broadcast %cst_43 : f32 to vector<39x256xf32>
    %67 = arith.addf %66, %65 : vector<39x256xf32>
    %68 = arith.mulf %57, %67 : vector<39x256xf32>
    %c0_44 = arith.constant 0 : index
    %c0_45 = arith.constant 0 : index
    %69 = vector.load %arg5[%c0_44, %c0_45] : memref<19x39xf32, #tpu.memory_space<vmem>>, vector<19x39xf32>
    %cst_46 = arith.constant dense<0.000000e+00> : vector<19x256xf32>
    %70 = tpu.matmul %69, %68, %cst_46 {dimension_numbers = #tpu.dot_dimension_numbers<[1], [0], [0], [1], [0, 0, 1, 1], [], []>} : vector<19x39xf32>, vector<39x256xf32>, vector<19x256xf32> -> vector<19x256xf32>
    %c0_47 = arith.constant 0 : index
    %c0_48 = arith.constant 0 : index
    %71 = vector.load %arg6[%c0_47, %c0_48] : memref<256x128xf32, #tpu.memory_space<vmem>>, vector<256x128xf32>
    %cst_49 = arith.constant dense<0.000000e+00> : vector<19x128xf32>
    %72 = tpu.matmul %70, %71, %cst_49 {dimension_numbers = #tpu.dot_dimension_numbers<[1], [0], [0], [1], [0, 0, 1, 1], [], []>} : vector<19x256xf32>, vector<256x128xf32>, vector<19x128xf32> -> vector<19x128xf32>
    %c0_50 = arith.constant 0 : index
    %c0_51 = arith.constant 0 : index
    %73 = vector.load %arg22[%c0_50, %c0_51] : memref<19x128xf32, #tpu.memory_space<vmem>>, vector<19x128xf32>
    tpu.vector_store %arg22[%c0_50, %c0_51], %72 {strides = array<i32>} : memref<19x128xf32, #tpu.memory_space<vmem>>, vector<19x128xf32>,
    %c0_52 = arith.constant 0 : index
    %c0_53 = arith.constant 0 : index
    %74 = vector.load %arg22[%c0_52, %c0_53] : memref<19x128xf32, #tpu.memory_space<vmem>>, vector<1x128xf32>
    %c0_54 = arith.constant 0 : index
    %c0_55 = arith.constant 0 : index
    %75 = vector.load %arg21[%c0_54, %c0_55] : memref<1x2432xf32, #tpu.memory_space<vmem>>, vector<1x128xf32>
    tpu.vector_store %arg21[%c0_54, %c0_55], %74 {strides = array<i32>} : memref<1x2432xf32, #tpu.memory_space<vmem>>, vector<1x128xf32>,
    %c1_56 = arith.constant 1 : index
    %c0_57 = arith.constant 0 : index
    %76 = vector.load %arg22[%c1_56, %c0_57] : memref<19x128xf32, #tpu.memory_space<vmem>>, vector<1x128xf32>
    %c0_58 = arith.constant 0 : index
    %c128 = arith.constant 128 : index
    %77 = vector.load %arg21[%c0_58, %c128] : memref<1x2432xf32, #tpu.memory_space<vmem>>, vector<1x128xf32>
    tpu.vector_store %arg21[%c0_58, %c128], %76 {strides = array<i32>} : memref<1x2432xf32, #tpu.memory_space<vmem>>, vector<1x128xf32>,
    %c2_59 = arith.constant 2 : index
    %c0_60 = arith.constant 0 : index
    %78 = vector.load %arg22[%c2_59, %c0_60] : memref<19x128xf32, #tpu.memory_space<vmem>>, vector<1x128xf32>
    %c0_61 = arith.constant 0 : index
    %c256 = arith.constant 256 : index
    %79 = vector.load %arg21[%c0_61, %c256] : memref<1x2432xf32, #tpu.memory_space<vmem>>, vector<1x128xf32>
    tpu.vector_store %arg21[%c0_61, %c256], %78 {strides = array<i32>} : memref<1x2432xf32, #tpu.memory_space<vmem>>, vector<1x128xf32>,
    %c3 = arith.constant 3 : index
    %c0_62 = arith.constant 0 : index
    %80 = vector.load %arg22[%c3, %c0_62] : memref<19x128xf32, #tpu.memory_space<vmem>>, vector<1x128xf32>
    %c0_63 = arith.constant 0 : index
    %c384 = arith.constant 384 : index
    %81 = vector.load %arg21[%c0_63, %c384] : memref<1x2432xf32, #tpu.memory_space<vmem>>, vector<1x128xf32>
    tpu.vector_store %arg21[%c0_63, %c384], %80 {strides = array<i32>} : memref<1x2432xf32, #tpu.memory_space<vmem>>, vector<1x128xf32>,
    %c4 = arith.constant 4 : index
    %c0_64 = arith.constant 0 : index
    %82 = vector.load %arg22[%c4, %c0_64] : memref<19x128xf32, #tpu.memory_space<vmem>>, vector<1x128xf32>
    %c0_65 = arith.constant 0 : index
    %c512 = arith.constant 512 : index
    %83 = vector.load %arg21[%c0_65, %c512] : memref<1x2432xf32, #tpu.memory_space<vmem>>, vector<1x128xf32>
    tpu.vector_store %arg21[%c0_65, %c512], %82 {strides = array<i32>} : memref<1x2432xf32, #tpu.memory_space<vmem>>, vector<1x128xf32>,
    %c5 = arith.constant 5 : index
    %c0_66 = arith.constant 0 : index
    %84 = vector.load %arg22[%c5, %c0_66] : memref<19x128xf32, #tpu.memory_space<vmem>>, vector<1x128xf32>
    %c0_67 = arith.constant 0 : index
    %c640 = arith.constant 640 : index
    %85 = vector.load %arg21[%c0_67, %c640] : memref<1x2432xf32, #tpu.memory_space<vmem>>, vector<1x128xf32>
    tpu.vector_store %arg21[%c0_67, %c640], %84 {strides = array<i32>} : memref<1x2432xf32, #tpu.memory_space<vmem>>, vector<1x128xf32>,
    %c6 = arith.constant 6 : index
    %c0_68 = arith.constant 0 : index
    %86 = vector.load %arg22[%c6, %c0_68] : memref<19x128xf32, #tpu.memory_space<vmem>>, vector<1x128xf32>
    %c0_69 = arith.constant 0 : index
    %c768 = arith.constant 768 : index
    %87 = vector.load %arg21[%c0_69, %c768] : memref<1x2432xf32, #tpu.memory_space<vmem>>, vector<1x128xf32>
    tpu.vector_store %arg21[%c0_69, %c768], %86 {strides = array<i32>} : memref<1x2432xf32, #tpu.memory_space<vmem>>, vector<1x128xf32>,
    %c7 = arith.constant 7 : index
    %c0_70 = arith.constant 0 : index
    %88 = vector.load %arg22[%c7, %c0_70] : memref<19x128xf32, #tpu.memory_space<vmem>>, vector<1x128xf32>
    %c0_71 = arith.constant 0 : index
    %c896 = arith.constant 896 : index
    %89 = vector.load %arg21[%c0_71, %c896] : memref<1x2432xf32, #tpu.memory_space<vmem>>, vector<1x128xf32>
    tpu.vector_store %arg21[%c0_71, %c896], %88 {strides = array<i32>} : memref<1x2432xf32, #tpu.memory_space<vmem>>, vector<1x128xf32>,
    %c8 = arith.constant 8 : index
    %c0_72 = arith.constant 0 : index
    %90 = vector.load %arg22[%c8, %c0_72] : memref<19x128xf32, #tpu.memory_space<vmem>>, vector<1x128xf32>
    %c0_73 = arith.constant 0 : index
    %c1024 = arith.constant 1024 : index
    %91 = vector.load %arg21[%c0_73, %c1024] : memref<1x2432xf32, #tpu.memory_space<vmem>>, vector<1x128xf32>
    tpu.vector_store %arg21[%c0_73, %c1024], %90 {strides = array<i32>} : memref<1x2432xf32, #tpu.memory_space<vmem>>, vector<1x128xf32>,
    %c9 = arith.constant 9 : index
    %c0_74 = arith.constant 0 : index
    %92 = vector.load %arg22[%c9, %c0_74] : memref<19x128xf32, #tpu.memory_space<vmem>>, vector<1x128xf32>
    %c0_75 = arith.constant 0 : index
    %c1152 = arith.constant 1152 : index
    %93 = vector.load %arg21[%c0_75, %c1152] : memref<1x2432xf32, #tpu.memory_space<vmem>>, vector<1x128xf32>
    tpu.vector_store %arg21[%c0_75, %c1152], %92 {strides = array<i32>} : memref<1x2432xf32, #tpu.memory_space<vmem>>, vector<1x128xf32>,
    %c10 = arith.constant 10 : index
    %c0_76 = arith.constant 0 : index
    %94 = vector.load %arg22[%c10, %c0_76] : memref<19x128xf32, #tpu.memory_space<vmem>>, vector<1x128xf32>
    %c0_77 = arith.constant 0 : index
    %c1280 = arith.constant 1280 : index
    %95 = vector.load %arg21[%c0_77, %c1280] : memref<1x2432xf32, #tpu.memory_space<vmem>>, vector<1x128xf32>
    tpu.vector_store %arg21[%c0_77, %c1280], %94 {strides = array<i32>} : memref<1x2432xf32, #tpu.memory_space<vmem>>, vector<1x128xf32>,
    %c11 = arith.constant 11 : index
    %c0_78 = arith.constant 0 : index
    %96 = vector.load %arg22[%c11, %c0_78] : memref<19x128xf32, #tpu.memory_space<vmem>>, vector<1x128xf32>
    %c0_79 = arith.constant 0 : index
    %c1408 = arith.constant 1408 : index
    %97 = vector.load %arg21[%c0_79, %c1408] : memref<1x2432xf32, #tpu.memory_space<vmem>>, vector<1x128xf32>
    tpu.vector_store %arg21[%c0_79, %c1408], %96 {strides = array<i32>} : memref<1x2432xf32, #tpu.memory_space<vmem>>, vector<1x128xf32>,
    %c12 = arith.constant 12 : index
    %c0_80 = arith.constant 0 : index
    %98 = vector.load %arg22[%c12, %c0_80] : memref<19x128xf32, #tpu.memory_space<vmem>>, vector<1x128xf32>
    %c0_81 = arith.constant 0 : index
    %c1536 = arith.constant 1536 : index
    %99 = vector.load %arg21[%c0_81, %c1536] : memref<1x2432xf32, #tpu.memory_space<vmem>>, vector<1x128xf32>
    tpu.vector_store %arg21[%c0_81, %c1536], %98 {strides = array<i32>} : memref<1x2432xf32, #tpu.memory_space<vmem>>, vector<1x128xf32>,
    %c13 = arith.constant 13 : index
    %c0_82 = arith.constant 0 : index
    %100 = vector.load %arg22[%c13, %c0_82] : memref<19x128xf32, #tpu.memory_space<vmem>>, vector<1x128xf32>
    %c0_83 = arith.constant 0 : index
    %c1664 = arith.constant 1664 : index
    %101 = vector.load %arg21[%c0_83, %c1664] : memref<1x2432xf32, #tpu.memory_space<vmem>>, vector<1x128xf32>
    tpu.vector_store %arg21[%c0_83, %c1664], %100 {strides = array<i32>} : memref<1x2432xf32, #tpu.memory_space<vmem>>, vector<1x128xf32>,
    %c14 = arith.constant 14 : index
    %c0_84 = arith.constant 0 : index
    %102 = vector.load %arg22[%c14, %c0_84] : memref<19x128xf32, #tpu.memory_space<vmem>>, vector<1x128xf32>
    %c0_85 = arith.constant 0 : index
    %c1792 = arith.constant 1792 : index
    %103 = vector.load %arg21[%c0_85, %c1792] : memref<1x2432xf32, #tpu.memory_space<vmem>>, vector<1x128xf32>
    tpu.vector_store %arg21[%c0_85, %c1792], %102 {strides = array<i32>} : memref<1x2432xf32, #tpu.memory_space<vmem>>, vector<1x128xf32>,
    %c15 = arith.constant 15 : index
    %c0_86 = arith.constant 0 : index
    %104 = vector.load %arg22[%c15, %c0_86] : memref<19x128xf32, #tpu.memory_space<vmem>>, vector<1x128xf32>
    %c0_87 = arith.constant 0 : index
    %c1920 = arith.constant 1920 : index
    %105 = vector.load %arg21[%c0_87, %c1920] : memref<1x2432xf32, #tpu.memory_space<vmem>>, vector<1x128xf32>
    tpu.vector_store %arg21[%c0_87, %c1920], %104 {strides = array<i32>} : memref<1x2432xf32, #tpu.memory_space<vmem>>, vector<1x128xf32>,
    %c16 = arith.constant 16 : index
    %c0_88 = arith.constant 0 : index
    %106 = vector.load %arg22[%c16, %c0_88] : memref<19x128xf32, #tpu.memory_space<vmem>>, vector<1x128xf32>
    %c0_89 = arith.constant 0 : index
    %c2048 = arith.constant 2048 : index
    %107 = vector.load %arg21[%c0_89, %c2048] : memref<1x2432xf32, #tpu.memory_space<vmem>>, vector<1x128xf32>
    tpu.vector_store %arg21[%c0_89, %c2048], %106 {strides = array<i32>} : memref<1x2432xf32, #tpu.memory_space<vmem>>, vector<1x128xf32>,
    %c17 = arith.constant 17 : index
    %c0_90 = arith.constant 0 : index
    %108 = vector.load %arg22[%c17, %c0_90] : memref<19x128xf32, #tpu.memory_space<vmem>>, vector<1x128xf32>
    %c0_91 = arith.constant 0 : index
    %c2176 = arith.constant 2176 : index
    %109 = vector.load %arg21[%c0_91, %c2176] : memref<1x2432xf32, #tpu.memory_space<vmem>>, vector<1x128xf32>
    tpu.vector_store %arg21[%c0_91, %c2176], %108 {strides = array<i32>} : memref<1x2432xf32, #tpu.memory_space<vmem>>, vector<1x128xf32>,
    %c18 = arith.constant 18 : index
    %c0_92 = arith.constant 0 : index
    %110 = vector.load %arg22[%c18, %c0_92] : memref<19x128xf32, #tpu.memory_space<vmem>>, vector<1x128xf32>
    %c0_93 = arith.constant 0 : index
    %c2304 = arith.constant 2304 : index
    %111 = vector.load %arg21[%c0_93, %c2304] : memref<1x2432xf32, #tpu.memory_space<vmem>>, vector<1x128xf32>
    tpu.vector_store %arg21[%c0_93, %c2304], %110 {strides = array<i32>} : memref<1x2432xf32, #tpu.memory_space<vmem>>, vector<1x128xf32>,
    %c0_94 = arith.constant 0 : index
    %c0_95 = arith.constant 0 : index
    %112 = vector.load %arg21[%c0_94, %c0_95] : memref<1x2432xf32, #tpu.memory_space<vmem>>, vector<1x2432xf32>
    %c0_96 = arith.constant 0 : index
    %c0_97 = arith.constant 0 : index
    %113 = vector.load %arg7[%c0_96, %c0_97] : memref<2432x32xf32, #tpu.memory_space<vmem>>, vector<2432x32xf32>
    %cst_98 = arith.constant dense<0.000000e+00> : vector<1x32xf32>
    %114 = tpu.matmul %112, %113, %cst_98 {dimension_numbers = #tpu.dot_dimension_numbers<[1], [0], [0], [1], [0, 0, 1, 1], [], []>} : vector<1x2432xf32>, vector<2432x32xf32>, vector<1x32xf32> -> vector<1x32xf32>
    %c0_99 = arith.constant 0 : index
    %c0_100 = arith.constant 0 : index
    %115 = vector.load %arg8[%c0_99, %c0_100] : memref<1x32xf32, #tpu.memory_space<vmem>>, vector<1x32xf32>
    %116 = arith.addf %114, %115 : vector<1x32xf32>
    %cst_101 = arith.constant dense<0.000000e+00> : vector<1xf32>
    %117 = vector.multi_reduction <add>, %116, %cst_101 [1] : vector<1x32xf32> to vector<1xf32>
    %118 = vector.shape_cast %117 : vector<1xf32> to vector<1x1xf32>
    %cst_102 = arith.constant 3.200000e+01 : f32
    %119 = vector.broadcast %cst_102 : f32 to vector<1x1xf32>
    %120 = arith.divf %118, %119 : vector<1x1xf32>
    %121 = vector.broadcast %120 : vector<1x1xf32> to vector<1x32xf32>
    %122 = arith.subf %116, %121 : vector<1x32xf32>
    %123 = arith.mulf %122, %122 : vector<1x32xf32>
    %cst_103 = arith.constant dense<0.000000e+00> : vector<1xf32>
    %124 = vector.multi_reduction <add>, %123, %cst_103 [1] : vector<1x32xf32> to vector<1xf32>
    %125 = vector.shape_cast %124 : vector<1xf32> to vector<1x1xf32>
    %cst_104 = arith.constant 3.200000e+01 : f32
    %126 = vector.broadcast %cst_104 : f32 to vector<1x1xf32>
    %127 = arith.divf %125, %126 : vector<1x1xf32>
    %128 = vector.broadcast %120 : vector<1x1xf32> to vector<1x32xf32>
    %129 = arith.subf %116, %128 : vector<1x32xf32>
    %cst_105 = arith.constant 9.99999974E-6 : f32
    %130 = vector.broadcast %cst_105 : f32 to vector<1x1xf32>
    %131 = arith.addf %127, %130 : vector<1x1xf32>
    %132 = math.rsqrt %131 : vector<1x1xf32>
    %133 = vector.broadcast %132 : vector<1x1xf32> to vector<1x32xf32>
    %134 = arith.mulf %129, %133 : vector<1x32xf32>
    %c0_106 = arith.constant 0 : index
    %c0_107 = arith.constant 0 : index
    %135 = vector.load %arg9[%c0_106, %c0_107] : memref<1x32xf32, #tpu.memory_space<vmem>>, vector<1x32xf32>
    %136 = arith.mulf %134, %135 : vector<1x32xf32>
    %c0_108 = arith.constant 0 : index
    %c0_109 = arith.constant 0 : index
    %137 = vector.load %arg10[%c0_108, %c0_109] : memref<1x32xf32, #tpu.memory_space<vmem>>, vector<1x32xf32>
    %138 = arith.addf %136, %137 : vector<1x32xf32>
    %cst_110 = arith.constant 5.000000e-01 : f32
    %139 = vector.broadcast %cst_110 : f32 to vector<1x32xf32>
    %140 = arith.mulf %139, %138 : vector<1x32xf32>
    %cst_111 = arith.constant 4.471500e-02 : f32
    %141 = vector.broadcast %cst_111 : f32 to vector<1x32xf32>
    %142 = arith.mulf %141, %138 : vector<1x32xf32>
    %143 = arith.mulf %142, %138 : vector<1x32xf32>
    %144 = arith.mulf %143, %138 : vector<1x32xf32>
    %145 = arith.addf %138, %144 : vector<1x32xf32>
    %cst_112 = arith.constant 0.797884583 : f32
    %146 = vector.broadcast %cst_112 : f32 to vector<1x32xf32>
    %147 = arith.mulf %146, %145 : vector<1x32xf32>
    %148 = math.tanh %147 : vector<1x32xf32>
    %cst_113 = arith.constant 1.000000e+00 : f32
    %149 = vector.broadcast %cst_113 : f32 to vector<1x32xf32>
    %150 = arith.addf %149, %148 : vector<1x32xf32>
    %151 = arith.mulf %140, %150 : vector<1x32xf32>
    %c0_114 = arith.constant 0 : index
    %c0_115 = arith.constant 0 : index
    %152 = vector.load %arg18[%c0_114, %c0_115] : memref<2x32xf32, #tpu.memory_space<vmem>>, vector<1x32xf32>
    tpu.vector_store %arg18[%c0_114, %c0_115], %151 {strides = array<i32>} : memref<2x32xf32, #tpu.memory_space<vmem>>, vector<1x32xf32>,
    %c0_116 = arith.constant 0 : index
    %c0_117 = arith.constant 0 : index
    %153 = vector.load %arg11[%c0_116, %c0_117] : memref<32x2432xf32, #tpu.memory_space<vmem>>, vector<32x2432xf32>
    %cst_118 = arith.constant dense<0.000000e+00> : vector<1x2432xf32>
    %154 = tpu.matmul %151, %153, %cst_118 {dimension_numbers = #tpu.dot_dimension_numbers<[1], [0], [0], [1], [0, 0, 1, 1], [], []>} : vector<1x32xf32>, vector<32x2432xf32>, vector<1x2432xf32> -> vector<1x2432xf32>
    %c0_119 = arith.constant 0 : index
    %c0_120 = arith.constant 0 : index
    %155 = vector.load %arg12[%c0_119, %c0_120] : memref<1x2432xf32, #tpu.memory_space<vmem>>, vector<1x2432xf32>
    %156 = arith.addf %154, %155 : vector<1x2432xf32>
    %cst_121 = arith.constant dense<0.000000e+00> : vector<1xf32>
    %157 = vector.multi_reduction <add>, %156, %cst_121 [1] : vector<1x2432xf32> to vector<1xf32>
    %158 = vector.shape_cast %157 : vector<1xf32> to vector<1x1xf32>
    %cst_122 = arith.constant 2.432000e+03 : f32
    %159 = vector.broadcast %cst_122 : f32 to vector<1x1xf32>
    %160 = arith.divf %158, %159 : vector<1x1xf32>
    %161 = vector.broadcast %160 : vector<1x1xf32> to vector<1x2432xf32>
    %162 = arith.subf %156, %161 : vector<1x2432xf32>
    %163 = arith.mulf %162, %162 : vector<1x2432xf32>
    %cst_123 = arith.constant dense<0.000000e+00> : vector<1xf32>
    %164 = vector.multi_reduction <add>, %163, %cst_123 [1] : vector<1x2432xf32> to vector<1xf32>
    %165 = vector.shape_cast %164 : vector<1xf32> to vector<1x1xf32>
    %cst_124 = arith.constant 2.432000e+03 : f32
    %166 = vector.broadcast %cst_124 : f32 to vector<1x1xf32>
    %167 = arith.divf %165, %166 : vector<1x1xf32>
    %168 = vector.broadcast %160 : vector<1x1xf32> to vector<1x2432xf32>
    %169 = arith.subf %156, %168 : vector<1x2432xf32>
    %cst_125 = arith.constant 9.99999974E-6 : f32
    %170 = vector.broadcast %cst_125 : f32 to vector<1x1xf32>
    %171 = arith.addf %167, %170 : vector<1x1xf32>
    %172 = math.rsqrt %171 : vector<1x1xf32>
    %173 = vector.broadcast %172 : vector<1x1xf32> to vector<1x2432xf32>
    %174 = arith.mulf %169, %173 : vector<1x2432xf32>
    %c0_126 = arith.constant 0 : index
    %c0_127 = arith.constant 0 : index
    %175 = vector.load %arg13[%c0_126, %c0_127] : memref<1x2432xf32, #tpu.memory_space<vmem>>, vector<1x2432xf32>
    %176 = arith.mulf %174, %175 : vector<1x2432xf32>
    %c0_128 = arith.constant 0 : index
    %c0_129 = arith.constant 0 : index
    %177 = vector.load %arg14[%c0_128, %c0_129] : memref<1x2432xf32, #tpu.memory_space<vmem>>, vector<1x2432xf32>
    %178 = arith.addf %176, %177 : vector<1x2432xf32>
    %cst_130 = arith.constant 5.000000e-01 : f32
    %179 = vector.broadcast %cst_130 : f32 to vector<1x2432xf32>
    %180 = arith.mulf %179, %178 : vector<1x2432xf32>
    %cst_131 = arith.constant 4.471500e-02 : f32
    %181 = vector.broadcast %cst_131 : f32 to vector<1x2432xf32>
    %182 = arith.mulf %181, %178 : vector<1x2432xf32>
    %183 = arith.mulf %182, %178 : vector<1x2432xf32>
    %184 = arith.mulf %183, %178 : vector<1x2432xf32>
    %185 = arith.addf %178, %184 : vector<1x2432xf32>
    %cst_132 = arith.constant 0.797884583 : f32
    %186 = vector.broadcast %cst_132 : f32 to vector<1x2432xf32>
    %187 = arith.mulf %186, %185 : vector<1x2432xf32>
    %188 = math.tanh %187 : vector<1x2432xf32>
    %cst_133 = arith.constant 1.000000e+00 : f32
    %189 = vector.broadcast %cst_133 : f32 to vector<1x2432xf32>
    %190 = arith.addf %189, %188 : vector<1x2432xf32>
    %191 = arith.mulf %180, %190 : vector<1x2432xf32>
    %c0_134 = arith.constant 0 : index
    %c0_135 = arith.constant 0 : index
    %192 = vector.load %arg21[%c0_134, %c0_135] : memref<1x2432xf32, #tpu.memory_space<vmem>>, vector<1x2432xf32>
    tpu.vector_store %arg21[%c0_134, %c0_135], %191 {strides = array<i32>} : memref<1x2432xf32, #tpu.memory_space<vmem>>, vector<1x2432xf32>,
    %c0_136 = arith.constant 0 : index
    %c0_137 = arith.constant 0 : index
    %193 = vector.load %arg21[%c0_136, %c0_137] : memref<1x2432xf32, #tpu.memory_space<vmem>>, vector<1x128xf32>
    %c0_138 = arith.constant 0 : index
    %c0_139 = arith.constant 0 : index
    %194 = vector.load %arg22[%c0_138, %c0_139] : memref<19x128xf32, #tpu.memory_space<vmem>>, vector<1x128xf32>
    tpu.vector_store %arg22[%c0_138, %c0_139], %193 {strides = array<i32>} : memref<19x128xf32, #tpu.memory_space<vmem>>, vector<1x128xf32>,
    %c0_140 = arith.constant 0 : index
    %c128_141 = arith.constant 128 : index
    %195 = vector.load %arg21[%c0_140, %c128_141] : memref<1x2432xf32, #tpu.memory_space<vmem>>, vector<1x128xf32>
    %c1_142 = arith.constant 1 : index
    %c0_143 = arith.constant 0 : index
    %196 = vector.load %arg22[%c1_142, %c0_143] : memref<19x128xf32, #tpu.memory_space<vmem>>, vector<1x128xf32>
    tpu.vector_store %arg22[%c1_142, %c0_143], %195 {strides = array<i32>} : memref<19x128xf32, #tpu.memory_space<vmem>>, vector<1x128xf32>,
    %c0_144 = arith.constant 0 : index
    %c256_145 = arith.constant 256 : index
    %197 = vector.load %arg21[%c0_144, %c256_145] : memref<1x2432xf32, #tpu.memory_space<vmem>>, vector<1x128xf32>
    %c2_146 = arith.constant 2 : index
    %c0_147 = arith.constant 0 : index
    %198 = vector.load %arg22[%c2_146, %c0_147] : memref<19x128xf32, #tpu.memory_space<vmem>>, vector<1x128xf32>
    tpu.vector_store %arg22[%c2_146, %c0_147], %197 {strides = array<i32>} : memref<19x128xf32, #tpu.memory_space<vmem>>, vector<1x128xf32>,
    %c0_148 = arith.constant 0 : index
    %c384_149 = arith.constant 384 : index
    %199 = vector.load %arg21[%c0_148, %c384_149] : memref<1x2432xf32, #tpu.memory_space<vmem>>, vector<1x128xf32>
    %c3_150 = arith.constant 3 : index
    %c0_151 = arith.constant 0 : index
    %200 = vector.load %arg22[%c3_150, %c0_151] : memref<19x128xf32, #tpu.memory_space<vmem>>, vector<1x128xf32>
    tpu.vector_store %arg22[%c3_150, %c0_151], %199 {strides = array<i32>} : memref<19x128xf32, #tpu.memory_space<vmem>>, vector<1x128xf32>,
    %c0_152 = arith.constant 0 : index
    %c512_153 = arith.constant 512 : index
    %201 = vector.load %arg21[%c0_152, %c512_153] : memref<1x2432xf32, #tpu.memory_space<vmem>>, vector<1x128xf32>
    %c4_154 = arith.constant 4 : index
    %c0_155 = arith.constant 0 : index
    %202 = vector.load %arg22[%c4_154, %c0_155] : memref<19x128xf32, #tpu.memory_space<vmem>>, vector<1x128xf32>
    tpu.vector_store %arg22[%c4_154, %c0_155], %201 {strides = array<i32>} : memref<19x128xf32, #tpu.memory_space<vmem>>, vector<1x128xf32>,
    %c0_156 = arith.constant 0 : index
    %c640_157 = arith.constant 640 : index
    %203 = vector.load %arg21[%c0_156, %c640_157] : memref<1x2432xf32, #tpu.memory_space<vmem>>, vector<1x128xf32>
    %c5_158 = arith.constant 5 : index
    %c0_159 = arith.constant 0 : index
    %204 = vector.load %arg22[%c5_158, %c0_159] : memref<19x128xf32, #tpu.memory_space<vmem>>, vector<1x128xf32>
    tpu.vector_store %arg22[%c5_158, %c0_159], %203 {strides = array<i32>} : memref<19x128xf32, #tpu.memory_space<vmem>>, vector<1x128xf32>,
    %c0_160 = arith.constant 0 : index
    %c768_161 = arith.constant 768 : index
    %205 = vector.load %arg21[%c0_160, %c768_161] : memref<1x2432xf32, #tpu.memory_space<vmem>>, vector<1x128xf32>
    %c6_162 = arith.constant 6 : index
    %c0_163 = arith.constant 0 : index
    %206 = vector.load %arg22[%c6_162, %c0_163] : memref<19x128xf32, #tpu.memory_space<vmem>>, vector<1x128xf32>
    tpu.vector_store %arg22[%c6_162, %c0_163], %205 {strides = array<i32>} : memref<19x128xf32, #tpu.memory_space<vmem>>, vector<1x128xf32>,
    %c0_164 = arith.constant 0 : index
    %c896_165 = arith.constant 896 : index
    %207 = vector.load %arg21[%c0_164, %c896_165] : memref<1x2432xf32, #tpu.memory_space<vmem>>, vector<1x128xf32>
    %c7_166 = arith.constant 7 : index
    %c0_167 = arith.constant 0 : index
    %208 = vector.load %arg22[%c7_166, %c0_167] : memref<19x128xf32, #tpu.memory_space<vmem>>, vector<1x128xf32>
    tpu.vector_store %arg22[%c7_166, %c0_167], %207 {strides = array<i32>} : memref<19x128xf32, #tpu.memory_space<vmem>>, vector<1x128xf32>,
    %c0_168 = arith.constant 0 : index
    %c1024_169 = arith.constant 1024 : index
    %209 = vector.load %arg21[%c0_168, %c1024_169] : memref<1x2432xf32, #tpu.memory_space<vmem>>, vector<1x128xf32>
    %c8_170 = arith.constant 8 : index
    %c0_171 = arith.constant 0 : index
    %210 = vector.load %arg22[%c8_170, %c0_171] : memref<19x128xf32, #tpu.memory_space<vmem>>, vector<1x128xf32>
    tpu.vector_store %arg22[%c8_170, %c0_171], %209 {strides = array<i32>} : memref<19x128xf32, #tpu.memory_space<vmem>>, vector<1x128xf32>,
    %c0_172 = arith.constant 0 : index
    %c1152_173 = arith.constant 1152 : index
    %211 = vector.load %arg21[%c0_172, %c1152_173] : memref<1x2432xf32, #tpu.memory_space<vmem>>, vector<1x128xf32>
    %c9_174 = arith.constant 9 : index
    %c0_175 = arith.constant 0 : index
    %212 = vector.load %arg22[%c9_174, %c0_175] : memref<19x128xf32, #tpu.memory_space<vmem>>, vector<1x128xf32>
    tpu.vector_store %arg22[%c9_174, %c0_175], %211 {strides = array<i32>} : memref<19x128xf32, #tpu.memory_space<vmem>>, vector<1x128xf32>,
    %c0_176 = arith.constant 0 : index
    %c1280_177 = arith.constant 1280 : index
    %213 = vector.load %arg21[%c0_176, %c1280_177] : memref<1x2432xf32, #tpu.memory_space<vmem>>, vector<1x128xf32>
    %c10_178 = arith.constant 10 : index
    %c0_179 = arith.constant 0 : index
    %214 = vector.load %arg22[%c10_178, %c0_179] : memref<19x128xf32, #tpu.memory_space<vmem>>, vector<1x128xf32>
    tpu.vector_store %arg22[%c10_178, %c0_179], %213 {strides = array<i32>} : memref<19x128xf32, #tpu.memory_space<vmem>>, vector<1x128xf32>,
    %c0_180 = arith.constant 0 : index
    %c1408_181 = arith.constant 1408 : index
    %215 = vector.load %arg21[%c0_180, %c1408_181] : memref<1x2432xf32, #tpu.memory_space<vmem>>, vector<1x128xf32>
    %c11_182 = arith.constant 11 : index
    %c0_183 = arith.constant 0 : index
    %216 = vector.load %arg22[%c11_182, %c0_183] : memref<19x128xf32, #tpu.memory_space<vmem>>, vector<1x128xf32>
    tpu.vector_store %arg22[%c11_182, %c0_183], %215 {strides = array<i32>} : memref<19x128xf32, #tpu.memory_space<vmem>>, vector<1x128xf32>,
    %c0_184 = arith.constant 0 : index
    %c1536_185 = arith.constant 1536 : index
    %217 = vector.load %arg21[%c0_184, %c1536_185] : memref<1x2432xf32, #tpu.memory_space<vmem>>, vector<1x128xf32>
    %c12_186 = arith.constant 12 : index
    %c0_187 = arith.constant 0 : index
    %218 = vector.load %arg22[%c12_186, %c0_187] : memref<19x128xf32, #tpu.memory_space<vmem>>, vector<1x128xf32>
    tpu.vector_store %arg22[%c12_186, %c0_187], %217 {strides = array<i32>} : memref<19x128xf32, #tpu.memory_space<vmem>>, vector<1x128xf32>,
    %c0_188 = arith.constant 0 : index
    %c1664_189 = arith.constant 1664 : index
    %219 = vector.load %arg21[%c0_188, %c1664_189] : memref<1x2432xf32, #tpu.memory_space<vmem>>, vector<1x128xf32>
    %c13_190 = arith.constant 13 : index
    %c0_191 = arith.constant 0 : index
    %220 = vector.load %arg22[%c13_190, %c0_191] : memref<19x128xf32, #tpu.memory_space<vmem>>, vector<1x128xf32>
    tpu.vector_store %arg22[%c13_190, %c0_191], %219 {strides = array<i32>} : memref<19x128xf32, #tpu.memory_space<vmem>>, vector<1x128xf32>,
    %c0_192 = arith.constant 0 : index
    %c1792_193 = arith.constant 1792 : index
    %221 = vector.load %arg21[%c0_192, %c1792_193] : memref<1x2432xf32, #tpu.memory_space<vmem>>, vector<1x128xf32>
    %c14_194 = arith.constant 14 : index
    %c0_195 = arith.constant 0 : index
    %222 = vector.load %arg22[%c14_194, %c0_195] : memref<19x128xf32, #tpu.memory_space<vmem>>, vector<1x128xf32>
    tpu.vector_store %arg22[%c14_194, %c0_195], %221 {strides = array<i32>} : memref<19x128xf32, #tpu.memory_space<vmem>>, vector<1x128xf32>,
    %c0_196 = arith.constant 0 : index
    %c1920_197 = arith.constant 1920 : index
    %223 = vector.load %arg21[%c0_196, %c1920_197] : memref<1x2432xf32, #tpu.memory_space<vmem>>, vector<1x128xf32>
    %c15_198 = arith.constant 15 : index
    %c0_199 = arith.constant 0 : index
    %224 = vector.load %arg22[%c15_198, %c0_199] : memref<19x128xf32, #tpu.memory_space<vmem>>, vector<1x128xf32>
    tpu.vector_store %arg22[%c15_198, %c0_199], %223 {strides = array<i32>} : memref<19x128xf32, #tpu.memory_space<vmem>>, vector<1x128xf32>,
    %c0_200 = arith.constant 0 : index
    %c2048_201 = arith.constant 2048 : index
    %225 = vector.load %arg21[%c0_200, %c2048_201] : memref<1x2432xf32, #tpu.memory_space<vmem>>, vector<1x128xf32>
    %c16_202 = arith.constant 16 : index
    %c0_203 = arith.constant 0 : index
    %226 = vector.load %arg22[%c16_202, %c0_203] : memref<19x128xf32, #tpu.memory_space<vmem>>, vector<1x128xf32>
    tpu.vector_store %arg22[%c16_202, %c0_203], %225 {strides = array<i32>} : memref<19x128xf32, #tpu.memory_space<vmem>>, vector<1x128xf32>,
    %c0_204 = arith.constant 0 : index
    %c2176_205 = arith.constant 2176 : index
    %227 = vector.load %arg21[%c0_204, %c2176_205] : memref<1x2432xf32, #tpu.memory_space<vmem>>, vector<1x128xf32>
    %c17_206 = arith.constant 17 : index
    %c0_207 = arith.constant 0 : index
    %228 = vector.load %arg22[%c17_206, %c0_207] : memref<19x128xf32, #tpu.memory_space<vmem>>, vector<1x128xf32>
    tpu.vector_store %arg22[%c17_206, %c0_207], %227 {strides = array<i32>} : memref<19x128xf32, #tpu.memory_space<vmem>>, vector<1x128xf32>,
    %c0_208 = arith.constant 0 : index
    %c2304_209 = arith.constant 2304 : index
    %229 = vector.load %arg21[%c0_208, %c2304_209] : memref<1x2432xf32, #tpu.memory_space<vmem>>, vector<1x128xf32>
    %c18_210 = arith.constant 18 : index
    %c0_211 = arith.constant 0 : index
    %230 = vector.load %arg22[%c18_210, %c0_211] : memref<19x128xf32, #tpu.memory_space<vmem>>, vector<1x128xf32>
    tpu.vector_store %arg22[%c18_210, %c0_211], %229 {strides = array<i32>} : memref<19x128xf32, #tpu.memory_space<vmem>>, vector<1x128xf32>,
    %c0_212 = arith.constant 0 : index
    %c0_213 = arith.constant 0 : index
    %231 = vector.load %arg22[%c0_212, %c0_213] : memref<19x128xf32, #tpu.memory_space<vmem>>, vector<19x128xf32>
    %cst_214 = arith.constant 0.000000e+00 : f32
    %232 = vector.broadcast %cst_214 : f32 to vector<39x16xf32>
    %c0_215 = arith.constant 0 : index
    %c0_216 = arith.constant 0 : index
    %c0_217 = arith.constant 0 : index
    %233 = vector.load %arg15[%c0_215, %c0_216, %c0_217] : memref<3x39x19xf32, #tpu.memory_space<vmem>>, vector<1x39x19xf32>
    %234 = vector.shape_cast %233 : vector<1x39x19xf32> to vector<39x19xf32>
    %cst_218 = arith.constant dense<0.000000e+00> : vector<39x128xf32>
    %235 = tpu.matmul %234, %231, %cst_218 {dimension_numbers = #tpu.dot_dimension_numbers<[1], [0], [0], [1], [0, 0, 1, 1], [], []>} : vector<39x19xf32>, vector<19x128xf32>, vector<39x128xf32> -> vector<39x128xf32>
    %c0_219 = arith.constant 0 : index
    %c0_220 = arith.constant 0 : index
    %c0_221 = arith.constant 0 : index
    %236 = vector.load %arg16[%c0_219, %c0_220, %c0_221] : memref<3x128x16xf32, #tpu.memory_space<vmem>>, vector<1x128x16xf32>
    %237 = vector.shape_cast %236 : vector<1x128x16xf32> to vector<128x16xf32>
    %cst_222 = arith.constant dense<0.000000e+00> : vector<39x16xf32>
    %238 = tpu.matmul %235, %237, %cst_222 {dimension_numbers = #tpu.dot_dimension_numbers<[1], [0], [0], [1], [0, 0, 1, 1], [], []>} : vector<39x128xf32>, vector<128x16xf32>, vector<39x16xf32> -> vector<39x16xf32>
    %239 = arith.addf %232, %238 : vector<39x16xf32>
    %c1_223 = arith.constant 1 : index
    %c0_224 = arith.constant 0 : index
    %c0_225 = arith.constant 0 : index
    %240 = vector.load %arg15[%c1_223, %c0_224, %c0_225] : memref<3x39x19xf32, #tpu.memory_space<vmem>>, vector<1x39x19xf32>
    %241 = vector.shape_cast %240 : vector<1x39x19xf32> to vector<39x19xf32>
    %cst_226 = arith.constant dense<0.000000e+00> : vector<39x128xf32>
    %242 = tpu.matmul %241, %231, %cst_226 {dimension_numbers = #tpu.dot_dimension_numbers<[1], [0], [0], [1], [0, 0, 1, 1], [], []>} : vector<39x19xf32>, vector<19x128xf32>, vector<39x128xf32> -> vector<39x128xf32>
    %c1_227 = arith.constant 1 : index
    %c0_228 = arith.constant 0 : index
    %c0_229 = arith.constant 0 : index
    %243 = vector.load %arg16[%c1_227, %c0_228, %c0_229] : memref<3x128x16xf32, #tpu.memory_space<vmem>>, vector<1x128x16xf32>
    %244 = vector.shape_cast %243 : vector<1x128x16xf32> to vector<128x16xf32>
    %cst_230 = arith.constant dense<0.000000e+00> : vector<39x16xf32>
    %245 = tpu.matmul %242, %244, %cst_230 {dimension_numbers = #tpu.dot_dimension_numbers<[1], [0], [0], [1], [0, 0, 1, 1], [], []>} : vector<39x128xf32>, vector<128x16xf32>, vector<39x16xf32> -> vector<39x16xf32>
    %246 = arith.addf %239, %245 : vector<39x16xf32>
    %c2_231 = arith.constant 2 : index
    %c0_232 = arith.constant 0 : index
    %c0_233 = arith.constant 0 : index
    %247 = vector.load %arg15[%c2_231, %c0_232, %c0_233] : memref<3x39x19xf32, #tpu.memory_space<vmem>>, vector<1x39x19xf32>
    %248 = vector.shape_cast %247 : vector<1x39x19xf32> to vector<39x19xf32>
    %cst_234 = arith.constant dense<0.000000e+00> : vector<39x128xf32>
    %249 = tpu.matmul %248, %231, %cst_234 {dimension_numbers = #tpu.dot_dimension_numbers<[1], [0], [0], [1], [0, 0, 1, 1], [], []>} : vector<39x19xf32>, vector<19x128xf32>, vector<39x128xf32> -> vector<39x128xf32>
    %c2_235 = arith.constant 2 : index
    %c0_236 = arith.constant 0 : index
    %c0_237 = arith.constant 0 : index
    %250 = vector.load %arg16[%c2_235, %c0_236, %c0_237] : memref<3x128x16xf32, #tpu.memory_space<vmem>>, vector<1x128x16xf32>
    %251 = vector.shape_cast %250 : vector<1x128x16xf32> to vector<128x16xf32>
    %cst_238 = arith.constant dense<0.000000e+00> : vector<39x16xf32>
    %252 = tpu.matmul %249, %251, %cst_238 {dimension_numbers = #tpu.dot_dimension_numbers<[1], [0], [0], [1], [0, 0, 1, 1], [], []>} : vector<39x128xf32>, vector<128x16xf32>, vector<39x16xf32> -> vector<39x16xf32>
    %253 = arith.addf %246, %252 : vector<39x16xf32>
    %c0_239 = arith.constant 0 : index
    %c0_240 = arith.constant 0 : index
    %254 = vector.load %arg17[%c0_239, %c0_240] : memref<1x1xf32, #tpu.memory_space<vmem>>, vector<1x1xf32>
    %255 = vector.broadcast %254 : vector<1x1xf32> to vector<39x16xf32>
    %256 = arith.addf %253, %255 : vector<39x16xf32>
    %c0_241 = arith.constant 0 : index
    %c0_242 = arith.constant 0 : index
    %c0_243 = arith.constant 0 : index
    %257 = vector.load %arg19[%c0_241, %c0_242, %c0_243] : memref<2x39x16xf32, #tpu.memory_space<vmem>>, vector<1x39x16xf32>
    %258 = vector.shape_cast %257 : vector<1x39x16xf32> to vector<39x16xf32>
    %259 = vector.shape_cast %256 : vector<39x16xf32> to vector<1x39x16xf32>
    tpu.vector_store %arg19[%c0_241, %c0_242, %c0_243], %259 {strides = array<i32>} : memref<2x39x16xf32, #tpu.memory_space<vmem>>, vector<1x39x16xf32>,
    %c1_244 = arith.constant 1 : index
    %c0_245 = arith.constant 0 : index
    %c0_246 = arith.constant 0 : index
    %260 = vector.load %arg0[%c1_244, %c0_245, %c0_246] : memref<2x39x16xf32, #tpu.memory_space<vmem>>, vector<1x39x16xf32>
    %261 = vector.shape_cast %260 : vector<1x39x16xf32> to vector<39x16xf32>
    %c1_247 = arith.constant 1 : index
    %c0_248 = arith.constant 0 : index
    %262 = vector.load %arg20[%c1_247, %c0_248] : memref<41x16xf32, #tpu.memory_space<vmem>>, vector<39x16xf32>
    tpu.vector_store %arg20[%c1_247, %c0_248], %261 {strides = array<i32>} : memref<41x16xf32, #tpu.memory_space<vmem>>, vector<39x16xf32>,
    %cst_249 = arith.constant 0.000000e+00 : f32
    %263 = vector.broadcast %cst_249 : f32 to vector<39x256xf32>
    %c0_250 = arith.constant 0 : index
    %c0_251 = arith.constant 0 : index
    %264 = vector.load %arg20[%c0_250, %c0_251] : memref<41x16xf32, #tpu.memory_space<vmem>>, vector<39x16xf32>
    %c0_252 = arith.constant 0 : index
    %c0_253 = arith.constant 0 : index
    %c0_254 = arith.constant 0 : index
    %265 = vector.load %arg1[%c0_252, %c0_253, %c0_254] : memref<3x16x256xf32, #tpu.memory_space<vmem>>, vector<1x16x256xf32>
    %266 = vector.shape_cast %265 : vector<1x16x256xf32> to vector<16x256xf32>
    %cst_255 = arith.constant dense<0.000000e+00> : vector<39x256xf32>
    %267 = tpu.matmul %264, %266, %cst_255 {dimension_numbers = #tpu.dot_dimension_numbers<[1], [0], [0], [1], [0, 0, 1, 1], [], []>} : vector<39x16xf32>, vector<16x256xf32>, vector<39x256xf32> -> vector<39x256xf32>
    %268 = arith.addf %263, %267 : vector<39x256xf32>
    %c1_256 = arith.constant 1 : index
    %c0_257 = arith.constant 0 : index
    %269 = vector.load %arg20[%c1_256, %c0_257] : memref<41x16xf32, #tpu.memory_space<vmem>>, vector<39x16xf32>
    %c1_258 = arith.constant 1 : index
    %c0_259 = arith.constant 0 : index
    %c0_260 = arith.constant 0 : index
    %270 = vector.load %arg1[%c1_258, %c0_259, %c0_260] : memref<3x16x256xf32, #tpu.memory_space<vmem>>, vector<1x16x256xf32>
    %271 = vector.shape_cast %270 : vector<1x16x256xf32> to vector<16x256xf32>
    %cst_261 = arith.constant dense<0.000000e+00> : vector<39x256xf32>
    %272 = tpu.matmul %269, %271, %cst_261 {dimension_numbers = #tpu.dot_dimension_numbers<[1], [0], [0], [1], [0, 0, 1, 1], [], []>} : vector<39x16xf32>, vector<16x256xf32>, vector<39x256xf32> -> vector<39x256xf32>
    %273 = arith.addf %268, %272 : vector<39x256xf32>
    %c2_262 = arith.constant 2 : index
    %c0_263 = arith.constant 0 : index
    %274 = vector.load %arg20[%c2_262, %c0_263] : memref<41x16xf32, #tpu.memory_space<vmem>>, vector<39x16xf32>
    %c2_264 = arith.constant 2 : index
    %c0_265 = arith.constant 0 : index
    %c0_266 = arith.constant 0 : index
    %275 = vector.load %arg1[%c2_264, %c0_265, %c0_266] : memref<3x16x256xf32, #tpu.memory_space<vmem>>, vector<1x16x256xf32>
    %276 = vector.shape_cast %275 : vector<1x16x256xf32> to vector<16x256xf32>
    %cst_267 = arith.constant dense<0.000000e+00> : vector<39x256xf32>
    %277 = tpu.matmul %274, %276, %cst_267 {dimension_numbers = #tpu.dot_dimension_numbers<[1], [0], [0], [1], [0, 0, 1, 1], [], []>} : vector<39x16xf32>, vector<16x256xf32>, vector<39x256xf32> -> vector<39x256xf32>
    %278 = arith.addf %273, %277 : vector<39x256xf32>
    %c0_268 = arith.constant 0 : index
    %c0_269 = arith.constant 0 : index
    %279 = vector.load %arg2[%c0_268, %c0_269] : memref<1x256xf32, #tpu.memory_space<vmem>>, vector<1x256xf32>
    %280 = vector.broadcast %279 : vector<1x256xf32> to vector<39x256xf32>
    %281 = arith.addf %278, %280 : vector<39x256xf32>
    %cst_270 = arith.constant dense<0.000000e+00> : vector<39xf32>
    %282 = vector.multi_reduction <add>, %281, %cst_270 [1] : vector<39x256xf32> to vector<39xf32>
    %283 = vector.shape_cast %282 : vector<39xf32> to vector<39x1xf32>
    %cst_271 = arith.constant 2.560000e+02 : f32
    %284 = vector.broadcast %cst_271 : f32 to vector<39x1xf32>
    %285 = arith.divf %283, %284 : vector<39x1xf32>
    %cst_272 = arith.constant dense<0.000000e+00> : vector<1xf32>
    %286 = vector.multi_reduction <add>, %285, %cst_272 [0] : vector<39x1xf32> to vector<1xf32>
    %287 = vector.shape_cast %286 : vector<1xf32> to vector<1x1xf32>
    %cst_273 = arith.constant 3.900000e+01 : f32
    %288 = vector.broadcast %cst_273 : f32 to vector<1x1xf32>
    %289 = arith.divf %287, %288 : vector<1x1xf32>
    %290 = vector.broadcast %289 : vector<1x1xf32> to vector<39x256xf32>
    %291 = arith.subf %281, %290 : vector<39x256xf32>
    %292 = arith.mulf %291, %291 : vector<39x256xf32>
    %cst_274 = arith.constant dense<0.000000e+00> : vector<39xf32>
    %293 = vector.multi_reduction <add>, %292, %cst_274 [1] : vector<39x256xf32> to vector<39xf32>
    %294 = vector.shape_cast %293 : vector<39xf32> to vector<39x1xf32>
    %cst_275 = arith.constant 2.560000e+02 : f32
    %295 = vector.broadcast %cst_275 : f32 to vector<39x1xf32>
    %296 = arith.divf %294, %295 : vector<39x1xf32>
    %cst_276 = arith.constant dense<0.000000e+00> : vector<1xf32>
    %297 = vector.multi_reduction <add>, %296, %cst_276 [0] : vector<39x1xf32> to vector<1xf32>
    %298 = vector.shape_cast %297 : vector<1xf32> to vector<1x1xf32>
    %cst_277 = arith.constant 3.900000e+01 : f32
    %299 = vector.broadcast %cst_277 : f32 to vector<1x1xf32>
    %300 = arith.divf %298, %299 : vector<1x1xf32>
    %301 = vector.broadcast %289 : vector<1x1xf32> to vector<39x256xf32>
    %302 = arith.subf %281, %301 : vector<39x256xf32>
    %cst_278 = arith.constant 9.99999974E-6 : f32
    %303 = vector.broadcast %cst_278 : f32 to vector<1x1xf32>
    %304 = arith.addf %300, %303 : vector<1x1xf32>
    %305 = math.rsqrt %304 : vector<1x1xf32>
    %306 = vector.broadcast %305 : vector<1x1xf32> to vector<39x256xf32>
    %307 = arith.mulf %302, %306 : vector<39x256xf32>
    %c0_279 = arith.constant 0 : index
    %c0_280 = arith.constant 0 : index
    %308 = vector.load %arg3[%c0_279, %c0_280] : memref<39x256xf32, #tpu.memory_space<vmem>>, vector<39x256xf32>
    %309 = arith.mulf %307, %308 : vector<39x256xf32>
    %c0_281 = arith.constant 0 : index
    %c0_282 = arith.constant 0 : index
    %310 = vector.load %arg4[%c0_281, %c0_282] : memref<39x256xf32, #tpu.memory_space<vmem>>, vector<39x256xf32>
    %311 = arith.addf %309, %310 : vector<39x256xf32>
    %cst_283 = arith.constant 5.000000e-01 : f32
    %312 = vector.broadcast %cst_283 : f32 to vector<39x256xf32>
    %313 = arith.mulf %312, %311 : vector<39x256xf32>
    %cst_284 = arith.constant 4.471500e-02 : f32
    %314 = vector.broadcast %cst_284 : f32 to vector<39x256xf32>
    %315 = arith.mulf %314, %311 : vector<39x256xf32>
    %316 = arith.mulf %315, %311 : vector<39x256xf32>
    %317 = arith.mulf %316, %311 : vector<39x256xf32>
    %318 = arith.addf %311, %317 : vector<39x256xf32>
    %cst_285 = arith.constant 0.797884583 : f32
    %319 = vector.broadcast %cst_285 : f32 to vector<39x256xf32>
    %320 = arith.mulf %319, %318 : vector<39x256xf32>
    %321 = math.tanh %320 : vector<39x256xf32>
    %cst_286 = arith.constant 1.000000e+00 : f32
    %322 = vector.broadcast %cst_286 : f32 to vector<39x256xf32>
    %323 = arith.addf %322, %321 : vector<39x256xf32>
    %324 = arith.mulf %313, %323 : vector<39x256xf32>
    %c0_287 = arith.constant 0 : index
    %c0_288 = arith.constant 0 : index
    %325 = vector.load %arg5[%c0_287, %c0_288] : memref<19x39xf32, #tpu.memory_space<vmem>>, vector<19x39xf32>
    %cst_289 = arith.constant dense<0.000000e+00> : vector<19x256xf32>
    %326 = tpu.matmul %325, %324, %cst_289 {dimension_numbers = #tpu.dot_dimension_numbers<[1], [0], [0], [1], [0, 0, 1, 1], [], []>} : vector<19x39xf32>, vector<39x256xf32>, vector<19x256xf32> -> vector<19x256xf32>
    %c0_290 = arith.constant 0 : index
    %c0_291 = arith.constant 0 : index
    %327 = vector.load %arg6[%c0_290, %c0_291] : memref<256x128xf32, #tpu.memory_space<vmem>>, vector<256x128xf32>
    %cst_292 = arith.constant dense<0.000000e+00> : vector<19x128xf32>
    %328 = tpu.matmul %326, %327, %cst_292 {dimension_numbers = #tpu.dot_dimension_numbers<[1], [0], [0], [1], [0, 0, 1, 1], [], []>} : vector<19x256xf32>, vector<256x128xf32>, vector<19x128xf32> -> vector<19x128xf32>
    %c0_293 = arith.constant 0 : index
    %c0_294 = arith.constant 0 : index
    %329 = vector.load %arg22[%c0_293, %c0_294] : memref<19x128xf32, #tpu.memory_space<vmem>>, vector<19x128xf32>
    tpu.vector_store %arg22[%c0_293, %c0_294], %328 {strides = array<i32>} : memref<19x128xf32, #tpu.memory_space<vmem>>, vector<19x128xf32>,
    %c0_295 = arith.constant 0 : index
    %c0_296 = arith.constant 0 : index
    %330 = vector.load %arg22[%c0_295, %c0_296] : memref<19x128xf32, #tpu.memory_space<vmem>>, vector<1x128xf32>
    %c0_297 = arith.constant 0 : index
    %c0_298 = arith.constant 0 : index
    %331 = vector.load %arg21[%c0_297, %c0_298] : memref<1x2432xf32, #tpu.memory_space<vmem>>, vector<1x128xf32>
    tpu.vector_store %arg21[%c0_297, %c0_298], %330 {strides = array<i32>} : memref<1x2432xf32, #tpu.memory_space<vmem>>, vector<1x128xf32>,
    %c1_299 = arith.constant 1 : index
    %c0_300 = arith.constant 0 : index
    %332 = vector.load %arg22[%c1_299, %c0_300] : memref<19x128xf32, #tpu.memory_space<vmem>>, vector<1x128xf32>
    %c0_301 = arith.constant 0 : index
    %c128_302 = arith.constant 128 : index
    %333 = vector.load %arg21[%c0_301, %c128_302] : memref<1x2432xf32, #tpu.memory_space<vmem>>, vector<1x128xf32>
    tpu.vector_store %arg21[%c0_301, %c128_302], %332 {strides = array<i32>} : memref<1x2432xf32, #tpu.memory_space<vmem>>, vector<1x128xf32>,
    %c2_303 = arith.constant 2 : index
    %c0_304 = arith.constant 0 : index
    %334 = vector.load %arg22[%c2_303, %c0_304] : memref<19x128xf32, #tpu.memory_space<vmem>>, vector<1x128xf32>
    %c0_305 = arith.constant 0 : index
    %c256_306 = arith.constant 256 : index
    %335 = vector.load %arg21[%c0_305, %c256_306] : memref<1x2432xf32, #tpu.memory_space<vmem>>, vector<1x128xf32>
    tpu.vector_store %arg21[%c0_305, %c256_306], %334 {strides = array<i32>} : memref<1x2432xf32, #tpu.memory_space<vmem>>, vector<1x128xf32>,
    %c3_307 = arith.constant 3 : index
    %c0_308 = arith.constant 0 : index
    %336 = vector.load %arg22[%c3_307, %c0_308] : memref<19x128xf32, #tpu.memory_space<vmem>>, vector<1x128xf32>
    %c0_309 = arith.constant 0 : index
    %c384_310 = arith.constant 384 : index
    %337 = vector.load %arg21[%c0_309, %c384_310] : memref<1x2432xf32, #tpu.memory_space<vmem>>, vector<1x128xf32>
    tpu.vector_store %arg21[%c0_309, %c384_310], %336 {strides = array<i32>} : memref<1x2432xf32, #tpu.memory_space<vmem>>, vector<1x128xf32>,
    %c4_311 = arith.constant 4 : index
    %c0_312 = arith.constant 0 : index
    %338 = vector.load %arg22[%c4_311, %c0_312] : memref<19x128xf32, #tpu.memory_space<vmem>>, vector<1x128xf32>
    %c0_313 = arith.constant 0 : index
    %c512_314 = arith.constant 512 : index
    %339 = vector.load %arg21[%c0_313, %c512_314] : memref<1x2432xf32, #tpu.memory_space<vmem>>, vector<1x128xf32>
    tpu.vector_store %arg21[%c0_313, %c512_314], %338 {strides = array<i32>} : memref<1x2432xf32, #tpu.memory_space<vmem>>, vector<1x128xf32>,
    %c5_315 = arith.constant 5 : index
    %c0_316 = arith.constant 0 : index
    %340 = vector.load %arg22[%c5_315, %c0_316] : memref<19x128xf32, #tpu.memory_space<vmem>>, vector<1x128xf32>
    %c0_317 = arith.constant 0 : index
    %c640_318 = arith.constant 640 : index
    %341 = vector.load %arg21[%c0_317, %c640_318] : memref<1x2432xf32, #tpu.memory_space<vmem>>, vector<1x128xf32>
    tpu.vector_store %arg21[%c0_317, %c640_318], %340 {strides = array<i32>} : memref<1x2432xf32, #tpu.memory_space<vmem>>, vector<1x128xf32>,
    %c6_319 = arith.constant 6 : index
    %c0_320 = arith.constant 0 : index
    %342 = vector.load %arg22[%c6_319, %c0_320] : memref<19x128xf32, #tpu.memory_space<vmem>>, vector<1x128xf32>
    %c0_321 = arith.constant 0 : index
    %c768_322 = arith.constant 768 : index
    %343 = vector.load %arg21[%c0_321, %c768_322] : memref<1x2432xf32, #tpu.memory_space<vmem>>, vector<1x128xf32>
    tpu.vector_store %arg21[%c0_321, %c768_322], %342 {strides = array<i32>} : memref<1x2432xf32, #tpu.memory_space<vmem>>, vector<1x128xf32>,
    %c7_323 = arith.constant 7 : index
    %c0_324 = arith.constant 0 : index
    %344 = vector.load %arg22[%c7_323, %c0_324] : memref<19x128xf32, #tpu.memory_space<vmem>>, vector<1x128xf32>
    %c0_325 = arith.constant 0 : index
    %c896_326 = arith.constant 896 : index
    %345 = vector.load %arg21[%c0_325, %c896_326] : memref<1x2432xf32, #tpu.memory_space<vmem>>, vector<1x128xf32>
    tpu.vector_store %arg21[%c0_325, %c896_326], %344 {strides = array<i32>} : memref<1x2432xf32, #tpu.memory_space<vmem>>, vector<1x128xf32>,
    %c8_327 = arith.constant 8 : index
    %c0_328 = arith.constant 0 : index
    %346 = vector.load %arg22[%c8_327, %c0_328] : memref<19x128xf32, #tpu.memory_space<vmem>>, vector<1x128xf32>
    %c0_329 = arith.constant 0 : index
    %c1024_330 = arith.constant 1024 : index
    %347 = vector.load %arg21[%c0_329, %c1024_330] : memref<1x2432xf32, #tpu.memory_space<vmem>>, vector<1x128xf32>
    tpu.vector_store %arg21[%c0_329, %c1024_330], %346 {strides = array<i32>} : memref<1x2432xf32, #tpu.memory_space<vmem>>, vector<1x128xf32>,
    %c9_331 = arith.constant 9 : index
    %c0_332 = arith.constant 0 : index
    %348 = vector.load %arg22[%c9_331, %c0_332] : memref<19x128xf32, #tpu.memory_space<vmem>>, vector<1x128xf32>
    %c0_333 = arith.constant 0 : index
    %c1152_334 = arith.constant 1152 : index
    %349 = vector.load %arg21[%c0_333, %c1152_334] : memref<1x2432xf32, #tpu.memory_space<vmem>>, vector<1x128xf32>
    tpu.vector_store %arg21[%c0_333, %c1152_334], %348 {strides = array<i32>} : memref<1x2432xf32, #tpu.memory_space<vmem>>, vector<1x128xf32>,
    %c10_335 = arith.constant 10 : index
    %c0_336 = arith.constant 0 : index
    %350 = vector.load %arg22[%c10_335, %c0_336] : memref<19x128xf32, #tpu.memory_space<vmem>>, vector<1x128xf32>
    %c0_337 = arith.constant 0 : index
    %c1280_338 = arith.constant 1280 : index
    %351 = vector.load %arg21[%c0_337, %c1280_338] : memref<1x2432xf32, #tpu.memory_space<vmem>>, vector<1x128xf32>
    tpu.vector_store %arg21[%c0_337, %c1280_338], %350 {strides = array<i32>} : memref<1x2432xf32, #tpu.memory_space<vmem>>, vector<1x128xf32>,
    %c11_339 = arith.constant 11 : index
    %c0_340 = arith.constant 0 : index
    %352 = vector.load %arg22[%c11_339, %c0_340] : memref<19x128xf32, #tpu.memory_space<vmem>>, vector<1x128xf32>
    %c0_341 = arith.constant 0 : index
    %c1408_342 = arith.constant 1408 : index
    %353 = vector.load %arg21[%c0_341, %c1408_342] : memref<1x2432xf32, #tpu.memory_space<vmem>>, vector<1x128xf32>
    tpu.vector_store %arg21[%c0_341, %c1408_342], %352 {strides = array<i32>} : memref<1x2432xf32, #tpu.memory_space<vmem>>, vector<1x128xf32>,
    %c12_343 = arith.constant 12 : index
    %c0_344 = arith.constant 0 : index
    %354 = vector.load %arg22[%c12_343, %c0_344] : memref<19x128xf32, #tpu.memory_space<vmem>>, vector<1x128xf32>
    %c0_345 = arith.constant 0 : index
    %c1536_346 = arith.constant 1536 : index
    %355 = vector.load %arg21[%c0_345, %c1536_346] : memref<1x2432xf32, #tpu.memory_space<vmem>>, vector<1x128xf32>
    tpu.vector_store %arg21[%c0_345, %c1536_346], %354 {strides = array<i32>} : memref<1x2432xf32, #tpu.memory_space<vmem>>, vector<1x128xf32>,
    %c13_347 = arith.constant 13 : index
    %c0_348 = arith.constant 0 : index
    %356 = vector.load %arg22[%c13_347, %c0_348] : memref<19x128xf32, #tpu.memory_space<vmem>>, vector<1x128xf32>
    %c0_349 = arith.constant 0 : index
    %c1664_350 = arith.constant 1664 : index
    %357 = vector.load %arg21[%c0_349, %c1664_350] : memref<1x2432xf32, #tpu.memory_space<vmem>>, vector<1x128xf32>
    tpu.vector_store %arg21[%c0_349, %c1664_350], %356 {strides = array<i32>} : memref<1x2432xf32, #tpu.memory_space<vmem>>, vector<1x128xf32>,
    %c14_351 = arith.constant 14 : index
    %c0_352 = arith.constant 0 : index
    %358 = vector.load %arg22[%c14_351, %c0_352] : memref<19x128xf32, #tpu.memory_space<vmem>>, vector<1x128xf32>
    %c0_353 = arith.constant 0 : index
    %c1792_354 = arith.constant 1792 : index
    %359 = vector.load %arg21[%c0_353, %c1792_354] : memref<1x2432xf32, #tpu.memory_space<vmem>>, vector<1x128xf32>
    tpu.vector_store %arg21[%c0_353, %c1792_354], %358 {strides = array<i32>} : memref<1x2432xf32, #tpu.memory_space<vmem>>, vector<1x128xf32>,
    %c15_355 = arith.constant 15 : index
    %c0_356 = arith.constant 0 : index
    %360 = vector.load %arg22[%c15_355, %c0_356] : memref<19x128xf32, #tpu.memory_space<vmem>>, vector<1x128xf32>
    %c0_357 = arith.constant 0 : index
    %c1920_358 = arith.constant 1920 : index
    %361 = vector.load %arg21[%c0_357, %c1920_358] : memref<1x2432xf32, #tpu.memory_space<vmem>>, vector<1x128xf32>
    tpu.vector_store %arg21[%c0_357, %c1920_358], %360 {strides = array<i32>} : memref<1x2432xf32, #tpu.memory_space<vmem>>, vector<1x128xf32>,
    %c16_359 = arith.constant 16 : index
    %c0_360 = arith.constant 0 : index
    %362 = vector.load %arg22[%c16_359, %c0_360] : memref<19x128xf32, #tpu.memory_space<vmem>>, vector<1x128xf32>
    %c0_361 = arith.constant 0 : index
    %c2048_362 = arith.constant 2048 : index
    %363 = vector.load %arg21[%c0_361, %c2048_362] : memref<1x2432xf32, #tpu.memory_space<vmem>>, vector<1x128xf32>
    tpu.vector_store %arg21[%c0_361, %c2048_362], %362 {strides = array<i32>} : memref<1x2432xf32, #tpu.memory_space<vmem>>, vector<1x128xf32>,
    %c17_363 = arith.constant 17 : index
    %c0_364 = arith.constant 0 : index
    %364 = vector.load %arg22[%c17_363, %c0_364] : memref<19x128xf32, #tpu.memory_space<vmem>>, vector<1x128xf32>
    %c0_365 = arith.constant 0 : index
    %c2176_366 = arith.constant 2176 : index
    %365 = vector.load %arg21[%c0_365, %c2176_366] : memref<1x2432xf32, #tpu.memory_space<vmem>>, vector<1x128xf32>
    tpu.vector_store %arg21[%c0_365, %c2176_366], %364 {strides = array<i32>} : memref<1x2432xf32, #tpu.memory_space<vmem>>, vector<1x128xf32>,
    %c18_367 = arith.constant 18 : index
    %c0_368 = arith.constant 0 : index
    %366 = vector.load %arg22[%c18_367, %c0_368] : memref<19x128xf32, #tpu.memory_space<vmem>>, vector<1x128xf32>
    %c0_369 = arith.constant 0 : index
    %c2304_370 = arith.constant 2304 : index
    %367 = vector.load %arg21[%c0_369, %c2304_370] : memref<1x2432xf32, #tpu.memory_space<vmem>>, vector<1x128xf32>
    tpu.vector_store %arg21[%c0_369, %c2304_370], %366 {strides = array<i32>} : memref<1x2432xf32, #tpu.memory_space<vmem>>, vector<1x128xf32>,
    %c0_371 = arith.constant 0 : index
    %c0_372 = arith.constant 0 : index
    %368 = vector.load %arg21[%c0_371, %c0_372] : memref<1x2432xf32, #tpu.memory_space<vmem>>, vector<1x2432xf32>
    %c0_373 = arith.constant 0 : index
    %c0_374 = arith.constant 0 : index
    %369 = vector.load %arg7[%c0_373, %c0_374] : memref<2432x32xf32, #tpu.memory_space<vmem>>, vector<2432x32xf32>
    %cst_375 = arith.constant dense<0.000000e+00> : vector<1x32xf32>
    %370 = tpu.matmul %368, %369, %cst_375 {dimension_numbers = #tpu.dot_dimension_numbers<[1], [0], [0], [1], [0, 0, 1, 1], [], []>} : vector<1x2432xf32>, vector<2432x32xf32>, vector<1x32xf32> -> vector<1x32xf32>
    %c0_376 = arith.constant 0 : index
    %c0_377 = arith.constant 0 : index
    %371 = vector.load %arg8[%c0_376, %c0_377] : memref<1x32xf32, #tpu.memory_space<vmem>>, vector<1x32xf32>
    %372 = arith.addf %370, %371 : vector<1x32xf32>
    %cst_378 = arith.constant dense<0.000000e+00> : vector<1xf32>
    %373 = vector.multi_reduction <add>, %372, %cst_378 [1] : vector<1x32xf32> to vector<1xf32>
    %374 = vector.shape_cast %373 : vector<1xf32> to vector<1x1xf32>
    %cst_379 = arith.constant 3.200000e+01 : f32
    %375 = vector.broadcast %cst_379 : f32 to vector<1x1xf32>
    %376 = arith.divf %374, %375 : vector<1x1xf32>
    %377 = vector.broadcast %376 : vector<1x1xf32> to vector<1x32xf32>
    %378 = arith.subf %372, %377 : vector<1x32xf32>
    %379 = arith.mulf %378, %378 : vector<1x32xf32>
    %cst_380 = arith.constant dense<0.000000e+00> : vector<1xf32>
    %380 = vector.multi_reduction <add>, %379, %cst_380 [1] : vector<1x32xf32> to vector<1xf32>
    %381 = vector.shape_cast %380 : vector<1xf32> to vector<1x1xf32>
    %cst_381 = arith.constant 3.200000e+01 : f32
    %382 = vector.broadcast %cst_381 : f32 to vector<1x1xf32>
    %383 = arith.divf %381, %382 : vector<1x1xf32>
    %384 = vector.broadcast %376 : vector<1x1xf32> to vector<1x32xf32>
    %385 = arith.subf %372, %384 : vector<1x32xf32>
    %cst_382 = arith.constant 9.99999974E-6 : f32
    %386 = vector.broadcast %cst_382 : f32 to vector<1x1xf32>
    %387 = arith.addf %383, %386 : vector<1x1xf32>
    %388 = math.rsqrt %387 : vector<1x1xf32>
    %389 = vector.broadcast %388 : vector<1x1xf32> to vector<1x32xf32>
    %390 = arith.mulf %385, %389 : vector<1x32xf32>
    %c0_383 = arith.constant 0 : index
    %c0_384 = arith.constant 0 : index
    %391 = vector.load %arg9[%c0_383, %c0_384] : memref<1x32xf32, #tpu.memory_space<vmem>>, vector<1x32xf32>
    %392 = arith.mulf %390, %391 : vector<1x32xf32>
    %c0_385 = arith.constant 0 : index
    %c0_386 = arith.constant 0 : index
    %393 = vector.load %arg10[%c0_385, %c0_386] : memref<1x32xf32, #tpu.memory_space<vmem>>, vector<1x32xf32>
    %394 = arith.addf %392, %393 : vector<1x32xf32>
    %cst_387 = arith.constant 5.000000e-01 : f32
    %395 = vector.broadcast %cst_387 : f32 to vector<1x32xf32>
    %396 = arith.mulf %395, %394 : vector<1x32xf32>
    %cst_388 = arith.constant 4.471500e-02 : f32
    %397 = vector.broadcast %cst_388 : f32 to vector<1x32xf32>
    %398 = arith.mulf %397, %394 : vector<1x32xf32>
    %399 = arith.mulf %398, %394 : vector<1x32xf32>
    %400 = arith.mulf %399, %394 : vector<1x32xf32>
    %401 = arith.addf %394, %400 : vector<1x32xf32>
    %cst_389 = arith.constant 0.797884583 : f32
    %402 = vector.broadcast %cst_389 : f32 to vector<1x32xf32>
    %403 = arith.mulf %402, %401 : vector<1x32xf32>
    %404 = math.tanh %403 : vector<1x32xf32>
    %cst_390 = arith.constant 1.000000e+00 : f32
    %405 = vector.broadcast %cst_390 : f32 to vector<1x32xf32>
    %406 = arith.addf %405, %404 : vector<1x32xf32>
    %407 = arith.mulf %396, %406 : vector<1x32xf32>
    %c1_391 = arith.constant 1 : index
    %c0_392 = arith.constant 0 : index
    %408 = vector.load %arg18[%c1_391, %c0_392] : memref<2x32xf32, #tpu.memory_space<vmem>>, vector<1x32xf32>
    tpu.vector_store %arg18[%c1_391, %c0_392], %407 {strides = array<i32>} : memref<2x32xf32, #tpu.memory_space<vmem>>, vector<1x32xf32>,
    %c0_393 = arith.constant 0 : index
    %c0_394 = arith.constant 0 : index
    %409 = vector.load %arg11[%c0_393, %c0_394] : memref<32x2432xf32, #tpu.memory_space<vmem>>, vector<32x2432xf32>
    %cst_395 = arith.constant dense<0.000000e+00> : vector<1x2432xf32>
    %410 = tpu.matmul %407, %409, %cst_395 {dimension_numbers = #tpu.dot_dimension_numbers<[1], [0], [0], [1], [0, 0, 1, 1], [], []>} : vector<1x32xf32>, vector<32x2432xf32>, vector<1x2432xf32> -> vector<1x2432xf32>
    %c0_396 = arith.constant 0 : index
    %c0_397 = arith.constant 0 : index
    %411 = vector.load %arg12[%c0_396, %c0_397] : memref<1x2432xf32, #tpu.memory_space<vmem>>, vector<1x2432xf32>
    %412 = arith.addf %410, %411 : vector<1x2432xf32>
    %cst_398 = arith.constant dense<0.000000e+00> : vector<1xf32>
    %413 = vector.multi_reduction <add>, %412, %cst_398 [1] : vector<1x2432xf32> to vector<1xf32>
    %414 = vector.shape_cast %413 : vector<1xf32> to vector<1x1xf32>
    %cst_399 = arith.constant 2.432000e+03 : f32
    %415 = vector.broadcast %cst_399 : f32 to vector<1x1xf32>
    %416 = arith.divf %414, %415 : vector<1x1xf32>
    %417 = vector.broadcast %416 : vector<1x1xf32> to vector<1x2432xf32>
    %418 = arith.subf %412, %417 : vector<1x2432xf32>
    %419 = arith.mulf %418, %418 : vector<1x2432xf32>
    %cst_400 = arith.constant dense<0.000000e+00> : vector<1xf32>
    %420 = vector.multi_reduction <add>, %419, %cst_400 [1] : vector<1x2432xf32> to vector<1xf32>
    %421 = vector.shape_cast %420 : vector<1xf32> to vector<1x1xf32>
    %cst_401 = arith.constant 2.432000e+03 : f32
    %422 = vector.broadcast %cst_401 : f32 to vector<1x1xf32>
    %423 = arith.divf %421, %422 : vector<1x1xf32>
    %424 = vector.broadcast %416 : vector<1x1xf32> to vector<1x2432xf32>
    %425 = arith.subf %412, %424 : vector<1x2432xf32>
    %cst_402 = arith.constant 9.99999974E-6 : f32
    %426 = vector.broadcast %cst_402 : f32 to vector<1x1xf32>
    %427 = arith.addf %423, %426 : vector<1x1xf32>
    %428 = math.rsqrt %427 : vector<1x1xf32>
    %429 = vector.broadcast %428 : vector<1x1xf32> to vector<1x2432xf32>
    %430 = arith.mulf %425, %429 : vector<1x2432xf32>
    %c0_403 = arith.constant 0 : index
    %c0_404 = arith.constant 0 : index
    %431 = vector.load %arg13[%c0_403, %c0_404] : memref<1x2432xf32, #tpu.memory_space<vmem>>, vector<1x2432xf32>
    %432 = arith.mulf %430, %431 : vector<1x2432xf32>
    %c0_405 = arith.constant 0 : index
    %c0_406 = arith.constant 0 : index
    %433 = vector.load %arg14[%c0_405, %c0_406] : memref<1x2432xf32, #tpu.memory_space<vmem>>, vector<1x2432xf32>
    %434 = arith.addf %432, %433 : vector<1x2432xf32>
    %cst_407 = arith.constant 5.000000e-01 : f32
    %435 = vector.broadcast %cst_407 : f32 to vector<1x2432xf32>
    %436 = arith.mulf %435, %434 : vector<1x2432xf32>
    %cst_408 = arith.constant 4.471500e-02 : f32
    %437 = vector.broadcast %cst_408 : f32 to vector<1x2432xf32>
    %438 = arith.mulf %437, %434 : vector<1x2432xf32>
    %439 = arith.mulf %438, %434 : vector<1x2432xf32>
    %440 = arith.mulf %439, %434 : vector<1x2432xf32>
    %441 = arith.addf %434, %440 : vector<1x2432xf32>
    %cst_409 = arith.constant 0.797884583 : f32
    %442 = vector.broadcast %cst_409 : f32 to vector<1x2432xf32>
    %443 = arith.mulf %442, %441 : vector<1x2432xf32>
    %444 = math.tanh %443 : vector<1x2432xf32>
    %cst_410 = arith.constant 1.000000e+00 : f32
    %445 = vector.broadcast %cst_410 : f32 to vector<1x2432xf32>
    %446 = arith.addf %445, %444 : vector<1x2432xf32>
    %447 = arith.mulf %436, %446 : vector<1x2432xf32>
    %c0_411 = arith.constant 0 : index
    %c0_412 = arith.constant 0 : index
    %448 = vector.load %arg21[%c0_411, %c0_412] : memref<1x2432xf32, #tpu.memory_space<vmem>>, vector<1x2432xf32>
    tpu.vector_store %arg21[%c0_411, %c0_412], %447 {strides = array<i32>} : memref<1x2432xf32, #tpu.memory_space<vmem>>, vector<1x2432xf32>,
    %c0_413 = arith.constant 0 : index
    %c0_414 = arith.constant 0 : index
    %449 = vector.load %arg21[%c0_413, %c0_414] : memref<1x2432xf32, #tpu.memory_space<vmem>>, vector<1x128xf32>
    %c0_415 = arith.constant 0 : index
    %c0_416 = arith.constant 0 : index
    %450 = vector.load %arg22[%c0_415, %c0_416] : memref<19x128xf32, #tpu.memory_space<vmem>>, vector<1x128xf32>
    tpu.vector_store %arg22[%c0_415, %c0_416], %449 {strides = array<i32>} : memref<19x128xf32, #tpu.memory_space<vmem>>, vector<1x128xf32>,
    %c0_417 = arith.constant 0 : index
    %c128_418 = arith.constant 128 : index
    %451 = vector.load %arg21[%c0_417, %c128_418] : memref<1x2432xf32, #tpu.memory_space<vmem>>, vector<1x128xf32>
    %c1_419 = arith.constant 1 : index
    %c0_420 = arith.constant 0 : index
    %452 = vector.load %arg22[%c1_419, %c0_420] : memref<19x128xf32, #tpu.memory_space<vmem>>, vector<1x128xf32>
    tpu.vector_store %arg22[%c1_419, %c0_420], %451 {strides = array<i32>} : memref<19x128xf32, #tpu.memory_space<vmem>>, vector<1x128xf32>,
    %c0_421 = arith.constant 0 : index
    %c256_422 = arith.constant 256 : index
    %453 = vector.load %arg21[%c0_421, %c256_422] : memref<1x2432xf32, #tpu.memory_space<vmem>>, vector<1x128xf32>
    %c2_423 = arith.constant 2 : index
    %c0_424 = arith.constant 0 : index
    %454 = vector.load %arg22[%c2_423, %c0_424] : memref<19x128xf32, #tpu.memory_space<vmem>>, vector<1x128xf32>
    tpu.vector_store %arg22[%c2_423, %c0_424], %453 {strides = array<i32>} : memref<19x128xf32, #tpu.memory_space<vmem>>, vector<1x128xf32>,
    %c0_425 = arith.constant 0 : index
    %c384_426 = arith.constant 384 : index
    %455 = vector.load %arg21[%c0_425, %c384_426] : memref<1x2432xf32, #tpu.memory_space<vmem>>, vector<1x128xf32>
    %c3_427 = arith.constant 3 : index
    %c0_428 = arith.constant 0 : index
    %456 = vector.load %arg22[%c3_427, %c0_428] : memref<19x128xf32, #tpu.memory_space<vmem>>, vector<1x128xf32>
    tpu.vector_store %arg22[%c3_427, %c0_428], %455 {strides = array<i32>} : memref<19x128xf32, #tpu.memory_space<vmem>>, vector<1x128xf32>,
    %c0_429 = arith.constant 0 : index
    %c512_430 = arith.constant 512 : index
    %457 = vector.load %arg21[%c0_429, %c512_430] : memref<1x2432xf32, #tpu.memory_space<vmem>>, vector<1x128xf32>
    %c4_431 = arith.constant 4 : index
    %c0_432 = arith.constant 0 : index
    %458 = vector.load %arg22[%c4_431, %c0_432] : memref<19x128xf32, #tpu.memory_space<vmem>>, vector<1x128xf32>
    tpu.vector_store %arg22[%c4_431, %c0_432], %457 {strides = array<i32>} : memref<19x128xf32, #tpu.memory_space<vmem>>, vector<1x128xf32>,
    %c0_433 = arith.constant 0 : index
    %c640_434 = arith.constant 640 : index
    %459 = vector.load %arg21[%c0_433, %c640_434] : memref<1x2432xf32, #tpu.memory_space<vmem>>, vector<1x128xf32>
    %c5_435 = arith.constant 5 : index
    %c0_436 = arith.constant 0 : index
    %460 = vector.load %arg22[%c5_435, %c0_436] : memref<19x128xf32, #tpu.memory_space<vmem>>, vector<1x128xf32>
    tpu.vector_store %arg22[%c5_435, %c0_436], %459 {strides = array<i32>} : memref<19x128xf32, #tpu.memory_space<vmem>>, vector<1x128xf32>,
    %c0_437 = arith.constant 0 : index
    %c768_438 = arith.constant 768 : index
    %461 = vector.load %arg21[%c0_437, %c768_438] : memref<1x2432xf32, #tpu.memory_space<vmem>>, vector<1x128xf32>
    %c6_439 = arith.constant 6 : index
    %c0_440 = arith.constant 0 : index
    %462 = vector.load %arg22[%c6_439, %c0_440] : memref<19x128xf32, #tpu.memory_space<vmem>>, vector<1x128xf32>
    tpu.vector_store %arg22[%c6_439, %c0_440], %461 {strides = array<i32>} : memref<19x128xf32, #tpu.memory_space<vmem>>, vector<1x128xf32>,
    %c0_441 = arith.constant 0 : index
    %c896_442 = arith.constant 896 : index
    %463 = vector.load %arg21[%c0_441, %c896_442] : memref<1x2432xf32, #tpu.memory_space<vmem>>, vector<1x128xf32>
    %c7_443 = arith.constant 7 : index
    %c0_444 = arith.constant 0 : index
    %464 = vector.load %arg22[%c7_443, %c0_444] : memref<19x128xf32, #tpu.memory_space<vmem>>, vector<1x128xf32>
    tpu.vector_store %arg22[%c7_443, %c0_444], %463 {strides = array<i32>} : memref<19x128xf32, #tpu.memory_space<vmem>>, vector<1x128xf32>,
    %c0_445 = arith.constant 0 : index
    %c1024_446 = arith.constant 1024 : index
    %465 = vector.load %arg21[%c0_445, %c1024_446] : memref<1x2432xf32, #tpu.memory_space<vmem>>, vector<1x128xf32>
    %c8_447 = arith.constant 8 : index
    %c0_448 = arith.constant 0 : index
    %466 = vector.load %arg22[%c8_447, %c0_448] : memref<19x128xf32, #tpu.memory_space<vmem>>, vector<1x128xf32>
    tpu.vector_store %arg22[%c8_447, %c0_448], %465 {strides = array<i32>} : memref<19x128xf32, #tpu.memory_space<vmem>>, vector<1x128xf32>,
    %c0_449 = arith.constant 0 : index
    %c1152_450 = arith.constant 1152 : index
    %467 = vector.load %arg21[%c0_449, %c1152_450] : memref<1x2432xf32, #tpu.memory_space<vmem>>, vector<1x128xf32>
    %c9_451 = arith.constant 9 : index
    %c0_452 = arith.constant 0 : index
    %468 = vector.load %arg22[%c9_451, %c0_452] : memref<19x128xf32, #tpu.memory_space<vmem>>, vector<1x128xf32>
    tpu.vector_store %arg22[%c9_451, %c0_452], %467 {strides = array<i32>} : memref<19x128xf32, #tpu.memory_space<vmem>>, vector<1x128xf32>,
    %c0_453 = arith.constant 0 : index
    %c1280_454 = arith.constant 1280 : index
    %469 = vector.load %arg21[%c0_453, %c1280_454] : memref<1x2432xf32, #tpu.memory_space<vmem>>, vector<1x128xf32>
    %c10_455 = arith.constant 10 : index
    %c0_456 = arith.constant 0 : index
    %470 = vector.load %arg22[%c10_455, %c0_456] : memref<19x128xf32, #tpu.memory_space<vmem>>, vector<1x128xf32>
    tpu.vector_store %arg22[%c10_455, %c0_456], %469 {strides = array<i32>} : memref<19x128xf32, #tpu.memory_space<vmem>>, vector<1x128xf32>,
    %c0_457 = arith.constant 0 : index
    %c1408_458 = arith.constant 1408 : index
    %471 = vector.load %arg21[%c0_457, %c1408_458] : memref<1x2432xf32, #tpu.memory_space<vmem>>, vector<1x128xf32>
    %c11_459 = arith.constant 11 : index
    %c0_460 = arith.constant 0 : index
    %472 = vector.load %arg22[%c11_459, %c0_460] : memref<19x128xf32, #tpu.memory_space<vmem>>, vector<1x128xf32>
    tpu.vector_store %arg22[%c11_459, %c0_460], %471 {strides = array<i32>} : memref<19x128xf32, #tpu.memory_space<vmem>>, vector<1x128xf32>,
    %c0_461 = arith.constant 0 : index
    %c1536_462 = arith.constant 1536 : index
    %473 = vector.load %arg21[%c0_461, %c1536_462] : memref<1x2432xf32, #tpu.memory_space<vmem>>, vector<1x128xf32>
    %c12_463 = arith.constant 12 : index
    %c0_464 = arith.constant 0 : index
    %474 = vector.load %arg22[%c12_463, %c0_464] : memref<19x128xf32, #tpu.memory_space<vmem>>, vector<1x128xf32>
    tpu.vector_store %arg22[%c12_463, %c0_464], %473 {strides = array<i32>} : memref<19x128xf32, #tpu.memory_space<vmem>>, vector<1x128xf32>,
    %c0_465 = arith.constant 0 : index
    %c1664_466 = arith.constant 1664 : index
    %475 = vector.load %arg21[%c0_465, %c1664_466] : memref<1x2432xf32, #tpu.memory_space<vmem>>, vector<1x128xf32>
    %c13_467 = arith.constant 13 : index
    %c0_468 = arith.constant 0 : index
    %476 = vector.load %arg22[%c13_467, %c0_468] : memref<19x128xf32, #tpu.memory_space<vmem>>, vector<1x128xf32>
    tpu.vector_store %arg22[%c13_467, %c0_468], %475 {strides = array<i32>} : memref<19x128xf32, #tpu.memory_space<vmem>>, vector<1x128xf32>,
    %c0_469 = arith.constant 0 : index
    %c1792_470 = arith.constant 1792 : index
    %477 = vector.load %arg21[%c0_469, %c1792_470] : memref<1x2432xf32, #tpu.memory_space<vmem>>, vector<1x128xf32>
    %c14_471 = arith.constant 14 : index
    %c0_472 = arith.constant 0 : index
    %478 = vector.load %arg22[%c14_471, %c0_472] : memref<19x128xf32, #tpu.memory_space<vmem>>, vector<1x128xf32>
    tpu.vector_store %arg22[%c14_471, %c0_472], %477 {strides = array<i32>} : memref<19x128xf32, #tpu.memory_space<vmem>>, vector<1x128xf32>,
    %c0_473 = arith.constant 0 : index
    %c1920_474 = arith.constant 1920 : index
    %479 = vector.load %arg21[%c0_473, %c1920_474] : memref<1x2432xf32, #tpu.memory_space<vmem>>, vector<1x128xf32>
    %c15_475 = arith.constant 15 : index
    %c0_476 = arith.constant 0 : index
    %480 = vector.load %arg22[%c15_475, %c0_476] : memref<19x128xf32, #tpu.memory_space<vmem>>, vector<1x128xf32>
    tpu.vector_store %arg22[%c15_475, %c0_476], %479 {strides = array<i32>} : memref<19x128xf32, #tpu.memory_space<vmem>>, vector<1x128xf32>,
    %c0_477 = arith.constant 0 : index
    %c2048_478 = arith.constant 2048 : index
    %481 = vector.load %arg21[%c0_477, %c2048_478] : memref<1x2432xf32, #tpu.memory_space<vmem>>, vector<1x128xf32>
    %c16_479 = arith.constant 16 : index
    %c0_480 = arith.constant 0 : index
    %482 = vector.load %arg22[%c16_479, %c0_480] : memref<19x128xf32, #tpu.memory_space<vmem>>, vector<1x128xf32>
    tpu.vector_store %arg22[%c16_479, %c0_480], %481 {strides = array<i32>} : memref<19x128xf32, #tpu.memory_space<vmem>>, vector<1x128xf32>,
    %c0_481 = arith.constant 0 : index
    %c2176_482 = arith.constant 2176 : index
    %483 = vector.load %arg21[%c0_481, %c2176_482] : memref<1x2432xf32, #tpu.memory_space<vmem>>, vector<1x128xf32>
    %c17_483 = arith.constant 17 : index
    %c0_484 = arith.constant 0 : index
    %484 = vector.load %arg22[%c17_483, %c0_484] : memref<19x128xf32, #tpu.memory_space<vmem>>, vector<1x128xf32>
    tpu.vector_store %arg22[%c17_483, %c0_484], %483 {strides = array<i32>} : memref<19x128xf32, #tpu.memory_space<vmem>>, vector<1x128xf32>,
    %c0_485 = arith.constant 0 : index
    %c2304_486 = arith.constant 2304 : index
    %485 = vector.load %arg21[%c0_485, %c2304_486] : memref<1x2432xf32, #tpu.memory_space<vmem>>, vector<1x128xf32>
    %c18_487 = arith.constant 18 : index
    %c0_488 = arith.constant 0 : index
    %486 = vector.load %arg22[%c18_487, %c0_488] : memref<19x128xf32, #tpu.memory_space<vmem>>, vector<1x128xf32>
    tpu.vector_store %arg22[%c18_487, %c0_488], %485 {strides = array<i32>} : memref<19x128xf32, #tpu.memory_space<vmem>>, vector<1x128xf32>,
    %c0_489 = arith.constant 0 : index
    %c0_490 = arith.constant 0 : index
    %487 = vector.load %arg22[%c0_489, %c0_490] : memref<19x128xf32, #tpu.memory_space<vmem>>, vector<19x128xf32>
    %cst_491 = arith.constant 0.000000e+00 : f32
    %488 = vector.broadcast %cst_491 : f32 to vector<39x16xf32>
    %c0_492 = arith.constant 0 : index
    %c0_493 = arith.constant 0 : index
    %c0_494 = arith.constant 0 : index
    %489 = vector.load %arg15[%c0_492, %c0_493, %c0_494] : memref<3x39x19xf32, #tpu.memory_space<vmem>>, vector<1x39x19xf32>
    %490 = vector.shape_cast %489 : vector<1x39x19xf32> to vector<39x19xf32>
    %cst_495 = arith.constant dense<0.000000e+00> : vector<39x128xf32>
    %491 = tpu.matmul %490, %487, %cst_495 {dimension_numbers = #tpu.dot_dimension_numbers<[1], [0], [0], [1], [0, 0, 1, 1], [], []>} : vector<39x19xf32>, vector<19x128xf32>, vector<39x128xf32> -> vector<39x128xf32>
    %c0_496 = arith.constant 0 : index
    %c0_497 = arith.constant 0 : index
    %c0_498 = arith.constant 0 : index
    %492 = vector.load %arg16[%c0_496, %c0_497, %c0_498] : memref<3x128x16xf32, #tpu.memory_space<vmem>>, vector<1x128x16xf32>
    %493 = vector.shape_cast %492 : vector<1x128x16xf32> to vector<128x16xf32>
    %cst_499 = arith.constant dense<0.000000e+00> : vector<39x16xf32>
    %494 = tpu.matmul %491, %493, %cst_499 {dimension_numbers = #tpu.dot_dimension_numbers<[1], [0], [0], [1], [0, 0, 1, 1], [], []>} : vector<39x128xf32>, vector<128x16xf32>, vector<39x16xf32> -> vector<39x16xf32>
    %495 = arith.addf %488, %494 : vector<39x16xf32>
    %c1_500 = arith.constant 1 : index
    %c0_501 = arith.constant 0 : index
    %c0_502 = arith.constant 0 : index
    %496 = vector.load %arg15[%c1_500, %c0_501, %c0_502] : memref<3x39x19xf32, #tpu.memory_space<vmem>>, vector<1x39x19xf32>
    %497 = vector.shape_cast %496 : vector<1x39x19xf32> to vector<39x19xf32>
    %cst_503 = arith.constant dense<0.000000e+00> : vector<39x128xf32>
    %498 = tpu.matmul %497, %487, %cst_503 {dimension_numbers = #tpu.dot_dimension_numbers<[1], [0], [0], [1], [0, 0, 1, 1], [], []>} : vector<39x19xf32>, vector<19x128xf32>, vector<39x128xf32> -> vector<39x128xf32>
    %c1_504 = arith.constant 1 : index
    %c0_505 = arith.constant 0 : index
    %c0_506 = arith.constant 0 : index
    %499 = vector.load %arg16[%c1_504, %c0_505, %c0_506] : memref<3x128x16xf32, #tpu.memory_space<vmem>>, vector<1x128x16xf32>
    %500 = vector.shape_cast %499 : vector<1x128x16xf32> to vector<128x16xf32>
    %cst_507 = arith.constant dense<0.000000e+00> : vector<39x16xf32>
    %501 = tpu.matmul %498, %500, %cst_507 {dimension_numbers = #tpu.dot_dimension_numbers<[1], [0], [0], [1], [0, 0, 1, 1], [], []>} : vector<39x128xf32>, vector<128x16xf32>, vector<39x16xf32> -> vector<39x16xf32>
    %502 = arith.addf %495, %501 : vector<39x16xf32>
    %c2_508 = arith.constant 2 : index
    %c0_509 = arith.constant 0 : index
    %c0_510 = arith.constant 0 : index
    %503 = vector.load %arg15[%c2_508, %c0_509, %c0_510] : memref<3x39x19xf32, #tpu.memory_space<vmem>>, vector<1x39x19xf32>
    %504 = vector.shape_cast %503 : vector<1x39x19xf32> to vector<39x19xf32>
    %cst_511 = arith.constant dense<0.000000e+00> : vector<39x128xf32>
    %505 = tpu.matmul %504, %487, %cst_511 {dimension_numbers = #tpu.dot_dimension_numbers<[1], [0], [0], [1], [0, 0, 1, 1], [], []>} : vector<39x19xf32>, vector<19x128xf32>, vector<39x128xf32> -> vector<39x128xf32>
    %c2_512 = arith.constant 2 : index
    %c0_513 = arith.constant 0 : index
    %c0_514 = arith.constant 0 : index
    %506 = vector.load %arg16[%c2_512, %c0_513, %c0_514] : memref<3x128x16xf32, #tpu.memory_space<vmem>>, vector<1x128x16xf32>
    %507 = vector.shape_cast %506 : vector<1x128x16xf32> to vector<128x16xf32>
    %cst_515 = arith.constant dense<0.000000e+00> : vector<39x16xf32>
    %508 = tpu.matmul %505, %507, %cst_515 {dimension_numbers = #tpu.dot_dimension_numbers<[1], [0], [0], [1], [0, 0, 1, 1], [], []>} : vector<39x128xf32>, vector<128x16xf32>, vector<39x16xf32> -> vector<39x16xf32>
    %509 = arith.addf %502, %508 : vector<39x16xf32>
    %c0_516 = arith.constant 0 : index
    %c0_517 = arith.constant 0 : index
    %510 = vector.load %arg17[%c0_516, %c0_517] : memref<1x1xf32, #tpu.memory_space<vmem>>, vector<1x1xf32>
    %511 = vector.broadcast %510 : vector<1x1xf32> to vector<39x16xf32>
    %512 = arith.addf %509, %511 : vector<39x16xf32>
    %c1_518 = arith.constant 1 : index
    %c0_519 = arith.constant 0 : index
    %c0_520 = arith.constant 0 : index
    %513 = vector.load %arg19[%c1_518, %c0_519, %c0_520] : memref<2x39x16xf32, #tpu.memory_space<vmem>>, vector<1x39x16xf32>
    %514 = vector.shape_cast %513 : vector<1x39x16xf32> to vector<39x16xf32>
    %515 = vector.shape_cast %512 : vector<39x16xf32> to vector<1x39x16xf32>
    tpu.vector_store %arg19[%c1_518, %c0_519, %c0_520], %515 {strides = array<i32>} : memref<2x39x16xf32, #tpu.memory_space<vmem>>, vector<1x39x16xf32>,
    return
  }
}

</mosaic_0001>

<bundles_post_ra>
// kernel: forward.2
= control target key start
LH: loop header
LB: loop body
LE: loop exit
PB: predicated region body
PF: predicated region fallthrough
CT: control target
= control target key end

     0   :  { %vm35_vm0 = vcmask 1042432   ;;  %vm31_vm1 = vcmask 23552   ;;  %v804_v1 = vmov 0.0   ;;  %vm805_vm2 = vmmov 0   ;;  %s988_s0 = inlined_call_operand.vmem [shape: f32[2,3], index: 0, kind: input, shape index: {}]   ;;  %s989_s1 = inlined_call_operand.vmem [shape: f32[3,32], index: 1, kind: input, shape index: {}]   ;;  %s990_s2 = inlined_call_operand.vmem [shape: f32[4,32,32], index: 2, kind: input, shape index: {}]   ;;  %s991_s3 = inlined_call_operand.vmem [shape: f32[5,32], index: 3, kind: input, shape index: {}]   ;;  %s992_s4 = inlined_call_operand.vmem [shape: f32[5,32], index: 4, kind: input, shape index: {}]   ;;  %s993_s5 = inlined_call_operand.vmem [shape: f32[5,32], index: 5, kind: input, shape index: {}]   ;;  %s994_s6 = inlined_call_operand.hbm [shape: f32[2,32], index: 6, kind: output, shape index: {}]  }
   0x1   :  { %v25_v0 = vld [vmem:[%s989_s1] sm:$0x7]  ;;  %683 = vmatprep.subr.mxu0 %v804_v1  ;;  %685 = vmatprep.mubr.msk.f32.mxu0 %vm805_vm2, %v804_v1 }
   0x2   :  { %v24_v2 = vld [vmem:[%s988_s0] sm:$0x3] }
   0x3   :  { %11 = vsyncpa [#allocation3], 0  ;;  %684 = vmatpush3.msk.msra.mxu0 %vm35_vm0, %v25_v0  ;;  %696 = vmatprep.mubr.msk.f32.mxu1 %vm805_vm2, %v804_v1  ;;  %v628_v3 = vld [vmem:[%s991_s3] ss:$0 sm:$0xff]  ;;  %vm109_vm3 = vcmask 254976   ;;  %v146_v14 = vld [vmem:[%s990_s2 + $0x8] sm:$0xff] }
   0x4   :  { %686 = vmatmul.mubr.msk.f32.vlgmr.msra.gmra.mrb[0].mxu0 %vm31_vm1, %v24_v2  ;;  %v145_v13 = vld [vmem:[%s990_s2] sm:$0xff]  ;;  %v147_v15 = vld [vmem:[%s990_s2 + $0x10] sm:$0xff]  ;;  %v806_v16 = vmov 0.0|0.0   ;;  %v148_v18 = vld [vmem:[%s990_s2 + $0x18] sm:$0xff]  ;;  %vm154_vm4 = vcmask 261120   ;;  %s807_s7 = smov [#allocation2]  }
   0x5   :  { %707 = vmatprep.mubr.msk.f32.mxu0 %vm805_vm2, %v804_v1  ;;  %732 = vmatprep.subr.bf16.mxu1 %v806_v16  ;;  %v733_v17 = vpack.c.bf16 %v146_v14, %v145_v13  ;;  %v736_v19 = vpack.c.bf16 %v148_v18, %v147_v15  ;;  %v631_v24 = vld [vmem:[%s992_s4] ss:$0 sm:$0xff]  ;;  %v633_v38 = vld [vmem:[%s991_s3 + $0x1] ss:$0 sm:$0xff]  ;;  %v638_v49 = vld [vmem:[%s990_s2 + $0x28] sm:$0xff]  ;;  %s620_s8 = sshll.u32 %s807_s7, 4  ;;  %s621_s8 = int_to_ptr.vmem [resolvable:$true] %s620_s8 }
   0x6   :  { %738 = vmatprep.subr.bf16.mxu0 %v806_v16  ;;  %v632_v26 = vld [vmem:[%s993_s5] ss:$0 sm:$0xff]  ;;  %v639_v50 = vld [vmem:[%s990_s2 + $0x30] sm:$0xff]  ;;  %v640_v52 = vld [vmem:[%s990_s2 + $0x38] sm:$0xff]  ;;  %p785_p1 = scmp.lt.s32.totalorder %s621_s8, %s621_s8 }
   0x7   :  { %734 = vmatpush3.bf16.msra.mxu1 %v733_v17  ;;  %v637_v48 = vld [vmem:[%s990_s2 + $0x20] sm:$0xff]  ;;  %v742_v53 = vpack.c.bf16 %v640_v52, %v639_v50 }
   0x8   :  { %735 = vmatprep.subr.bf16.mxu1 %v806_v16  ;;  %v739_v51 = vpack.c.bf16 %v638_v49, %v637_v48  ;;  %v635_v58 = vld [vmem:[%s992_s4 + $0x1] ss:$0 sm:$0xff] }
   0x9   :  { %v636_v60 = vld [vmem:[%s993_s5 + $0x1] ss:$0 sm:$0xff] }
   0xa   :  { %740 = vmatpush3.bf16.msra.mxu0 %v739_v51 }
   0xb   :  { %737 = vmatpush3.bf16.msra.mxu1 %v736_v19  ;;  %741 = vmatprep.subr.bf16.mxu0 %v806_v16 }
   0xc   :  { %744 = vmatprep.subr.bf16.mxu1 %v806_v16 }
   0xe   :  { %743 = vmatpush3.bf16.msra.mxu0 %v742_v53  ;;  %v653_v53 = vld [vmem:[%s990_s2 + $0x60] sm:$0xff] }
   0xf   :  { %750 = vmatprep.subr.bf16.mxu0 %v806_v16 }
  0xd7   :  { %v105_v4 = vpop.f32.mrb[0].mxu0 }
  0xd8   :  { %v106_v5 = vadd.f32 %v628_v3, %v105_v4  ;;  %v687_v6 = vpop.f32.mrb[1].mxu0 }
  0xda   :  { %v110_v7 = vsel %vm109_vm3, %v106_v5, 0.0 }
  0xdb   :  { %111 = vadd.xlane.f32.xlu0 %v110_v7 }
 0x168   :  { %v112_v8 = vpop.xlane.xlu0 %111 }
 0x169   :  { %v114_v9 = vmul.f32 0.03125, %v112_v8 }
 0x16b   :  { %v115_v10 = vsub.f32 %v106_v5, %v114_v9  ;;  %v641_v9 = vld [vmem:[%s991_s3 + $0x2] ss:$0 sm:$0xff] }
 0x16d   :  { %v116_v11 = vmul.f32 %v115_v10, %v115_v10 }
 0x16f   :  { %v117_v12 = vsel %vm109_vm3, %v116_v11, 0.0 }
 0x170   :  { %118 = vadd.xlane.f32.xlu0 %v117_v12 }
 0x1fd   :  { %v119_v20 = vpop.xlane.xlu0 %118 }
 0x1fe   :  { %v120_v21 = vmul.f32 0.03125, %v119_v20  ;;  %v646_v20 = vld [vmem:[%s990_s2 + $0x48] sm:$0xff] }
 0x200   :  { %v121_v22 = vadd.f32 1e-05, %v120_v21  ;;  %v647_v21 = vld [vmem:[%s990_s2 + $0x50] sm:$0xff] }
 0x202   :  { %760 = vrsqrt.f32 %v121_v22 }
 0x20c   :  { %v761_v23 = vpop.eup %760 }
 0x20d   :  { %v123_v25 = vmul.f32 %v761_v23, %v115_v10  ;;  %v648_v23 = vld [vmem:[%s990_s2 + $0x58] sm:$0xff] }
 0x20f   :  { %v129_v27 = vmul.f32 %v631_v24, %v123_v25  ;;  %v748_v24 = vpack.c.bf16 %v648_v23, %v647_v21 }
 0x211   :  { %v135_v28 = vadd.f32 %v632_v26, %v129_v27 }
 0x213   :  { %v137_v29 = vmul.f32 0.044715, %v135_v28  ;;  %v136_v35 = vmul.f32 0.5, %v135_v28 }
 0x215   :  { %v138_v30 = vmul.f32 %v137_v29, %v135_v28  ;;  %v643_v29 = vld [vmem:[%s992_s4 + $0x2] ss:$0 sm:$0xff] }
 0x217   :  { %v139_v31 = vmul.f32 %v138_v30, %v135_v28 }
 0x219   :  { %v140_v32 = vadd.f32 %v139_v31, %v135_v28  ;;  %v644_v31 = vld [vmem:[%s993_s5 + $0x2] ss:$0 sm:$0xff] }
 0x21b   :  { %v141_v33 = vmul.f32 0.7978846, %v140_v32 }
 0x21d   :  { %762 = vtanh.f32 %v141_v33 }
 0x227   :  { %v763_v34 = vpop.eup %762 }
 0x228   :  { %v143_v36 = vadd.f32 1.0, %v763_v34 }
 0x22a   :  { %v144_v37 = vmul.f32 %v143_v36, %v136_v35 }
 0x22c   :  { %697 = vmatmul.mubr.msk.f32.vlgmr.msra.gmra.mrb[0].mxu1 %vm154_vm4, %v144_v37 }
 0x22d   :  { %718 = vmatprep.mubr.msk.f32.mxu1 %vm805_vm2, %v804_v1 }
 0x2ff   :  { %v224_v39 = vpop.f32.mrb[0].mxu1 }
 0x300   :  { %v225_v40 = vadd.f32 %v633_v38, %v224_v39  ;;  %v698_v41 = vpop.f32.mrb[1].mxu1 }
 0x302   :  { %v228_v42 = vsel %vm109_vm3, %v225_v40, 0.0 }
 0x303   :  { %229 = vadd.xlane.f32.xlu1 %v228_v42 }
 0x390   :  { %v230_v43 = vpop.xlane.xlu1 %229 }
 0x391   :  { %v231_v44 = vmul.f32 0.03125, %v230_v43  ;;  %v649_v43 = vld [vmem:[%s991_s3 + $0x3] ss:$0 sm:$0xff] }
 0x393   :  { %v232_v45 = vsub.f32 %v225_v40, %v231_v44 }
 0x395   :  { %v233_v46 = vmul.f32 %v232_v45, %v232_v45 }
 0x397   :  { %v234_v47 = vsel %vm109_vm3, %v233_v46, 0.0 }
 0x398   :  { %235 = vadd.xlane.f32.xlu1 %v234_v47 }
 0x425   :  { %v236_v54 = vpop.xlane.xlu1 %235 }
 0x426   :  { %v237_v55 = vmul.f32 0.03125, %v236_v54  ;;  %v654_v54 = vld [vmem:[%s990_s2 + $0x68] sm:$0xff] }
 0x428   :  { %v238_v56 = vadd.f32 1e-05, %v237_v55  ;;  %v655_v55 = vld [vmem:[%s990_s2 + $0x70] sm:$0xff] }
 0x42a   :  { %764 = vrsqrt.f32 %v238_v56  ;;  %v751_v56 = vpack.c.bf16 %v654_v54, %v653_v53 }
 0x434   :  { %v765_v57 = vpop.eup %764 }
 0x435   :  { %v240_v59 = vmul.f32 %v765_v57, %v232_v45  ;;  %v656_v57 = vld [vmem:[%s990_s2 + $0x78] sm:$0xff] }
 0x437   :  { %v246_v61 = vmul.f32 %v635_v58, %v240_v59  ;;  %v754_v58 = vpack.c.bf16 %v656_v57, %v655_v55 }
 0x439   :  { %v252_v62 = vadd.f32 %v636_v60, %v246_v61 }
 0x43b   :  { %v254_v63 = vmul.f32 0.044715, %v252_v62  ;;  %v253_v6 = vmul.f32 0.5, %v252_v62 }
 0x43d   :  { %v255_v0 = vmul.f32 %v254_v63, %v252_v62  ;;  %v651_v63 = vld [vmem:[%s992_s4 + $0x3] ss:$0 sm:$0xff] }
 0x43f   :  { %v256_v2 = vmul.f32 %v255_v0, %v252_v62 }
 0x441   :  { %v257_v3 = vadd.f32 %v256_v2, %v252_v62  ;;  %v652_v2 = vld [vmem:[%s993_s5 + $0x3] ss:$0 sm:$0xff] }
 0x443   :  { %v258_v4 = vmul.f32 0.7978846, %v257_v3 }
 0x445   :  { %766 = vtanh.f32 %v258_v4 }
 0x44f   :  { %v767_v5 = vpop.eup %766 }
 0x450   :  { %v260_v7 = vadd.f32 1.0, %v767_v5 }
 0x452   :  { %v261_v8 = vmul.f32 %v260_v7, %v253_v6 }
 0x454   :  { %708 = vmatmul.mubr.msk.f32.vlgmr.msra.gmra.mrb[2].mxu0 %vm154_vm4, %v261_v8 }
 0x455   :  { %729 = vmatprep.mubr.msk.f32.mxu0 %vm805_vm2, %v804_v1  ;;  %v645_v1 = vld [vmem:[%s990_s2 + $0x40] sm:$0xff]  ;;  %752 = vmatpush3.bf16.msra.mxu0 %v751_v56 }
 0x456   :  { %v745_v22 = vpack.c.bf16 %v646_v20, %v645_v1  ;;  %753 = vmatprep.subr.bf16.mxu0 %v806_v16 }
 0x458   :  { %746 = vmatpush3.bf16.msra.mxu1 %v745_v22 }
 0x459   :  { %747 = vmatprep.subr.bf16.mxu1 %v806_v16  ;;  %755 = vmatpush3.bf16.msra.mxu0 %v754_v58 }
 0x45c   :  { %749 = vmatpush3.bf16.msra.mxu1 %v748_v24 }
 0x527   :  { %v341_v10 = vpop.f32.mrb[2].mxu0 }
 0x528   :  { %v342_v11 = vadd.f32 %v641_v9, %v341_v10  ;;  %v709_v12 = vpop.f32.mrb[3].mxu0 }
 0x52a   :  { %v345_v13 = vsel %vm109_vm3, %v342_v11, 0.0 }
 0x52b   :  { %346 = vadd.xlane.f32.xlu0 %v345_v13  ;;  %v657_v13 = vld [vmem:[%s991_s3 + $0x4] ss:$0 sm:$0xff] }
 0x5b8   :  { %v347_v14 = vpop.xlane.xlu0 %346 }
 0x5b9   :  { %v348_v15 = vmul.f32 0.03125, %v347_v14 }
 0x5bb   :  { %v349_v17 = vsub.f32 %v342_v11, %v348_v15 }
 0x5bd   :  { %v350_v18 = vmul.f32 %v349_v17, %v349_v17 }
 0x5bf   :  { %v351_v19 = vsel %vm109_vm3, %v350_v18, 0.0 }
 0x5c0   :  { %352 = vadd.xlane.f32.xlu1 %v351_v19 }
 0x64d   :  { %v353_v25 = vpop.xlane.xlu1 %352 }
 0x64e   :  { %v354_v26 = vmul.f32 0.03125, %v353_v25 }
 0x650   :  { %v355_v27 = vadd.f32 1e-05, %v354_v26 }
 0x652   :  { %768 = vrsqrt.f32 %v355_v27  ;;  %v659_v27 = vld [vmem:[%s992_s4 + $0x4] ss:$0 sm:$0xff]  ;;  %s780_s4 = scalar_lea.vmem %s621_s8, 32 }
 0x653   :  { %p781_p0 = scmp.ne.s32.totalorder %s621_s8, %s780_s4  ;;  %p786_p2 = scmp.lt.s32.totalorder %s780_s4, %s780_s4 }
 0x655   :  { %p787_p3 = por %p786_p2, %p785_p1 }
 0x657   :  { %p788_p4 = pnand %p787_p3, %p781_p0 }
 0x65c   :  { %v769_v28 = vpop.eup %768 }
 0x65d   :  { %v357_v30 = vmul.f32 %v769_v28, %v349_v17 }
 0x65f   :  { %v363_v32 = vmul.f32 %v643_v29, %v357_v30  ;;  %v660_v29 = vld [vmem:[%s993_s5 + $0x4] ss:$0 sm:$0xff] }
 0x661   :  { %v369_v33 = vadd.f32 %v644_v31, %v363_v32 }
 0x663   :  { %v371_v34 = vmul.f32 0.044715, %v369_v33  ;;  %v370_v40 = vmul.f32 0.5, %v369_v33 }
 0x665   :  { %v372_v35 = vmul.f32 %v371_v34, %v369_v33 }
 0x667   :  { %v373_v36 = vmul.f32 %v372_v35, %v369_v33 }
 0x669   :  { %v374_v37 = vadd.f32 %v373_v36, %v369_v33 }
 0x66b   :  { %v375_v38 = vmul.f32 0.7978846, %v374_v37 }
 0x66d   :  { %770 = vtanh.f32 %v375_v38 }
 0x677   :  { %v771_v39 = vpop.eup %770 }
 0x678   :  { %v377_v41 = vadd.f32 1.0, %v771_v39 }
 0x67a   :  { %v378_v42 = vmul.f32 %v377_v41, %v370_v40 }
 0x67c   :  { %719 = vmatmul.mubr.msk.f32.vlgmr.msra.gmra.mrb[2].mxu1 %vm154_vm4, %v378_v42 }
 0x74f   :  { %v458_v44 = vpop.f32.mrb[2].mxu1 }
 0x750   :  { %v459_v45 = vadd.f32 %v649_v43, %v458_v44  ;;  %v720_v46 = vpop.f32.mrb[3].mxu1 }
 0x752   :  { %v462_v47 = vsel %vm109_vm3, %v459_v45, 0.0 }
 0x753   :  { %463 = vadd.xlane.f32.xlu0 %v462_v47 }
 0x7e0   :  { %v464_v48 = vpop.xlane.xlu0 %463 }
 0x7e1   :  { %v465_v49 = vmul.f32 0.03125, %v464_v48 }
 0x7e3   :  { %v466_v50 = vsub.f32 %v459_v45, %v465_v49 }
 0x7e5   :  { %v467_v51 = vmul.f32 %v466_v50, %v466_v50 }
 0x7e7   :  { %v468_v52 = vsel %vm109_vm3, %v467_v51, 0.0 }
 0x7e8   :  { %469 = vadd.xlane.f32.xlu1 %v468_v52 }
 0x875   :  { %v470_v59 = vpop.xlane.xlu1 %469 }
 0x876   :  { %v471_v60 = vmul.f32 0.03125, %v470_v59 }
 0x878   :  { %v472_v61 = vadd.f32 1e-05, %v471_v60 }
 0x87a   :  { %772 = vrsqrt.f32 %v472_v61 }
 0x884   :  { %v773_v62 = vpop.eup %772 }
 0x885   :  { %v474_v0 = vmul.f32 %v773_v62, %v466_v50 }
 0x887   :  { %v480_v3 = vmul.f32 %v651_v63, %v474_v0 }
 0x889   :  { %v486_v4 = vadd.f32 %v652_v2, %v480_v3 }
 0x88b   :  { %v488_v5 = vmul.f32 0.044715, %v486_v4  ;;  %v487_v10 = vmul.f32 0.5, %v486_v4 }
 0x88d   :  { %v489_v6 = vmul.f32 %v488_v5, %v486_v4 }
 0x88f   :  { %v490_v16 = vmul.f32 %v489_v6, %v486_v4 }
 0x891   :  { %v491_v7 = vadd.f32 %v490_v16, %v486_v4 }
 0x893   :  { %v492_v8 = vmul.f32 0.7978846, %v491_v7 }
 0x895   :  { %774 = vtanh.f32 %v492_v8 }
 0x89f   :  { %v775_v9 = vpop.eup %774 }
 0x8a0   :  { %v494_v11 = vadd.f32 1.0, %v775_v9 }
 0x8a2   :  { %v495_v12 = vmul.f32 %v494_v11, %v487_v10 }
 0x8a4   :  { %730 = vmatmul.mubr.msk.f32.vlgmr.msra.gmra.mrb[4].mxu0 %vm154_vm4, %v495_v12 }
 0x977   :  { %v575_v14 = vpop.f32.mrb[4].mxu0 }
 0x978   :  { %v576_v15 = vadd.f32 %v657_v13, %v575_v14  ;;  %v731_v17 = vpop.f32.mrb[5].mxu0 }
 0x97a   :  { %v579_v18 = vsel %vm109_vm3, %v576_v15, 0.0 }
 0x97b   :  { %580 = vadd.xlane.f32.xlu0 %v579_v18 }
 0xa08   :  { %v581_v19 = vpop.xlane.xlu0 %580 }
 0xa09   :  { %v582_v1 = vmul.f32 0.03125, %v581_v19 }
 0xa0b   :  { %v583_v20 = vsub.f32 %v576_v15, %v582_v1 }
 0xa0d   :  { %v584_v21 = vmul.f32 %v583_v20, %v583_v20 }
 0xa0f   :  { %v585_v22 = vsel %vm109_vm3, %v584_v21, 0.0 }
 0xa10   :  { %586 = vadd.xlane.f32.xlu1 %v585_v22 }
 0xa9d   :  { %v587_v23 = vpop.xlane.xlu1 %586 }
 0xa9e   :  { %v588_v24 = vmul.f32 0.03125, %v587_v23 }
 0xaa0   :  { %v589_v25 = vadd.f32 1e-05, %v588_v24 }
 0xaa2   :  { %776 = vrsqrt.f32 %v589_v25 }
 0xaac   :  { %v777_v26 = vpop.eup %776 }
 0xaad   :  { %v591_v28 = vmul.f32 %v777_v26, %v583_v20 }
 0xaaf   :  { %v597_v30 = vmul.f32 %v659_v27, %v591_v28 }
 0xab1   :  { %v603_v31 = vadd.f32 %v660_v29, %v597_v30 }
 0xab3   :  { %v605_v32 = vmul.f32 0.044715, %v603_v31  ;;  %v604_v38 = vmul.f32 0.5, %v603_v31 }
 0xab5   :  { %v606_v33 = vmul.f32 %v605_v32, %v603_v31 }
 0xab7   :  { %v607_v34 = vmul.f32 %v606_v33, %v603_v31 }
 0xab9   :  { %v608_v35 = vadd.f32 %v607_v34, %v603_v31 }
 0xabb   :  { %v609_v36 = vmul.f32 0.7978846, %v608_v35 }
 0xabd   :  { %778 = vtanh.f32 %v609_v36 }
 0xac7   :  { %v779_v37 = vpop.eup %778 }
 0xac8   :  { %v611_v39 = vadd.f32 1.0, %v779_v37 }
 0xaca   :  { %v612_v40 = vmul.f32 %v611_v39, %v604_v38 }
 0xacc   :  { %613 = vst.msk [vmem:[#allocation2] sm:$0x3] %vm109_vm3, %v612_v40 }
 0xacd   :  { %791 = shalt.err (!%p788_p4)
}
 0xace   :  { %s792_s10 = scalar_lea.hbm %s994_s6, 32 }
 0xacf   :  { %p793_p5 = scmp.ne.s32.totalorder %s994_s6, %s792_s10  ;;  %p796_p6 = scmp.lt.u32.totalorder %s792_s10, %s994_s6 }
 0xad1   :  { %p798_p7 = pnand %p796_p6, %p793_p5 }
 0xad3   :  { %801 = shalt.err (!%p798_p7)
}
 0xad4   :  { %623 = dma.vmem_to_hbm [thread:$0]  %s621_s8, 32, %s994_s6, [#allocation3]  }
 0xad5   :  { %802 = dma.done.wait [#allocation3], 32  }
 0xad6   :  { %803 = vsyncadd [#allocation3], 4294967264 }
 0xad7   :  { %627 = vsyncpa [#allocation3], 1 }

// kernel: forward.3
= control target key start
LH: loop header
LB: loop body
LE: loop exit
PB: predicated region body
PF: predicated region fallthrough
CT: control target
= control target key end

     0   :  { %s17039_s0 = inlined_call_operand.vmem [shape: f32[2,39,16], index: 0, kind: input, shape index: {}]   ;;  %s17040_s1 = inlined_call_operand.vmem [shape: f32[3,16,256], index: 1, kind: input, shape index: {}]   ;;  %s17041_s2 = inlined_call_operand.vmem [shape: f32[1,256], index: 2, kind: input, shape index: {}]   ;;  %s17042_s3 = inlined_call_operand.vmem [shape: f32[39,256], index: 3, kind: input, shape index: {}]   ;;  %s17043_s4 = inlined_call_operand.vmem [shape: f32[39,256], index: 4, kind: input, shape index: {}]   ;;  %s17044_s5 = inlined_call_operand.vmem [shape: f32[19,39], index: 5, kind: input, shape index: {}]   ;;  %s17045_s6 = inlined_call_operand.vmem [shape: f32[256,128], index: 6, kind: input, shape index: {}]   ;;  %s17046_s7 = inlined_call_operand.vmem [shape: f32[2432,32], index: 7, kind: input, shape index: {}]   ;;  %s17047_s8 = inlined_call_operand.vmem [shape: f32[1,32], index: 8, kind: input, shape index: {}]   ;;  %s17048_s9 = inlined_call_operand.vmem [shape: f32[1,32], index: 9, kind: input, shape index: {}]   ;;  %s17049_s10 = inlined_call_operand.vmem [shape: f32[1,32], index: 10, kind: input, shape index: {}]   ;;  %s17050_s11 = inlined_call_operand.vmem [shape: f32[32,2432], index: 11, kind: input, shape index: {}]   ;;  %s17051_s12 = inlined_call_operand.vmem [shape: f32[1,2432], index: 12, kind: input, shape index: {}]   ;;  %s17052_s13 = inlined_call_operand.vmem [shape: f32[1,2432], index: 13, kind: input, shape index: {}]   ;;  %s17053_s14 = inlined_call_operand.vmem [shape: f32[1,2432], index: 14, kind: input, shape index: {}]   ;;  %s17054_s15 = inlined_call_operand.vmem [shape: f32[3,39,19], index: 15, kind: input, shape index: {}]   ;;  %s17055_s16 = inlined_call_operand.vmem [shape: f32[3,128,16], index: 16, kind: input, shape index: {}]   ;;  %s17056_s17 = inlined_call_operand.<no memory space> [shape: f32[1,1], index: 17, kind: input, shape index: {}]   ;;  %s17057_s18 = inlined_call_operand.hbm [shape: f32[2,32], index: 18, kind: output, shape index: {0}]   ;;  %s17058_s19 = inlined_call_operand.vmem [shape: f32[2,39,16], index: 19, kind: output, shape index: {1}]  }
   0x1   :  { %17108 = sst [smem:[#allocation25_spill]] %s17039_s0  ;;  %v25_v0 = vstv %s17056_s17 }
   0x2   :  { %17109 = sst [smem:[#allocation26_spill]] %s17040_s1  ;;  %26 = vst [vmem:[#allocation5] sm:$0x1] %v25_v0 }
   0x3   :  { %17110 = sst [smem:[#allocation27_spill]] %s17041_s2 }
   0x4   :  { %17111 = sst [smem:[#allocation28_spill]] %s17042_s3 }
   0x5   :  { %s17112_s1 = sld [smem:[#allocation26_spill]]  ;;  %vm72_vm0 = vcmask 130048   ;;  %vm64_vm1 = vcmask 122880   ;;  %v17065_v6 = vmov 0.0   ;;  %s17113_s27 = sld [smem:[#allocation25_spill]]  ;;  %vm77_vm2 = vcmask 129024  }
   0x6   :  { %177 = vmatprep.mubr.f32.mxu0 %v17065_v6  ;;  %65 = vst.msk [vmem:[#allocation2] sm:$0x1] %vm64_vm1, %v17065_v6  ;;  %66 = vst.msk [vmem:[#allocation2 + $0x28] sm:$0x1] %vm64_vm1, %v17065_v6  ;;  %189 = vmatprep.mubr.f32.mxu1 %v17065_v6 }
   0xb   :  { %v8749_v1 = vld [vmem:[%s17112_s1 + $0x28] sm:$0xff]  ;;  %v8751_v2 = vld [vmem:[%s17112_s1 + $0x38] sm:$0xff]  ;;  %v8748_v3 = vld [vmem:[%s17112_s1 + $0x20] sm:$0xff] }
   0xc   :  { %v10386_v4 = vpack.c.bf16 %v8751_v2, %v8749_v1  ;;  %v8750_v5 = vld [vmem:[%s17112_s1 + $0x30] sm:$0xff]  ;;  %v67_v7 = vld [vmem:[%s17113_s27] sm:$0xff]  ;;  %v68_v8 = vld [vmem:[%s17113_s27 + $0x8] sm:$0xff] }
   0xd   :  { %v10388_v9 = vpack.c.bf16 %v8750_v5, %v8748_v3  ;;  %73 = vst.msk [vmem:[#allocation2 + $0x1] sm:$0xff] %vm72_vm0, %v67_v7  ;;  %74 = vst.msk [vmem:[#allocation2 + $0x9] sm:$0xff] %vm72_vm0, %v68_v8  ;;  %v85_v10 = vld [vmem:[%s17112_s1 + $0x8] sm:$0xff]  ;;  %v87_v11 = vld [vmem:[%s17112_s1 + $0x18] sm:$0xff] }
   0xe   :  { %10387 = vmatprep.subr.bf16.mxu0 %v10386_v4  ;;  %v10390_v12 = vpack.c.bf16 %v87_v11, %v85_v10  ;;  %v69_v13 = vld [vmem:[%s17113_s27 + $0x10] sm:$0xff]  ;;  %11432 = vmatprep.subr.bf16.mxu1 %v10386_v4  ;;  %v84_v14 = vld [vmem:[%s17112_s1] sm:$0xff]  ;;  %v8763_v16 = vld [vmem:[%s17112_s1 + $0x48] sm:$0xff] }
   0xf   :  { %10389 = vmatpush1.bf16.msra.mxu0 %v10388_v9  ;;  %v86_v15 = vld [vmem:[%s17112_s1 + $0x10] sm:$0xff]  ;;  %75 = vst.msk [vmem:[#allocation2 + $0x11] sm:$0xff] %vm72_vm0, %v69_v13  ;;  %11433 = vmatpush1.bf16.msra.mxu1 %v10388_v9  ;;  %v8765_v17 = vld [vmem:[%s17112_s1 + $0x58] sm:$0xff]  ;;  %v71_v19 = vld [vmem:[%s17113_s27 + $0x20] sm:$0x7f] }
  0x10   :  { %10391 = vmatprep.subr.bf16.mxu0 %v10390_v12  ;;  %v70_v18 = vld [vmem:[%s17113_s27 + $0x18] sm:$0xff]  ;;  %78 = vst.msk [vmem:[#allocation2 + $0x21] sm:$0x7f] %vm77_vm2, %v71_v19  ;;  %v10392_v20 = vpack.c.bf16 %v86_v15, %v84_v14 }
  0x11   :  { %76 = vst.msk [vmem:[#allocation2 + $0x19] sm:$0xff] %vm72_vm0, %v70_v18 }
  0x12   :  { %27 = vsyncpa [#allocation7], 0  ;;  %v10394_v21 = vpack.c.bf16 %v8765_v17, %v8763_v16  ;;  %v8847_v22 = vld [vmem:[%s17113_s27 + $0x28] sm:$0xff]  ;;  %v8848_v23 = vld [vmem:[%s17113_s27 + $0x30] sm:$0xff]  ;;  %v17067_v51 = vlaneseq  ;;  %s17115_s2 = sld [smem:[#allocation27_spill]]  ;;  %vm482_vm3 = vcmask 1046528  }
  0x13   :  { %v8849_v26 = vld [vmem:[%s17113_s27 + $0x38] sm:$0xff]  ;;  %v8762_v33 = vld [vmem:[%s17112_s1 + $0x40] sm:$0xff]  ;;  %v8764_v34 = vld [vmem:[%s17112_s1 + $0x50] sm:$0xff]  ;;  %s17117_s25 = sld [smem:[#allocation28_spill]]  ;;  %vm706_vm4 = vcmask 318464   ;;  %vm11640_vm6 = vmmov 0  }
  0x14   :  { %v88_v24 = vld [vmem:[#allocation2 + $0x1] sm:$0xff]  ;;  %v89_v25 = vld [vmem:[#allocation2 + $0x9] sm:$0xff]  ;;  %v10396_v42 = vpack.c.bf16 %v8764_v34, %v8762_v33  ;;  %v11857_v52 = vshrl.u32 %v17067_v51, 7  ;;  %vm12366_vm5 = vcmp.lt.s32.totalorder %v17067_v51, 128  ;;  %vm2068_vm7 = vcmask 253952  }
  0x15   :  { %8752 = vmatmul.mubr.msk.f32.vlgmr.msra.gmra.mrb[0].mxu0 %vm72_vm0, %v88_v24  ;;  %v79_v27 = vld [vmem:[#allocation2] sm:$0xff]  ;;  %v80_v28 = vld [vmem:[#allocation2 + $0x8] sm:$0xff]  ;;  %vm2274_vm8 = vcmask 261120   ;;  %vm2987_vm9 = vcmask 1040384   ;;  %vm3749_vm11 = vcmask 1042432   ;;  %vm3733_vm12 = vcmask 154624  }
  0x16   :  { %v318_v29 = vld [vmem:[#allocation2 + $0x2] sm:$0xff]  ;;  %183 = vmatprep.mubr.f32.mxu0 %v17065_v6  ;;  %10393 = vmatpush1.bf16.msra.mxu0 %v10392_v20  ;;  %v81_v30 = vld [vmem:[#allocation2 + $0x10] sm:$0xff]  ;;  %v11860_v53 = vsub.s32 0, %v11857_v52  ;;  %v11866_v55 = vsub.s32 1, %v11857_v52 }
  0x17   :  { %4416 = vst.msk [vmem:[#allocation2 + $0x1] sm:$0xff] %vm72_vm0, %v8847_v22  ;;  %v319_v31 = vld [vmem:[#allocation2 + $0xa] sm:$0xff]  ;;  %10395 = vmatprep.subr.bf16.mxu0 %v10394_v21  ;;  %v8850_v35 = vld [vmem:[%s17113_s27 + $0x40] sm:$0xff] }
  0x18   :  { %v90_v32 = vld [vmem:[#allocation2 + $0x11] sm:$0xff]  ;;  %4417 = vst.msk [vmem:[#allocation2 + $0x9] sm:$0xff] %vm72_vm0, %v8848_v23  ;;  %v8851_v38 = vld [vmem:[%s17113_s27 + $0x48] sm:$0x7f]  ;;  %v83_v39 = vld [vmem:[#allocation2 + $0x20] sm:$0x7f] }
  0x19   :  { %8754 = vmatmul.mubr.msk.f32.vlgmr.msra.gmra.mrb[0].mxu1 %vm72_vm0, %v90_v32  ;;  %v82_v36 = vld [vmem:[#allocation2 + $0x18] sm:$0xff]  ;;  %8753 = vmatmul.mubr.msk.f32.gmra.mrb[2].mxu0 %vm72_vm0, %v89_v25  ;;  %v92_v43 = vld [vmem:[#allocation2 + $0x21] sm:$0x7f]  ;;  %17114 = vst [vmem:[#allocation9_spill] sm:$0xff] %v11860_v53  ;;  %17116 = vst [vmem:[#allocation10_spill] sm:$0xff] %v11866_v55 }
  0x1a   :  { %v320_v37 = vld [vmem:[#allocation2 + $0x12] sm:$0xff]  ;;  %195 = vmatprep.mubr.f32.mxu1 %v17065_v6  ;;  %v321_v41 = vld [vmem:[#allocation2 + $0x1a] sm:$0xff]  ;;  %287 = vmatprep.mubr.f32.mxu0 %v17065_v6  ;;  %v322_v44 = vld [vmem:[#allocation2 + $0x22] sm:$0x7f] }
  0x1b   :  { %4418 = vst.msk [vmem:[#allocation2 + $0x11] sm:$0xff] %vm72_vm0, %v8849_v26  ;;  %v91_v40 = vld [vmem:[#allocation2 + $0x19] sm:$0xff] }
  0x1c   :  { %4419 = vst.msk [vmem:[#allocation2 + $0x19] sm:$0xff] %vm72_vm0, %v8850_v35  ;;  %v448_v54 = vld [vmem:[%s17115_s2] sm:$0x3] }
  0x1d   :  { %8755 = vmatmul.mubr.msk.f32.gmra.mrb[2].mxu1 %vm72_vm0, %v91_v40  ;;  %4420 = vst.msk [vmem:[#allocation2 + $0x21] sm:$0x7f] %vm77_vm2, %v8851_v38  ;;  %8757 = vmatmul.mubr.msk.f32.vlgmr.msra.gmra.mrb[0].mxu0 %vm72_vm0, %v79_v27  ;;  %v453_v56 = vrot.slane %v448_v54, %v11860_v53  ;;  %v457_v57 = vrot.slane %v448_v54, %v11866_v55 }
  0x1e   :  { %201 = vmatprep.mubr.f32.mxu1 %v17065_v6  ;;  %293 = vmatprep.mubr.f32.mxu0 %v17065_v6 }
  0x1f   :  { %10397 = vmatpush1.bf16.msra.mxu0 %v10396_v42 }
  0x21   :  { %8756 = vmatmul.mubr.msk.f32.gmra.mrb[4].mxu1 %vm72_vm0, %v92_v43  ;;  %8758 = vmatmul.mubr.msk.f32.gmra.mrb[2].mxu0 %vm72_vm0, %v80_v28 }
  0x22   :  { %786 = vmatprep.mubr.f32.mxu1 %v17065_v6  ;;  %299 = vmatprep.mubr.f32.mxu0 %v17065_v6 }
  0x25   :  { %8759 = vmatmul.mubr.msk.f32.gmra.mrb[4].mxu0 %vm72_vm0, %v81_v30 }
  0x26   :  { %305 = vmatprep.mubr.f32.mxu0 %v17065_v6 }
  0x29   :  { %8760 = vmatmul.mubr.msk.f32.gmra.mrb[6].mxu0 %vm72_vm0, %v82_v36 }
  0x2a   :  { %311 = vmatprep.mubr.f32.mxu0 %v17065_v6 }
  0x2d   :  { %8761 = vmatmul.mubr.msk.f32.gmra.mrb[8].mxu0 %vm72_vm0, %v83_v39 }
  0x2e   :  { %407 = vmatprep.mubr.f32.mxu0 %v17065_v6 }
  0x31   :  { %8766 = vmatmul.mubr.msk.f32.vlgmr.msra.gmra.mrb[0].mxu0 %vm72_vm0, %v318_v29 }
  0x32   :  { %413 = vmatprep.mubr.f32.mxu0 %v17065_v6 }
  0x35   :  { %8767 = vmatmul.mubr.msk.f32.gmra.mrb[2].mxu0 %vm72_vm0, %v319_v31 }
  0x36   :  { %419 = vmatprep.mubr.f32.mxu0 %v17065_v6 }
  0x39   :  { %8768 = vmatmul.mubr.msk.f32.gmra.mrb[4].mxu0 %vm72_vm0, %v320_v37 }
  0x3a   :  { %425 = vmatprep.mubr.f32.mxu0 %v17065_v6 }
  0x3d   :  { %8769 = vmatmul.mubr.msk.f32.gmra.mrb[6].mxu0 %vm72_vm0, %v321_v41 }
  0x3e   :  { %431 = vmatprep.mubr.f32.mxu0 %v17065_v6 }
  0x41   :  { %8770 = vmatmul.mubr.msk.f32.gmra.mrb[8].mxu0 %vm72_vm0, %v322_v44 }
  0xec   :  { %v191_v45 = vpop.f32.mrb[0].mxu1 }
  0xed   :  { %v193_v46 = vpop.f32.mrb[1].mxu1 }
  0xf0   :  { %v197_v47 = vpop.f32.mrb[2].mxu1 }
  0xf1   :  { %v199_v48 = vpop.f32.mrb[3].mxu1 }
  0xf4   :  { %v203_v49 = vpop.f32.mrb[4].mxu1 }
  0xf5   :  { %v205_v50 = vpop.f32.mrb[5].mxu1 }
 0x104   :  { %v409_v58 = vpop.f32.mrb[0].mxu0 }
 0x105   :  { %v460_v59 = vadd.f32 %v453_v56, %v409_v58  ;;  %v411_v60 = vpop.f32.mrb[1].mxu0 }
 0x106   :  { %v461_v61 = vadd.f32 %v457_v57, %v411_v60 }
 0x108   :  { %v415_v62 = vpop.f32.mrb[2].mxu0  ;;  %v470_v63 = vadd.f32 %v461_v61, %v460_v59 }
 0x109   :  { %v462_v0 = vadd.f32 %v453_v56, %v415_v62  ;;  %v417_v1 = vpop.f32.mrb[3].mxu0 }
 0x10a   :  { %v463_v2 = vadd.f32 %v457_v57, %v417_v1  ;;  %471 = vadd.xlane.f32.xlu0 %v470_v63 }
 0x10c   :  { %v421_v3 = vpop.f32.mrb[4].mxu0  ;;  %v473_v4 = vadd.f32 %v463_v2, %v462_v0 }
 0x10d   :  { %v11434_v5 = vadd.f32 %v421_v3, %v191_v45  ;;  %v423_v7 = vpop.f32.mrb[5].mxu0 }
 0x10e   :  { %v11435_v8 = vadd.f32 %v423_v7, %v193_v46  ;;  %474 = vadd.xlane.f32.xlu0 %v473_v4 }
 0x10f   :  { %v464_v9 = vadd.f32 %v11434_v5, %v453_v56 }
 0x110   :  { %v427_v10 = vpop.f32.mrb[6].mxu0  ;;  %v465_v11 = vadd.f32 %v11435_v8, %v457_v57 }
 0x111   :  { %v11436_v12 = vadd.f32 %v427_v10, %v197_v47  ;;  %v429_v13 = vpop.f32.mrb[7].mxu0 }
 0x112   :  { %v11437_v14 = vadd.f32 %v429_v13, %v199_v48  ;;  %v476_v15 = vadd.f32 %v465_v11, %v464_v9 }
 0x113   :  { %v466_v16 = vadd.f32 %v11436_v12, %v453_v56 }
 0x114   :  { %v467_v17 = vadd.f32 %v11437_v14, %v457_v57  ;;  %477 = vadd.xlane.f32.xlu1 %v476_v15  ;;  %v433_v18 = vpop.f32.mrb[8].mxu0 }
 0x115   :  { %v11438_v19 = vadd.f32 %v433_v18, %v203_v49  ;;  %v435_v20 = vpop.f32.mrb[9].mxu0 }
 0x116   :  { %v11439_v21 = vadd.f32 %v435_v20, %v205_v50  ;;  %v479_v22 = vadd.f32 %v467_v17, %v466_v16 }
 0x117   :  { %v468_v23 = vadd.f32 %v11438_v19, %v453_v56 }
 0x118   :  { %v469_v24 = vadd.f32 %v11439_v21, %v457_v57  ;;  %480 = vadd.xlane.f32.xlu1 %v479_v22 }
 0x119   :  { %v483_v25 = vsel %vm482_vm3, %v468_v23, 0.0 }
 0x11a   :  { %v484_v26 = vsel %vm482_vm3, %v469_v24, 0.0 }
 0x11b   :  { %v485_v27 = vadd.f32 %v484_v26, %v483_v25 }
 0x11d   :  { %486 = vadd.xlane.f32.xlu0 %v485_v27 }
 0x197   :  { %v472_v28 = vpop.xlane.xlu0 %471 }
 0x198   :  { %v489_v33 = vmul.f32 0.00390625, %v472_v28 }
 0x19b   :  { %v475_v29 = vpop.xlane.xlu0 %474 }
 0x19c   :  { %v490_v31 = vmul.f32 0.00390625, %v475_v29 }
 0x19e   :  { %v494_v35 = vadd.f32 %v490_v31, %v489_v33 }
 0x1a1   :  { %v478_v30 = vpop.xlane.xlu1 %477 }
 0x1a2   :  { %v491_v34 = vmul.f32 0.00390625, %v478_v30 }
 0x1a4   :  { %v495_v37 = vadd.f32 %v494_v35, %v491_v34 }
 0x1a5   :  { %v481_v32 = vpop.xlane.xlu1 %480 }
 0x1a6   :  { %v492_v36 = vmul.f32 0.00390625, %v481_v32 }
 0x1a8   :  { %v496_v40 = vadd.f32 %v495_v37, %v492_v36 }
 0x1aa   :  { %v487_v38 = vpop.xlane.xlu0 %486 }
 0x1ab   :  { %v493_v39 = vmul.f32 0.00390625, %v487_v38 }
 0x1ad   :  { %v497_v41 = vsel %vm482_vm3, %v493_v39, 0.0 }
 0x1ae   :  { %v498_v42 = vadd.f32 %v497_v41, %v496_v40  ;;  %v574_v41 = vld [vmem:[%s17117_s25 + $0x8] sm:$0xff] }
 0x1b0   :  { %v499_v43 = vrot.slane %v498_v42, 4 }
 0x1b2   :  { %v500_v44 = vadd.f32 %v499_v43, %v498_v42  ;;  %v576_v42 = vld [vmem:[%s17117_s25 + $0x18] sm:$0xff] }
 0x1b4   :  { %v501_v45 = vrot.slane %v500_v44, 2 }
 0x1b6   :  { %v502_v46 = vadd.f32 %v501_v45, %v500_v44  ;;  %v594_v44 = vld [vmem:[%s17043_s4 + $0x8] sm:$0xff]  ;;  %v573_v45 = vld [vmem:[%s17117_s25] sm:$0xff] }
 0x1b8   :  { %v503_v47 = vrot.slane %v502_v46, 1 }
 0x1ba   :  { %v504_v48 = vadd.f32 %v503_v47, %v502_v46  ;;  %v575_v46 = vld [vmem:[%s17117_s25 + $0x10] sm:$0xff]  ;;  %v578_v47 = vld [vmem:[%s17117_s25 + $0x28] sm:$0xff] }
 0x1bc   :  { %v506_v49 = vmul.f32 0.025641026, %v504_v48 }
 0x1be   :  { %v11873_v50 = vsub.f32 %v462_v0, %v506_v49  ;;  %v11875_v54 = vsub.f32 %v463_v2, %v506_v49  ;;  %v11877_v56 = vsub.f32 %v460_v59, %v506_v49  ;;  %v508_v57 = vsub.f32 %v461_v61, %v506_v49 }
 0x1bf   :  { %v11879_v58 = vsub.f32 %v466_v16, %v506_v49  ;;  %v11881_v60 = vsub.f32 %v467_v17, %v506_v49  ;;  %v11883_v62 = vsub.f32 %v464_v9, %v506_v49  ;;  %v11885_v63 = vsub.f32 %v465_v11, %v506_v49 }
 0x1c0   :  { %v519_v1 = vmul.f32 %v11873_v50, %v11873_v50  ;;  %v520_v0 = vmul.f32 %v11875_v54, %v11875_v54  ;;  %v517_v2 = vmul.f32 %v11877_v56, %v11877_v56  ;;  %v518_v59 = vmul.f32 %v508_v57, %v508_v57 }
 0x1c1   :  { %v523_v61 = vmul.f32 %v11879_v58, %v11879_v58  ;;  %v524_v3 = vmul.f32 %v11881_v60, %v11881_v60  ;;  %v521_v4 = vmul.f32 %v11883_v62, %v11883_v62  ;;  %v522_v5 = vmul.f32 %v11885_v63, %v11885_v63 }
 0x1c2   :  { %v530_v7 = vadd.f32 %v520_v0, %v519_v1  ;;  %v527_v8 = vadd.f32 %v518_v59, %v517_v2  ;;  %v11901_v9 = vsub.f32 %v468_v23, %v506_v49  ;;  %v11903_v10 = vsub.f32 %v469_v24, %v506_v49  ;;  %v580_v2 = vld [vmem:[%s17117_s25 + $0x38] sm:$0xff]  ;;  %v577_v59 = vld [vmem:[%s17117_s25 + $0x20] sm:$0xff] }
 0x1c3   :  { %v536_v13 = vadd.f32 %v524_v3, %v523_v61  ;;  %v533_v14 = vadd.f32 %v522_v5, %v521_v4 }
 0x1c4   :  { %531 = vadd.xlane.f32.xlu0 %v530_v7  ;;  %528 = vadd.xlane.f32.xlu1 %v527_v8  ;;  %v525_v11 = vmul.f32 %v11901_v9, %v11901_v9  ;;  %v526_v12 = vmul.f32 %v11903_v10, %v11903_v10 }
 0x1c6   :  { %v539_v15 = vsel %vm482_vm3, %v525_v11, 0.0  ;;  %v540_v16 = vsel %vm482_vm3, %v526_v12, 0.0 }
 0x1c7   :  { %v541_v17 = vadd.f32 %v540_v16, %v539_v15 }
 0x1c8   :  { %537 = vadd.xlane.f32.xlu0 %v536_v13  ;;  %534 = vadd.xlane.f32.xlu1 %v533_v14  ;;  %v598_v13 = vld [vmem:[%s17043_s4 + $0x28] sm:$0xff] }
 0x1cc   :  { %542 = vadd.xlane.f32.xlu1 %v541_v17 }
 0x251   :  { %v532_v18 = vpop.xlane.xlu0 %531  ;;  %v529_v19 = vpop.xlane.xlu1 %528 }
 0x252   :  { %v545_v20 = vmul.f32 0.00390625, %v532_v18  ;;  %v544_v21 = vmul.f32 0.00390625, %v529_v19 }
 0x254   :  { %v549_v24 = vadd.f32 %v545_v20, %v544_v21  ;;  %v597_v21 = vld [vmem:[%s17043_s4 + $0x20] sm:$0xff] }
 0x255   :  { %v538_v22 = vpop.xlane.xlu0 %537  ;;  %v535_v23 = vpop.xlane.xlu1 %534 }
 0x256   :  { %v546_v25 = vmul.f32 0.00390625, %v535_v23  ;;  %v547_v26 = vmul.f32 0.00390625, %v538_v22  ;;  %v599_v22 = vld [vmem:[%s17043_s4 + $0x30] sm:$0xff] }
 0x258   :  { %v550_v27 = vadd.f32 %v549_v24, %v546_v25 }
 0x259   :  { %v543_v28 = vpop.xlane.xlu1 %542 }
 0x25a   :  { %v551_v29 = vadd.f32 %v550_v27, %v547_v26  ;;  %v548_v30 = vmul.f32 0.00390625, %v543_v28 }
 0x25c   :  { %v552_v31 = vsel %vm482_vm3, %v548_v30, 0.0 }
 0x25d   :  { %v553_v32 = vadd.f32 %v552_v31, %v551_v29 }
 0x25f   :  { %v554_v33 = vrot.slane %v553_v32, 4 }
 0x261   :  { %v555_v34 = vadd.f32 %v554_v33, %v553_v32 }
 0x263   :  { %v556_v35 = vrot.slane %v555_v34, 2 }
 0x265   :  { %v557_v36 = vadd.f32 %v556_v35, %v555_v34 }
 0x267   :  { %v558_v37 = vrot.slane %v557_v36, 1 }
 0x269   :  { %v559_v38 = vadd.f32 %v558_v37, %v557_v36 }
 0x26b   :  { %v560_v39 = vmul.f32 0.025641026, %v559_v38 }
 0x26d   :  { %v561_v40 = vadd.f32 1e-05, %v560_v39 }
 0x26f   :  { %11482 = vrsqrt.f32 %v561_v40 }
 0x279   :  { %v11918_v43 = vpop.eup %11482 }
 0x27a   :  { %v564_v48 = vmul.f32 %v11918_v43, %v508_v57  ;;  %v566_v49 = vmul.f32 %v11918_v43, %v11875_v54  ;;  %v563_v1 = vmul.f32 %v11918_v43, %v11877_v56  ;;  %v565_v0 = vmul.f32 %v11918_v43, %v11873_v50  ;;  %v579_v57 = vld [vmem:[%s17117_s25 + $0x30] sm:$0xff]  ;;  %v596_v54 = vld [vmem:[%s17043_s4 + $0x18] sm:$0xff]  ;;  %v593_v50 = vld [vmem:[%s17043_s4] sm:$0xff] }
 0x27b   :  { %v595_v56 = vld [vmem:[%s17043_s4 + $0x10] sm:$0xff]  ;;  %v568_v61 = vmul.f32 %v11918_v43, %v11885_v63  ;;  %v570_v3 = vmul.f32 %v11918_v43, %v11881_v60  ;;  %v567_v4 = vmul.f32 %v11918_v43, %v11883_v62  ;;  %v569_v5 = vmul.f32 %v11918_v43, %v11879_v58  ;;  %v600_v63 = vld [vmem:[%s17043_s4 + $0x38] sm:$0xff] }
 0x27c   :  { %v584_v7 = vmul.f32 %v574_v41, %v564_v48  ;;  %v586_v8 = vmul.f32 %v576_v42, %v566_v49  ;;  %v583_v11 = vmul.f32 %v573_v45, %v563_v1  ;;  %v585_v12 = vmul.f32 %v575_v46, %v565_v0 }
 0x27d   :  { %v588_v14 = vmul.f32 %v578_v47, %v568_v61  ;;  %v590_v60 = vmul.f32 %v580_v2, %v570_v3  ;;  %v587_v15 = vmul.f32 %v577_v59, %v567_v4  ;;  %v589_v16 = vmul.f32 %v579_v57, %v569_v5  ;;  %v582_v61 = vld [vmem:[%s17117_s25 + $0x48] sm:$0x7f] }
 0x27e   :  { %v11971_v62 = vadd.f32 %v594_v44, %v584_v7  ;;  %v11973_v17 = vadd.f32 %v596_v54, %v586_v8  ;;  %v11975_v58 = vadd.f32 %v593_v50, %v583_v11  ;;  %v11977_v18 = vadd.f32 %v595_v56, %v585_v12  ;;  %v581_v7 = vld [vmem:[%s17117_s25 + $0x40] sm:$0x7f]  ;;  %v602_v12 = vld [vmem:[%s17043_s4 + $0x48] sm:$0x7f] }
 0x27f   :  { %v11979_v19 = vadd.f32 %v598_v13, %v588_v14  ;;  %v11981_v20 = vadd.f32 %v600_v63, %v590_v60  ;;  %v11995_v29 = vadd.f32 %v597_v21, %v587_v15  ;;  %v11997_v30 = vadd.f32 %v599_v22, %v589_v16  ;;  %v601_v60 = vld [vmem:[%s17043_s4 + $0x40] sm:$0x7f] }
 0x280   :  { %v624_v23 = vmul.f32 0.044715, %v11971_v62  ;;  %v626_v24 = vmul.f32 0.044715, %v11973_v17  ;;  %v623_v25 = vmul.f32 0.044715, %v11975_v58  ;;  %v572_v5 = vmul.f32 %v11918_v43, %v11903_v10 }
 0x281   :  { %v625_v26 = vmul.f32 0.044715, %v11977_v18  ;;  %v628_v33 = vmul.f32 0.044715, %v11979_v19  ;;  %v630_v34 = vmul.f32 0.044715, %v11981_v20  ;;  %v571_v13 = vmul.f32 %v11918_v43, %v11901_v9 }
 0x282   :  { %v634_v27 = vmul.f32 %v624_v23, %v11971_v62  ;;  %v636_v28 = vmul.f32 %v626_v24, %v11973_v17  ;;  %v633_v31 = vmul.f32 %v623_v25, %v11975_v58  ;;  %v627_v44 = vmul.f32 0.044715, %v11995_v29 }
 0x283   :  { %v635_v32 = vmul.f32 %v625_v26, %v11977_v18  ;;  %v638_v39 = vmul.f32 %v628_v33, %v11979_v19  ;;  %v640_v40 = vmul.f32 %v630_v34, %v11981_v20  ;;  %v629_v45 = vmul.f32 0.044715, %v11997_v30 }
 0x284   :  { %v644_v35 = vmul.f32 %v634_v27, %v11971_v62  ;;  %v646_v36 = vmul.f32 %v636_v28, %v11973_v17  ;;  %v643_v37 = vmul.f32 %v633_v31, %v11975_v58  ;;  %v637_v2 = vmul.f32 %v627_v44, %v11995_v29 }
 0x285   :  { %v645_v38 = vmul.f32 %v635_v32, %v11977_v18  ;;  %v648_v48 = vmul.f32 %v638_v39, %v11979_v19  ;;  %v650_v49 = vmul.f32 %v640_v40, %v11981_v20  ;;  %v639_v59 = vmul.f32 %v629_v45, %v11997_v30 }
 0x286   :  { %v654_v41 = vadd.f32 %v644_v35, %v11971_v62  ;;  %v656_v42 = vadd.f32 %v646_v36, %v11973_v17  ;;  %v653_v46 = vadd.f32 %v643_v37, %v11975_v58  ;;  %v647_v3 = vmul.f32 %v637_v2, %v11995_v29 }
 0x287   :  { %v655_v47 = vadd.f32 %v645_v38, %v11977_v18  ;;  %v658_v50 = vadd.f32 %v648_v48, %v11979_v19  ;;  %v660_v56 = vadd.f32 %v650_v49, %v11981_v20  ;;  %v649_v4 = vmul.f32 %v639_v59, %v11997_v30 }
 0x288   :  { %v664_v1 = vmul.f32 0.7978846, %v654_v41  ;;  %v666_v0 = vmul.f32 0.7978846, %v656_v42  ;;  %v663_v57 = vmul.f32 0.7978846, %v653_v46  ;;  %v657_v63 = vadd.f32 %v647_v3, %v11995_v29 }
 0x289   :  { %v665_v54 = vmul.f32 0.7978846, %v655_v47  ;;  %v668_v8 = vmul.f32 0.7978846, %v658_v50  ;;  %v670_v11 = vmul.f32 0.7978846, %v660_v56  ;;  %v659_v14 = vadd.f32 %v649_v4, %v11997_v30 }
 0x28a   :  { %11484 = vtanh.f32 %v664_v1  ;;  %v592_v10 = vmul.f32 %v582_v61, %v572_v5  ;;  %v591_v15 = vmul.f32 %v581_v7, %v571_v13  ;;  %v667_v16 = vmul.f32 0.7978846, %v657_v63  ;;  %v822_v13 = vld [vmem:[%s17045_s6 + $0x88] sm:$0xff] }
 0x28b   :  { %11486 = vtanh.f32 %v666_v0  ;;  %v669_v21 = vmul.f32 0.7978846, %v659_v14  ;;  %v614_v31 = vmul.f32 0.5, %v11971_v62  ;;  %v616_v35 = vmul.f32 0.5, %v11973_v17 }
 0x28c   :  { %11488 = vtanh.f32 %v663_v57  ;;  %v612_v22 = vadd.f32 %v602_v12, %v592_v10  ;;  %v611_v23 = vadd.f32 %v601_v60, %v591_v15  ;;  %v613_v37 = vmul.f32 0.5, %v11975_v58  ;;  %v805_v10 = vld [vmem:[%s17045_s6] sm:$0xff]  ;;  %v806_v60 = vld [vmem:[%s17045_s6 + $0x8] sm:$0xff] }
 0x28d   :  { %11490 = vtanh.f32 %v665_v54  ;;  %v615_v41 = vmul.f32 0.5, %v11977_v18  ;;  %v618_v62 = vmul.f32 0.5, %v11979_v19  ;;  %v620_v17 = vmul.f32 0.5, %v11981_v20 }
 0x28e   :  { %11492 = vtanh.f32 %v668_v8  ;;  %v632_v9 = vmul.f32 0.044715, %v612_v22  ;;  %v631_v43 = vmul.f32 0.044715, %v611_v23  ;;  %v617_v56 = vmul.f32 0.5, %v11995_v29  ;;  %v821_v29 = vld [vmem:[%s17045_s6 + $0x80] sm:$0xff] }
 0x28f   :  { %11494 = vtanh.f32 %v670_v11  ;;  %v619_v4 = vmul.f32 0.5, %v11997_v30  ;;  %v622_v14 = vmul.f32 0.5, %v612_v22  ;;  %v621_v15 = vmul.f32 0.5, %v611_v23 }
 0x290   :  { %11496 = vtanh.f32 %v667_v16  ;;  %v642_v24 = vmul.f32 %v632_v9, %v612_v22  ;;  %v641_v25 = vmul.f32 %v631_v43, %v611_v23  ;;  %v824_v9 = vld [vmem:[%s17045_s6 + $0x98] sm:$0xff]  ;;  %v10406_v43 = vpack.c.bf16 %v822_v13, %v821_v29  ;;  %v982_v29 = vld [vmem:[%s17046_s7 + $0x88] sm:$0xff]  ;;  %v1013_v13 = vld [vmem:[%s17046_s7 + $0x180] sm:$0xff] }
 0x291   :  { %11498 = vtanh.f32 %v669_v21  ;;  %v823_v21 = vld [vmem:[%s17045_s6 + $0x90] sm:$0xff] }
 0x292   :  { %v652_v27 = vmul.f32 %v642_v24, %v612_v22  ;;  %v651_v33 = vmul.f32 %v641_v25, %v611_v23  ;;  %v703_v25 = vld [vmem:[%s17044_s5] sm:$0xff] }
 0x294   :  { %v11485_v26 = vpop.eup %11484  ;;  %v662_v38 = vadd.f32 %v652_v27, %v612_v22  ;;  %v661_v44 = vadd.f32 %v651_v33, %v611_v23  ;;  %v10410_v23 = vpack.c.bf16 %v824_v9, %v823_v21  ;;  %v807_v27 = vld [vmem:[%s17045_s6 + $0x10] sm:$0xff]  ;;  %v704_v33 = vld [vmem:[%s17044_s5 + $0x8] sm:$0xff]  ;;  %v1016_v21 = vld [vmem:[%s17046_s7 + $0x198] sm:$0xff] }
 0x295   :  { %v11487_v28 = vpop.eup %11486  ;;  %v684_v32 = vadd.f32 1.0, %v11485_v26  ;;  %v10408_v26 = vpack.c.bf16 %v806_v60, %v805_v10  ;;  %v997_v10 = vld [vmem:[%s17046_s7 + $0x100] sm:$0xff]  ;;  %v998_v60 = vld [vmem:[%s17046_s7 + $0x108] sm:$0xff] }
 0x296   :  { %v11489_v34 = vpop.eup %11488  ;;  %v686_v36 = vadd.f32 1.0, %v11487_v28  ;;  %v672_v48 = vmul.f32 0.7978846, %v662_v38  ;;  %v671_v2 = vmul.f32 0.7978846, %v661_v44  ;;  %v808_v28 = vld [vmem:[%s17045_s6 + $0x18] sm:$0xff] }
 0x297   :  { %v11491_v39 = vpop.eup %11490  ;;  %v694_v40 = vmul.f32 %v684_v32, %v614_v31  ;;  %v683_v42 = vadd.f32 1.0, %v11489_v34  ;;  %v825_v31 = vld [vmem:[%s17045_s6 + $0xa0] sm:$0xff]  ;;  %v826_v32 = vld [vmem:[%s17045_s6 + $0xa8] sm:$0xff]  ;;  %v10412_v34 = vpack.c.bf16 %v808_v28, %v807_v27  ;;  %v827_v38 = vld [vmem:[%s17045_s6 + $0xb0] sm:$0xff] }
 0x298   :  { %v11493_v45 = vpop.eup %11492  ;;  %v696_v46 = vmul.f32 %v686_v36, %v616_v35  ;;  %v685_v47 = vadd.f32 1.0, %v11491_v39  ;;  %11500 = vtanh.f32 %v672_v48  ;;  %v10414_v35 = vpack.c.bf16 %v826_v32, %v825_v31  ;;  %v809_v36 = vld [vmem:[%s17045_s6 + $0x20] sm:$0xff]  ;;  %v828_v39 = vld [vmem:[%s17045_s6 + $0xb8] sm:$0xff]  ;;  %v811_v44 = vld [vmem:[%s17045_s6 + $0x30] sm:$0xff] }
 0x299   :  { %v11495_v49 = vpop.eup %11494  ;;  %v693_v1 = vmul.f32 %v683_v42, %v613_v37  ;;  %v688_v0 = vadd.f32 1.0, %v11493_v45  ;;  %11502 = vtanh.f32 %v671_v2  ;;  %v810_v37 = vld [vmem:[%s17045_s6 + $0x28] sm:$0xff]  ;;  %v10418_v42 = vpack.c.bf16 %v828_v39, %v827_v38  ;;  %v812_v45 = vld [vmem:[%s17045_s6 + $0x38] sm:$0xff]  ;;  %v1001_v27 = vld [vmem:[%s17046_s7 + $0x120] sm:$0xff] }
 0x29a   :  { %v11497_v58 = vpop.eup %11496  ;;  %v10398_v59 = vpack.c.bf16 %v696_v46, %v694_v40  ;;  %v695_v57 = vmul.f32 %v685_v47, %v615_v41  ;;  %v690_v54 = vadd.f32 1.0, %v11495_v49  ;;  %v705_v40 = vld [vmem:[%s17044_s5 + $0x10] sm:$0x7]  ;;  %v10416_v41 = vpack.c.bf16 %v810_v37, %v809_v36  ;;  %v829_v46 = vld [vmem:[%s17045_s6 + $0xc0] sm:$0xff]  ;;  %v830_v47 = vld [vmem:[%s17045_s6 + $0xc8] sm:$0xff] }
 0x29b   :  { %v11499_v18 = vpop.eup %11498  ;;  %v698_v50 = vmul.f32 %v688_v0, %v618_v62  ;;  %v687_v61 = vadd.f32 1.0, %v11497_v58  ;;  %v10420_v62 = vpack.c.bf16 %v812_v45, %v811_v44  ;;  %v10422_v48 = vpack.c.bf16 %v830_v47, %v829_v46  ;;  %v813_v49 = vld [vmem:[%s17045_s6 + $0x40] sm:$0xff]  ;;  %v832_v0 = vld [vmem:[%s17045_s6 + $0xd8] sm:$0xff]  ;;  %v1002_v28 = vld [vmem:[%s17046_s7 + $0x128] sm:$0xff] }
 0x29c   :  { %10399 = vmatprep.subr.bf16.mxu1 %v10398_v59  ;;  %v10400_v19 = vpack.c.bf16 %v695_v57, %v693_v1  ;;  %v700_v3 = vmul.f32 %v690_v54, %v620_v17  ;;  %v689_v5 = vadd.f32 1.0, %v11499_v18  ;;  %v814_v1 = vld [vmem:[%s17045_s6 + $0x48] sm:$0xff]  ;;  %v831_v17 = vld [vmem:[%s17045_s6 + $0xd0] sm:$0xff]  ;;  %v816_v57 = vld [vmem:[%s17045_s6 + $0x58] sm:$0xff]  ;;  %v10480_v31 = vpack.c.bf16 %v1002_v28, %v1001_v27 }
 0x29d   :  { %v697_v20 = vmul.f32 %v687_v61, %v617_v56  ;;  %v10424_v2 = vpack.c.bf16 %v814_v1, %v813_v49  ;;  %v10426_v58 = vpack.c.bf16 %v832_v0, %v831_v17  ;;  %v815_v59 = vld [vmem:[%s17045_s6 + $0x50] sm:$0xff]  ;;  %v833_v54 = vld [vmem:[%s17045_s6 + $0xe0] sm:$0xff]  ;;  %v834_v18 = vld [vmem:[%s17045_s6 + $0xe8] sm:$0xff] }
 0x29e   :  { %10401 = vmatpush1.bf16.msra.mxu1 %v10400_v19  ;;  %v10402_v7 = vpack.c.bf16 %v700_v3, %v698_v50  ;;  %v699_v8 = vmul.f32 %v689_v5, %v619_v4  ;;  %v10428_v50 = vpack.c.bf16 %v816_v57, %v815_v59  ;;  %v10430_v56 = vpack.c.bf16 %v834_v18, %v833_v54  ;;  %v817_v61 = vld [vmem:[%s17045_s6 + $0x60] sm:$0xff]  ;;  %v818_v19 = vld [vmem:[%s17045_s6 + $0x68] sm:$0xff]  ;;  %v835_v3 = vld [vmem:[%s17045_s6 + $0xf0] sm:$0xff] }
 0x29f   :  { %v836_v4 = vld [vmem:[%s17045_s6 + $0xf8] sm:$0xff]  ;;  %v10432_v5 = vpack.c.bf16 %v818_v19, %v817_v61  ;;  %v965_v32 = vld [vmem:[%s17046_s7] sm:$0xff]  ;;  %v986_v44 = vld [vmem:[%s17046_s7 + $0xa8] sm:$0xff] }
 0x2a0   :  { %10403 = vmatprep.subr.bf16.mxu1 %v10402_v7  ;;  %v10404_v11 = vpack.c.bf16 %v699_v8, %v697_v20  ;;  %v10434_v20 = vpack.c.bf16 %v836_v4, %v835_v3  ;;  %v819_v7 = vld [vmem:[%s17045_s6 + $0x70] sm:$0xff]  ;;  %v820_v8 = vld [vmem:[%s17045_s6 + $0x78] sm:$0xff]  ;;  %v970_v49 = vld [vmem:[%s17046_s7 + $0x28] sm:$0xff] }
 0x2a1   :  { %v1019_v59 = vld [vmem:[%s17046_s7 + $0x1b0] sm:$0xff]  ;;  %v1020_v54 = vld [vmem:[%s17046_s7 + $0x1b8] sm:$0xff]  ;;  %v993_v27 = vld [vmem:[%s17046_s7 + $0xe0] sm:$0xff] }
 0x2a2   :  { %10405 = vmatpush1.bf16.msra.mxu1 %v10404_v11  ;;  %v11501_v12 = vpop.eup %11500  ;;  %v10436_v11 = vpack.c.bf16 %v820_v8, %v819_v7  ;;  %v971_v18 = vld [vmem:[%s17046_s7 + $0x30] sm:$0xff]  ;;  %v1004_v3 = vld [vmem:[%s17046_s7 + $0x138] sm:$0xff]  ;;  %v1021_v7 = vld [vmem:[%s17046_s7 + $0x1c0] sm:$0xff] }
 0x2a3   :  { %v11503_v63 = vpop.eup %11502  ;;  %v692_v30 = vadd.f32 1.0, %v11501_v12  ;;  %v981_v12 = vld [vmem:[%s17046_s7 + $0x80] sm:$0xff]  ;;  %v1003_v19 = vld [vmem:[%s17046_s7 + $0x130] sm:$0xff]  ;;  %v994_v28 = vld [vmem:[%s17046_s7 + $0xe8] sm:$0xff] }
 0x2a4   :  { %v691_v16 = vadd.f32 1.0, %v11503_v63  ;;  %v10438_v63 = vpack.c.bf16 %v982_v29, %v981_v12  ;;  %v10484_v4 = vpack.c.bf16 %v1004_v3, %v1003_v19  ;;  %v973_v12 = vld [vmem:[%s17046_s7 + $0x40] sm:$0xff]  ;;  %v974_v29 = vld [vmem:[%s17046_s7 + $0x48] sm:$0xff] }
 0x2a5   :  { %v702_v22 = vmul.f32 %v692_v30, %v622_v14  ;;  %v1014_v14 = vld [vmem:[%s17046_s7 + $0x188] sm:$0xff] }
 0x2a6   :  { %v701_v24 = vmul.f32 %v691_v16, %v621_v15  ;;  %v10470_v30 = vpack.c.bf16 %v1014_v14, %v1013_v13  ;;  %v10472_v15 = vpack.c.bf16 %v998_v60, %v997_v10  ;;  %v1015_v16 = vld [vmem:[%s17046_s7 + $0x190] sm:$0xff]  ;;  %v1005_v14 = vld [vmem:[%s17046_s7 + $0x140] sm:$0xff] }
 0x2a7   :  { %8771 = vmatprep.subr.msk.mxu1 %vm482_vm3, %v702_v22  ;;  %v10474_v9 = vpack.c.bf16 %v1016_v21, %v1015_v16  ;;  %v999_v22 = vld [vmem:[%s17046_s7 + $0x110] sm:$0xff]  ;;  %v1024_v21 = vld [vmem:[%s17046_s7 + $0x1d8] sm:$0xff] }
 0x2a8   :  { %8772 = vmatpush1.msk.msra.mxu1 %vm482_vm3, %v701_v24  ;;  %10471 = vmatprep.subr.bf16.mxu0 %v10470_v30  ;;  %v1006_v30 = vld [vmem:[%s17046_s7 + $0x148] sm:$0xff]  ;;  %v991_v10 = vld [vmem:[%s17046_s7 + $0xd0] sm:$0xff] }
 0x2a9   :  { %8773 = vmatmul.mubr.msk.f32.vlgmr.msra.gmra.mrb[6].mxu1 %vm706_vm4, %v703_v25  ;;  %10407 = vmatprep.subr.bf16.mxu1 %v10406_v43  ;;  %v1000_v43 = vld [vmem:[%s17046_s7 + $0x118] sm:$0xff]  ;;  %v1017_v25 = vld [vmem:[%s17046_s7 + $0x1a0] sm:$0xff]  ;;  %v10488_v60 = vpack.c.bf16 %v1006_v30, %v1005_v14  ;;  %v1023_v16 = vld [vmem:[%s17046_s7 + $0x1d0] sm:$0xff] }
 0x2aa   :  { %792 = vmatprep.mubr.f32.mxu1 %v17065_v6  ;;  %10409 = vmatpush3.bf16.msra.mxu1 %v10408_v26  ;;  %v10476_v24 = vpack.c.bf16 %v1000_v43, %v999_v22  ;;  %v1018_v26 = vld [vmem:[%s17046_s7 + $0x1a8] sm:$0xff]  ;;  %v10490_v22 = vpack.c.bf16 %v1024_v21, %v1023_v16  ;;  %v975_v43 = vld [vmem:[%s17046_s7 + $0x50] sm:$0xff] }
 0x2ab   :  { %10411 = vmatprep.subr.bf16.mxu1 %v10410_v23  ;;  %10473 = vmatpush3.bf16.msra.mxu0 %v10472_v15  ;;  %v10478_v23 = vpack.c.bf16 %v1018_v26, %v1017_v25  ;;  %v992_v15 = vld [vmem:[%s17046_s7 + $0xd8] sm:$0xff]  ;;  %v1007_v25 = vld [vmem:[%s17046_s7 + $0x150] sm:$0xff] }
 0x2ac   :  { %10475 = vmatprep.subr.bf16.mxu0 %v10474_v9  ;;  %v10458_v9 = vpack.c.bf16 %v992_v15, %v991_v10 }
 0x2ad   :  { %8774 = vmatmul.mubr.msk.f32.gmra.mrb[8].mxu1 %vm706_vm4, %v704_v33  ;;  %v966_v33 = vld [vmem:[%s17046_s7 + $0x8] sm:$0xff] }
 0x2ae   :  { %798 = vmatprep.mubr.f32.mxu1 %v17065_v6  ;;  %10413 = vmatpush3.bf16.msra.mxu1 %v10412_v34  ;;  %v983_v34 = vld [vmem:[%s17046_s7 + $0x90] sm:$0xff]  ;;  %v10440_v37 = vpack.c.bf16 %v966_v33, %v965_v32  ;;  %v10462_v32 = vpack.c.bf16 %v994_v28, %v993_v27  ;;  %v1025_v33 = vld [vmem:[%s17046_s7 + $0x1e0] sm:$0xff]  ;;  %v12405_v27 = vsub.s32 2, %v11857_v52  ;;  %v1030_v28 = vld [vmem:[%s17046_s7 + $0x208] sm:$0xff] }
 0x2af   :  { %10415 = vmatprep.subr.bf16.mxu1 %v10414_v35  ;;  %10477 = vmatpush3.bf16.msra.mxu0 %v10476_v24  ;;  %v984_v35 = vld [vmem:[%s17046_s7 + $0x98] sm:$0xff] }
 0x2b0   :  { %10479 = vmatprep.subr.bf16.mxu0 %v10478_v23  ;;  %v10442_v39 = vpack.c.bf16 %v984_v35, %v983_v34  ;;  %v976_v24 = vld [vmem:[%s17046_s7 + $0x58] sm:$0xff]  ;;  %v1026_v34 = vld [vmem:[%s17046_s7 + $0x1e8] sm:$0xff]  ;;  %v977_v35 = vld [vmem:[%s17046_s7 + $0x60] sm:$0xff]  ;;  %17122 = vst [vmem:[#allocation13_spill] sm:$0xff] %v12405_v27 }
 0x2b1   :  { %8775 = vmatmul.mubr.msk.f32.gmra.mrb[10].mxu1 %vm706_vm4, %v705_v40  ;;  %v967_v40 = vld [vmem:[%s17046_s7 + $0x10] sm:$0xff]  ;;  %v10460_v26 = vpack.c.bf16 %v976_v24, %v975_v43  ;;  %v1008_v23 = vld [vmem:[%s17046_s7 + $0x158] sm:$0xff]  ;;  %v1029_v24 = vld [vmem:[%s17046_s7 + $0x200] sm:$0xff] }
 0x2b2   :  { %10417 = vmatpush3.bf16.msra.mxu1 %v10416_v41  ;;  %v968_v41 = vld [vmem:[%s17046_s7 + $0x18] sm:$0xff] }
 0x2b3   :  { %10419 = vmatprep.subr.bf16.mxu1 %v10418_v42  ;;  %10481 = vmatpush3.bf16.msra.mxu0 %v10480_v31  ;;  %v985_v42 = vld [vmem:[%s17046_s7 + $0xa0] sm:$0xff]  ;;  %v10444_v46 = vpack.c.bf16 %v968_v41, %v967_v40  ;;  %v10492_v31 = vpack.c.bf16 %v1008_v23, %v1007_v25  ;;  %v995_v41 = vld [vmem:[%s17046_s7 + $0xf0] sm:$0xff]  ;;  %v12402_v23 = vsub.s32 3, %v11857_v52 }
 0x2b5   :  { %17121 = vst [vmem:[#allocation12_spill] sm:$0xff] %v12402_v23 }
 0x2b6   :  { %10421 = vmatpush3.bf16.msra.mxu1 %v10420_v62  ;;  %v10446_v62 = vpack.c.bf16 %v986_v44, %v985_v42  ;;  %v996_v42 = vld [vmem:[%s17046_s7 + $0xf8] sm:$0xff]  ;;  %v1027_v44 = vld [vmem:[%s17046_s7 + $0x1f0] sm:$0xff] }
 0x2b7   :  { %10423 = vmatprep.subr.bf16.mxu1 %v10422_v48  ;;  %v969_v48 = vld [vmem:[%s17046_s7 + $0x20] sm:$0xff] }
 0x2b8   :  { %v10448_v17 = vpack.c.bf16 %v970_v49, %v969_v48  ;;  %v980_v48 = vld [vmem:[%s17046_s7 + $0x78] sm:$0xff] }
 0x2ba   :  { %10425 = vmatpush3.bf16.msra.mxu1 %v10424_v2  ;;  %v987_v2 = vld [vmem:[%s17046_s7 + $0xb0] sm:$0xff] }
 0x2bb   :  { %10427 = vmatprep.subr.bf16.mxu1 %v10426_v58  ;;  %v988_v58 = vld [vmem:[%s17046_s7 + $0xb8] sm:$0xff] }
 0x2bc   :  { %v10450_v57 = vpack.c.bf16 %v988_v58, %v987_v2  ;;  %v1045_v2 = vld [vmem:[%s17046_s7 + $0x280] sm:$0xff]  ;;  %v1046_v58 = vld [vmem:[%s17046_s7 + $0x288] sm:$0xff] }
 0x2be   :  { %10429 = vmatpush3.bf16.msra.mxu1 %v10428_v50  ;;  %v972_v50 = vld [vmem:[%s17046_s7 + $0x38] sm:$0xff] }
 0x2bf   :  { %10431 = vmatprep.subr.bf16.mxu1 %v10430_v56  ;;  %v10482_v56 = vpack.c.bf16 %v1020_v54, %v1019_v59  ;;  %v10452_v61 = vpack.c.bf16 %v972_v50, %v971_v18  ;;  %v1077_v59 = vld [vmem:[%s17046_s7 + $0x380] sm:$0xff]  ;;  %v10502_v54 = vpack.c.bf16 %v1046_v58, %v1045_v2  ;;  %v1078_v18 = vld [vmem:[%s17046_s7 + $0x388] sm:$0xff] }
 0x2c0   :  { %v10534_v50 = vpack.c.bf16 %v1078_v18, %v1077_v59  ;;  %v1049_v2 = vld [vmem:[%s17046_s7 + $0x2a0] sm:$0xff]  ;;  %v1082_v18 = vld [vmem:[%s17046_s7 + $0x3a8] sm:$0xff] }
 0x2c1   :  { %10483 = vmatprep.subr.bf16.mxu0 %v10482_v56 }
 0x2c2   :  { %10433 = vmatpush3.bf16.msra.mxu1 %v10432_v5  ;;  %v989_v5 = vld [vmem:[%s17046_s7 + $0xc0] sm:$0xff]  ;;  %10485 = vmatpush3.bf16.msra.mxu0 %v10484_v4 }
 0x2c3   :  { %10435 = vmatprep.subr.bf16.mxu1 %v10434_v20  ;;  %v990_v20 = vld [vmem:[%s17046_s7 + $0xc8] sm:$0xff] }
 0x2c4   :  { %v10454_v8 = vpack.c.bf16 %v990_v20, %v989_v5 }
 0x2c6   :  { %10437 = vmatpush3.bf16.msra.mxu1 %v10436_v11  ;;  %v1022_v11 = vld [vmem:[%s17046_s7 + $0x1c8] sm:$0xff] }
 0x2c7   :  { %10439 = vmatprep.subr.bf16.mxu1 %v10438_v63  ;;  %v10486_v13 = vpack.c.bf16 %v1022_v11, %v1021_v7  ;;  %v10456_v63 = vpack.c.bf16 %v974_v29, %v973_v12  ;;  %v17118_v7 = vmov 0 }
 0x2c8   :  { %v17119_v7 = vsel %vm12366_vm5, 4294967295, %v17118_v7 }
 0x2c9   :  { %10487 = vmatprep.subr.bf16.mxu0 %v10486_v13  ;;  %17120 = vst [vmem:[#allocation11_spill] sm:$0xff] %v17119_v7 }
 0x2ca   :  { %10489 = vmatpush3.bf16.msra.mxu0 %v10488_v60 }
 0x2cb   :  { %10491 = vmatprep.subr.bf16.mxu0 %v10490_v22 }
 0x2ce   :  { %10493 = vmatpush3.bf16.msra.mxu0 %v10492_v31  ;;  %v1061_v31 = vld [vmem:[%s17046_s7 + $0x300] sm:$0xff] }
 0x37c   :  { %v788_v36 = vpop.f32.mrb[6].mxu1 }
 0x37d   :  { %v790_v38 = vpop.f32.mrb[7].mxu1 }
 0x37e   :  { %901 = vmatprep.mubr.f32.mxu1 %v790_v38  ;;  %v1009_v38 = vld [vmem:[%s17046_s7 + $0x160] sm:$0xff] }
 0x37f   :  { %902 = vmatmul.mubr.f32.vlgmr.msra.gmra.mrb[12].mxu1 %v788_v36  ;;  %v10494_v36 = vpack.c.bf16 %v1026_v34, %v1025_v33 }
 0x380   :  { %v794_v45 = vpop.f32.mrb[8].mxu1  ;;  %10441 = vmatpush3.bf16.msra.mxu1 %v10440_v37  ;;  %v978_v37 = vld [vmem:[%s17046_s7 + $0x68] sm:$0xff] }
 0x381   :  { %v796_v47 = vpop.f32.mrb[9].mxu1  ;;  %10443 = vmatprep.subr.bf16.mxu1 %v10442_v39  ;;  %v1010_v39 = vld [vmem:[%s17046_s7 + $0x168] sm:$0xff]  ;;  %v10464_v40 = vpack.c.bf16 %v978_v37, %v977_v35  ;;  %10495 = vmatprep.subr.bf16.mxu0 %v10494_v36  ;;  %v1047_v36 = vld [vmem:[%s17046_s7 + $0x290] sm:$0xff]  ;;  %v1048_v37 = vld [vmem:[%s17046_s7 + $0x298] sm:$0xff] }
 0x382   :  { %906 = vmatprep.mubr.f32.mxu1 %v796_v47  ;;  %v1028_v47 = vld [vmem:[%s17046_s7 + $0x1f8] sm:$0xff]  ;;  %v10506_v58 = vpack.c.bf16 %v1048_v37, %v1047_v36  ;;  %v1070_v36 = vld [vmem:[%s17046_s7 + $0x348] sm:$0xff]  ;;  %v1055_v37 = vld [vmem:[%s17046_s7 + $0x2d0] sm:$0xff] }
 0x383   :  { %907 = vmatmul.mubr.f32.gmra.mrb[14].mxu1 %v794_v45  ;;  %v10496_v45 = vpack.c.bf16 %v1010_v39, %v1009_v38  ;;  %v10498_v49 = vpack.c.bf16 %v1028_v47, %v1027_v44  ;;  %v10504_v39 = vpack.c.bf16 %v1030_v28, %v1029_v24  ;;  %v1079_v44 = vld [vmem:[%s17046_s7 + $0x390] sm:$0xff]  ;;  %v1085_v24 = vld [vmem:[%s17046_s7 + $0x3c0] sm:$0xff] }
 0x384   :  { %v800_v1 = vpop.f32.mrb[10].mxu1  ;;  %10445 = vmatpush3.bf16.msra.mxu1 %v10444_v46  ;;  %v10466_v46 = vpack.c.bf16 %v996_v42, %v995_v41  ;;  %v12435_v41 = vsub.s32 5, %v11857_v52  ;;  %v12438_v42 = vsub.s32 7, %v11857_v52 }
 0x385   :  { %v802_v0 = vpop.f32.mrb[11].mxu1  ;;  %10447 = vmatprep.subr.bf16.mxu1 %v10446_v62  ;;  %v979_v62 = vld [vmem:[%s17046_s7 + $0x70] sm:$0xff]  ;;  %10497 = vmatpush3.bf16.msra.mxu0 %v10496_v45  ;;  %v1080_v45 = vld [vmem:[%s17046_s7 + $0x398] sm:$0xff] }
 0x386   :  { %911 = vmatprep.mubr.f32.mxu1 %v802_v0  ;;  %v10468_v0 = vpack.c.bf16 %v980_v48, %v979_v62  ;;  %10499 = vmatprep.subr.bf16.mxu0 %v10498_v49  ;;  %17123 = vst [vmem:[#allocation14_spill] sm:$0xff] %v12435_v41  ;;  %17124 = vst [vmem:[#allocation15_spill] sm:$0xff] %v12438_v42  ;;  %v1031_v49 = vld [vmem:[%s17046_s7 + $0x210] sm:$0xff]  ;;  %v10538_v59 = vpack.c.bf16 %v1080_v45, %v1079_v44  ;;  %v1088_v44 = vld [vmem:[%s17046_s7 + $0x3d8] sm:$0xff] }
 0x387   :  { %912 = vmatmul.mubr.f32.gmra.mrb[16].mxu1 %v800_v1  ;;  %v1011_v1 = vld [vmem:[%s17046_s7 + $0x170] sm:$0xff] }
 0x388   :  { %10449 = vmatpush3.bf16.msra.mxu1 %v10448_v17  ;;  %v1012_v17 = vld [vmem:[%s17046_s7 + $0x178] sm:$0xff] }
 0x389   :  { %10451 = vmatprep.subr.bf16.mxu1 %v10450_v57  ;;  %v10500_v57 = vpack.c.bf16 %v1012_v17, %v1011_v1  ;;  %v1032_v1 = vld [vmem:[%s17046_s7 + $0x218] sm:$0xff]  ;;  %v1063_v17 = vld [vmem:[%s17046_s7 + $0x310] sm:$0xff] }
 0x38b   :  { %10501 = vmatpush3.bf16.msra.mxu0 %v10500_v57  ;;  %v1050_v57 = vld [vmem:[%s17046_s7 + $0x2a8] sm:$0xff] }
 0x38c   :  { %10453 = vmatpush3.bf16.msra.mxu1 %v10452_v61  ;;  %10535 = vmatprep.subr.bf16.mxu0 %v10534_v50 }
 0x38d   :  { %10455 = vmatprep.subr.bf16.mxu1 %v10454_v8 }
 0x390   :  { %10457 = vmatpush3.bf16.msra.mxu1 %v10456_v63 }
 0x391   :  { %10459 = vmatprep.subr.bf16.mxu1 %v10458_v9 }
 0x394   :  { %10461 = vmatpush3.bf16.msra.mxu1 %v10460_v26 }
 0x395   :  { %10463 = vmatprep.subr.bf16.mxu1 %v10462_v32  ;;  %v1062_v32 = vld [vmem:[%s17046_s7 + $0x308] sm:$0xff] }
 0x398   :  { %10465 = vmatpush3.bf16.msra.mxu1 %v10464_v40  ;;  %v10536_v40 = vpack.c.bf16 %v1062_v32, %v1061_v31  ;;  %v1037_v31 = vld [vmem:[%s17046_s7 + $0x240] sm:$0xff]  ;;  %v1038_v32 = vld [vmem:[%s17046_s7 + $0x248] sm:$0xff] }
 0x399   :  { %10467 = vmatprep.subr.bf16.mxu1 %v10466_v46  ;;  %v10520_v45 = vpack.c.bf16 %v1038_v32, %v1037_v31 }
 0x39c   :  { %10469 = vmatpush3.bf16.msra.mxu1 %v10468_v0  ;;  %v1064_v0 = vld [vmem:[%s17046_s7 + $0x318] sm:$0xff] }
 0x39d   :  { %10503 = vmatprep.subr.bf16.mxu1 %v10502_v54  ;;  %v1081_v54 = vld [vmem:[%s17046_s7 + $0x3a0] sm:$0xff] }
 0x452   :  { %v8988_v56 = vpop.f32.mrb[12].mxu1 }
 0x453   :  { %v8989_v61 = vpop.f32.mrb[13].mxu1 }
 0x454   :  { %v8990_v19 = vadd.f32 %v8989_v61, %v8988_v56  ;;  %v10508_v61 = vpack.c.bf16 %v1032_v1, %v1031_v49  ;;  %v1071_v1 = vld [vmem:[%s17046_s7 + $0x350] sm:$0xff] }
 0x456   :  { %917 = vst [vmem:[#allocation4] sm:$0xff] %v8990_v19  ;;  %v8991_v3 = vpop.f32.mrb[14].mxu1  ;;  %v10540_v19 = vpack.c.bf16 %v1064_v0, %v1063_v17  ;;  %v1072_v17 = vld [vmem:[%s17046_s7 + $0x358] sm:$0xff]  ;;  %v1057_v0 = vld [vmem:[%s17046_s7 + $0x2e0] sm:$0xff] }
 0x457   :  { %v8992_v4 = vpop.f32.mrb[15].mxu1 }
 0x458   :  { %v8993_v5 = vadd.f32 %v8992_v4, %v8991_v3  ;;  %v1033_v3 = vld [vmem:[%s17046_s7 + $0x220] sm:$0xff]  ;;  %v1034_v4 = vld [vmem:[%s17046_s7 + $0x228] sm:$0xff] }
 0x45a   :  { %918 = vst [vmem:[#allocation4 + $0x8] sm:$0xff] %v8993_v5  ;;  %v8994_v20 = vpop.f32.mrb[16].mxu1  ;;  %v10510_v5 = vpack.c.bf16 %v1050_v57, %v1049_v2  ;;  %v1058_v2 = vld [vmem:[%s17046_s7 + $0x2e8] sm:$0xff] }
 0x45b   :  { %v8995_v8 = vpop.f32.mrb[17].mxu1 }
 0x45c   :  { %v8996_v11 = vadd.f32 %v8995_v8, %v8994_v20  ;;  %v10542_v20 = vpack.c.bf16 %v1082_v18, %v1081_v54  ;;  %v1065_v8 = vld [vmem:[%s17046_s7 + $0x320] sm:$0xff]  ;;  %v10556_v54 = vpack.c.bf16 %v1072_v17, %v1071_v1  ;;  %v1127_v1 = vld [vmem:[%s17046_s7 + $0x510] sm:$0xff]  ;;  %v1128_v17 = vld [vmem:[%s17046_s7 + $0x518] sm:$0xff] }
 0x45d   :  { %v920_v12 = vld [vmem:[#allocation4] sm:$0x1]  ;;  %v926_v29 = vld [vmem:[#allocation4 + $0x1] sm:$0x1]  ;;  %v928_v13 = vld [vmem:[#allocation4 + $0x2] sm:$0x1] }
 0x45e   :  { %925 = vst.msk [vmem:[#allocation3] sm:$0x1] %vm12366_vm5, %v920_v12  ;;  %927 = vst.msk [vmem:[#allocation3 + $0x1] sm:$0x1] %vm12366_vm5, %v926_v29  ;;  %v930_v63 = vld [vmem:[#allocation4 + $0x3] sm:$0x1] }
 0x45f   :  { %929 = vst.msk [vmem:[#allocation3 + $0x2] sm:$0x1] %vm12366_vm5, %v928_v13  ;;  %v932_v14 = vld [vmem:[#allocation4 + $0x4] sm:$0x1]  ;;  %v934_v30 = vld [vmem:[#allocation4 + $0x5] sm:$0x1] }
 0x460   :  { %919 = vst [vmem:[#allocation4 + $0x10] sm:$0x7] %v8996_v11  ;;  %931 = vst.msk [vmem:[#allocation3 + $0x3] sm:$0x1] %vm12366_vm5, %v930_v63  ;;  %v936_v10 = vld [vmem:[#allocation4 + $0x6] sm:$0x1] }
 0x461   :  { %933 = vst.msk [vmem:[#allocation3 + $0x4] sm:$0x1] %vm12366_vm5, %v932_v14  ;;  %935 = vst.msk [vmem:[#allocation3 + $0x5] sm:$0x1] %vm12366_vm5, %v934_v30  ;;  %v938_v60 = vld [vmem:[#allocation4 + $0x7] sm:$0x1]  ;;  %v10512_v14 = vpack.c.bf16 %v1034_v4, %v1033_v3 }
 0x462   :  { %937 = vst.msk [vmem:[#allocation3 + $0x6] sm:$0x1] %vm12366_vm5, %v936_v10  ;;  %939 = vst.msk [vmem:[#allocation3 + $0x7] sm:$0x1] %vm12366_vm5, %v938_v60  ;;  %v940_v15 = vld [vmem:[#allocation4 + $0x8] sm:$0x1] }
 0x463   :  { %v942_v16 = vld [vmem:[#allocation4 + $0x9] sm:$0x1]  ;;  %v944_v21 = vld [vmem:[#allocation4 + $0xa] sm:$0x1]  ;;  %941 = vst.msk [vmem:[#allocation3 + $0x8] sm:$0x1] %vm12366_vm5, %v940_v15 }
 0x464   :  { %943 = vst.msk [vmem:[#allocation3 + $0x9] sm:$0x1] %vm12366_vm5, %v942_v16  ;;  %945 = vst.msk [vmem:[#allocation3 + $0xa] sm:$0x1] %vm12366_vm5, %v944_v21  ;;  %v946_v9 = vld [vmem:[#allocation4 + $0xb] sm:$0x1] }
 0x465   :  { %v948_v22 = vld [vmem:[#allocation4 + $0xc] sm:$0x1]  ;;  %v950_v43 = vld [vmem:[#allocation4 + $0xd] sm:$0x1]  ;;  %947 = vst.msk [vmem:[#allocation3 + $0xb] sm:$0x1] %vm12366_vm5, %v946_v9 }
 0x466   :  { %949 = vst.msk [vmem:[#allocation3 + $0xc] sm:$0x1] %vm12366_vm5, %v948_v22  ;;  %951 = vst.msk [vmem:[#allocation3 + $0xd] sm:$0x1] %vm12366_vm5, %v950_v43  ;;  %v952_v25 = vld [vmem:[#allocation4 + $0xe] sm:$0x1] }
 0x467   :  { %v954_v26 = vld [vmem:[#allocation4 + $0xf] sm:$0x1]  ;;  %953 = vst.msk [vmem:[#allocation3 + $0xe] sm:$0x1] %vm12366_vm5, %v952_v25  ;;  %v956_v33 = vld [vmem:[#allocation4 + $0x10] sm:$0x1] }
 0x468   :  { %955 = vst.msk [vmem:[#allocation3 + $0xf] sm:$0x1] %vm12366_vm5, %v954_v26  ;;  %v958_v34 = vld [vmem:[#allocation4 + $0x11] sm:$0x1]  ;;  %v960_v35 = vld [vmem:[#allocation4 + $0x12] sm:$0x1] }
 0x469   :  { %957 = vst.msk [vmem:[#allocation3 + $0x10] sm:$0x1] %vm12366_vm5, %v956_v33  ;;  %959 = vst.msk [vmem:[#allocation3 + $0x11] sm:$0x1] %vm12366_vm5, %v958_v34  ;;  %v12432_v38 = vld [vmem:[#allocation3] sm:$0xff]  ;;  %v1066_v11 = vld [vmem:[%s17046_s7 + $0x328] sm:$0xff] }
 0x46a   :  { %961 = vst.msk [vmem:[#allocation3 + $0x12] sm:$0x1] %vm12366_vm5, %v960_v35  ;;  %v1280_v46 = vrot.slane %v12432_v38, %v11866_v55  ;;  %v1288_v47 = vrot.slane %v12432_v38, %v12402_v23  ;;  %v1276_v62 = vrot.slane %v12432_v38, %v11860_v53  ;;  %v1284_v48 = vrot.slane %v12432_v38, %v12405_v27  ;;  %v1051_v12 = vld [vmem:[%s17046_s7 + $0x2b0] sm:$0xff]  ;;  %v1052_v29 = vld [vmem:[%s17046_s7 + $0x2b8] sm:$0xff]  ;;  %v1053_v22 = vld [vmem:[%s17046_s7 + $0x2c0] sm:$0xff] }
 0x46b   :  { %v1296_v50 = vrot.slane %v12432_v38, %v12435_v41  ;;  %v1304_v56 = vrot.slane %v12432_v38, %v12438_v42  ;;  %v1083_v13 = vld [vmem:[%s17046_s7 + $0x3b0] sm:$0xff]  ;;  %v1084_v63 = vld [vmem:[%s17046_s7 + $0x3b8] sm:$0xff]  ;;  %v10544_v30 = vpack.c.bf16 %v1066_v11, %v1065_v8  ;;  %v10514_v15 = vpack.c.bf16 %v1052_v29, %v1051_v12  ;;  %v1054_v43 = vld [vmem:[%s17046_s7 + $0x2c8] sm:$0xff] }
 0x46c   :  { %1432 = vmatprep.mubr.f32.mxu1 %v1280_v46  ;;  %1502 = vmatprep.mubr.f32.mxu0 %v1288_v47  ;;  %v1035_v10 = vld [vmem:[%s17046_s7 + $0x230] sm:$0xff]  ;;  %v1036_v60 = vld [vmem:[%s17046_s7 + $0x238] sm:$0xff]  ;;  %v10546_v16 = vpack.c.bf16 %v1084_v63, %v1083_v13  ;;  %v1086_v25 = vld [vmem:[%s17046_s7 + $0x3c8] sm:$0xff]  ;;  %v10518_v33 = vpack.c.bf16 %v1054_v43, %v1053_v22 }
 0x46d   :  { %1433 = vmatmul.mubr.f32.vlgmr.msra.gmra.mrb[18].mxu1 %v1276_v62  ;;  %1503 = vmatmul.mubr.f32.vlgmr.msra.gmra.mrb[10].mxu0 %v1284_v48  ;;  %v1067_v21 = vld [vmem:[%s17046_s7 + $0x330] sm:$0xff]  ;;  %v1068_v9 = vld [vmem:[%s17046_s7 + $0x338] sm:$0xff]  ;;  %v10516_v26 = vpack.c.bf16 %v1036_v60, %v1035_v10  ;;  %v10550_v34 = vpack.c.bf16 %v1086_v25, %v1085_v24  ;;  %v1069_v35 = vld [vmem:[%s17046_s7 + $0x340] sm:$0xff] }
 0x46e   :  { %10505 = vmatpush3.bf16.msra.mxu1 %v10504_v39  ;;  %10537 = vmatpush3.bf16.msra.mxu0 %v10536_v40  ;;  %v10548_v28 = vpack.c.bf16 %v1068_v9, %v1067_v21  ;;  %v1056_v39 = vld [vmem:[%s17046_s7 + $0x2d8] sm:$0xff]  ;;  %v1087_v40 = vld [vmem:[%s17046_s7 + $0x3d0] sm:$0xff]  ;;  %v10552_v46 = vpack.c.bf16 %v1070_v36, %v1069_v35  ;;  %v1041_v18 = vld [vmem:[%s17046_s7 + $0x260] sm:$0xff] }
 0x46f   :  { %1572 = vmatprep.mubr.f32.mxu1 %v1296_v50  ;;  %1642 = vmatprep.mubr.f32.mxu0 %v1304_v56  ;;  %v1039_v47 = vld [vmem:[%s17046_s7 + $0x250] sm:$0xff]  ;;  %v1040_v62 = vld [vmem:[%s17046_s7 + $0x258] sm:$0xff]  ;;  %v10522_v48 = vpack.c.bf16 %v1056_v39, %v1055_v37  ;;  %v10554_v49 = vpack.c.bf16 %v1088_v44, %v1087_v40  ;;  %v1042_v50 = vld [vmem:[%s17046_s7 + $0x268] sm:$0xff]  ;;  %v10526_v56 = vpack.c.bf16 %v1058_v2, %v1057_v0 }
 0x470   :  { %10507 = vmatprep.subr.bf16.mxu1 %v10506_v58  ;;  %10539 = vmatprep.subr.bf16.mxu0 %v10538_v59  ;;  %v1089_v58 = vld [vmem:[%s17046_s7 + $0x3e0] sm:$0xff]  ;;  %v1090_v59 = vld [vmem:[%s17046_s7 + $0x3e8] sm:$0xff]  ;;  %v10524_v57 = vpack.c.bf16 %v1040_v62, %v1039_v47  ;;  %v1059_v4 = vld [vmem:[%s17046_s7 + $0x2f0] sm:$0xff]  ;;  %v10528_v11 = vpack.c.bf16 %v1042_v50, %v1041_v18  ;;  %v10604_v18 = vpack.c.bf16 %v1128_v17, %v1127_v1 }
 0x471   :  { %v1074_v3 = vld [vmem:[%s17046_s7 + $0x368] sm:$0xff]  ;;  %v1092_v8 = vld [vmem:[%s17046_s7 + $0x3f8] sm:$0xff]  ;;  %v1043_v29 = vld [vmem:[%s17046_s7 + $0x270] sm:$0xff] }
 0x472   :  { %10509 = vmatpush3.bf16.msra.mxu1 %v10508_v61  ;;  %10541 = vmatpush3.bf16.msra.mxu0 %v10540_v19  ;;  %v10558_v61 = vpack.c.bf16 %v1090_v59, %v1089_v58  ;;  %v1073_v19 = vld [vmem:[%s17046_s7 + $0x360] sm:$0xff]  ;;  %v1044_v13 = vld [vmem:[%s17046_s7 + $0x278] sm:$0xff]  ;;  %v1142_v21 = vld [vmem:[%s17046_s7 + $0x588] sm:$0xff] }
 0x473   :  { %10511 = vmatprep.subr.bf16.mxu1 %v10510_v5  ;;  %10543 = vmatprep.subr.bf16.mxu0 %v10542_v20  ;;  %v1060_v5 = vld [vmem:[%s17046_s7 + $0x2f8] sm:$0xff]  ;;  %v1091_v20 = vld [vmem:[%s17046_s7 + $0x3f0] sm:$0xff]  ;;  %v10560_v12 = vpack.c.bf16 %v1074_v3, %v1073_v19  ;;  %v1109_v60 = vld [vmem:[%s17046_s7 + $0x480] sm:$0xff]  ;;  %v10532_v9 = vpack.c.bf16 %v1044_v13, %v1043_v29 }
 0x474   :  { %v10530_v63 = vpack.c.bf16 %v1060_v5, %v1059_v4  ;;  %v1076_v10 = vld [vmem:[%s17046_s7 + $0x378] sm:$0xff]  ;;  %v1093_v43 = vld [vmem:[%s17046_s7 + $0x400] sm:$0xff]  ;;  %v1094_v24 = vld [vmem:[%s17046_s7 + $0x408] sm:$0xff] }
 0x475   :  { %v1125_v25 = vld [vmem:[%s17046_s7 + $0x500] sm:$0xff]  ;;  %v1112_v35 = vld [vmem:[%s17046_s7 + $0x498] sm:$0xff]  ;;  %v1143_v36 = vld [vmem:[%s17046_s7 + $0x590] sm:$0xff]  ;;  %v10568_v40 = vpack.c.bf16 %v1094_v24, %v1093_v43 }
 0x476   :  { %10513 = vmatpush3.bf16.msra.mxu1 %v10512_v14  ;;  %10545 = vmatpush3.bf16.msra.mxu0 %v10544_v30  ;;  %v10562_v14 = vpack.c.bf16 %v1092_v8, %v1091_v20  ;;  %v1075_v30 = vld [vmem:[%s17046_s7 + $0x370] sm:$0xff]  ;;  %v1144_v37 = vld [vmem:[%s17046_s7 + $0x598] sm:$0xff]  ;;  %v1113_v0 = vld [vmem:[%s17046_s7 + $0x4a0] sm:$0xff] }
 0x477   :  { %10515 = vmatprep.subr.bf16.mxu1 %v10514_v15  ;;  %10547 = vmatprep.subr.bf16.mxu0 %v10546_v16  ;;  %v1110_v15 = vld [vmem:[%s17046_s7 + $0x488] sm:$0xff]  ;;  %v1141_v16 = vld [vmem:[%s17046_s7 + $0x580] sm:$0xff]  ;;  %v10564_v22 = vpack.c.bf16 %v1076_v10, %v1075_v30  ;;  %v12656_v39 = vld [vmem:[#allocation3 + $0x8] sm:$0xff] }
 0x478   :  { %v10566_v31 = vpack.c.bf16 %v1110_v15, %v1109_v60  ;;  %v10598_v32 = vpack.c.bf16 %v1142_v21, %v1141_v16  ;;  %v1096_v47 = vld [vmem:[%s17046_s7 + $0x418] sm:$0xff]  ;;  %v1114_v2 = vld [vmem:[%s17046_s7 + $0x4a8] sm:$0xff]  ;;  %v1312_v59 = vrot.slane %v12656_v39, %v11866_v55  ;;  %v1097_v50 = vld [vmem:[%s17046_s7 + $0x420] sm:$0xff] }
 0x479   :  { %v1146_v58 = vld [vmem:[%s17046_s7 + $0x5a8] sm:$0xff]  ;;  %v1129_v3 = vld [vmem:[%s17046_s7 + $0x520] sm:$0xff]  ;;  %v1115_v5 = vld [vmem:[%s17046_s7 + $0x4b0] sm:$0xff] }
 0x47a   :  { %10517 = vmatpush3.bf16.msra.mxu1 %v10516_v26  ;;  %10549 = vmatpush3.bf16.msra.mxu0 %v10548_v28  ;;  %v12636_v26 = vsub.s32 4, %v11857_v52  ;;  %v12639_v28 = vsub.s32 6, %v11857_v52  ;;  %v1130_v4 = vld [vmem:[%s17046_s7 + $0x528] sm:$0xff]  ;;  %v1116_v20 = vld [vmem:[%s17046_s7 + $0x4b8] sm:$0xff]  ;;  %v1147_v8 = vld [vmem:[%s17046_s7 + $0x5b0] sm:$0xff] }
 0x47b   :  { %10519 = vmatprep.subr.bf16.mxu1 %v10518_v33  ;;  %10551 = vmatprep.subr.bf16.mxu0 %v10550_v34  ;;  %v1126_v33 = vld [vmem:[%s17046_s7 + $0x508] sm:$0xff]  ;;  %v1111_v34 = vld [vmem:[%s17046_s7 + $0x490] sm:$0xff]  ;;  %v10608_v29 = vpack.c.bf16 %v1130_v4, %v1129_v3  ;;  %v1132_v60 = vld [vmem:[%s17046_s7 + $0x538] sm:$0xff] }
 0x47c   :  { %17125 = vst [vmem:[#allocation16_spill] sm:$0xff] %v12636_v26  ;;  %17126 = vst [vmem:[#allocation17_spill] sm:$0xff] %v12639_v28  ;;  %v10600_v44 = vpack.c.bf16 %v1126_v33, %v1125_v25  ;;  %v1292_v62 = vrot.slane %v12432_v38, %v12636_v26  ;;  %v1099_v13 = vld [vmem:[%s17046_s7 + $0x430] sm:$0xff]  ;;  %v1117_v15 = vld [vmem:[%s17046_s7 + $0x4c0] sm:$0xff] }
 0x47d   :  { %v1131_v10 = vld [vmem:[%s17046_s7 + $0x530] sm:$0xff]  ;;  %v1118_v16 = vld [vmem:[%s17046_s7 + $0x4c8] sm:$0xff]  ;;  %v1149_v21 = vld [vmem:[%s17046_s7 + $0x5c0] sm:$0xff] }
 0x47e   :  { %10521 = vmatpush3.bf16.msra.mxu1 %v10520_v45  ;;  %10553 = vmatpush3.bf16.msra.mxu0 %v10552_v46  ;;  %v10570_v45 = vpack.c.bf16 %v1112_v35, %v1111_v34  ;;  %v1095_v46 = vld [vmem:[%s17046_s7 + $0x410] sm:$0xff]  ;;  %v10612_v43 = vpack.c.bf16 %v1132_v60, %v1131_v10  ;;  %v1101_v24 = vld [vmem:[%s17046_s7 + $0x440] sm:$0xff]  ;;  %v1102_v25 = vld [vmem:[%s17046_s7 + $0x448] sm:$0xff] }
 0x47f   :  { %10523 = vmatprep.subr.bf16.mxu1 %v10522_v48  ;;  %10555 = vmatprep.subr.bf16.mxu0 %v10554_v49  ;;  %v1300_v48 = vrot.slane %v12432_v38, %v12639_v28  ;;  %v10602_v49 = vpack.c.bf16 %v1144_v37, %v1143_v36  ;;  %v1145_v38 = vld [vmem:[%s17046_s7 + $0x5a0] sm:$0xff]  ;;  %v1134_v34 = vld [vmem:[%s17046_s7 + $0x548] sm:$0xff]  ;;  %v1119_v35 = vld [vmem:[%s17046_s7 + $0x4d0] sm:$0xff] }
 0x480   :  { %v10606_v19 = vpack.c.bf16 %v1146_v58, %v1145_v38  ;;  %v1133_v33 = vld [vmem:[%s17046_s7 + $0x540] sm:$0xff]  ;;  %v1120_v36 = vld [vmem:[%s17046_s7 + $0x4d8] sm:$0xff]  ;;  %v1151_v37 = vld [vmem:[%s17046_s7 + $0x5d0] sm:$0xff] }
 0x481   :  { %v1136_v1 = vld [vmem:[%s17046_s7 + $0x558] sm:$0xff]  ;;  %v1121_v17 = vld [vmem:[%s17046_s7 + $0x4e0] sm:$0xff]  ;;  %v1154_v38 = vld [vmem:[%s17046_s7 + $0x5e8] sm:$0xff] }
 0x482   :  { %10525 = vmatpush3.bf16.msra.mxu1 %v10524_v57  ;;  %10557 = vmatpush3.bf16.msra.mxu0 %v10556_v54  ;;  %v1320_v57 = vrot.slane %v12656_v39, %v12402_v23  ;;  %v10572_v54 = vpack.c.bf16 %v1096_v47, %v1095_v46  ;;  %v1103_v46 = vld [vmem:[%s17046_s7 + $0x450] sm:$0xff]  ;;  %v1104_v47 = vld [vmem:[%s17046_s7 + $0x458] sm:$0xff]  ;;  %v1174_v10 = vld [vmem:[%s17046_s7 + $0x688] sm:$0xff] }
 0x483   :  { %10527 = vmatprep.subr.bf16.mxu1 %v10526_v56  ;;  %10559 = vmatprep.subr.bf16.mxu0 %v10558_v61  ;;  %v1098_v56 = vld [vmem:[%s17046_s7 + $0x428] sm:$0xff]  ;;  %v10574_v61 = vpack.c.bf16 %v1114_v2, %v1113_v0  ;;  %v1153_v2 = vld [vmem:[%s17046_s7 + $0x5e0] sm:$0xff]  ;;  %v10588_v58 = vpack.c.bf16 %v1104_v47, %v1103_v46  ;;  %v1124_v3 = vld [vmem:[%s17046_s7 + $0x4f8] sm:$0xff] }
 0x484   :  { %v1122_v0 = vld [vmem:[%s17046_s7 + $0x4e8] sm:$0xff]  ;;  %v1155_v4 = vld [vmem:[%s17046_s7 + $0x5f0] sm:$0xff]  ;;  %v1205_v60 = vld [vmem:[%s17046_s7 + $0x780] sm:$0xff] }
 0x485   :  { %v1160_v46 = vld [vmem:[%s17046_s7 + $0x618] sm:$0xff]  ;;  %v1191_v47 = vld [vmem:[%s17046_s7 + $0x710] sm:$0xff] }
 0x486   :  { %10529 = vmatpush3.bf16.msra.mxu1 %v10528_v11  ;;  %10561 = vmatpush3.bf16.msra.mxu0 %v10560_v12  ;;  %v1148_v11 = vld [vmem:[%s17046_s7 + $0x5b8] sm:$0xff]  ;;  %v10576_v12 = vpack.c.bf16 %v1098_v56, %v1097_v50  ;;  %v10622_v50 = vpack.c.bf16 %v1154_v38, %v1153_v2  ;;  %v1137_v56 = vld [vmem:[%s17046_s7 + $0x560] sm:$0xff]  ;;  %v1336_v2 = vrot.slane %v12656_v39, %v12438_v42 }
 0x487   :  { %10531 = vmatprep.subr.bf16.mxu1 %v10530_v63  ;;  %10563 = vmatprep.subr.bf16.mxu0 %v10562_v14  ;;  %v1100_v63 = vld [vmem:[%s17046_s7 + $0x438] sm:$0xff]  ;;  %v10578_v14 = vpack.c.bf16 %v1116_v20, %v1115_v5  ;;  %v10610_v30 = vpack.c.bf16 %v1148_v11, %v1147_v8  ;;  %v1107_v11 = vld [vmem:[%s17046_s7 + $0x470] sm:$0xff]  ;;  %v1209_v38 = vld [vmem:[%s17046_s7 + $0x7a0] sm:$0xff] }
 0x488   :  { %v1156_v5 = vld [vmem:[%s17046_s7 + $0x5f8] sm:$0xff] }
 0x48a   :  { %10533 = vmatpush3.bf16.msra.mxu1 %v10532_v9  ;;  %10565 = vmatpush3.bf16.msra.mxu0 %v10564_v22  ;;  %v1150_v9 = vld [vmem:[%s17046_s7 + $0x5c8] sm:$0xff]  ;;  %v10580_v22 = vpack.c.bf16 %v1100_v63, %v1099_v13  ;;  %v10626_v13 = vpack.c.bf16 %v1156_v5, %v1155_v4  ;;  %v1139_v63 = vld [vmem:[%s17046_s7 + $0x570] sm:$0xff]  ;;  %v1180_v4 = vld [vmem:[%s17046_s7 + $0x6b8] sm:$0xff] }
 0x48b   :  { %10567 = vmatprep.subr.bf16.mxu1 %v10566_v31  ;;  %10599 = vmatprep.subr.bf16.mxu0 %v10598_v32  ;;  %v10582_v31 = vpack.c.bf16 %v1118_v16, %v1117_v15  ;;  %v10614_v32 = vpack.c.bf16 %v1150_v9, %v1149_v21  ;;  %v1206_v15 = vld [vmem:[%s17046_s7 + $0x788] sm:$0xff]  ;;  %v1211_v5 = vld [vmem:[%s17046_s7 + $0x7b0] sm:$0xff] }
 0x48d   :  { %1573 = vmatmul.mubr.f32.vlgmr.msra.gmra.mrb[20].mxu1 %v1292_v62  ;;  %1643 = vmatmul.mubr.f32.vlgmr.msra.gmra.mrb[12].mxu0 %v1300_v48  ;;  %v10586_v62 = vpack.c.bf16 %v1120_v36, %v1119_v35  ;;  %v1208_v35 = vld [vmem:[%s17046_s7 + $0x798] sm:$0xff] }
 0x48e   :  { %10569 = vmatpush3.bf16.msra.mxu1 %v10568_v40  ;;  %10601 = vmatpush3.bf16.msra.mxu0 %v10600_v44  ;;  %v1152_v40 = vld [vmem:[%s17046_s7 + $0x5d8] sm:$0xff]  ;;  %v10584_v44 = vpack.c.bf16 %v1102_v25, %v1101_v24  ;;  %v1158_v24 = vld [vmem:[%s17046_s7 + $0x608] sm:$0xff]  ;;  %v1189_v25 = vld [vmem:[%s17046_s7 + $0x700] sm:$0xff] }
 0x48f   :  { %10571 = vmatprep.subr.bf16.mxu1 %v10570_v45  ;;  %10603 = vmatprep.subr.bf16.mxu0 %v10602_v49  ;;  %v10616_v45 = vpack.c.bf16 %v1134_v34, %v1133_v33  ;;  %v10618_v48 = vpack.c.bf16 %v1152_v40, %v1151_v37  ;;  %v1135_v49 = vld [vmem:[%s17046_s7 + $0x550] sm:$0xff]  ;;  %v1176_v33 = vld [vmem:[%s17046_s7 + $0x698] sm:$0xff]  ;;  %v1308_v37 = vrot.slane %v12656_v39, %v11860_v53 }
 0x490   :  { %1712 = vmatprep.mubr.f32.mxu1 %v1312_v59  ;;  %1782 = vmatprep.mubr.f32.mxu0 %v1320_v57  ;;  %v10620_v59 = vpack.c.bf16 %v1136_v1, %v1135_v49  ;;  %v1105_v57 = vld [vmem:[%s17046_s7 + $0x460] sm:$0xff]  ;;  %v1207_v34 = vld [vmem:[%s17046_s7 + $0x790] sm:$0xff]  ;;  %v1316_v40 = vrot.slane %v12656_v39, %v12405_v27  ;;  %v1192_v1 = vld [vmem:[%s17046_s7 + $0x718] sm:$0xff] }
 0x491   :  { %v10666_v49 = vpack.c.bf16 %v1208_v35, %v1207_v34  ;;  %v1184_v34 = vld [vmem:[%s17046_s7 + $0x6d8] sm:$0xff]  ;;  %v1215_v35 = vld [vmem:[%s17046_s7 + $0x7d0] sm:$0xff] }
 0x492   :  { %10573 = vmatpush3.bf16.msra.mxu1 %v10572_v54  ;;  %10605 = vmatpush3.bf16.msra.mxu0 %v10604_v18  ;;  %v1106_v54 = vld [vmem:[%s17046_s7 + $0x468] sm:$0xff]  ;;  %v10590_v18 = vpack.c.bf16 %v1122_v0, %v1121_v17  ;;  %v1177_v17 = vld [vmem:[%s17046_s7 + $0x6a0] sm:$0xff] }
 0x493   :  { %10575 = vmatprep.subr.bf16.mxu1 %v10574_v61  ;;  %10607 = vmatprep.subr.bf16.mxu0 %v10606_v19  ;;  %v1138_v61 = vld [vmem:[%s17046_s7 + $0x568] sm:$0xff]  ;;  %v1123_v19 = vld [vmem:[%s17046_s7 + $0x4f0] sm:$0xff]  ;;  %v10592_v20 = vpack.c.bf16 %v1106_v54, %v1105_v57  ;;  %v10668_v57 = vpack.c.bf16 %v1192_v1, %v1191_v47 }
 0x494   :  { %v10624_v8 = vpack.c.bf16 %v1138_v61, %v1137_v56  ;;  %v1178_v0 = vld [vmem:[%s17046_s7 + $0x6a8] sm:$0xff]  ;;  %v1193_v56 = vld [vmem:[%s17046_s7 + $0x720] sm:$0xff]  ;;  %v1199_v47 = vld [vmem:[%s17046_s7 + $0x750] sm:$0xff] }
 0x495   :  { %v10638_v54 = vpack.c.bf16 %v1178_v0, %v1177_v17  ;;  %v1186_v1 = vld [vmem:[%s17046_s7 + $0x6e8] sm:$0xff]  ;;  %v1217_v17 = vld [vmem:[%s17046_s7 + $0x7e0] sm:$0xff] }
 0x496   :  { %10577 = vmatpush3.bf16.msra.mxu1 %v10576_v12  ;;  %10609 = vmatpush3.bf16.msra.mxu0 %v10608_v29  ;;  %v1108_v12 = vld [vmem:[%s17046_s7 + $0x478] sm:$0xff]  ;;  %v10594_v29 = vpack.c.bf16 %v1124_v3, %v1123_v19  ;;  %v1194_v19 = vld [vmem:[%s17046_s7 + $0x728] sm:$0xff]  ;;  %v1179_v3 = vld [vmem:[%s17046_s7 + $0x6b0] sm:$0xff] }
 0x497   :  { %10579 = vmatprep.subr.bf16.mxu1 %v10578_v14  ;;  %10611 = vmatprep.subr.bf16.mxu0 %v10610_v30  ;;  %v1140_v14 = vld [vmem:[%s17046_s7 + $0x578] sm:$0xff]  ;;  %v1173_v30 = vld [vmem:[%s17046_s7 + $0x680] sm:$0xff]  ;;  %v10596_v16 = vpack.c.bf16 %v1108_v12, %v1107_v11  ;;  %v10672_v11 = vpack.c.bf16 %v1194_v19, %v1193_v56  ;;  %v10642_v12 = vpack.c.bf16 %v1180_v4, %v1179_v3  ;;  %v1218_v0 = vld [vmem:[%s17046_s7 + $0x7e8] sm:$0xff] }
 0x498   :  { %v10628_v21 = vpack.c.bf16 %v1140_v14, %v1139_v63  ;;  %v10630_v9 = vpack.c.bf16 %v1174_v10, %v1173_v30  ;;  %v1195_v63 = vld [vmem:[%s17046_s7 + $0x730] sm:$0xff]  ;;  %v1196_v30 = vld [vmem:[%s17046_s7 + $0x738] sm:$0xff]  ;;  %v1181_v10 = vld [vmem:[%s17046_s7 + $0x6c0] sm:$0xff] }
 0x499   :  { %v1187_v56 = vld [vmem:[%s17046_s7 + $0x6f0] sm:$0xff]  ;;  %v1220_v3 = vld [vmem:[%s17046_s7 + $0x7f8] sm:$0xff] }
 0x49a   :  { %10581 = vmatpush3.bf16.msra.mxu1 %v10580_v22  ;;  %10613 = vmatpush3.bf16.msra.mxu0 %v10612_v43  ;;  %v10662_v22 = vpack.c.bf16 %v1206_v15, %v1205_v60  ;;  %v1157_v43 = vld [vmem:[%s17046_s7 + $0x600] sm:$0xff]  ;;  %v1182_v60 = vld [vmem:[%s17046_s7 + $0x6c8] sm:$0xff]  ;;  %v1219_v19 = vld [vmem:[%s17046_s7 + $0x7f0] sm:$0xff] }
 0x49b   :  { %10583 = vmatprep.subr.bf16.mxu1 %v10582_v31  ;;  %10615 = vmatprep.subr.bf16.mxu0 %v10614_v32  ;;  %v1190_v31 = vld [vmem:[%s17046_s7 + $0x708] sm:$0xff]  ;;  %v1175_v32 = vld [vmem:[%s17046_s7 + $0x690] sm:$0xff]  ;;  %v10632_v36 = vpack.c.bf16 %v1158_v24, %v1157_v43  ;;  %v1213_v15 = vld [vmem:[%s17046_s7 + $0x7c0] sm:$0xff] }
 0x49c   :  { %v1165_v43 = vld [vmem:[%s17046_s7 + $0x640] sm:$0xff]  ;;  %v1166_v24 = vld [vmem:[%s17046_s7 + $0x648] sm:$0xff] }
 0x49e   :  { %10585 = vmatpush3.bf16.msra.mxu1 %v10584_v44  ;;  %10617 = vmatpush3.bf16.msra.mxu0 %v10616_v45  ;;  %v10664_v44 = vpack.c.bf16 %v1190_v31, %v1189_v25  ;;  %v1159_v45 = vld [vmem:[%s17046_s7 + $0x610] sm:$0xff]  ;;  %v1197_v25 = vld [vmem:[%s17046_s7 + $0x740] sm:$0xff] }
 0x49f   :  { %10587 = vmatprep.subr.bf16.mxu1 %v10586_v62  ;;  %10619 = vmatprep.subr.bf16.mxu0 %v10618_v48  ;;  %v1328_v62 = vrot.slane %v12656_v39, %v12435_v41  ;;  %v10634_v48 = vpack.c.bf16 %v1176_v33, %v1175_v32  ;;  %v1198_v32 = vld [vmem:[%s17046_s7 + $0x748] sm:$0xff]  ;;  %v1183_v33 = vld [vmem:[%s17046_s7 + $0x6d0] sm:$0xff] }
 0x4a2   :  { %10589 = vmatpush3.bf16.msra.mxu1 %v10588_v58  ;;  %10621 = vmatpush3.bf16.msra.mxu0 %v10620_v59  ;;  %v1210_v58 = vld [vmem:[%s17046_s7 + $0x7a8] sm:$0xff]  ;;  %v10636_v59 = vpack.c.bf16 %v1160_v46, %v1159_v45  ;;  %v1167_v45 = vld [vmem:[%s17046_s7 + $0x650] sm:$0xff]  ;;  %v1168_v46 = vld [vmem:[%s17046_s7 + $0x658] sm:$0xff] }
 0x4a3   :  { %10591 = vmatprep.subr.bf16.mxu1 %v10590_v18  ;;  %10623 = vmatprep.subr.bf16.mxu0 %v10622_v50  ;;  %v1161_v18 = vld [vmem:[%s17046_s7 + $0x620] sm:$0xff]  ;;  %v1162_v50 = vld [vmem:[%s17046_s7 + $0x628] sm:$0xff]  ;;  %v10670_v61 = vpack.c.bf16 %v1210_v58, %v1209_v38 }
 0x4a6   :  { %10593 = vmatpush3.bf16.msra.mxu1 %v10592_v20  ;;  %10625 = vmatpush3.bf16.msra.mxu0 %v10624_v8  ;;  %v1212_v20 = vld [vmem:[%s17046_s7 + $0x7b8] sm:$0xff]  ;;  %v10640_v8 = vpack.c.bf16 %v1162_v50, %v1161_v18  ;;  %v10686_v18 = vpack.c.bf16 %v1218_v0, %v1217_v17  ;;  %v1202_v50 = vld [vmem:[%s17046_s7 + $0x768] sm:$0xff]  ;;  %v1257_v17 = vld [vmem:[%s17046_s7 + $0x920] sm:$0xff] }
 0x4a7   :  { %10595 = vmatprep.subr.bf16.mxu1 %v10594_v29  ;;  %10627 = vmatprep.subr.bf16.mxu0 %v10626_v13  ;;  %v1163_v29 = vld [vmem:[%s17046_s7 + $0x630] sm:$0xff]  ;;  %v1164_v13 = vld [vmem:[%s17046_s7 + $0x638] sm:$0xff]  ;;  %v10674_v14 = vpack.c.bf16 %v1212_v20, %v1211_v5  ;;  %v1258_v0 = vld [vmem:[%s17046_s7 + $0x928] sm:$0xff] }
 0x4aa   :  { %10597 = vmatpush3.bf16.msra.mxu1 %v10596_v16  ;;  %10629 = vmatpush3.bf16.msra.mxu0 %v10628_v21  ;;  %v1214_v16 = vld [vmem:[%s17046_s7 + $0x7c8] sm:$0xff]  ;;  %v10644_v21 = vpack.c.bf16 %v1164_v13, %v1163_v29  ;;  %v10690_v29 = vpack.c.bf16 %v1220_v3, %v1219_v19  ;;  %v1204_v13 = vld [vmem:[%s17046_s7 + $0x778] sm:$0xff] }
 0x4ab   :  { %10631 = vmatprep.subr.bf16.mxu1 %v10630_v9  ;;  %10663 = vmatprep.subr.bf16.mxu0 %v10662_v22  ;;  %v10676_v9 = vpack.c.bf16 %v1196_v30, %v1195_v63  ;;  %v10646_v22 = vpack.c.bf16 %v1182_v60, %v1181_v10  ;;  %v10678_v31 = vpack.c.bf16 %v1214_v16, %v1213_v15  ;;  %v1237_v63 = vld [vmem:[%s17046_s7 + $0x880] sm:$0xff]  ;;  %v1222_v16 = vld [vmem:[%s17046_s7 + $0x808] sm:$0xff] }
 0x4ac   :  { %v1221_v15 = vld [vmem:[%s17046_s7 + $0x800] sm:$0xff]  ;;  %v1246_v19 = vld [vmem:[%s17046_s7 + $0x8c8] sm:$0xff] }
 0x4ad   :  { %1713 = vmatmul.mubr.f32.vlgmr.msra.gmra.mrb[22].mxu1 %v1308_v37  ;;  %1783 = vmatmul.mubr.f32.vlgmr.msra.gmra.mrb[14].mxu0 %v1316_v40  ;;  %v10648_v37 = vpack.c.bf16 %v1166_v24, %v1165_v43  ;;  %v10680_v40 = vpack.c.bf16 %v1198_v32, %v1197_v25  ;;  %v1240_v43 = vld [vmem:[%s17046_s7 + $0x898] sm:$0xff]  ;;  %v13046_v24 = vld [vmem:[#allocation3 + $0x10] sm:$0x7]  ;;  %v10696_v25 = vpack.c.bf16 %v1222_v16, %v1221_v15  ;;  %v1263_v15 = vld [vmem:[%s17046_s7 + $0x950] sm:$0xff] }
 0x4ae   :  { %10633 = vmatpush3.bf16.msra.mxu1 %v10632_v36  ;;  %1852 = vmatprep.mubr.f32.mxu1 %v1328_v62  ;;  %v1216_v36 = vld [vmem:[%s17046_s7 + $0x7d8] sm:$0xff] }
 0x4af   :  { %10665 = vmatpush3.bf16.msra.mxu0 %v10664_v44  ;;  %1922 = vmatprep.mubr.f32.mxu0 %v1336_v2  ;;  %v10650_v44 = vpack.c.bf16 %v1184_v34, %v1183_v33  ;;  %v10682_v62 = vpack.c.bf16 %v1216_v36, %v1215_v35  ;;  %v10652_v2 = vpack.c.bf16 %v1168_v46, %v1167_v45  ;;  %v1223_v34 = vld [vmem:[%s17046_s7 + $0x810] sm:$0xff]  ;;  %v1224_v35 = vld [vmem:[%s17046_s7 + $0x818] sm:$0xff]  ;;  %v1241_v45 = vld [vmem:[%s17046_s7 + $0x8a0] sm:$0xff] }
 0x4b0   :  { %10635 = vmatprep.subr.bf16.mxu1 %v10634_v48  ;;  %10667 = vmatprep.subr.bf16.mxu0 %v10666_v49  ;;  %v1200_v48 = vld [vmem:[%s17046_s7 + $0x758] sm:$0xff]  ;;  %v1185_v49 = vld [vmem:[%s17046_s7 + $0x6e0] sm:$0xff]  ;;  %v1255_v36 = vld [vmem:[%s17046_s7 + $0x910] sm:$0xff] }
 0x4b1   :  { %v10684_v38 = vpack.c.bf16 %v1200_v48, %v1199_v47  ;;  %v10654_v58 = vpack.c.bf16 %v1186_v1, %v1185_v49  ;;  %v1242_v46 = vld [vmem:[%s17046_s7 + $0x8a8] sm:$0xff]  ;;  %v1344_v47 = vrot.slane %v13046_v24, %v11866_v55  ;;  %v1225_v49 = vld [vmem:[%s17046_s7 + $0x820] sm:$0xff]  ;;  %v1264_v16 = vld [vmem:[%s17046_s7 + $0x958] sm:$0xff] }
 0x4b2   :  { %10637 = vmatpush3.bf16.msra.mxu1 %v10636_v59  ;;  %v1169_v59 = vld [vmem:[%s17046_s7 + $0x660] sm:$0xff]  ;;  %v10702_v48 = vpack.c.bf16 %v1242_v46, %v1241_v45  ;;  %v1226_v1 = vld [vmem:[%s17046_s7 + $0x828] sm:$0xff]  ;;  %v1235_v46 = vld [vmem:[%s17046_s7 + $0x870] sm:$0xff] }
 0x4b3   :  { %10669 = vmatpush3.bf16.msra.mxu0 %v10668_v57  ;;  %10639 = vmatprep.subr.bf16.mxu1 %v10638_v54  ;;  %v1170_v57 = vld [vmem:[%s17046_s7 + $0x668] sm:$0xff]  ;;  %v1201_v54 = vld [vmem:[%s17046_s7 + $0x760] sm:$0xff] }
 0x4b4   :  { %10671 = vmatprep.subr.bf16.mxu0 %v10670_v61  ;;  %v1188_v61 = vld [vmem:[%s17046_s7 + $0x6f8] sm:$0xff]  ;;  %v10656_v4 = vpack.c.bf16 %v1170_v57, %v1169_v59  ;;  %v10688_v5 = vpack.c.bf16 %v1202_v50, %v1201_v54  ;;  %v10733_v59 = vpack.c.bf16 %v1258_v0, %v1257_v17  ;;  %v1227_v54 = vld [vmem:[%s17046_s7 + $0x830] sm:$0xff]  ;;  %v1348_v17 = vrot.slane %v13046_v24, %v12405_v27 }
 0x4b5   :  { %v10658_v20 = vpack.c.bf16 %v1188_v61, %v1187_v56  ;;  %v1259_v50 = vld [vmem:[%s17046_s7 + $0x930] sm:$0xff]  ;;  %v1260_v56 = vld [vmem:[%s17046_s7 + $0x938] sm:$0xff]  ;;  %v1245_v61 = vld [vmem:[%s17046_s7 + $0x8c0] sm:$0xff] }
 0x4b6   :  { %10641 = vmatpush3.bf16.msra.mxu1 %v10640_v8  ;;  %v1171_v8 = vld [vmem:[%s17046_s7 + $0x670] sm:$0xff] }
 0x4b7   :  { %10673 = vmatpush3.bf16.msra.mxu0 %v10672_v11  ;;  %10643 = vmatprep.subr.bf16.mxu1 %v10642_v12  ;;  %v1172_v11 = vld [vmem:[%s17046_s7 + $0x678] sm:$0xff]  ;;  %v1203_v12 = vld [vmem:[%s17046_s7 + $0x770] sm:$0xff] }
 0x4b8   :  { %10675 = vmatprep.subr.bf16.mxu0 %v10674_v14  ;;  %v1238_v14 = vld [vmem:[%s17046_s7 + $0x888] sm:$0xff]  ;;  %v10660_v30 = vpack.c.bf16 %v1172_v11, %v1171_v8  ;;  %v10692_v10 = vpack.c.bf16 %v1204_v13, %v1203_v12  ;;  %v1261_v11 = vld [vmem:[%s17046_s7 + $0x940] sm:$0xff]  ;;  %v1248_v13 = vld [vmem:[%s17046_s7 + $0x8d8] sm:$0xff] }
 0x4b9   :  { %v10694_v60 = vpack.c.bf16 %v1238_v14, %v1237_v63  ;;  %v1230_v8 = vld [vmem:[%s17046_s7 + $0x848] sm:$0xff] }
 0x4ba   :  { %10645 = vmatpush3.bf16.msra.mxu1 %v10644_v21  ;;  %v1253_v21 = vld [vmem:[%s17046_s7 + $0x900] sm:$0xff]  ;;  %v1262_v12 = vld [vmem:[%s17046_s7 + $0x948] sm:$0xff] }
 0x4bb   :  { %10677 = vmatpush3.bf16.msra.mxu0 %v10676_v9  ;;  %10647 = vmatprep.subr.bf16.mxu1 %v10646_v22  ;;  %v1254_v9 = vld [vmem:[%s17046_s7 + $0x908] sm:$0xff]  ;;  %v1239_v22 = vld [vmem:[%s17046_s7 + $0x890] sm:$0xff]  ;;  %v10739_v14 = vpack.c.bf16 %v1262_v12, %v1261_v11 }
 0x4bc   :  { %10679 = vmatprep.subr.bf16.mxu0 %v10678_v31  ;;  %v1324_v31 = vrot.slane %v12656_v39, %v12636_v26  ;;  %v10727_v32 = vpack.c.bf16 %v1254_v9, %v1253_v21  ;;  %v10698_v33 = vpack.c.bf16 %v1240_v43, %v1239_v22  ;;  %v1249_v21 = vld [vmem:[%s17046_s7 + $0x8e0] sm:$0xff]  ;;  %v1250_v9 = vld [vmem:[%s17046_s7 + $0x8e8] sm:$0xff]  ;;  %v10742_v43 = vpack.c.bf16 %v1264_v16, %v1263_v15 }
 0x4be   :  { %10649 = vmatpush3.bf16.msra.mxu1 %v10648_v37  ;;  %v1332_v37 = vrot.slane %v12656_v39, %v12639_v28  ;;  %v10700_v39 = vpack.c.bf16 %v1224_v35, %v1223_v34  ;;  %v1266_v34 = vld [vmem:[%s17046_s7 + $0x968] sm:$0xff]  ;;  %v1251_v35 = vld [vmem:[%s17046_s7 + $0x8f0] sm:$0xff] }
 0x4bf   :  { %10681 = vmatpush3.bf16.msra.mxu0 %v10680_v40  ;;  %10651 = vmatprep.subr.bf16.mxu1 %v10650_v44  ;;  %v17063_v40 = vmov 0.0|0.0   ;;  %v1256_v44 = vld [vmem:[%s17046_s7 + $0x918] sm:$0xff] }
 0x4c0   :  { %10683 = vmatprep.subr.bf16.mxu0 %v10682_v62  ;;  %v10730_v62 = vpack.c.bf16 %v1256_v44, %v1255_v36  ;;  %v1252_v36 = vld [vmem:[%s17046_s7 + $0x8f8] sm:$0xff] }
 0x4c1   :  { %v10722_v45 = vpack.c.bf16 %v1252_v36, %v1251_v35 }
 0x4c2   :  { %10653 = vmatpush3.bf16.msra.mxu1 %v10652_v2  ;;  %v1243_v2 = vld [vmem:[%s17046_s7 + $0x8b0] sm:$0xff] }
 0x4c3   :  { %10685 = vmatpush3.bf16.msra.mxu0 %v10684_v38  ;;  %10655 = vmatprep.subr.bf16.mxu1 %v10654_v58  ;;  %v1244_v38 = vld [vmem:[%s17046_s7 + $0x8b8] sm:$0xff]  ;;  %v10704_v58 = vpack.c.bf16 %v1226_v1, %v1225_v49  ;;  %v1340_v1 = vrot.slane %v13046_v24, %v11860_v53 }
 0x4c4   :  { %10687 = vmatprep.subr.bf16.mxu0 %v10686_v18  ;;  %v10706_v57 = vpack.c.bf16 %v1244_v38, %v1243_v2  ;;  %v1228_v18 = vld [vmem:[%s17046_s7 + $0x838] sm:$0xff]  ;;  %v1269_v38 = vld [vmem:[%s17047_s8] sm:$0x1] }
 0x4c5   :  { %v10708_v3 = vpack.c.bf16 %v1228_v18, %v1227_v54 }
 0x4c6   :  { %10657 = vmatpush3.bf16.msra.mxu1 %v10656_v4  ;;  %v10736_v4 = vpack.c.bf16 %v1260_v56, %v1259_v50 }
 0x4c7   :  { %10689 = vmatpush3.bf16.msra.mxu0 %v10688_v5  ;;  %10659 = vmatprep.subr.bf16.mxu1 %v10658_v20  ;;  %v10710_v5 = vpack.c.bf16 %v1246_v19, %v1245_v61  ;;  %v1229_v20 = vld [vmem:[%s17046_s7 + $0x840] sm:$0xff] }
 0x4c8   :  { %10691 = vmatprep.subr.bf16.mxu0 %v10690_v29  ;;  %v1247_v29 = vld [vmem:[%s17046_s7 + $0x8d0] sm:$0xff]  ;;  %v10712_v63 = vpack.c.bf16 %v1230_v8, %v1229_v20 }
 0x4ca   :  { %10661 = vmatpush3.bf16.msra.mxu1 %v10660_v30  ;;  %v10714_v30 = vpack.c.bf16 %v1248_v13, %v1247_v29 }
 0x4cb   :  { %10693 = vmatpush3.bf16.msra.mxu0 %v10692_v10  ;;  %10695 = vmatprep.subr.bf16.mxu1 %v10694_v60  ;;  %v1231_v10 = vld [vmem:[%s17046_s7 + $0x850] sm:$0xff]  ;;  %v1232_v60 = vld [vmem:[%s17046_s7 + $0x858] sm:$0xff] }
 0x4cc   :  { %10726 = vmatprep.subr.bf16.mxu0 %v17063_v40  ;;  %v10716_v22 = vpack.c.bf16 %v1232_v60, %v1231_v10 }
 0x4cd   :  { %1853 = vmatmul.mubr.f32.vlgmr.msra.gmra.mrb[24].mxu1 %v1324_v31  ;;  %v1233_v31 = vld [vmem:[%s17046_s7 + $0x860] sm:$0xff] }
 0x4ce   :  { %1923 = vmatmul.mubr.f32.vlgmr.msra.gmra.mrb[16].mxu0 %v1332_v37  ;;  %10697 = vmatpush3.bf16.msra.mxu1 %v10696_v25  ;;  %v10718_v25 = vpack.c.bf16 %v1250_v9, %v1249_v21 }
 0x4cf   :  { %10728 = vmatpush3.bf16.msra.mxu0 %v10727_v32  ;;  %10699 = vmatprep.subr.bf16.mxu1 %v10698_v33  ;;  %v1234_v32 = vld [vmem:[%s17046_s7 + $0x868] sm:$0xff]  ;;  %v1265_v33 = vld [vmem:[%s17046_s7 + $0x960] sm:$0xff] }
 0x4d0   :  { %10729 = vmatprep.subr.bf16.mxu0 %v17063_v40  ;;  %1992 = vmatprep.mubr.f32.mxu1 %v1344_v47  ;;  %v10720_v37 = vpack.c.bf16 %v1234_v32, %v1233_v31  ;;  %v10745_v44 = vpack.c.bf16 %v1266_v34, %v1265_v33  ;;  %v1236_v47 = vld [vmem:[%s17046_s7 + $0x878] sm:$0xff] }
 0x4d1   :  { %9918 = vmatprep.mubr.msk.f32.mxu0 %vm11640_vm6, %v17065_v6 }
 0x4d2   :  { %10701 = vmatpush3.bf16.msra.mxu1 %v10700_v39  ;;  %v1267_v39 = vld [vmem:[%s17046_s7 + $0x970] sm:$0xff] }
 0x4d3   :  { %10731 = vmatpush3.bf16.msra.mxu0 %v10730_v62  ;;  %10703 = vmatprep.subr.bf16.mxu1 %v10702_v48  ;;  %v1268_v62 = vld [vmem:[%s17046_s7 + $0x978] sm:$0xff]  ;;  %v10724_v48 = vpack.c.bf16 %v1236_v47, %v1235_v46 }
 0x4d4   :  { %10732 = vmatprep.subr.bf16.mxu0 %v17063_v40  ;;  %v10748_v49 = vpack.c.bf16 %v1268_v62, %v1267_v39  ;;  %v2098_v62 = vld [vmem:[%s17050_s11 + $0x8] sm:$0xff] }
 0x4d6   :  { %10705 = vmatpush3.bf16.msra.mxu1 %v10704_v58 }
 0x4d7   :  { %10734 = vmatpush3.bf16.msra.mxu0 %v10733_v59  ;;  %10707 = vmatprep.subr.bf16.mxu1 %v10706_v57 }
 0x4d8   :  { %10735 = vmatprep.subr.bf16.mxu0 %v17063_v40 }
 0x4da   :  { %10709 = vmatpush3.bf16.msra.mxu1 %v10708_v3 }
 0x4db   :  { %10737 = vmatpush3.bf16.msra.mxu0 %v10736_v4  ;;  %10711 = vmatprep.subr.bf16.mxu1 %v10710_v5 }
 0x4dc   :  { %10738 = vmatprep.subr.bf16.mxu0 %v17063_v40 }
 0x4de   :  { %10713 = vmatpush3.bf16.msra.mxu1 %v10712_v63 }
 0x4df   :  { %10740 = vmatpush3.bf16.msra.mxu0 %v10739_v14  ;;  %10715 = vmatprep.subr.bf16.mxu1 %v10714_v30 }
 0x4e0   :  { %10741 = vmatprep.subr.bf16.mxu0 %v17063_v40 }
 0x4e2   :  { %10717 = vmatpush3.bf16.msra.mxu1 %v10716_v22 }
 0x4e3   :  { %10743 = vmatpush3.bf16.msra.mxu0 %v10742_v43  ;;  %10719 = vmatprep.subr.bf16.mxu1 %v10718_v25 }
 0x4e4   :  { %10744 = vmatprep.subr.bf16.mxu0 %v17063_v40 }
 0x4e6   :  { %10721 = vmatpush3.bf16.msra.mxu1 %v10720_v37 }
 0x4e7   :  { %10746 = vmatpush3.bf16.msra.mxu0 %v10745_v44  ;;  %10723 = vmatprep.subr.bf16.mxu1 %v10722_v45 }
 0x4e8   :  { %10747 = vmatprep.subr.bf16.mxu0 %v17063_v40 }
 0x4ea   :  { %10725 = vmatpush3.bf16.msra.mxu1 %v10724_v48  ;;  %v2117_v48 = vld [vmem:[%s17050_s11 + $0xa0] sm:$0xff] }
 0x4eb   :  { %10749 = vmatpush3.bf16.msra.mxu0 %v10748_v49  ;;  %v2100_v49 = vld [vmem:[%s17050_s11 + $0x18] sm:$0xff] }
 0x4ed   :  { %1993 = vmatmul.mubr.f32.vlgmr.msra.gmra.mrb[26].mxu1 %v1340_v1  ;;  %v10750_v1 = vpack.c.bf16 %v2117_v48, %v2098_v62  ;;  %v2142_v62 = vld [vmem:[%s17050_s11 + $0x168] sm:$0xff]  ;;  %v2161_v48 = vld [vmem:[%s17050_s11 + $0x200] sm:$0xff] }
 0x4ee   :  { %9919 = vmatmul.mubr.f32.vlgmr.msra.gmra.mrb[18].mxu0 %v1348_v17  ;;  %2342 = vmatprep.mubr.f32.mxu1 %v17065_v6  ;;  %v2119_v17 = vld [vmem:[%s17050_s11 + $0xb0] sm:$0xff] }
 0x4ef   :  { %2413 = vmatprep.mubr.f32.mxu0 %v17065_v6  ;;  %10751 = vmatprep.subr.bf16.mxu1 %v10750_v1 }
 0x540   :  { %v9029_v0 = vpop.f32.mrb[18].mxu1  ;;  %v9064_v2 = vpop.f32.mrb[10].mxu0 }
 0x541   :  { %v9030_v58 = vpop.f32.mrb[19].mxu1  ;;  %v9065_v59 = vpop.f32.mrb[11].mxu0 }
 0x542   :  { %v9031_v57 = vadd.f32 %v9030_v58, %v9029_v0  ;;  %v9066_v54 = vadd.f32 %v9065_v59, %v9064_v2  ;;  %v2097_v0 = vld [vmem:[%s17050_s11] sm:$0xff]  ;;  %v2116_v2 = vld [vmem:[%s17050_s11 + $0x98] sm:$0xff]  ;;  %v2099_v59 = vld [vmem:[%s17050_s11 + $0x10] sm:$0xff] }
 0x543   :  { %v10752_v58 = vpack.c.bf16 %v2116_v2, %v2097_v0  ;;  %v2139_v2 = vld [vmem:[%s17050_s11 + $0x150] sm:$0xff] }
 0x544   :  { %v1435_v18 = vadd.f32 %v9031_v57, %v1269_v38  ;;  %v10758_v38 = vpack.c.bf16 %v2119_v17, %v2100_v49  ;;  %v2118_v57 = vld [vmem:[%s17050_s11 + $0xa8] sm:$0xff] }
 0x545   :  { %10753 = vmatpush1.bf16.msra.mxu1 %v10752_v58 }
 0x546   :  { %v1505_v50 = vadd.f32 %v9066_v54, %v1435_v18  ;;  %v10760_v54 = vpack.c.bf16 %v2118_v57, %v2099_v59  ;;  %10759 = vmatprep.subr.bf16.mxu0 %v10758_v38  ;;  %v2136_v18 = vld [vmem:[%s17050_s11 + $0x138] sm:$0xff]  ;;  %v2158_v38 = vld [vmem:[%s17050_s11 + $0x1e8] sm:$0xff]  ;;  %v10778_v57 = vpack.c.bf16 %v2161_v48, %v2142_v62  ;;  %v2169_v48 = vld [vmem:[%s17050_s11 + $0x240] sm:$0xff] }
 0x547   :  { %v2150_v62 = vld [vmem:[%s17050_s11 + $0x1a8] sm:$0xff] }
 0x548   :  { %10761 = vmatpush1.bf16.msra.mxu0 %v10760_v54  ;;  %v2141_v54 = vld [vmem:[%s17050_s11 + $0x160] sm:$0xff] }
 0x560   :  { %v9099_v56 = vpop.f32.mrb[20].mxu1  ;;  %v9134_v24 = vpop.f32.mrb[12].mxu0 }
 0x561   :  { %v9100_v61 = vpop.f32.mrb[21].mxu1  ;;  %v9135_v19 = vpop.f32.mrb[13].mxu0 }
 0x562   :  { %v9101_v3 = vadd.f32 %v9100_v61, %v9099_v56  ;;  %v9136_v4 = vadd.f32 %v9135_v19, %v9134_v24  ;;  %v2138_v56 = vld [vmem:[%s17050_s11 + $0x148] sm:$0xff]  ;;  %v2157_v61 = vld [vmem:[%s17050_s11 + $0x1e0] sm:$0xff]  ;;  %v2135_v19 = vld [vmem:[%s17050_s11 + $0x130] sm:$0xff] }
 0x564   :  { %v1575_v5 = vadd.f32 %v9101_v3, %v1505_v50  ;;  %v2155_v50 = vld [vmem:[%s17050_s11 + $0x1d0] sm:$0xff]  ;;  %v2154_v3 = vld [vmem:[%s17050_s11 + $0x1c8] sm:$0xff] }
 0x565   :  { %v10754_v24 = vpack.c.bf16 %v2155_v50, %v2136_v18  ;;  %v2160_v18 = vld [vmem:[%s17050_s11 + $0x1f8] sm:$0xff]  ;;  %v2106_v50 = vld [vmem:[%s17050_s11 + $0x48] sm:$0xff] }
 0x566   :  { %v1645_v20 = vadd.f32 %v9136_v4, %v1575_v5  ;;  %v10762_v4 = vpack.c.bf16 %v2157_v61, %v2138_v56  ;;  %v10756_v5 = vpack.c.bf16 %v2154_v3, %v2135_v19  ;;  %v2125_v56 = vld [vmem:[%s17050_s11 + $0xe0] sm:$0xff]  ;;  %v2127_v61 = vld [vmem:[%s17050_s11 + $0xf0] sm:$0xff]  ;;  %v10772_v19 = vpack.c.bf16 %v2158_v38, %v2139_v2  ;;  %v2166_v38 = vld [vmem:[%s17050_s11 + $0x228] sm:$0xff] }
 0x567   :  { %10755 = vmatprep.subr.bf16.mxu1 %v10754_v24  ;;  %v2108_v24 = vld [vmem:[%s17050_s11 + $0x58] sm:$0xff]  ;;  %v10780_v3 = vpack.c.bf16 %v2160_v18, %v2141_v54  ;;  %v10810_v2 = vpack.c.bf16 %v2169_v48, %v2150_v62  ;;  %v2114_v54 = vld [vmem:[%s17050_s11 + $0x88] sm:$0xff]  ;;  %v2133_v18 = vld [vmem:[%s17050_s11 + $0x120] sm:$0xff] }
 0x568   :  { %10763 = vmatprep.subr.bf16.mxu0 %v10762_v4  ;;  %10757 = vmatpush1.bf16.msra.mxu1 %v10756_v5  ;;  %v2105_v4 = vld [vmem:[%s17050_s11 + $0x40] sm:$0xff]  ;;  %v2124_v5 = vld [vmem:[%s17050_s11 + $0xd8] sm:$0xff] }
 0x580   :  { %v9169_v8 = vpop.f32.mrb[22].mxu1  ;;  %v9204_v11 = vpop.f32.mrb[14].mxu0 }
 0x581   :  { %v9170_v12 = vpop.f32.mrb[23].mxu1  ;;  %v9205_v29 = vpop.f32.mrb[15].mxu0 }
 0x582   :  { %v9171_v13 = vadd.f32 %v9170_v12, %v9169_v8  ;;  %v9206_v63 = vadd.f32 %v9205_v29, %v9204_v11  ;;  %v2156_v8 = vld [vmem:[%s17050_s11 + $0x1d8] sm:$0xff]  ;;  %v2102_v11 = vld [vmem:[%s17050_s11 + $0x28] sm:$0xff]  ;;  %v2121_v29 = vld [vmem:[%s17050_s11 + $0xc0] sm:$0xff] }
 0x584   :  { %v1715_v14 = vadd.f32 %v9171_v13, %v1645_v20  ;;  %v2137_v20 = vld [vmem:[%s17050_s11 + $0x140] sm:$0xff]  ;;  %v2104_v13 = vld [vmem:[%s17050_s11 + $0x38] sm:$0xff] }
 0x585   :  { %v10764_v12 = vpack.c.bf16 %v2156_v8, %v2137_v20  ;;  %v10782_v20 = vpack.c.bf16 %v2125_v56, %v2106_v50  ;;  %v10790_v8 = vpack.c.bf16 %v2127_v61, %v2108_v24  ;;  %v2113_v24 = vld [vmem:[%s17050_s11 + $0x80] sm:$0xff]  ;;  %v10814_v61 = vpack.c.bf16 %v2133_v18, %v2114_v54 }
 0x586   :  { %v1785_v30 = vadd.f32 %v9206_v63, %v1715_v14  ;;  %v2123_v63 = vld [vmem:[%s17050_s11 + $0xd0] sm:$0xff]  ;;  %v10766_v14 = vpack.c.bf16 %v2121_v29, %v2102_v11  ;;  %v2144_v29 = vld [vmem:[%s17050_s11 + $0x178] sm:$0xff] }
 0x587   :  { %10765 = vmatpush1.bf16.msra.mxu0 %v10764_v12  ;;  %v2107_v11 = vld [vmem:[%s17050_s11 + $0x50] sm:$0xff]  ;;  %v2126_v12 = vld [vmem:[%s17050_s11 + $0xe8] sm:$0xff] }
 0x588   :  { %10767 = vmatprep.subr.bf16.mxu1 %v10766_v14  ;;  %v2165_v14 = vld [vmem:[%s17050_s11 + $0x220] sm:$0xff] }
 0x5a0   :  { %v9239_v10 = vpop.f32.mrb[24].mxu1 }
 0x5a1   :  { %v9274_v60 = vpop.f32.mrb[16].mxu0  ;;  %v9240_v15 = vpop.f32.mrb[25].mxu1 }
 0x5a2   :  { %v9241_v16 = vadd.f32 %v9240_v15, %v9239_v10  ;;  %v9275_v21 = vpop.f32.mrb[17].mxu0 }
 0x5a3   :  { %v9276_v9 = vadd.f32 %v9275_v21, %v9274_v60  ;;  %v2083_v21 = vld [vmem:[%s17048_s9] sm:$0x1] }
 0x5a4   :  { %v1855_v22 = vadd.f32 %v9241_v16, %v1785_v30  ;;  %v10774_v30 = vpack.c.bf16 %v2123_v63, %v2104_v13  ;;  %v2163_v13 = vld [vmem:[%s17050_s11 + $0x210] sm:$0xff]  ;;  %v2146_v63 = vld [vmem:[%s17050_s11 + $0x188] sm:$0xff] }
 0x5a6   :  { %v1925_v43 = vadd.f32 %v9276_v9, %v1855_v22  ;;  %10775 = vmatprep.subr.bf16.mxu0 %v10774_v30  ;;  %v2085_v22 = vld [vmem:[%s17049_s10] sm:$0x1]  ;;  %v10784_v30 = vpack.c.bf16 %v2124_v5, %v2105_v4  ;;  %v2134_v4 = vld [vmem:[%s17050_s11 + $0x128] sm:$0xff]  ;;  %v2152_v5 = vld [vmem:[%s17050_s11 + $0x1b8] sm:$0xff] }
 0x5c0   :  { %v9309_v25 = vpop.f32.mrb[26].mxu1 }
 0x5c1   :  { %v2064_v31 = vpop.f32.mrb[18].mxu0  ;;  %v9310_v32 = vpop.f32.mrb[27].mxu1 }
 0x5c2   :  { %v9311_v33 = vadd.f32 %v9310_v32, %v9309_v25  ;;  %v9920_v34 = vpop.f32.mrb[19].mxu0 }
 0x5c4   :  { %v1995_v35 = vadd.f32 %v9311_v33, %v1925_v43 }
 0x5c6   :  { %v2065_v36 = vadd.f32 %v2064_v31, %v1995_v35 }
 0x5c8   :  { %v2069_v37 = vsel %vm2068_vm7, %v2065_v36, 0.0 }
 0x5c9   :  { %2070 = vadd.xlane.f32.xlu0 %v2069_v37  ;;  %v2120_v37 = vld [vmem:[%s17050_s11 + $0xb8] sm:$0xff] }
 0x656   :  { %v2071_v44 = vpop.xlane.xlu0 %2070 }
 0x657   :  { %v2073_v45 = vmul.f32 0.03125, %v2071_v44  ;;  %v2103_v44 = vld [vmem:[%s17050_s11 + $0x30] sm:$0xff] }
 0x659   :  { %v2074_v46 = vsub.f32 %v2065_v36, %v2073_v45  ;;  %v2101_v36 = vld [vmem:[%s17050_s11 + $0x20] sm:$0xff]  ;;  %v2122_v45 = vld [vmem:[%s17050_s11 + $0xc8] sm:$0xff] }
 0x65a   :  { %v10768_v17 = vpack.c.bf16 %v2120_v37, %v2101_v36  ;;  %v10776_v0 = vpack.c.bf16 %v2122_v45, %v2103_v44  ;;  %v2128_v36 = vld [vmem:[%s17050_s11 + $0xf8] sm:$0xff]  ;;  %v2111_v45 = vld [vmem:[%s17050_s11 + $0x70] sm:$0xff] }
 0x65b   :  { %v2075_v47 = vmul.f32 %v2074_v46, %v2074_v46 }
 0x65d   :  { %v2076_v39 = vsel %vm2068_vm7, %v2075_v47, 0.0 }
 0x65e   :  { %2077 = vadd.xlane.f32.xlu1 %v2076_v39  ;;  %v2159_v39 = vld [vmem:[%s17050_s11 + $0x1f0] sm:$0xff] }
 0x6eb   :  { %v2078_v10 = vpop.xlane.xlu1 %2077 }
 0x6ec   :  { %v2079_v60 = vmul.f32 0.03125, %v2078_v10  ;;  %v10792_v10 = vpack.c.bf16 %v2126_v12, %v2107_v11  ;;  %v2151_v12 = vld [vmem:[%s17050_s11 + $0x1b0] sm:$0xff] }
 0x6ee   :  { %v2080_v15 = vadd.f32 1e-05, %v2079_v60  ;;  %v2143_v60 = vld [vmem:[%s17050_s11 + $0x170] sm:$0xff] }
 0x6f0   :  { %11504 = vrsqrt.f32 %v2080_v15  ;;  %v2162_v15 = vld [vmem:[%s17050_s11 + $0x208] sm:$0xff] }
 0x6fa   :  { %v11505_v16 = vpop.eup %11504 }
 0x6fb   :  { %v2082_v9 = vmul.f32 %v11505_v16, %v2074_v46  ;;  %v2140_v46 = vld [vmem:[%s17050_s11 + $0x158] sm:$0xff]  ;;  %v10786_v16 = vpack.c.bf16 %v2163_v13, %v2144_v29  ;;  %v2170_v13 = vld [vmem:[%s17050_s11 + $0x248] sm:$0xff] }
 0x6fc   :  { %v10770_v59 = vpack.c.bf16 %v2159_v39, %v2140_v46  ;;  %v2130_v46 = vld [vmem:[%s17050_s11 + $0x108] sm:$0xff]  ;;  %v2167_v39 = vld [vmem:[%s17050_s11 + $0x230] sm:$0xff] }
 0x6fd   :  { %v2084_v43 = vmul.f32 %v2083_v21, %v2082_v9  ;;  %v10794_v21 = vpack.c.bf16 %v2165_v14, %v2146_v63  ;;  %v2145_v9 = vld [vmem:[%s17050_s11 + $0x180] sm:$0xff]  ;;  %v2172_v14 = vld [vmem:[%s17050_s11 + $0x258] sm:$0xff] }
 0x6fe   :  { %v2153_v63 = vld [vmem:[%s17050_s11 + $0x1c0] sm:$0xff] }
 0x6ff   :  { %v2086_v25 = vadd.f32 %v2085_v22, %v2084_v43  ;;  %v2164_v22 = vld [vmem:[%s17050_s11 + $0x218] sm:$0xff]  ;;  %v2110_v43 = vld [vmem:[%s17050_s11 + $0x68] sm:$0xff] }
 0x701   :  { %v2088_v31 = vmul.f32 0.044715, %v2086_v25  ;;  %v2087_v49 = vmul.f32 0.5, %v2086_v25 }
 0x703   :  { %v2089_v32 = vmul.f32 %v2088_v31, %v2086_v25  ;;  %v2112_v31 = vld [vmem:[%s17050_s11 + $0x78] sm:$0xff] }
 0x705   :  { %v2090_v33 = vmul.f32 %v2089_v32, %v2086_v25  ;;  %v2131_v32 = vld [vmem:[%s17050_s11 + $0x110] sm:$0xff] }
 0x706   :  { %v10806_v44 = vpack.c.bf16 %v2131_v32, %v2112_v31 }
 0x707   :  { %v2091_v34 = vadd.f32 %v2090_v33, %v2086_v25  ;;  %v2129_v25 = vld [vmem:[%s17050_s11 + $0x100] sm:$0xff]  ;;  %v10788_v33 = vpack.c.bf16 %v2162_v15, %v2143_v60 }
 0x708   :  { %v10798_v37 = vpack.c.bf16 %v2129_v25, %v2110_v43  ;;  %v2173_v60 = vld [vmem:[%s17051_s12] sm:$0xff] }
 0x709   :  { %v2092_v35 = vmul.f32 0.7978846, %v2091_v34  ;;  %v10796_v34 = vpack.c.bf16 %v2164_v22, %v2145_v9  ;;  %v2182_v15 = vrot.slane %v2173_v60, %v11860_v53 }
 0x70b   :  { %11506 = vtanh.f32 %v2092_v35  ;;  %v2109_v35 = vld [vmem:[%s17050_s11 + $0x60] sm:$0xff] }
 0x715   :  { %v11507_v47 = vpop.eup %11506 }
 0x716   :  { %v2094_v1 = vadd.f32 1.0, %v11507_v47  ;;  %v2148_v47 = vld [vmem:[%s17050_s11 + $0x198] sm:$0xff] }
 0x718   :  { %v13291_v58 = vmul.f32 %v2094_v1, %v2087_v49  ;;  %v10800_v49 = vpack.c.bf16 %v2128_v36, %v2109_v35  ;;  %v10808_v1 = vpack.c.bf16 %v2130_v46, %v2111_v45  ;;  %v2202_v46 = vrot.slane %v2173_v60, %v12435_v41 }
 0x71a   :  { %2096 = vst.msk [vmem:[#allocation6] sm:$0x1] %vm2068_vm7, %v13291_v58  ;;  %8776 = vmatmul.mubr.msk.f32.vlgmr.msra.gmra.mrb[28].mxu1 %vm2274_vm8, %v13291_v58  ;;  %8777 = vmatmul.mubr.msk.f32.vlgmr.msra.gmra.mrb[20].mxu0 %vm2274_vm8, %v13291_v58 }
 0x71b   :  { %10769 = vmatpush1.bf16.msra.mxu1 %v10768_v17  ;;  %10777 = vmatpush1.bf16.msra.mxu0 %v10776_v0  ;;  %v2147_v17 = vld [vmem:[%s17050_s11 + $0x190] sm:$0xff]  ;;  %v10802_v0 = vpack.c.bf16 %v2167_v39, %v2148_v47  ;;  %v2206_v39 = vrot.slane %v2173_v60, %v12639_v28 }
 0x71c   :  { %10771 = vmatprep.subr.bf16.mxu1 %v10770_v59  ;;  %10779 = vmatprep.subr.bf16.mxu0 %v10778_v57  ;;  %v2149_v59 = vld [vmem:[%s17050_s11 + $0x1a0] sm:$0xff]  ;;  %v2168_v57 = vld [vmem:[%s17050_s11 + $0x238] sm:$0xff]  ;;  %v10804_v50 = vpack.c.bf16 %v2166_v38, %v2147_v17 }
 0x71d   :  { %2484 = vmatprep.mubr.f32.mxu1 %v17065_v6  ;;  %2555 = vmatprep.mubr.f32.mxu0 %v17065_v6  ;;  %v10812_v56 = vpack.c.bf16 %v2168_v57, %v2149_v59  ;;  %v2174_v57 = vld [vmem:[%s17051_s12 + $0x8] sm:$0xff] }
 0x71f   :  { %10773 = vmatpush1.bf16.msra.mxu1 %v10772_v19  ;;  %10781 = vmatpush1.bf16.msra.mxu0 %v10780_v3  ;;  %v2132_v19 = vld [vmem:[%s17050_s11 + $0x118] sm:$0xff]  ;;  %v2115_v3 = vld [vmem:[%s17050_s11 + $0x90] sm:$0xff] }
 0x720   :  { %10783 = vmatprep.subr.bf16.mxu1 %v10782_v20  ;;  %10791 = vmatprep.subr.bf16.mxu0 %v10790_v8  ;;  %v2171_v20 = vld [vmem:[%s17050_s11 + $0x250] sm:$0xff]  ;;  %v10816_v8 = vpack.c.bf16 %v2132_v19, %v2113_v24  ;;  %v10823_v11 = vpack.c.bf16 %v2134_v4, %v2115_v3  ;;  %v2218_v3 = vrot.slane %v2174_v57, %v11866_v55 }
 0x721   :  { %v10818_v29 = vpack.c.bf16 %v2171_v20, %v2152_v5  ;;  %v2222_v5 = vrot.slane %v2174_v57, %v12405_v27 }
 0x722   :  { %8778 = vmatmul.mubr.msk.f32.vlgmr.msra.gmra.mrb[30].mxu1 %vm2274_vm8, %v13291_v58  ;;  %8779 = vmatmul.mubr.msk.f32.vlgmr.msra.gmra.mrb[22].mxu0 %vm2274_vm8, %v13291_v58 }
 0x723   :  { %10785 = vmatpush1.bf16.msra.mxu1 %v10784_v30  ;;  %10793 = vmatpush1.bf16.msra.mxu0 %v10792_v10  ;;  %v10820_v30 = vpack.c.bf16 %v2170_v13, %v2151_v12  ;;  %v10826_v10 = vpack.c.bf16 %v2172_v14, %v2153_v63  ;;  %v2226_v63 = vrot.slane %v2174_v57, %v12402_v23 }
 0x724   :  { %10787 = vmatprep.subr.bf16.mxu1 %v10786_v16  ;;  %10795 = vmatprep.subr.bf16.mxu0 %v10794_v21  ;;  %v2190_v16 = vrot.slane %v2173_v60, %v12405_v27  ;;  %v2186_v21 = vrot.slane %v2173_v60, %v11866_v55 }
 0x725   :  { %2626 = vmatprep.mubr.f32.mxu1 %v17065_v6  ;;  %2697 = vmatprep.mubr.f32.mxu0 %v17065_v6 }
 0x727   :  { %10789 = vmatpush1.bf16.msra.mxu1 %v10788_v33  ;;  %10797 = vmatpush1.bf16.msra.mxu0 %v10796_v34 }
 0x728   :  { %10799 = vmatprep.subr.bf16.mxu1 %v10798_v37  ;;  %10807 = vmatprep.subr.bf16.mxu0 %v10806_v44  ;;  %v2198_v44 = vrot.slane %v2173_v60, %v12636_v26 }
 0x72a   :  { %8780 = vmatmul.mubr.msk.f32.vlgmr.msra.gmra.mrb[32].mxu1 %vm2274_vm8, %v13291_v58  ;;  %8781 = vmatmul.mubr.msk.f32.vlgmr.msra.gmra.mrb[24].mxu0 %vm2274_vm8, %v13291_v58 }
 0x72b   :  { %10801 = vmatpush1.bf16.msra.mxu1 %v10800_v49  ;;  %10809 = vmatpush1.bf16.msra.mxu0 %v10808_v1 }
 0x72c   :  { %10803 = vmatprep.subr.bf16.mxu1 %v10802_v0  ;;  %10811 = vmatprep.subr.bf16.mxu0 %v10810_v2  ;;  %v2210_v2 = vrot.slane %v2173_v60, %v12438_v42 }
 0x72d   :  { %2768 = vmatprep.mubr.f32.mxu1 %v17065_v6  ;;  %2839 = vmatprep.mubr.f32.mxu0 %v17065_v6 }
 0x72f   :  { %10805 = vmatpush1.bf16.msra.mxu1 %v10804_v50  ;;  %10813 = vmatpush1.bf16.msra.mxu0 %v10812_v56 }
 0x730   :  { %10815 = vmatprep.subr.bf16.mxu1 %v10814_v61  ;;  %10822 = vmatprep.subr.bf16.mxu0 %v17063_v40  ;;  %v2214_v61 = vrot.slane %v2174_v57, %v11860_v53 }
 0x732   :  { %8782 = vmatmul.mubr.msk.f32.vlgmr.msra.gmra.mrb[34].mxu1 %vm2274_vm8, %v13291_v58  ;;  %8783 = vmatmul.mubr.msk.f32.vlgmr.msra.gmra.mrb[26].mxu0 %vm2274_vm8, %v13291_v58 }
 0x733   :  { %10817 = vmatpush1.bf16.msra.mxu1 %v10816_v8  ;;  %10824 = vmatpush3.bf16.msra.mxu0 %v10823_v11 }
 0x734   :  { %10819 = vmatprep.subr.bf16.mxu1 %v10818_v29  ;;  %10825 = vmatprep.subr.bf16.mxu0 %v17063_v40 }
 0x735   :  { %2910 = vmatprep.mubr.f32.mxu1 %v17065_v6  ;;  %9929 = vmatprep.mubr.msk.f32.mxu0 %vm11640_vm6, %v17065_v6 }
 0x737   :  { %10821 = vmatpush1.bf16.msra.mxu1 %v10820_v30  ;;  %10827 = vmatpush3.bf16.msra.mxu0 %v10826_v10 }
 0x738   :  { %10828 = vmatprep.subr.bf16.mxu1 %v17063_v40  ;;  %10831 = vmatprep.subr.bf16.mxu0 %v17063_v40 }
 0x73a   :  { %8784 = vmatmul.mubr.msk.f32.vlgmr.msra.gmra.mrb[36].mxu1 %vm2274_vm8, %v13291_v58  ;;  %9930 = vmatmul.mubr.msk.f32.vlgmr.msra.gmra.mrb[28].mxu0 %vm2274_vm8, %v13291_v58  ;;  %v2194_v58 = vrot.slane %v2173_v60, %v12402_v23 }
 0x73b   :  { %9938 = vmatprep.mubr.msk.f32.mxu1 %vm11640_vm6, %v17065_v6  ;;  %9959 = vmatprep.mubr.msk.f32.mxu0 %vm11640_vm6, %v17065_v6 }
 0x7ed   :  { %v2344_v9 = vpop.f32.mrb[28].mxu1  ;;  %v2415_v22 = vpop.f32.mrb[20].mxu0 }
 0x7ee   :  { %v13477_v43 = vadd.f32 %v2344_v9, %v2182_v15  ;;  %v2346_v25 = vpop.f32.mrb[29].mxu1  ;;  %v2417_v31 = vpop.f32.mrb[21].mxu0  ;;  %v13479_v32 = vadd.f32 %v2415_v22, %v2190_v16  ;;  %v2230_v22 = vrot.slane %v2174_v57, %v12636_v26 }
 0x7ef   :  { %v13481_v33 = vadd.f32 %v2346_v25, %v2186_v21  ;;  %v13487_v36 = vadd.f32 %v2417_v31, %v2194_v58  ;;  %v2234_v25 = vrot.slane %v2174_v57, %v12435_v41 }
 0x7f0   :  { %v2988_v34 = vsel %vm2987_vm9, %v13477_v43, 0.0  ;;  %v2991_v45 = vsel %vm2987_vm9, %v13479_v32, 0.0 }
 0x7f1   :  { %v2989_v35 = vsel %vm2987_vm9, %v13481_v33, 0.0  ;;  %v2993_v62 = vsel %vm2987_vm9, %v13487_v36, 0.0 }
 0x7f2   :  { %v2990_v37 = vadd.f32 %v2989_v35, %v2988_v34  ;;  %v2238_v34 = vrot.slane %v2174_v57, %v12639_v28 }
 0x7f4   :  { %v2992_v47 = vadd.f32 %v2991_v45, %v2990_v37 }
 0x7f5   :  { %v2486_v48 = vpop.f32.mrb[30].mxu1  ;;  %v2557_v49 = vpop.f32.mrb[22].mxu0 }
 0x7f6   :  { %v2994_v1 = vadd.f32 %v2993_v62, %v2992_v47  ;;  %v13496_v17 = vadd.f32 %v2486_v48, %v2198_v44  ;;  %v2488_v0 = vpop.f32.mrb[31].mxu1  ;;  %v2559_v38 = vpop.f32.mrb[23].mxu0  ;;  %v13506_v18 = vadd.f32 %v2557_v49, %v2206_v39  ;;  %v2242_v39 = vrot.slane %v2174_v57, %v12438_v42 }
 0x7f7   :  { %v13499_v59 = vadd.f32 %v2488_v0, %v2202_v46  ;;  %v13510_v24 = vadd.f32 %v2559_v38, %v2210_v2 }
 0x7f8   :  { %v2995_v54 = vsel %vm2987_vm9, %v13496_v17, 0.0  ;;  %v2999_v4 = vsel %vm2987_vm9, %v13506_v18, 0.0 }
 0x7f9   :  { %v2996_v50 = vadd.f32 %v2995_v54, %v2994_v1  ;;  %v2997_v56 = vsel %vm2987_vm9, %v13499_v59, 0.0  ;;  %v3001_v12 = vsel %vm2987_vm9, %v13510_v24, 0.0  ;;  %v2175_v1 = vld [vmem:[%s17051_s12 + $0x10] sm:$0x7] }
 0x7fa   :  { %v2246_v57 = vrot.slane %v2175_v1, %v11860_v53 }
 0x7fb   :  { %v2998_v19 = vadd.f32 %v2997_v56, %v2996_v50 }
 0x7fd   :  { %v3000_v20 = vadd.f32 %v2999_v4, %v2998_v19  ;;  %v2628_v8 = vpop.f32.mrb[32].mxu1  ;;  %v2699_v11 = vpop.f32.mrb[24].mxu0 }
 0x7fe   :  { %v13519_v29 = vadd.f32 %v2628_v8, %v2214_v61  ;;  %v2630_v13 = vpop.f32.mrb[33].mxu1  ;;  %v2701_v14 = vpop.f32.mrb[25].mxu0  ;;  %v13526_v15 = vadd.f32 %v2699_v11, %v2222_v5  ;;  %v2250_v61 = vrot.slane %v2175_v1, %v11866_v55 }
 0x7ff   :  { %v3002_v30 = vadd.f32 %v3001_v12, %v3000_v20  ;;  %v13522_v10 = vadd.f32 %v2630_v13, %v2218_v3  ;;  %v13530_v9 = vadd.f32 %v2701_v14, %v2226_v63  ;;  %v2254_v3 = vrot.slane %v2175_v1, %v12405_v27 }
 0x800   :  { %v3003_v60 = vsel %vm2987_vm9, %v13519_v29, 0.0  ;;  %v3007_v31 = vsel %vm2987_vm9, %v13526_v15, 0.0 }
 0x801   :  { %v3004_v16 = vadd.f32 %v3003_v60, %v3002_v30  ;;  %v3005_v21 = vsel %vm2987_vm9, %v13522_v10, 0.0  ;;  %v3009_v45 = vsel %vm2987_vm9, %v13530_v9, 0.0 }
 0x803   :  { %v3006_v58 = vadd.f32 %v3005_v21, %v3004_v16 }
 0x805   :  { %v3008_v35 = vadd.f32 %v3007_v31, %v3006_v58  ;;  %v2770_v37 = vpop.f32.mrb[34].mxu1  ;;  %v2841_v44 = vpop.f32.mrb[26].mxu0 }
 0x806   :  { %v13539_v46 = vadd.f32 %v2770_v37, %v2230_v22  ;;  %v2772_v47 = vpop.f32.mrb[35].mxu1  ;;  %v2843_v62 = vpop.f32.mrb[27].mxu0  ;;  %v13549_v2 = vadd.f32 %v2841_v44, %v2238_v34 }
 0x807   :  { %v3010_v48 = vadd.f32 %v3009_v45, %v3008_v35  ;;  %v13542_v49 = vadd.f32 %v2772_v47, %v2234_v25  ;;  %v13553_v50 = vadd.f32 %v2843_v62, %v2242_v39 }
 0x808   :  { %v3011_v0 = vsel %vm2987_vm9, %v13539_v46, 0.0  ;;  %v3015_v19 = vsel %vm2987_vm9, %v13549_v2, 0.0 }
 0x809   :  { %v3012_v38 = vadd.f32 %v3011_v0, %v3010_v48  ;;  %v3013_v54 = vsel %vm2987_vm9, %v13542_v49, 0.0  ;;  %v3017_v8 = vsel %vm2987_vm9, %v13553_v50, 0.0 }
 0x80b   :  { %v3014_v56 = vadd.f32 %v3013_v54, %v3012_v38 }
 0x80d   :  { %v3016_v4 = vadd.f32 %v3015_v19, %v3014_v56  ;;  %v2912_v5 = vpop.f32.mrb[36].mxu1  ;;  %v2983_v20 = vpop.f32.mrb[28].mxu0 }
 0x80e   :  { %v13562_v11 = vadd.f32 %v2912_v5, %v2246_v57  ;;  %v2914_v12 = vpop.f32.mrb[37].mxu1  ;;  %v9931_v13 = vpop.f32.mrb[29].mxu0  ;;  %v13568_v60 = vadd.f32 %v2983_v20, %v2254_v3 }
 0x80f   :  { %v3018_v63 = vadd.f32 %v3017_v8, %v3016_v4  ;;  %v13564_v14 = vadd.f32 %v2914_v12, %v2250_v61 }
 0x810   :  { %v3019_v30 = vsel %vm2987_vm9, %v13562_v11, 0.0  ;;  %v3023_v58 = vsel %vm2987_vm9, %v13568_v60, 0.0 }
 0x811   :  { %v3020_v16 = vadd.f32 %v3019_v30, %v3018_v63  ;;  %v3021_v21 = vsel %vm2987_vm9, %v13564_v14, 0.0 }
 0x813   :  { %v3022_v22 = vadd.f32 %v3021_v21, %v3020_v16 }
 0x815   :  { %v3024_v25 = vadd.f32 %v3023_v58, %v3022_v22 }
 0x817   :  { %3025 = vadd.xlane.f32.xlu0 %v3024_v25 }
 0x8a4   :  { %v3026_v31 = vpop.xlane.xlu0 %3025 }
 0x8a5   :  { %v3028_v34 = vmul.f32 0.0004111842, %v3026_v31 }
 0x8a7   :  { %v13575_v35 = vsub.f32 %v13477_v43, %v3028_v34  ;;  %v13578_v37 = vsub.f32 %v13481_v33, %v3028_v34  ;;  %v13581_v44 = vsub.f32 %v13479_v32, %v3028_v34  ;;  %v13584_v45 = vsub.f32 %v13487_v36, %v3028_v34 }
 0x8a8   :  { %v13591_v62 = vsub.f32 %v13496_v17, %v3028_v34  ;;  %v13596_v33 = vsub.f32 %v13499_v59, %v3028_v34  ;;  %v13603_v0 = vsub.f32 %v13506_v18, %v3028_v34  ;;  %v13609_v59 = vsub.f32 %v13510_v24, %v3028_v34 }
 0x8a9   :  { %v3048_v47 = vmul.f32 %v13575_v35, %v13575_v35  ;;  %v3049_v39 = vmul.f32 %v13578_v37, %v13578_v37  ;;  %v3050_v43 = vmul.f32 %v13581_v44, %v13581_v44  ;;  %v3051_v32 = vmul.f32 %v13584_v45, %v13584_v45 }
 0x8aa   :  { %v3052_v17 = vmul.f32 %v13591_v62, %v13591_v62  ;;  %v3053_v57 = vmul.f32 %v13596_v33, %v13596_v33  ;;  %v13615_v19 = vsub.f32 %v13519_v29, %v3028_v34  ;;  %v3054_v18 = vmul.f32 %v13603_v0, %v13603_v0 }
 0x8ab   :  { %v3067_v36 = vsel %vm2987_vm9, %v3048_v47, 0.0  ;;  %v3068_v48 = vsel %vm2987_vm9, %v3049_v39, 0.0  ;;  %v3070_v38 = vsel %vm2987_vm9, %v3050_v43, 0.0  ;;  %v3072_v56 = vsel %vm2987_vm9, %v3051_v32, 0.0 }
 0x8ac   :  { %v3069_v1 = vadd.f32 %v3068_v48, %v3067_v36  ;;  %v3074_v3 = vsel %vm2987_vm9, %v3052_v17, 0.0  ;;  %v13621_v5 = vsub.f32 %v13522_v10, %v3028_v34  ;;  %v3055_v24 = vmul.f32 %v13609_v59, %v13609_v59 }
 0x8ad   :  { %v3076_v20 = vsel %vm2987_vm9, %v3053_v57, 0.0  ;;  %v13627_v12 = vsub.f32 %v13526_v15, %v3028_v34  ;;  %v3056_v29 = vmul.f32 %v13615_v19, %v13615_v19  ;;  %v3078_v13 = vsel %vm2987_vm9, %v3054_v18, 0.0 }
 0x8ae   :  { %v3071_v54 = vadd.f32 %v3070_v38, %v3069_v1  ;;  %v13633_v30 = vsub.f32 %v13530_v9, %v3028_v34  ;;  %v3057_v10 = vmul.f32 %v13621_v5, %v13621_v5  ;;  %v3080_v16 = vsel %vm2987_vm9, %v3055_v24, 0.0 }
 0x8af   :  { %v13639_v22 = vsub.f32 %v13539_v46, %v3028_v34  ;;  %v3058_v15 = vmul.f32 %v13627_v12, %v13627_v12  ;;  %v3082_v58 = vsel %vm2987_vm9, %v3056_v29, 0.0  ;;  %v13645_v31 = vsub.f32 %v13542_v49, %v3028_v34 }
 0x8b0   :  { %v3073_v61 = vadd.f32 %v3072_v56, %v3071_v54  ;;  %v3059_v9 = vmul.f32 %v13633_v30, %v13633_v30  ;;  %v3084_v47 = vsel %vm2987_vm9, %v3057_v10, 0.0  ;;  %v13651_v43 = vsub.f32 %v13549_v2, %v3028_v34 }
 0x8b1   :  { %v3060_v46 = vmul.f32 %v13639_v22, %v13639_v22  ;;  %v3086_v32 = vsel %vm2987_vm9, %v3058_v15, 0.0  ;;  %v13657_v48 = vsub.f32 %v13553_v50, %v3028_v34  ;;  %v3061_v49 = vmul.f32 %v13645_v31, %v13645_v31 }
 0x8b2   :  { %v3075_v4 = vadd.f32 %v3074_v3, %v3073_v61  ;;  %v3088_v1 = vsel %vm2987_vm9, %v3059_v9, 0.0  ;;  %v13663_v38 = vsub.f32 %v13562_v11, %v3028_v34  ;;  %v3062_v2 = vmul.f32 %v13651_v43, %v13651_v43 }
 0x8b3   :  { %v3090_v54 = vsel %vm2987_vm9, %v3060_v46, 0.0  ;;  %v13669_v56 = vsub.f32 %v13564_v14, %v3028_v34  ;;  %v3063_v50 = vmul.f32 %v13657_v48, %v13657_v48  ;;  %v3092_v61 = vsel %vm2987_vm9, %v3061_v49, 0.0 }
 0x8b4   :  { %v3077_v8 = vadd.f32 %v3076_v20, %v3075_v4  ;;  %17127 = vst [vmem:[#allocation18_spill] sm:$0xff] %v13663_v38  ;;  %v13675_v3 = vsub.f32 %v13568_v60, %v3028_v34  ;;  %v3064_v11 = vmul.f32 %v13663_v38, %v13663_v38  ;;  %v3094_v4 = vsel %vm2987_vm9, %v3062_v2, 0.0 }
 0x8b5   :  { %17128 = vst [vmem:[#allocation19_spill] sm:$0xff] %v13669_v56  ;;  %v3065_v20 = vmul.f32 %v13669_v56, %v13669_v56  ;;  %v3096_v14 = vsel %vm2987_vm9, %v3063_v50, 0.0  ;;  %v11641_v15 = vmov 1966171168   ;;  %v13720_v50 = vld [vmem:[%s17053_s14] sm:$0xff] }
 0x8b6   :  { %v3079_v63 = vadd.f32 %v3078_v13, %v3077_v8  ;;  %17129 = vst [vmem:[#allocation20_spill] sm:$0xff] %v13675_v3  ;;  %v3066_v29 = vmul.f32 %v13675_v3, %v13675_v3  ;;  %v3098_v13 = vsel %vm2987_vm9, %v3064_v11, 0.0 }
 0x8b7   :  { %v3100_v60 = vsel %vm2987_vm9, %v3065_v20, 0.0 }
 0x8b8   :  { %v3081_v21 = vadd.f32 %v3080_v16, %v3079_v63  ;;  %v3102_v10 = vsel %vm2987_vm9, %v3066_v29, 0.0  ;;  %v13741_v29 = vld [vmem:[%s17053_s14 + $0x8] sm:$0xff] }
 0x8b9   :  { %v3305_v40 = vrot.slane %v13741_v29, %v12636_v26  ;;  %v3309_v6 = vrot.slane %v13741_v29, %v12435_v41  ;;  %v3313_v51 = vrot.slane %v13741_v29, %v12639_v28  ;;  %v3317_v7 = vrot.slane %v13741_v29, %v12438_v42 }
 0x8ba   :  { %v3083_v25 = vadd.f32 %v3082_v58, %v3081_v21  ;;  %v3563_v58 = vunpack.c.l.s4 %v11641_v15  ;;  %v3285_v15 = vrot.slane %v13720_v50, %v12438_v42 }
 0x8bc   :  { %v3085_v39 = vadd.f32 %v3084_v47, %v3083_v25  ;;  %v3564_v47 = vunpack.c.0.s8 %v3563_v58  ;;  %v13762_v58 = vld [vmem:[%s17052_s13 + $0x10] sm:$0x7] }
 0x8bd   :  { %17131 = vst [vmem:[#allocation22_spill] sm:$0xff] %v13762_v58 }
 0x8be   :  { %v3087_v36 = vadd.f32 %v3086_v32, %v3085_v39  ;;  %v13691_v39 = vld [vmem:[%s17052_s13] sm:$0xff]  ;;  %v13694_v46 = vsub.s32 %v3564_v47, %v11857_v52  ;;  %v13699_v32 = vld [vmem:[%s17052_s13 + $0x8] sm:$0xff]  ;;  %v3289_v47 = vrot.slane %v13741_v29, %v11860_v53 }
 0x8bf   :  { %v3141_v49 = vrot.slane %v13691_v39, %v11866_v55  ;;  %v3153_v52 = vrot.slane %v13691_v39, %v12636_v26  ;;  %v3157_v2 = vrot.slane %v13691_v39, %v12435_v41  ;;  %v3177_v11 = vrot.slane %v13699_v32, %v12405_v27 }
 0x8c0   :  { %v3089_v17 = vadd.f32 %v3088_v1, %v3087_v36  ;;  %17130 = vst [vmem:[#allocation21_spill] sm:$0xff] %v13694_v46  ;;  %v3137_v36 = vrot.slane %v13691_v39, %v11860_v53  ;;  %v3145_v1 = vrot.slane %v13691_v39, %v12405_v27  ;;  %v3189_v20 = vrot.slane %v13699_v32, %v12435_v41 }
 0x8c2   :  { %v3091_v57 = vadd.f32 %v3090_v54, %v3089_v17  ;;  %v3149_v17 = vrot.slane %v13691_v39, %v12402_v23  ;;  %v3161_v54 = vrot.slane %v13691_v39, %v12639_v28 }
 0x8c4   :  { %v3093_v18 = vadd.f32 %v3092_v61, %v3091_v57  ;;  %v3165_v57 = vrot.slane %v13691_v39, %v12438_v42  ;;  %v3169_v61 = vrot.slane %v13699_v32, %v11860_v53  ;;  %v3293_v39 = vrot.slane %v13741_v29, %v11866_v55 }
 0x8c6   :  { %v3095_v24 = vadd.f32 %v3094_v4, %v3093_v18  ;;  %v3173_v18 = vrot.slane %v13699_v32, %v11866_v55  ;;  %v3181_v4 = vrot.slane %v13699_v32, %v12402_v23 }
 0x8c8   :  { %v3097_v8 = vadd.f32 %v3096_v14, %v3095_v24  ;;  %v3185_v24 = vrot.slane %v13699_v32, %v12636_v26  ;;  %v3193_v14 = vrot.slane %v13699_v32, %v12639_v28 }
 0x8ca   :  { %v3099_v63 = vadd.f32 %v3098_v13, %v3097_v8  ;;  %v3197_v8 = vrot.slane %v13699_v32, %v12438_v42  ;;  %v3257_v13 = vrot.slane %v13720_v50, %v11860_v53  ;;  %v3297_v32 = vrot.slane %v13741_v29, %v12405_v27 }
 0x8cc   :  { %v3101_v34 = vadd.f32 %v3100_v60, %v3099_v63  ;;  %v3261_v63 = vrot.slane %v13720_v50, %v11866_v55  ;;  %v3265_v60 = vrot.slane %v13720_v50, %v12405_v27 }
 0x8ce   :  { %v3103_v16 = vadd.f32 %v3102_v10, %v3101_v34  ;;  %v3269_v34 = vrot.slane %v13720_v50, %v12402_v23  ;;  %v3273_v10 = vrot.slane %v13720_v50, %v12636_v26 }
 0x8d0   :  { %3104 = vadd.xlane.f32.xlu1 %v3103_v16  ;;  %v3277_v16 = vrot.slane %v13720_v50, %v12435_v41 }
 0x95d   :  { %v3105_v21 = vpop.xlane.xlu1 %3104 }
 0x95e   :  { %v3106_v25 = vmul.f32 0.0004111842, %v3105_v21  ;;  %v3281_v21 = vrot.slane %v13720_v50, %v12639_v28  ;;  %v3301_v50 = vrot.slane %v13741_v29, %v12402_v23 }
 0x960   :  { %v3107_v9 = vadd.f32 1e-05, %v3106_v25  ;;  %v13767_v25 = vld [vmem:[%s17053_s14 + $0x10] sm:$0x7] }
 0x961   :  { %17132 = vst [vmem:[#allocation23_spill] sm:$0xff] %v13767_v25 }
 0x962   :  { %11508 = vrsqrt.f32 %v3107_v9 }
 0x96c   :  { %v13769_v9 = vpop.eup %11508 }
 0x96d   :  { %17133 = vst [vmem:[#allocation24_spill] sm:$0xff] %v13769_v9  ;;  %v3109_v41 = vmul.f32 %v13769_v9, %v13575_v35  ;;  %v3110_v28 = vmul.f32 %v13769_v9, %v13578_v37  ;;  %v3111_v3 = vmul.f32 %v13769_v9, %v13581_v44  ;;  %v3112_v23 = vmul.f32 %v13769_v9, %v13584_v45 }
 0x96e   :  { %v3113_v26 = vmul.f32 %v13769_v9, %v13591_v62  ;;  %v3114_v35 = vmul.f32 %v13769_v9, %v13596_v33  ;;  %v3115_v37 = vmul.f32 %v13769_v9, %v13603_v0  ;;  %v3116_v29 = vmul.f32 %v13769_v9, %v13609_v59 }
 0x96f   :  { %v3117_v46 = vmul.f32 %v13769_v9, %v13615_v19  ;;  %v3118_v44 = vmul.f32 %v13769_v9, %v13621_v5  ;;  %v3119_v45 = vmul.f32 %v13769_v9, %v13627_v12  ;;  %v3120_v62 = vmul.f32 %v13769_v9, %v13633_v30 }
 0x970   :  { %v3121_v33 = vmul.f32 %v13769_v9, %v13639_v22  ;;  %v3122_v0 = vmul.f32 %v13769_v9, %v13645_v31  ;;  %v3123_v59 = vmul.f32 %v13769_v9, %v13651_v43  ;;  %v3124_v19 = vmul.f32 %v13769_v9, %v13657_v48 }
 0x971   :  { %v3229_v42 = vmul.f32 %v3137_v36, %v3109_v41  ;;  %v3230_v5 = vmul.f32 %v3141_v49, %v3110_v28  ;;  %v3231_v25 = vmul.f32 %v3145_v1, %v3111_v3  ;;  %v3232_v27 = vmul.f32 %v3149_v17, %v3112_v23 }
 0x972   :  { %v3233_v12 = vmul.f32 %v3153_v52, %v3113_v26  ;;  %v3234_v55 = vmul.f32 %v3157_v2, %v3114_v35  ;;  %v3235_v53 = vmul.f32 %v3161_v54, %v3115_v37  ;;  %v3236_v30 = vmul.f32 %v3165_v57, %v3116_v29 }
 0x973   :  { %v3237_v58 = vmul.f32 %v3169_v61, %v3117_v46  ;;  %v3238_v56 = vmul.f32 %v3173_v18, %v3118_v44  ;;  %v3239_v22 = vmul.f32 %v3177_v11, %v3119_v45  ;;  %v3240_v38 = vmul.f32 %v3181_v4, %v3120_v62 }
 0x974   :  { %v3241_v31 = vmul.f32 %v3185_v24, %v3121_v33  ;;  %v3242_v43 = vmul.f32 %v3189_v20, %v3122_v0  ;;  %v3243_v9 = vmul.f32 %v3193_v14, %v3123_v59  ;;  %v3244_v48 = vmul.f32 %v3197_v8, %v3124_v19 }
 0x975   :  { %v13831_v36 = vadd.f32 %v3257_v13, %v3229_v42  ;;  %v13833_v41 = vadd.f32 %v3261_v63, %v3230_v5  ;;  %v13835_v28 = vadd.f32 %v3265_v60, %v3231_v25  ;;  %v13837_v3 = vadd.f32 %v3269_v34, %v3232_v27  ;;  %v17134_v63 = vld [vmem:[#allocation18_spill] sm:$0xff]  ;;  %v17135_v60 = vld [vmem:[#allocation24_spill] sm:$0xff] }
 0x976   :  { %v13839_v23 = vadd.f32 %v3273_v10, %v3233_v12  ;;  %v13841_v26 = vadd.f32 %v3277_v16, %v3234_v55  ;;  %v13843_v46 = vadd.f32 %v3281_v21, %v3235_v53  ;;  %v13845_v49 = vadd.f32 %v3285_v15, %v3236_v30  ;;  %v17136_v15 = vld [vmem:[#allocation19_spill] sm:$0xff] }
 0x977   :  { %v13847_v1 = vadd.f32 %v3289_v47, %v3237_v58  ;;  %v13849_v17 = vadd.f32 %v3293_v39, %v3238_v56  ;;  %v13851_v42 = vadd.f32 %v3297_v32, %v3239_v22  ;;  %v13853_v52 = vadd.f32 %v3301_v50, %v3240_v38 }
 0x978   :  { %v13855_v2 = vadd.f32 %v3305_v40, %v3241_v31  ;;  %v13857_v27 = vadd.f32 %v3309_v6, %v3242_v43  ;;  %v13859_v54 = vadd.f32 %v3313_v51, %v3243_v9  ;;  %v13861_v55 = vadd.f32 %v3317_v7, %v3244_v48 }
 0x979   :  { %v13864_v53 = vmul.f32 0.5, %v13831_v36  ;;  %v13867_v57 = vmul.f32 0.5, %v13833_v41  ;;  %v13870_v56 = vmul.f32 0.5, %v13835_v28  ;;  %v13873_v38 = vmul.f32 0.5, %v13837_v3 }
 0x97a   :  { %v3387_v40 = vmul.f32 0.044715, %v13831_v36  ;;  %v3388_v6 = vmul.f32 0.044715, %v13833_v41  ;;  %v13878_v51 = vmul.f32 0.5, %v13839_v23  ;;  %v13881_v7 = vmul.f32 0.5, %v13841_v26 }
 0x97b   :  { %v3389_v61 = vmul.f32 0.044715, %v13835_v28  ;;  %v3390_v18 = vmul.f32 0.044715, %v13837_v3  ;;  %v13886_v11 = vmul.f32 0.5, %v13843_v46  ;;  %v13889_v4 = vmul.f32 0.5, %v13845_v49 }
 0x97c   :  { %v13892_v24 = vmul.f32 0.5, %v13847_v1  ;;  %v3391_v20 = vmul.f32 0.044715, %v13839_v23  ;;  %v13896_v14 = vmul.f32 0.5, %v13849_v17  ;;  %v13899_v8 = vmul.f32 0.5, %v13851_v42 }
 0x97d   :  { %v3392_v13 = vmul.f32 0.044715, %v13841_v26  ;;  %v13904_v34 = vmul.f32 %v17135_v60, %v17134_v63  ;;  %v3393_v10 = vmul.f32 0.044715, %v13843_v46  ;;  %v3406_v16 = vmul.f32 %v3387_v40, %v13831_v36 }
 0x97e   :  { %v3407_v21 = vmul.f32 %v3388_v6, %v13833_v41  ;;  %v13911_v58 = vmul.f32 %v17135_v60, %v17136_v15  ;;  %v3394_v25 = vmul.f32 0.044715, %v13845_v49  ;;  %v3395_v9 = vmul.f32 0.044715, %v13847_v1 }
 0x97f   :  { %v3408_v47 = vmul.f32 %v3389_v61, %v13835_v28  ;;  %v3409_v39 = vmul.f32 %v3390_v18, %v13837_v3  ;;  %v3396_v32 = vmul.f32 0.044715, %v13849_v17  ;;  %v3397_v50 = vmul.f32 0.044715, %v13851_v42 }
 0x980   :  { %v3398_v29 = vmul.f32 0.044715, %v13853_v52  ;;  %v3410_v35 = vmul.f32 %v3391_v20, %v13839_v23  ;;  %v3399_v37 = vmul.f32 0.044715, %v13855_v2  ;;  %v3400_v44 = vmul.f32 0.044715, %v13857_v27 }
 0x981   :  { %v3401_v45 = vmul.f32 0.044715, %v13859_v54  ;;  %v3411_v62 = vmul.f32 %v3392_v13, %v13841_v26  ;;  %v3402_v33 = vmul.f32 0.044715, %v13861_v55  ;;  %v3412_v0 = vmul.f32 %v3393_v10, %v13843_v46 }
 0x982   :  { %v3425_v59 = vmul.f32 %v3406_v16, %v13831_v36  ;;  %v3426_v19 = vmul.f32 %v3407_v21, %v13833_v41  ;;  %v3413_v5 = vmul.f32 %v3394_v25, %v13845_v49  ;;  %v3414_v12 = vmul.f32 %v3395_v9, %v13847_v1 }
 0x983   :  { %v3427_v30 = vmul.f32 %v3408_v47, %v13835_v28  ;;  %v3428_v22 = vmul.f32 %v3409_v39, %v13837_v3  ;;  %v3415_v31 = vmul.f32 %v3396_v32, %v13849_v17  ;;  %v3416_v43 = vmul.f32 %v3397_v50, %v13851_v42 }
 0x984   :  { %v3417_v48 = vmul.f32 %v3398_v29, %v13853_v52  ;;  %v3429_v40 = vmul.f32 %v3410_v35, %v13839_v23  ;;  %v3418_v6 = vmul.f32 %v3399_v37, %v13855_v2  ;;  %v3419_v61 = vmul.f32 %v3400_v44, %v13857_v27 }
 0x985   :  { %v3420_v18 = vmul.f32 %v3401_v45, %v13859_v54  ;;  %v3430_v20 = vmul.f32 %v3411_v62, %v13841_v26  ;;  %v3421_v13 = vmul.f32 %v3402_v33, %v13861_v55  ;;  %v3431_v63 = vmul.f32 %v3412_v0, %v13843_v46 }
 0x986   :  { %v3444_v10 = vadd.f32 %v3425_v59, %v13831_v36  ;;  %v3445_v16 = vadd.f32 %v3426_v19, %v13833_v41  ;;  %v3432_v21 = vmul.f32 %v3413_v5, %v13845_v49  ;;  %v3433_v15 = vmul.f32 %v3414_v12, %v13847_v1  ;;  %v17137_v19 = vld [vmem:[#allocation20_spill] sm:$0xff] }
 0x987   :  { %v3446_v25 = vadd.f32 %v3427_v30, %v13835_v28  ;;  %v3447_v9 = vadd.f32 %v3428_v22, %v13837_v3  ;;  %v3434_v47 = vmul.f32 %v3415_v31, %v13849_v17  ;;  %v3435_v39 = vmul.f32 %v3416_v43, %v13851_v42  ;;  %v17138_v31 = vld [vmem:[#allocation22_spill] sm:$0xff]  ;;  %v17139_v43 = vld [vmem:[#allocation9_spill] sm:$0xff] }
 0x988   :  { %v3436_v32 = vmul.f32 %v3417_v48, %v13853_v52  ;;  %v3448_v50 = vadd.f32 %v3429_v40, %v13839_v23  ;;  %v3437_v36 = vmul.f32 %v3418_v6, %v13855_v2  ;;  %v3438_v41 = vmul.f32 %v3419_v61, %v13857_v27  ;;  %v17141_v40 = vld [vmem:[#allocation10_spill] sm:$0xff] }
 0x989   :  { %v3439_v29 = vmul.f32 %v3420_v18, %v13859_v54  ;;  %v3449_v35 = vadd.f32 %v3430_v20, %v13841_v26  ;;  %v3440_v28 = vmul.f32 %v3421_v13, %v13861_v55  ;;  %v3450_v3 = vadd.f32 %v3431_v63, %v13843_v46  ;;  %v17143_v18 = vld [vmem:[#allocation13_spill] sm:$0xff] }
 0x98a   :  { %v3463_v37 = vmul.f32 0.7978846, %v3444_v10  ;;  %v3464_v44 = vmul.f32 0.7978846, %v3445_v16  ;;  %v3451_v45 = vadd.f32 %v3432_v21, %v13845_v49  ;;  %v3452_v62 = vadd.f32 %v3433_v15, %v13847_v1  ;;  %v17145_v16 = vld [vmem:[#allocation23_spill] sm:$0xff] }
 0x98b   :  { %v3465_v33 = vmul.f32 0.7978846, %v3446_v25  ;;  %v3466_v23 = vmul.f32 0.7978846, %v3447_v9  ;;  %v3453_v0 = vadd.f32 %v3434_v47, %v13849_v17  ;;  %v3467_v59 = vmul.f32 0.7978846, %v3448_v50 }
 0x98c   :  { %11510 = vtanh.f32 %v3463_v37  ;;  %v3127_v5 = vmul.f32 %v17135_v60, %v17137_v19  ;;  %v3454_v26 = vadd.f32 %v3435_v39, %v13851_v42  ;;  %v3455_v12 = vadd.f32 %v3436_v32, %v13853_v52 }
 0x98d   :  { %v3468_v46 = vmul.f32 0.7978846, %v3449_v35  ;;  %11512 = vtanh.f32 %v3464_v44  ;;  %v3456_v30 = vadd.f32 %v3437_v36, %v13855_v2  ;;  %v3457_v49 = vadd.f32 %v3438_v41, %v13857_v27 }
 0x98e   :  { %v3469_v1 = vmul.f32 0.7978846, %v3450_v3  ;;  %11514 = vtanh.f32 %v3465_v33  ;;  %v3458_v22 = vadd.f32 %v3439_v29, %v13859_v54  ;;  %v3470_v17 = vmul.f32 0.7978846, %v3451_v45 }
 0x98f   :  { %11516 = vtanh.f32 %v3466_v23  ;;  %v17140_v60 = vrot.slane %v17138_v31, %v17139_v43  ;;  %v3471_v42 = vmul.f32 0.7978846, %v3452_v62  ;;  %v17142_v6 = vrot.slane %v17138_v31, %v17141_v40 }
 0x990   :  { %11518 = vtanh.f32 %v3467_v59  ;;  %v17144_v20 = vrot.slane %v17138_v31, %v17143_v18  ;;  %v3459_v63 = vadd.f32 %v3440_v28, %v13861_v55  ;;  %v3472_v10 = vmul.f32 0.7978846, %v3453_v0 }
 0x991   :  { %v3245_v48 = vmul.f32 %v17140_v60, %v13904_v34  ;;  %v3246_v61 = vmul.f32 %v17142_v6, %v13911_v58  ;;  %11520 = vtanh.f32 %v3468_v46  ;;  %v17146_v21 = vrot.slane %v17145_v16, %v17139_v43 }
 0x992   :  { %v3247_v13 = vmul.f32 %v17144_v20, %v3127_v5  ;;  %v3473_v34 = vmul.f32 0.7978846, %v3454_v26  ;;  %11522 = vtanh.f32 %v3469_v1  ;;  %v17147_v25 = vrot.slane %v17145_v16, %v17141_v40 }
 0x993   :  { %v13984_v15 = vadd.f32 %v17146_v21, %v3245_v48  ;;  %v17148_v58 = vrot.slane %v17145_v16, %v17143_v18  ;;  %v13997_v39 = vmul.f32 0.5, %v13853_v52  ;;  %v3474_v32 = vmul.f32 0.7978846, %v3455_v12 }
 0x994   :  { %v13989_v9 = vadd.f32 %v17147_v25, %v3246_v61  ;;  %11524 = vtanh.f32 %v3470_v17  ;;  %v14001_v36 = vmul.f32 0.5, %v13855_v2  ;;  %v3475_v41 = vmul.f32 0.7978846, %v3456_v30 }
 0x995   :  { %v13994_v47 = vadd.f32 %v17148_v58, %v3247_v13  ;;  %v3403_v50 = vmul.f32 0.044715, %v13984_v15  ;;  %11526 = vtanh.f32 %v3471_v42  ;;  %v3476_v35 = vmul.f32 0.7978846, %v3457_v49  ;;  %v17149_v58 = vld [vmem:[#allocation21_spill] sm:$0xff] }
 0x996   :  { %v3404_v29 = vmul.f32 0.044715, %v13989_v9  ;;  %11528 = vtanh.f32 %v3472_v10  ;;  %v11511_v37 = vpop.eup %11510  ;;  %v3477_v52 = vmul.f32 0.7978846, %v3458_v22  ;;  %v3478_v44 = vmul.f32 0.7978846, %v3459_v63 }
 0x997   :  { %v3405_v28 = vmul.f32 0.044715, %v13994_v47  ;;  %v3422_v3 = vmul.f32 %v3403_v50, %v13984_v15  ;;  %11530 = vtanh.f32 %v3473_v34  ;;  %v11513_v62 = vpop.eup %11512  ;;  %v3501_v2 = vadd.f32 1.0, %v11511_v37 }
 0x998   :  { %v3423_v45 = vmul.f32 %v3404_v29, %v13989_v9  ;;  %11532 = vtanh.f32 %v3474_v32  ;;  %v11515_v0 = vpop.eup %11514  ;;  %v14010_v59 = vmul.f32 0.5, %v13857_v27  ;;  %v3502_v19 = vadd.f32 1.0, %v11513_v62 }
 0x999   :  { %v3424_v33 = vmul.f32 %v3405_v28, %v13994_v47  ;;  %v3441_v23 = vmul.f32 %v3422_v3, %v13984_v15  ;;  %11534 = vtanh.f32 %v3475_v41  ;;  %v11517_v26 = vpop.eup %11516  ;;  %v3503_v12 = vadd.f32 1.0, %v11515_v0 }
 0x99a   :  { %v3442_v5 = vmul.f32 %v3423_v45, %v13989_v9  ;;  %11536 = vtanh.f32 %v3476_v35  ;;  %v3520_v46 = vmul.f32 %v3501_v2, %v13864_v53  ;;  %v11519_v49 = vpop.eup %11518  ;;  %v3504_v1 = vadd.f32 1.0, %v11517_v26 }
 0x99b   :  { %v3443_v30 = vmul.f32 %v3424_v33, %v13994_v47  ;;  %11538 = vtanh.f32 %v3477_v52  ;;  %v3521_v22 = vmul.f32 %v3502_v19, %v13867_v57  ;;  %v3460_v17 = vadd.f32 %v3441_v23, %v13984_v15  ;;  %v11521_v27 = vpop.eup %11520 }
 0x99c   :  { %11540 = vtanh.f32 %v3478_v44  ;;  %v3505_v31 = vadd.f32 1.0, %v11519_v49  ;;  %v3522_v60 = vmul.f32 %v3503_v12, %v13870_v56  ;;  %v3461_v48 = vadd.f32 %v3442_v5, %v13989_v9  ;;  %v11523_v42 = vpop.eup %11522 }
 0x99d   :  { %v3506_v6 = vadd.f32 1.0, %v11521_v27  ;;  %v3523_v53 = vmul.f32 %v3504_v1, %v13873_v38  ;;  %v3558_v61 = vcombine.low %v3520_v46, %v3521_v22  ;;  %v3462_v20 = vadd.f32 %v3443_v30, %v13994_v47 }
 0x99e   :  { %v11525_v13 = vpop.eup %11524  ;;  %v3507_v63 = vadd.f32 1.0, %v11523_v42  ;;  %v3524_v57 = vmul.f32 %v3505_v31, %v13878_v51  ;;  %v3479_v10 = vmul.f32 0.7978846, %v3460_v17  ;;  %v3480_v16 = vmul.f32 0.7978846, %v3461_v48 }
 0x99f   :  { %v11527_v21 = vpop.eup %11526  ;;  %v3508_v34 = vadd.f32 1.0, %v11525_v13  ;;  %v3525_v25 = vmul.f32 %v3506_v6, %v13881_v7  ;;  %v3559_v56 = vcombine.low %v3522_v60, %v3523_v53  ;;  %v3568_v32 = vrot.slane %v3558_v61, %v17149_v58 }
 0x9a0   :  { %v11529_v50 = vpop.eup %11528  ;;  %v3509_v41 = vadd.f32 1.0, %v11527_v21  ;;  %v3526_v38 = vmul.f32 %v3507_v63, %v13886_v11  ;;  %v3481_v29 = vmul.f32 0.7978846, %v3462_v20  ;;  %11542 = vtanh.f32 %v3479_v10 }
 0x9a1   :  { %v11531_v35 = vpop.eup %11530  ;;  %v3510_v28 = vadd.f32 1.0, %v11529_v50  ;;  %v3527_v3 = vmul.f32 %v3508_v34, %v13889_v4  ;;  %v3560_v51 = vcombine.low %v3524_v57, %v3525_v25  ;;  %v3575_v37 = vrot.slane %v3559_v56, %v17149_v58 }
 0x9a2   :  { %v11533_v52 = vpop.eup %11532  ;;  %v3382_v44 = vmul.f32 0.5, %v13859_v54  ;;  %v3511_v7 = vadd.f32 1.0, %v11531_v35  ;;  %v3528_v45 = vmul.f32 %v3509_v41, %v13892_v24  ;;  %11544 = vtanh.f32 %v3480_v16 }
 0x9a3   :  { %v11535_v62 = vpop.eup %11534  ;;  %v3512_v2 = vadd.f32 1.0, %v11533_v52  ;;  %v3529_v11 = vmul.f32 %v3510_v28, %v13896_v14  ;;  %v3561_v33 = vcombine.low %v3526_v38, %v3527_v3  ;;  %v3582_v23 = vrot.slane %v3560_v51, %v17149_v58 }
 0x9a4   :  { %v11537_v0 = vpop.eup %11536  ;;  %v3513_v19 = vadd.f32 1.0, %v11535_v62  ;;  %v3530_v4 = vmul.f32 %v3511_v7, %v13899_v8  ;;  %v3590_v5 = vcombine.low %v3568_v32, %v3575_v37  ;;  %11546 = vtanh.f32 %v3481_v29 }
 0x9a5   :  { %v11539_v26 = vpop.eup %11538  ;;  %v3514_v12 = vadd.f32 1.0, %v11537_v0  ;;  %v3531_v54 = vmul.f32 %v3512_v2, %v13997_v39  ;;  %v3589_v24 = vrot.slane %v3561_v33, %v17149_v58  ;;  %v3607_v46 = vcombine.low %v3528_v45, %v3529_v11 }
 0x9a6   :  { %v11541_v30 = vpop.eup %11540  ;;  %v3383_v49 = vmul.f32 0.5, %v13861_v55  ;;  %v3515_v14 = vadd.f32 1.0, %v11539_v26  ;;  %v3532_v1 = vmul.f32 %v3513_v19, %v14001_v36  ;;  %v3598_v22 = vrot.slane %v3590_v5, %v17149_v58 }
 0x9a7   :  { %v3516_v17 = vadd.f32 1.0, %v11541_v30  ;;  %v3533_v8 = vmul.f32 %v3514_v12, %v14010_v59  ;;  %v3591_v27 = vcombine.low %v3582_v23, %v3589_v24  ;;  %v3608_v31 = vcombine.low %v3530_v4, %v3531_v54 }
 0x9a8   :  { %v3534_v60 = vmul.f32 %v3515_v14, %v3382_v44  ;;  %v3617_v48 = vrot.slane %v3607_v46, %v17149_v58  ;;  %v3384_v59 = vmul.f32 0.5, %v13984_v15  ;;  %v3385_v16 = vmul.f32 0.5, %v13989_v9 }
 0x9a9   :  { %v3535_v39 = vmul.f32 %v3516_v17, %v3383_v49  ;;  %v3605_v42 = vrot.slane %v3591_v27, %v17149_v58  ;;  %v3609_v6 = vcombine.low %v3532_v1, %v3533_v8  ;;  %v3624_v53 = vrot.slane %v3608_v31, %v17149_v58  ;;  %v8803_v17 = vld [vmem:[%s17055_s16 + $0x80] sm:$0xff]  ;;  %v8804_v27 = vld [vmem:[%s17055_s16 + $0x88] sm:$0xff] }
 0x9aa   :  { %v11543_v55 = vpop.eup %11542  ;;  %v3386_v25 = vmul.f32 0.5, %v13994_v47  ;;  %v17150_v11 = vlaneseq  ;;  %v17151_v33 = vmov 0  ;;  %v17154_v8 = vmov 0.0   ;;  %v3843_v31 = vld [vmem:[%s17055_s16] sm:$0xff] }
 0x9ab   :  { %v3606_v61 = vcombine.low %v3598_v22, %v3605_v42  ;;  %v3610_v20 = vcombine.low %v3534_v60, %v3535_v39  ;;  %v3631_v36 = vrot.slane %v3609_v6, %v17149_v58  ;;  %v3639_v13 = vcombine.low %v3617_v48, %v3624_v53  ;;  %v3844_v60 = vld [vmem:[%s17055_s16 + $0x8] sm:$0xff]  ;;  %v3728_v48 = vld [vmem:[%s17054_s15] sm:$0xff] }
 0x9ac   :  { %v11545_v63 = vpop.eup %11544  ;;  %v3517_v57 = vadd.f32 1.0, %v11543_v55  ;;  %vm14051_vm10 = vcmp.lt.s32.totalorder %v17150_v11, 384  ;;  %v8792_v39 = vld [vmem:[%s17054_s15 + $0x28] sm:$0xff]  ;;  %v10835_v6 = vpack.c.bf16 %v8804_v27, %v8803_v17  ;;  %v10859_v53 = vpack.c.bf16 %v3844_v60, %v3843_v31  ;;  %v8805_v55 = vld [vmem:[%s17055_s16 + $0x90] sm:$0xff]  ;;  %v3858_v17 = vld [vmem:[%s17055_s16 + $0x78] sm:$0xff] }
 0x9ad   :  { %v3638_v10 = vrot.slane %v3610_v20, %v17149_v58  ;;  %3682 = vst [vmem:[#allocation3] sm:$0xff] %v3606_v61  ;;  %v3518_v21 = vadd.f32 1.0, %v11545_v63  ;;  %v3647_v50 = vrot.slane %v3639_v13, %v17149_v58  ;;  %v17152_v33 = vsel %vm14051_vm10, 4294967295, %v17151_v33  ;;  %v8806_v61 = vld [vmem:[%s17055_s16 + $0x98] sm:$0xff]  ;;  %v3845_v20 = vld [vmem:[%s17055_s16 + $0x10] sm:$0xff]  ;;  %v3729_v13 = vld [vmem:[%s17054_s15 + $0x8] sm:$0xff] }
 0x9ae   :  { %v11547_v34 = vpop.eup %11546  ;;  %v3536_v56 = vmul.f32 %v3517_v57, %v3384_v59  ;;  %17153 = vst [vmem:[#allocation18_spill] sm:$0xff] %v17152_v33  ;;  %v8793_v63 = vld [vmem:[%s17054_s15 + $0x30] sm:$0xff]  ;;  %v17155_v59 = vmov 0.0|0.0   ;;  %v10838_v57 = vpack.c.bf16 %v8806_v61, %v8805_v55  ;;  %v8830_v60 = vld [vmem:[%s17055_s16 + $0x100] sm:$0xff]  ;;  %v8855_v55 = vld [vmem:[%s17112_s1 + $0x38] sm:$0xff] }
 0x9af   :  { %v3640_v32 = vcombine.low %v3631_v36, %v3638_v10  ;;  %v3519_v41 = vadd.f32 1.0, %v11547_v34  ;;  %v3537_v38 = vmul.f32 %v3518_v21, %v3385_v16  ;;  %v3846_v36 = vld [vmem:[%s17055_s16 + $0x18] sm:$0xff]  ;;  %v8807_v16 = vld [vmem:[%s17055_s16 + $0xa0] sm:$0xff]  ;;  %v8808_v21 = vld [vmem:[%s17055_s16 + $0xa8] sm:$0xff] }
 0x9b0   :  { %v10862_v10 = vpack.c.bf16 %v3846_v36, %v3845_v20  ;;  %v3847_v34 = vld [vmem:[%s17055_s16 + $0x20] sm:$0xff]  ;;  %v8813_v11 = vld [vmem:[%s17055_s16 + $0xd0] sm:$0xff] }
 0x9b1   :  { %v3654_v29 = vrot.slane %v3640_v32, %v17149_v58  ;;  %v3538_v35 = vmul.f32 %v3519_v41, %v3386_v25  ;;  %v3656_v15 = vcombine.low %v3536_v56, %v3537_v38  ;;  %v3848_v25 = vld [vmem:[%s17055_s16 + $0x28] sm:$0xff]  ;;  %v3730_v56 = vld [vmem:[%s17054_s15 + $0x10] sm:$0xff]  ;;  %v8794_v32 = vld [vmem:[%s17054_s15 + $0x38] sm:$0xff] }
 0x9b2   :  { %v10865_v41 = vpack.c.bf16 %v3848_v25, %v3847_v34  ;;  %v8809_v38 = vld [vmem:[%s17055_s16 + $0xb0] sm:$0xff] }
 0x9b3   :  { %v3655_v28 = vcombine.low %v3647_v50, %v3654_v29  ;;  %v3663_v3 = vrot.slane %v3656_v15, %v17149_v58  ;;  %v3670_v51 = vrot.slane %v3538_v35, %v17149_v58  ;;  %v10841_v50 = vpack.c.bf16 %v8808_v21, %v8807_v16  ;;  %v8810_v29 = vld [vmem:[%s17055_s16 + $0xb8] sm:$0xff]  ;;  %v3849_v35 = vld [vmem:[%s17055_s16 + $0x30] sm:$0xff] }
 0x9b4   :  { %v3687_v9 = vld [vmem:[#allocation3] sm:$0x1]  ;;  %v3689_v37 = vld [vmem:[#allocation3 + $0x1] sm:$0x1]  ;;  %v3691_v52 = vld [vmem:[#allocation3 + $0x2] sm:$0x1] }
 0x9b5   :  { %3683 = vst [vmem:[#allocation3 + $0x8] sm:$0xff] %v3655_v28  ;;  %3688 = vst [vmem:[#allocation4] sm:$0x1] %v3687_v9  ;;  %v3693_v47 = vld [vmem:[#allocation3 + $0x3] sm:$0x1]  ;;  %v3671_v45 = vcombine.low %v3663_v3, %v3670_v51  ;;  %v3850_v15 = vld [vmem:[%s17055_s16 + $0x38] sm:$0xff]  ;;  %v10844_v51 = vpack.c.bf16 %v8810_v29, %v8809_v38 }
 0x9b6   :  { %3690 = vst [vmem:[#allocation4 + $0x1] sm:$0x1] %v3689_v37  ;;  %3692 = vst [vmem:[#allocation4 + $0x2] sm:$0x1] %v3691_v52  ;;  %v3695_v44 = vld [vmem:[#allocation3 + $0x4] sm:$0x1]  ;;  %v10868_v9 = vpack.c.bf16 %v3850_v15, %v3849_v35 }
 0x9b7   :  { %v3697_v7 = vld [vmem:[#allocation3 + $0x5] sm:$0x1]  ;;  %3694 = vst [vmem:[#allocation4 + $0x3] sm:$0x1] %v3693_v47  ;;  %3696 = vst [vmem:[#allocation4 + $0x4] sm:$0x1] %v3695_v44  ;;  %v3678_v23 = vrot.slane %v3671_v45, %v17149_v58 }
 0x9b8   :  { %3698 = vst [vmem:[#allocation4 + $0x5] sm:$0x1] %v3697_v7  ;;  %v3699_v62 = vld [vmem:[#allocation3 + $0x6] sm:$0x1]  ;;  %v3701_v2 = vld [vmem:[#allocation3 + $0x7] sm:$0x1] }
 0x9b9   :  { %3700 = vst [vmem:[#allocation4 + $0x6] sm:$0x1] %v3699_v62  ;;  %3702 = vst [vmem:[#allocation4 + $0x7] sm:$0x1] %v3701_v2  ;;  %v3731_v28 = vld [vmem:[%s17054_s15 + $0x18] sm:$0xff]  ;;  %v8795_v3 = vld [vmem:[%s17054_s15 + $0x40] sm:$0xff] }
 0x9ba   :  { %3686 = vst.msk [vmem:[#allocation3 + $0x10] sm:$0x7] %vm14051_vm10, %v3678_v23  ;;  %v8811_v37 = vld [vmem:[%s17055_s16 + $0xc0] sm:$0xff]  ;;  %v8812_v52 = vld [vmem:[%s17055_s16 + $0xc8] sm:$0xff]  ;;  %v8814_v23 = vld [vmem:[%s17055_s16 + $0xd8] sm:$0xff] }
 0x9bb   :  { %v3851_v47 = vld [vmem:[%s17055_s16 + $0x40] sm:$0xff]  ;;  %v3852_v44 = vld [vmem:[%s17055_s16 + $0x48] sm:$0xff]  ;;  %v10847_v62 = vpack.c.bf16 %v8812_v52, %v8811_v37 }
 0x9bc   :  { %v3703_v0 = vld [vmem:[#allocation3 + $0x8] sm:$0x1]  ;;  %v3705_v19 = vld [vmem:[#allocation3 + $0x9] sm:$0x1]  ;;  %v3707_v4 = vld [vmem:[#allocation3 + $0xa] sm:$0x1]  ;;  %v10871_v2 = vpack.c.bf16 %v3852_v44, %v3851_v47 }
 0x9bd   :  { %3704 = vst [vmem:[#allocation4 + $0x8] sm:$0x1] %v3703_v0  ;;  %3706 = vst [vmem:[#allocation4 + $0x9] sm:$0x1] %v3705_v19  ;;  %v3709_v5 = vld [vmem:[#allocation3 + $0xb] sm:$0x1] }
 0x9be   :  { %3708 = vst [vmem:[#allocation4 + $0xa] sm:$0x1] %v3707_v4  ;;  %v3711_v26 = vld [vmem:[#allocation3 + $0xc] sm:$0x1]  ;;  %v3713_v12 = vld [vmem:[#allocation3 + $0xd] sm:$0x1]  ;;  %v10850_v4 = vpack.c.bf16 %v8814_v23, %v8813_v11 }
 0x9bf   :  { %3710 = vst [vmem:[#allocation4 + $0xb] sm:$0x1] %v3709_v5  ;;  %3712 = vst [vmem:[#allocation4 + $0xc] sm:$0x1] %v3711_v26  ;;  %v3715_v54 = vld [vmem:[#allocation3 + $0xe] sm:$0x1] }
 0x9c0   :  { %3714 = vst [vmem:[#allocation4 + $0xd] sm:$0x1] %v3713_v12  ;;  %v3717_v24 = vld [vmem:[#allocation3 + $0xf] sm:$0x1]  ;;  %3716 = vst [vmem:[#allocation4 + $0xe] sm:$0x1] %v3715_v54 }
 0x9c1   :  { %3718 = vst [vmem:[#allocation4 + $0xf] sm:$0x1] %v3717_v24  ;;  %v3719_v46 = vld [vmem:[#allocation3 + $0x10] sm:$0x1]  ;;  %v3721_v30 = vld [vmem:[#allocation3 + $0x11] sm:$0x1] }
 0x9c2   :  { %v3723_v49 = vld [vmem:[#allocation3 + $0x12] sm:$0x1]  ;;  %3720 = vst [vmem:[#allocation4 + $0x10] sm:$0x1] %v3719_v46  ;;  %3722 = vst [vmem:[#allocation4 + $0x11] sm:$0x1] %v3721_v30 }
 0x9c3   :  { %3724 = vst [vmem:[#allocation4 + $0x12] sm:$0x1] %v3723_v49  ;;  %v3725_v14 = vld [vmem:[#allocation4] sm:$0xff]  ;;  %v3853_v0 = vld [vmem:[%s17055_s16 + $0x50] sm:$0xff]  ;;  %v3854_v19 = vld [vmem:[%s17055_s16 + $0x58] sm:$0xff] }
 0x9c4   :  { %v3732_v7 = vld [vmem:[%s17054_s15 + $0x20] sm:$0x7f]  ;;  %v8796_v45 = vld [vmem:[%s17054_s15 + $0x48] sm:$0x7f]  ;;  %v10874_v5 = vpack.c.bf16 %v3854_v19, %v3853_v0  ;;  %v8817_v49 = vld [vmem:[%s17055_s16 + $0xf0] sm:$0xff] }
 0x9c5   :  { %v8815_v26 = vld [vmem:[%s17055_s16 + $0xe0] sm:$0xff]  ;;  %v8816_v12 = vld [vmem:[%s17055_s16 + $0xe8] sm:$0xff]  ;;  %v4429_v47 = vld [vmem:[%s17112_s1 + $0x18] sm:$0xff] }
 0x9c6   :  { %v3855_v54 = vld [vmem:[%s17055_s16 + $0x60] sm:$0xff]  ;;  %v3856_v24 = vld [vmem:[%s17055_s16 + $0x68] sm:$0xff]  ;;  %v10853_v46 = vpack.c.bf16 %v8816_v12, %v8815_v26  ;;  %v8820_v11 = vld [vmem:[%s17054_s15 + $0x58] sm:$0xff] }
 0x9c7   :  { %v10877_v30 = vpack.c.bf16 %v3856_v24, %v3855_v54  ;;  %v4427_v52 = vld [vmem:[%s17112_s1 + $0x8] sm:$0xff]  ;;  %v8821_v23 = vld [vmem:[%s17054_s15 + $0x60] sm:$0xff]  ;;  %v8823_v19 = vld [vmem:[%s17054_s15 + $0x70] sm:$0x7f] }
 0x9c8   :  { %v3726_v1 = vld [vmem:[#allocation4 + $0x8] sm:$0xff]  ;;  %v8869_v12 = vld [vmem:[%s17112_s1 + $0x58] sm:$0xff]  ;;  %v4430_v54 = vld [vmem:[#allocation2 + $0x1] sm:$0xff] }
 0x9c9   :  { %v14058_v22 = vpack.c.bf16 %v3726_v1, %v3725_v14  ;;  %v8818_v14 = vld [vmem:[%s17055_s16 + $0xf8] sm:$0xff]  ;;  %v3857_v1 = vld [vmem:[%s17055_s16 + $0x70] sm:$0xff]  ;;  %v8822_v0 = vld [vmem:[%s17054_s15 + $0x68] sm:$0xff] }
 0x9ca   :  { %v14082_v42 = vld [vmem:[#allocation4 + $0x10] sm:$0x7]  ;;  %v10856_v27 = vpack.c.bf16 %v8818_v14, %v8817_v49  ;;  %v10880_v31 = vpack.c.bf16 %v3858_v17, %v3857_v1  ;;  %v8867_v26 = vld [vmem:[%s17112_s1 + $0x48] sm:$0xff]  ;;  %v4433_v14 = vld [vmem:[#allocation2 + $0x19] sm:$0xff] }
 0x9cb   :  { %10830 = vmatpush3.bf16.msra.mxu1 %v14058_v22  ;;  %10833 = vmatpush3.bf16.msra.mxu0 %v14058_v22  ;;  %v4432_v49 = vld [vmem:[#allocation2 + $0x11] sm:$0xff]  ;;  %v4434_v1 = vld [vmem:[#allocation2 + $0x21] sm:$0x7f] }
 0x9cc   :  { %9936 = vmatprep.subr.mxu1 %v17154_v8  ;;  %9957 = vmatprep.subr.mxu0 %v17154_v8  ;;  %v8866_v17 = vld [vmem:[%s17112_s1 + $0x40] sm:$0xff] }
 0x9cf   :  { %9937 = vmatpush3.msk.msra.mxu1 %vm3749_vm11, %v14082_v42  ;;  %9958 = vmatpush3.msk.msra.mxu0 %vm3749_vm11, %v14082_v42 }
 0x9d0   :  { %9939 = vmatmul.mubr.msk.f32.vlgmr.msra.gmra.mrb[38].mxu1 %vm3733_vm12, %v3728_v48  ;;  %9960 = vmatmul.mubr.msk.f32.vlgmr.msra.gmra.mrb[30].mxu0 %vm3733_vm12, %v8792_v39  ;;  %v8831_v48 = vld [vmem:[%s17055_s16 + $0x108] sm:$0xff] }
 0x9d1   :  { %9941 = vmatprep.mubr.msk.f32.mxu1 %vm11640_vm6, %v17154_v8  ;;  %9962 = vmatprep.mubr.msk.f32.mxu0 %vm11640_vm6, %v17154_v8  ;;  %v10886_v61 = vpack.c.bf16 %v8831_v48, %v8830_v60  ;;  %v4422_v48 = vld [vmem:[#allocation2 + $0x8] sm:$0xff] }
 0x9d2   :  { %10834 = vmatprep.subr.bf16.mxu1 %v17155_v59  ;;  %10858 = vmatprep.subr.bf16.mxu0 %v17155_v59 }
 0x9d3   :  { %10836 = vmatpush3.bf16.msra.mxu1 %v10835_v6  ;;  %10860 = vmatpush3.bf16.msra.mxu0 %v10859_v53  ;;  %v8853_v53 = vld [vmem:[%s17112_s1 + $0x28] sm:$0xff] }
 0x9d4   :  { %9942 = vmatmul.mubr.msk.f32.gmra.mrb[40].mxu1 %vm3733_vm12, %v3729_v13  ;;  %9963 = vmatmul.mubr.msk.f32.gmra.mrb[32].mxu0 %vm3733_vm12, %v8793_v63  ;;  %v10909_v13 = vpack.c.bf16 %v8855_v55, %v8853_v53  ;;  %v4425_v53 = vld [vmem:[#allocation2 + $0x20] sm:$0x7f] }
 0x9d5   :  { %9944 = vmatprep.mubr.msk.f32.mxu1 %vm11640_vm6, %v17154_v8  ;;  %9965 = vmatprep.mubr.msk.f32.mxu0 %vm11640_vm6, %v17154_v8  ;;  %v4659_v55 = vld [vmem:[#allocation2 + $0x2] sm:$0xff] }
 0x9d6   :  { %10837 = vmatprep.subr.bf16.mxu1 %v17155_v59  ;;  %10861 = vmatprep.subr.bf16.mxu0 %v17155_v59 }
 0x9d7   :  { %10839 = vmatpush3.bf16.msra.mxu1 %v10838_v57  ;;  %10863 = vmatpush3.bf16.msra.mxu0 %v10862_v10  ;;  %v8832_v10 = vld [vmem:[%s17055_s16 + $0x110] sm:$0xff] }
 0x9d8   :  { %9945 = vmatmul.mubr.msk.f32.gmra.mrb[42].mxu1 %vm3733_vm12, %v3730_v56  ;;  %9966 = vmatmul.mubr.msk.f32.gmra.mrb[34].mxu0 %vm3733_vm12, %v8794_v32  ;;  %v8834_v32 = vld [vmem:[%s17055_s16 + $0x120] sm:$0xff] }
 0x9d9   :  { %9947 = vmatprep.mubr.msk.f32.mxu1 %vm11640_vm6, %v17154_v8  ;;  %9968 = vmatprep.mubr.msk.f32.mxu0 %vm11640_vm6, %v17154_v8 }
 0x9da   :  { %10840 = vmatprep.subr.bf16.mxu1 %v17155_v59  ;;  %10864 = vmatprep.subr.bf16.mxu0 %v17155_v59 }
 0x9db   :  { %10842 = vmatpush3.bf16.msra.mxu1 %v10841_v50  ;;  %10866 = vmatpush3.bf16.msra.mxu0 %v10865_v41 }
 0x9dc   :  { %9948 = vmatmul.mubr.msk.f32.gmra.mrb[44].mxu1 %vm3733_vm12, %v3731_v28  ;;  %9969 = vmatmul.mubr.msk.f32.gmra.mrb[36].mxu0 %vm3733_vm12, %v8795_v3  ;;  %v8852_v3 = vld [vmem:[%s17112_s1 + $0x20] sm:$0xff] }
 0x9dd   :  { %9950 = vmatprep.mubr.msk.f32.mxu1 %vm11640_vm6, %v17154_v8  ;;  %9971 = vmatprep.mubr.msk.f32.mxu0 %vm11640_vm6, %v17154_v8 }
 0x9de   :  { %10843 = vmatprep.subr.bf16.mxu1 %v17155_v59  ;;  %10867 = vmatprep.subr.bf16.mxu0 %v17155_v59 }
 0x9df   :  { %10845 = vmatpush3.bf16.msra.mxu1 %v10844_v51  ;;  %10869 = vmatpush3.bf16.msra.mxu0 %v10868_v9  ;;  %v8854_v51 = vld [vmem:[%s17112_s1 + $0x30] sm:$0xff] }
 0x9e0   :  { %9951 = vmatmul.mubr.msk.f32.gmra.mrb[46].mxu1 %vm3733_vm12, %v3732_v7  ;;  %9972 = vmatmul.mubr.msk.f32.gmra.mrb[38].mxu0 %vm3733_vm12, %v8796_v45  ;;  %v8819_v45 = vld [vmem:[%s17054_s15 + $0x50] sm:$0xff] }
 0x9e1   :  { %10846 = vmatprep.subr.bf16.mxu1 %v17155_v59  ;;  %10870 = vmatprep.subr.bf16.mxu0 %v17155_v59 }
 0x9e2   :  { %10006 = vmatprep.mubr.msk.f32.mxu1 %vm11640_vm6, %v17154_v8  ;;  %10053 = vmatprep.mubr.msk.f32.mxu0 %vm11640_vm6, %v17154_v8 }
 0x9e3   :  { %10848 = vmatpush3.bf16.msra.mxu1 %v10847_v62  ;;  %10872 = vmatpush3.bf16.msra.mxu0 %v10871_v2  ;;  %v10911_v62 = vpack.c.bf16 %v8854_v51, %v8852_v3  ;;  %v10913_v2 = vpack.c.bf16 %v4429_v47, %v4427_v52 }
 0x9e4   :  { %10849 = vmatprep.subr.bf16.mxu1 %v17155_v59  ;;  %10873 = vmatprep.subr.bf16.mxu0 %v17155_v59 }
 0x9e7   :  { %10851 = vmatpush3.bf16.msra.mxu1 %v10850_v4  ;;  %10875 = vmatpush3.bf16.msra.mxu0 %v10874_v5  ;;  %v4426_v4 = vld [vmem:[%s17112_s1] sm:$0xff]  ;;  %v4428_v5 = vld [vmem:[%s17112_s1 + $0x10] sm:$0xff] }
 0x9e8   :  { %10852 = vmatprep.subr.bf16.mxu1 %v17155_v59  ;;  %10876 = vmatprep.subr.bf16.mxu0 %v17155_v59  ;;  %v10915_v24 = vpack.c.bf16 %v4428_v5, %v4426_v4 }
 0x9eb   :  { %10854 = vmatpush3.bf16.msra.mxu1 %v10853_v46  ;;  %10878 = vmatpush3.bf16.msra.mxu0 %v10877_v30  ;;  %v10917_v46 = vpack.c.bf16 %v8869_v12, %v8867_v26  ;;  %v4431_v30 = vld [vmem:[#allocation2 + $0x9] sm:$0xff] }
 0x9ec   :  { %10855 = vmatprep.subr.bf16.mxu1 %v17155_v59  ;;  %10879 = vmatprep.subr.bf16.mxu0 %v17155_v59 }
 0x9ef   :  { %10857 = vmatpush3.bf16.msra.mxu1 %v10856_v27  ;;  %10881 = vmatpush3.bf16.msra.mxu0 %v10880_v31  ;;  %v8868_v27 = vld [vmem:[%s17112_s1 + $0x50] sm:$0xff]  ;;  %v4421_v31 = vld [vmem:[#allocation2] sm:$0xff] }
 0x9f0   :  { %10882 = vmatprep.subr.bf16.mxu1 %v17155_v59  ;;  %10885 = vmatprep.subr.bf16.mxu0 %v17155_v59  ;;  %v10919_v60 = vpack.c.bf16 %v8868_v27, %v8866_v17 }
 0xaa3   :  { %v3819_v39 = vpop.f32.mrb[38].mxu1  ;;  %v3946_v6 = vpop.f32.mrb[30].mxu0 }
 0xaa4   :  { %v9961_v20 = vpop.f32.mrb[31].mxu0  ;;  %10007 = vmatmul.mubr.f32.vlgmr.msra.gmra.mrb[48].mxu1 %v3946_v6  ;;  %10054 = vmatmul.mubr.f32.vlgmr.msra.gmra.mrb[40].mxu0 %v3819_v39  ;;  %v9940_v36 = vpop.f32.mrb[39].mxu1  ;;  %v4423_v39 = vld [vmem:[#allocation2 + $0x10] sm:$0xff]  ;;  %v4424_v6 = vld [vmem:[#allocation2 + $0x18] sm:$0xff] }
 0xaa5   :  { %10884 = vmatpush3.bf16.msra.mxu1 %v14058_v22  ;;  %10009 = vmatprep.mubr.msk.f32.mxu1 %vm11640_vm6, %v17154_v8  ;;  %v8833_v22 = vld [vmem:[%s17055_s16 + $0x118] sm:$0xff]  ;;  %v8836_v20 = vld [vmem:[%s17055_s16 + $0x130] sm:$0xff] }
 0xaa6   :  { %10056 = vmatprep.mubr.msk.f32.mxu0 %vm11640_vm6, %v17154_v8  ;;  %10072 = vmatprep.subr.mxu1 %v17154_v8  ;;  %v10889_v34 = vpack.c.bf16 %v8833_v22, %v8832_v10  ;;  %v8837_v36 = vld [vmem:[%s17055_s16 + $0x138] sm:$0xff]  ;;  %v8839_v10 = vld [vmem:[%s17055_s16 + $0x148] sm:$0xff] }
 0xaa7   :  { %v3824_v63 = vpop.f32.mrb[40].mxu1  ;;  %v3951_v57 = vpop.f32.mrb[32].mxu0  ;;  %10887 = vmatpush3.bf16.msra.mxu0 %v10886_v61  ;;  %v4660_v61 = vld [vmem:[#allocation2 + $0xa] sm:$0xff]  ;;  %v4662_v22 = vld [vmem:[#allocation2 + $0x1a] sm:$0xff] }
 0xaa8   :  { %v9964_v16 = vpop.f32.mrb[33].mxu0  ;;  %10010 = vmatmul.mubr.f32.gmra.mrb[50].mxu1 %v3951_v57  ;;  %10057 = vmatmul.mubr.f32.gmra.mrb[42].mxu0 %v3824_v63  ;;  %v9943_v21 = vpop.f32.mrb[41].mxu1  ;;  %v10895_v63 = vpack.c.bf16 %v8837_v36, %v8836_v20  ;;  %v8838_v57 = vld [vmem:[%s17055_s16 + $0x140] sm:$0xff] }
 0xaa9   :  { %10073 = vmatpush3.msk.msra.mxu1 %vm3749_vm11, %v14082_v42  ;;  %10012 = vmatprep.mubr.msk.f32.mxu1 %vm11640_vm6, %v17154_v8  ;;  %v8835_v42 = vld [vmem:[%s17055_s16 + $0x128] sm:$0xff]  ;;  %v10898_v16 = vpack.c.bf16 %v8839_v10, %v8838_v57  ;;  %v8840_v21 = vld [vmem:[%s17055_s16 + $0x150] sm:$0xff] }
 0xaaa   :  { %10059 = vmatprep.mubr.msk.f32.mxu0 %vm11640_vm6, %v17154_v8  ;;  %10910 = vmatprep.subr.bf16.mxu1 %v10909_v13  ;;  %v10892_v38 = vpack.c.bf16 %v8835_v42, %v8834_v32  ;;  %v4661_v13 = vld [vmem:[#allocation2 + $0x12] sm:$0xff]  ;;  %v8842_v32 = vld [vmem:[%s17055_s16 + $0x160] sm:$0xff]  ;;  %v8843_v42 = vld [vmem:[%s17055_s16 + $0x168] sm:$0xff] }
 0xaab   :  { %v3829_v25 = vpop.f32.mrb[42].mxu1  ;;  %v3956_v56 = vpop.f32.mrb[34].mxu0  ;;  %10888 = vmatprep.subr.bf16.mxu0 %v17155_v59 }
 0xaac   :  { %v9967_v50 = vpop.f32.mrb[35].mxu0  ;;  %10013 = vmatmul.mubr.f32.gmra.mrb[52].mxu1 %v3956_v56  ;;  %10060 = vmatmul.mubr.f32.gmra.mrb[44].mxu0 %v3829_v25  ;;  %v9946_v41 = vpop.f32.mrb[43].mxu1  ;;  %v4663_v25 = vld [vmem:[#allocation2 + $0x22] sm:$0x7f] }
 0xaad   :  { %10015 = vmatprep.mubr.msk.f32.mxu1 %vm11640_vm6, %v17154_v8  ;;  %10062 = vmatprep.mubr.msk.f32.mxu0 %vm11640_vm6, %v17154_v8  ;;  %v10904_v50 = vpack.c.bf16 %v8843_v42, %v8842_v32  ;;  %v8844_v41 = vld [vmem:[%s17055_s16 + $0x170] sm:$0xff] }
 0xaae   :  { %10890 = vmatpush3.bf16.msra.mxu0 %v10889_v34  ;;  %v8841_v34 = vld [vmem:[%s17055_s16 + $0x158] sm:$0xff] }
 0xaaf   :  { %v3834_v29 = vpop.f32.mrb[44].mxu1  ;;  %v3961_v35 = vpop.f32.mrb[36].mxu0  ;;  %10891 = vmatprep.subr.bf16.mxu0 %v17155_v59  ;;  %v10901_v56 = vpack.c.bf16 %v8841_v34, %v8840_v21 }
 0xab0   :  { %v9970_v15 = vpop.f32.mrb[37].mxu0  ;;  %10016 = vmatmul.mubr.f32.gmra.mrb[54].mxu1 %v3961_v35  ;;  %10063 = vmatmul.mubr.f32.gmra.mrb[46].mxu0 %v3834_v29  ;;  %v9949_v28 = vpop.f32.mrb[45].mxu1 }
 0xab1   :  { %10018 = vmatprep.mubr.msk.f32.mxu1 %vm11640_vm6, %v17154_v8  ;;  %10065 = vmatprep.mubr.msk.f32.mxu0 %vm11640_vm6, %v17154_v8 }
 0xab2   :  { %10893 = vmatpush3.bf16.msra.mxu0 %v10892_v38  ;;  %v8845_v38 = vld [vmem:[%s17055_s16 + $0x178] sm:$0xff] }
 0xab3   :  { %v3839_v9 = vpop.f32.mrb[46].mxu1  ;;  %v3966_v37 = vpop.f32.mrb[38].mxu0  ;;  %10894 = vmatprep.subr.bf16.mxu0 %v17155_v59  ;;  %v10907_v29 = vpack.c.bf16 %v8845_v38, %v8844_v41 }
 0xab4   :  { %v9973_v44 = vpop.f32.mrb[39].mxu0  ;;  %10019 = vmatmul.mubr.f32.gmra.mrb[56].mxu1 %v3966_v37  ;;  %10066 = vmatmul.mubr.f32.gmra.mrb[48].mxu0 %v3839_v9  ;;  %v9952_v7 = vpop.f32.mrb[47].mxu1 }
 0xab5   :  { %10074 = vmatprep.mubr.msk.f32.mxu1 %vm11640_vm6, %v17154_v8  ;;  %10121 = vmatprep.mubr.msk.f32.mxu0 %vm11640_vm6, %v17154_v8 }
 0xab6   :  { %10896 = vmatpush3.bf16.msra.mxu0 %v10895_v63 }
 0xab7   :  { %10897 = vmatprep.subr.bf16.mxu0 %v17155_v59 }
 0xab8   :  { %10075 = vmatmul.mubr.msk.f32.vlgmr.msra.gmra.mrb[58].mxu1 %vm3733_vm12, %v8819_v45 }
 0xab9   :  { %10077 = vmatprep.mubr.msk.f32.mxu1 %vm11640_vm6, %v17154_v8  ;;  %10912 = vmatpush1.bf16.msra.mxu1 %v10911_v62 }
 0xaba   :  { %10914 = vmatprep.subr.bf16.mxu1 %v10913_v2  ;;  %10899 = vmatpush3.bf16.msra.mxu0 %v10898_v16 }
 0xabb   :  { %10900 = vmatprep.subr.bf16.mxu0 %v17155_v59 }
 0xabc   :  { %10078 = vmatmul.mubr.msk.f32.gmra.mrb[60].mxu1 %vm3733_vm12, %v8820_v11 }
 0xabd   :  { %10080 = vmatprep.mubr.msk.f32.mxu1 %vm11640_vm6, %v17154_v8 }
 0xabe   :  { %10902 = vmatpush3.bf16.msra.mxu0 %v10901_v56 }
 0xabf   :  { %10903 = vmatprep.subr.bf16.mxu0 %v17155_v59 }
 0xac0   :  { %10081 = vmatmul.mubr.msk.f32.gmra.mrb[62].mxu1 %vm3733_vm12, %v8821_v23 }
 0xac1   :  { %10083 = vmatprep.mubr.msk.f32.mxu1 %vm11640_vm6, %v17154_v8 }
 0xac2   :  { %10905 = vmatpush3.bf16.msra.mxu0 %v10904_v50 }
 0xac3   :  { %10906 = vmatprep.subr.bf16.mxu0 %v17155_v59 }
 0xac4   :  { %10084 = vmatmul.mubr.msk.f32.gmra.mrb[64].mxu1 %vm3733_vm12, %v8822_v0 }
 0xac5   :  { %10086 = vmatprep.mubr.msk.f32.mxu1 %vm11640_vm6, %v17154_v8 }
 0xac6   :  { %10908 = vmatpush3.bf16.msra.mxu0 %v10907_v29 }
 0xac8   :  { %10087 = vmatmul.mubr.msk.f32.gmra.mrb[66].mxu1 %vm3733_vm12, %v8823_v19 }
 0xac9   :  { %4518 = vmatprep.mubr.f32.mxu1 %v17154_v8 }
 0xacc   :  { %8856 = vmatmul.mubr.msk.f32.vlgmr.msra.gmra.mrb[68].mxu1 %vm72_vm0, %v4430_v54 }
 0xacd   :  { %4524 = vmatprep.mubr.f32.mxu1 %v17154_v8  ;;  %10916 = vmatpush1.bf16.msra.mxu1 %v10915_v24 }
 0xace   :  { %10918 = vmatprep.subr.bf16.mxu1 %v10917_v46 }
 0xad0   :  { %8857 = vmatmul.mubr.msk.f32.gmra.mrb[70].mxu1 %vm72_vm0, %v4431_v30 }
 0xad1   :  { %4530 = vmatprep.mubr.f32.mxu1 %v17154_v8 }
 0xad4   :  { %8858 = vmatmul.mubr.msk.f32.gmra.mrb[72].mxu1 %vm72_vm0, %v4432_v49 }
 0xad5   :  { %4536 = vmatprep.mubr.f32.mxu1 %v17154_v8 }
 0xad8   :  { %8859 = vmatmul.mubr.msk.f32.gmra.mrb[74].mxu1 %vm72_vm0, %v4433_v14 }
 0xad9   :  { %4542 = vmatprep.mubr.f32.mxu1 %v17154_v8 }
 0xadc   :  { %8860 = vmatmul.mubr.msk.f32.gmra.mrb[76].mxu1 %vm72_vm0, %v4434_v1 }
 0xadd   :  { %4628 = vmatprep.mubr.f32.mxu1 %v17154_v8 }
 0xae0   :  { %8861 = vmatmul.mubr.msk.f32.vlgmr.msra.gmra.mrb[68].mxu1 %vm72_vm0, %v4421_v31 }
 0xae1   :  { %4634 = vmatprep.mubr.f32.mxu1 %v17154_v8  ;;  %10920 = vmatpush1.bf16.msra.mxu1 %v10919_v60 }
 0xae4   :  { %8862 = vmatmul.mubr.msk.f32.gmra.mrb[70].mxu1 %vm72_vm0, %v4422_v48 }
 0xae5   :  { %4640 = vmatprep.mubr.f32.mxu1 %v17154_v8 }
 0xae8   :  { %8863 = vmatmul.mubr.msk.f32.gmra.mrb[72].mxu1 %vm72_vm0, %v4423_v39 }
 0xae9   :  { %4646 = vmatprep.mubr.f32.mxu1 %v17154_v8 }
 0xaec   :  { %8864 = vmatmul.mubr.msk.f32.gmra.mrb[74].mxu1 %vm72_vm0, %v4424_v6  ;;  %v4788_v6 = vld [vmem:[%s17115_s2] sm:$0x3] }
 0xaed   :  { %4652 = vmatprep.mubr.f32.mxu1 %v17154_v8 }
 0xaf0   :  { %8865 = vmatmul.mubr.msk.f32.gmra.mrb[76].mxu1 %vm72_vm0, %v4425_v53  ;;  %v4793_v53 = vrot.slane %v4788_v6, %v17139_v43 }
 0xaf1   :  { %4747 = vmatprep.mubr.f32.mxu1 %v17154_v8 }
 0xaf4   :  { %8870 = vmatmul.mubr.msk.f32.vlgmr.msra.gmra.mrb[68].mxu1 %vm72_vm0, %v4659_v55  ;;  %v4797_v55 = vrot.slane %v4788_v6, %v17141_v40 }
 0xaf5   :  { %4753 = vmatprep.mubr.f32.mxu1 %v17154_v8 }
 0xaf8   :  { %8871 = vmatmul.mubr.msk.f32.gmra.mrb[70].mxu1 %vm72_vm0, %v4660_v61 }
 0xaf9   :  { %4759 = vmatprep.mubr.f32.mxu1 %v17154_v8 }
 0xafc   :  { %8872 = vmatmul.mubr.msk.f32.gmra.mrb[72].mxu1 %vm72_vm0, %v4661_v13 }
 0xafd   :  { %4765 = vmatprep.mubr.f32.mxu1 %v17154_v8 }
 0xb00   :  { %8873 = vmatmul.mubr.msk.f32.gmra.mrb[74].mxu1 %vm72_vm0, %v4662_v22 }
 0xb01   :  { %4771 = vmatprep.mubr.f32.mxu1 %v17154_v8 }
 0xb04   :  { %8874 = vmatmul.mubr.msk.f32.gmra.mrb[76].mxu1 %vm72_vm0, %v4663_v25 }
 0xb77   :  { %v4053_v35 = vpop.f32.mrb[48].mxu1  ;;  %v4143_v15 = vpop.f32.mrb[40].mxu0 }
 0xb78   :  { %v14417_v28 = vadd.f32 %v4143_v15, %v4053_v35  ;;  %v10008_v3 = vpop.f32.mrb[49].mxu1  ;;  %v10055_v51 = vpop.f32.mrb[41].mxu0 }
 0xb7b   :  { %v4058_v9 = vpop.f32.mrb[50].mxu1  ;;  %v4148_v37 = vpop.f32.mrb[42].mxu0 }
 0xb7c   :  { %v14419_v52 = vadd.f32 %v4148_v37, %v4058_v9  ;;  %v10011_v47 = vpop.f32.mrb[51].mxu1  ;;  %v10058_v44 = vpop.f32.mrb[43].mxu0 }
 0xb7f   :  { %v4063_v7 = vpop.f32.mrb[52].mxu1  ;;  %v4153_v45 = vpop.f32.mrb[44].mxu0 }
 0xb80   :  { %v14421_v62 = vadd.f32 %v4153_v45, %v4063_v7  ;;  %v10014_v2 = vpop.f32.mrb[53].mxu1  ;;  %v10061_v11 = vpop.f32.mrb[45].mxu0 }
 0xb83   :  { %v4068_v23 = vpop.f32.mrb[54].mxu1  ;;  %v4158_v0 = vpop.f32.mrb[46].mxu0 }
 0xb84   :  { %v14423_v19 = vadd.f32 %v4158_v0, %v4068_v23  ;;  %v10017_v4 = vpop.f32.mrb[55].mxu1  ;;  %v10064_v5 = vpop.f32.mrb[47].mxu0 }
 0xb87   :  { %v4073_v26 = vpop.f32.mrb[56].mxu1  ;;  %v4163_v12 = vpop.f32.mrb[48].mxu0 }
 0xb88   :  { %v14425_v54 = vadd.f32 %v4163_v12, %v4073_v26  ;;  %v10020_v24 = vpop.f32.mrb[57].mxu1  ;;  %v10067_v46 = vpop.f32.mrb[49].mxu0 }
 0xb8b   :  { %v4254_v30 = vpop.f32.mrb[58].mxu1 }
 0xb8c   :  { %v10076_v49 = vpop.f32.mrb[59].mxu1  ;;  %10122 = vmatmul.mubr.f32.vlgmr.msra.gmra.mrb[50].mxu0 %v4254_v30 }
 0xb8d   :  { %10124 = vmatprep.mubr.msk.f32.mxu0 %vm11640_vm6, %v17154_v8 }
 0xb8f   :  { %v4259_v14 = vpop.f32.mrb[60].mxu1 }
 0xb90   :  { %v10079_v1 = vpop.f32.mrb[61].mxu1  ;;  %10125 = vmatmul.mubr.f32.gmra.mrb[52].mxu0 %v4259_v14 }
 0xb91   :  { %10127 = vmatprep.mubr.msk.f32.mxu0 %vm11640_vm6, %v17154_v8 }
 0xb93   :  { %v4264_v17 = vpop.f32.mrb[62].mxu1 }
 0xb94   :  { %v10082_v27 = vpop.f32.mrb[63].mxu1  ;;  %10128 = vmatmul.mubr.f32.gmra.mrb[54].mxu0 %v4264_v17 }
 0xb95   :  { %10130 = vmatprep.mubr.msk.f32.mxu0 %vm11640_vm6, %v17154_v8 }
 0xb97   :  { %v4269_v31 = vpop.f32.mrb[64].mxu1 }
 0xb98   :  { %v10085_v60 = vpop.f32.mrb[65].mxu1  ;;  %10131 = vmatmul.mubr.f32.gmra.mrb[56].mxu0 %v4269_v31 }
 0xb99   :  { %10133 = vmatprep.mubr.msk.f32.mxu0 %vm11640_vm6, %v17154_v8 }
 0xb9b   :  { %v4274_v48 = vpop.f32.mrb[66].mxu1 }
 0xb9c   :  { %v10088_v39 = vpop.f32.mrb[67].mxu1  ;;  %10134 = vmatmul.mubr.f32.gmra.mrb[58].mxu0 %v4274_v48 }
 0xb9d   :  { %5122 = vmatprep.mubr.f32.mxu0 %v17154_v8 }
 0xbc7   :  { %v4749_v61 = vpop.f32.mrb[68].mxu1 }
 0xbc8   :  { %v14441_v20 = vadd.f32 %v4793_v53, %v4749_v61  ;;  %v4751_v36 = vpop.f32.mrb[69].mxu1 }
 0xbc9   :  { %v14443_v13 = vadd.f32 %v4797_v55, %v4751_v36 }
 0xbcb   :  { %v4755_v63 = vpop.f32.mrb[70].mxu1  ;;  %v4810_v57 = vadd.f32 %v14443_v13, %v14441_v20 }
 0xbcc   :  { %v14447_v10 = vadd.f32 %v4793_v53, %v4755_v63  ;;  %v4757_v22 = vpop.f32.mrb[71].mxu1 }
 0xbcd   :  { %v4803_v16 = vadd.f32 %v4797_v55, %v4757_v22  ;;  %4811 = vadd.xlane.f32.xlu0 %v4810_v57 }
 0xbcf   :  { %v4761_v21 = vpop.f32.mrb[72].mxu1  ;;  %v4813_v34 = vadd.f32 %v4803_v16, %v14447_v10 }
 0xbd0   :  { %v14450_v25 = vadd.f32 %v4793_v53, %v4761_v21  ;;  %v4763_v56 = vpop.f32.mrb[73].mxu1 }
 0xbd1   :  { %v4805_v32 = vadd.f32 %v4797_v55, %v4763_v56  ;;  %4814 = vadd.xlane.f32.xlu1 %v4813_v34 }
 0xbd3   :  { %v4767_v42 = vpop.f32.mrb[74].mxu1  ;;  %v4816_v50 = vadd.f32 %v4805_v32, %v14450_v25 }
 0xbd4   :  { %v4806_v41 = vadd.f32 %v4793_v53, %v4767_v42  ;;  %v4769_v38 = vpop.f32.mrb[75].mxu1 }
 0xbd5   :  { %v4807_v29 = vadd.f32 %v4797_v55, %v4769_v38  ;;  %4817 = vadd.xlane.f32.xlu0 %v4816_v50 }
 0xbd7   :  { %v4773_v35 = vpop.f32.mrb[76].mxu1  ;;  %v4819_v15 = vadd.f32 %v4807_v29, %v4806_v41 }
 0xbd8   :  { %v14453_v3 = vadd.f32 %v4793_v53, %v4773_v35  ;;  %v4775_v51 = vpop.f32.mrb[77].mxu1 }
 0xbd9   :  { %v4809_v9 = vadd.f32 %v4797_v55, %v4775_v51  ;;  %4820 = vadd.xlane.f32.xlu1 %v4819_v15 }
 0xbda   :  { %v4822_v37 = vsel %vm482_vm3, %v14453_v3, 0.0 }
 0xbdb   :  { %v4823_v47 = vsel %vm482_vm3, %v4809_v9, 0.0 }
 0xbdc   :  { %v4824_v44 = vadd.f32 %v4823_v47, %v4822_v37 }
 0xbde   :  { %4825 = vadd.xlane.f32.xlu0 %v4824_v44 }
 0xc5a   :  { %v4812_v45 = vpop.xlane.xlu0 %4811 }
 0xc5b   :  { %v4827_v46 = vmul.f32 0.00390625, %v4812_v45 }
 0xc5e   :  { %v4815_v23 = vpop.xlane.xlu1 %4814 }
 0xc5f   :  { %v4361_v7 = vpop.f32.mrb[50].mxu0  ;;  %v4828_v12 = vmul.f32 0.00390625, %v4815_v23 }
 0xc60   :  { %v14459_v2 = vadd.f32 %v4361_v7, %v14417_v28  ;;  %v10123_v11 = vpop.f32.mrb[51].mxu0 }
 0xc61   :  { %v4832_v17 = vadd.f32 %v4828_v12, %v4827_v46 }
 0xc62   :  { %v4818_v4 = vpop.xlane.xlu0 %4817 }
 0xc63   :  { %v4366_v0 = vpop.f32.mrb[52].mxu0  ;;  %v4829_v30 = vmul.f32 0.00390625, %v4818_v4 }
 0xc64   :  { %v14462_v5 = vadd.f32 %v4366_v0, %v14419_v52  ;;  %v10126_v26 = vpop.f32.mrb[53].mxu0 }
 0xc65   :  { %v4833_v27 = vadd.f32 %v4832_v17, %v4829_v30 }
 0xc66   :  { %v4821_v24 = vpop.xlane.xlu1 %4820 }
 0xc67   :  { %v4371_v49 = vpop.f32.mrb[54].mxu0  ;;  %v4830_v28 = vmul.f32 0.00390625, %v4821_v24 }
 0xc68   :  { %v14465_v14 = vadd.f32 %v4371_v49, %v14421_v62  ;;  %v10129_v1 = vpop.f32.mrb[55].mxu0 }
 0xc69   :  { %v4834_v6 = vadd.f32 %v4833_v27, %v4830_v28 }
 0xc6b   :  { %v4376_v31 = vpop.f32.mrb[56].mxu0  ;;  %v4826_v60 = vpop.xlane.xlu0 %4825 }
 0xc6c   :  { %v14468_v48 = vadd.f32 %v4376_v31, %v14423_v19  ;;  %v4831_v52 = vmul.f32 0.00390625, %v4826_v60  ;;  %v10132_v39 = vpop.f32.mrb[57].mxu0 }
 0xc6e   :  { %v4835_v53 = vsel %vm482_vm3, %v4831_v52, 0.0 }
 0xc6f   :  { %v4836_v55 = vadd.f32 %v4835_v53, %v4834_v6  ;;  %v4381_v61 = vpop.f32.mrb[58].mxu0 }
 0xc70   :  { %v14472_v36 = vadd.f32 %v4381_v61, %v14425_v54  ;;  %v10135_v62 = vpop.f32.mrb[59].mxu0 }
 0xc71   :  { %v4837_v63 = vrot.slane %v4836_v55, 4 }
 0xc73   :  { %v4838_v57 = vadd.f32 %v4837_v63, %v4836_v55 }
 0xc75   :  { %v4839_v22 = vrot.slane %v4838_v57, 2 }
 0xc77   :  { %v4840_v21 = vadd.f32 %v4839_v22, %v4838_v57 }
 0xc79   :  { %v4841_v34 = vrot.slane %v4840_v21, 1 }
 0xc7b   :  { %v4842_v56 = vadd.f32 %v4841_v34, %v4840_v21 }
 0xc7d   :  { %v4843_v42 = vmul.f32 0.025641026, %v4842_v56  ;;  %v4911_v56 = vld [vmem:[%s17117_s25 + $0x8] sm:$0xff] }
 0xc7f   :  { %v14475_v19 = vsub.f32 %v14447_v10, %v4843_v42  ;;  %v14477_v50 = vsub.f32 %v4803_v16, %v4843_v42  ;;  %v14480_v38 = vsub.f32 %v14441_v20, %v4843_v42  ;;  %v4845_v35 = vsub.f32 %v14443_v13, %v4843_v42 }
 0xc80   :  { %v14483_v54 = vsub.f32 %v4806_v41, %v4843_v42  ;;  %v14485_v15 = vsub.f32 %v4807_v29, %v4843_v42  ;;  %v14488_v51 = vsub.f32 %v14450_v25, %v4843_v42  ;;  %v14490_v37 = vsub.f32 %v4805_v32, %v4843_v42 }
 0xc81   :  { %v4856_v10 = vmul.f32 %v14475_v19, %v14475_v19  ;;  %v4857_v16 = vmul.f32 %v14477_v50, %v14477_v50  ;;  %v4854_v20 = vmul.f32 %v14480_v38, %v14480_v38  ;;  %v4855_v47 = vmul.f32 %v4845_v35, %v4845_v35 }
 0xc82   :  { %v4860_v13 = vmul.f32 %v14483_v54, %v14483_v54  ;;  %v4861_v41 = vmul.f32 %v14485_v15, %v14485_v15  ;;  %v4858_v25 = vmul.f32 %v14488_v51, %v14488_v51  ;;  %v4859_v32 = vmul.f32 %v14490_v37, %v14490_v37 }
 0xc83   :  { %v4867_v29 = vadd.f32 %v4857_v16, %v4856_v10  ;;  %v4864_v44 = vadd.f32 %v4855_v47, %v4854_v20  ;;  %v14507_v7 = vsub.f32 %v14453_v3, %v4843_v42  ;;  %v14509_v45 = vsub.f32 %v4809_v9, %v4843_v42  ;;  %v4913_v42 = vld [vmem:[%s17117_s25 + $0x18] sm:$0xff]  ;;  %v4931_v16 = vld [vmem:[%s17043_s4 + $0x8] sm:$0xff]  ;;  %v4910_v20 = vld [vmem:[%s17117_s25] sm:$0xff] }
 0xc84   :  { %v4873_v0 = vadd.f32 %v4861_v41, %v4860_v13  ;;  %v4870_v4 = vadd.f32 %v4859_v32, %v4858_v25  ;;  %v4912_v47 = vld [vmem:[%s17117_s25 + $0x10] sm:$0xff]  ;;  %v4915_v13 = vld [vmem:[%s17117_s25 + $0x28] sm:$0xff] }
 0xc85   :  { %4868 = vadd.xlane.f32.xlu0 %v4867_v29  ;;  %4865 = vadd.xlane.f32.xlu1 %v4864_v44  ;;  %v4862_v11 = vmul.f32 %v14507_v7, %v14507_v7  ;;  %v4863_v23 = vmul.f32 %v14509_v45, %v14509_v45  ;;  %v4917_v44 = vld [vmem:[%s17117_s25 + $0x38] sm:$0xff] }
 0xc87   :  { %v4876_v26 = vsel %vm482_vm3, %v4862_v11, 0.0  ;;  %v4877_v12 = vsel %vm482_vm3, %v4863_v23, 0.0  ;;  %v4914_v11 = vld [vmem:[%s17117_s25 + $0x20] sm:$0xff] }
 0xc88   :  { %v4878_v3 = vadd.f32 %v4877_v12, %v4876_v26 }
 0xc89   :  { %4874 = vadd.xlane.f32.xlu0 %v4873_v0  ;;  %4871 = vadd.xlane.f32.xlu1 %v4870_v4 }
 0xc8d   :  { %4879 = vadd.xlane.f32.xlu1 %v4878_v3 }
 0xd12   :  { %v4869_v9 = vpop.xlane.xlu0 %4868  ;;  %v4866_v24 = vpop.xlane.xlu1 %4865 }
 0xd13   :  { %v4882_v46 = vmul.f32 0.00390625, %v4869_v9  ;;  %v4881_v30 = vmul.f32 0.00390625, %v4866_v24 }
 0xd15   :  { %v4886_v17 = vadd.f32 %v4882_v46, %v4881_v30  ;;  %v4935_v46 = vld [vmem:[%s17043_s4 + $0x28] sm:$0xff] }
 0xd16   :  { %v4875_v49 = vpop.xlane.xlu0 %4874  ;;  %v4872_v1 = vpop.xlane.xlu1 %4871 }
 0xd17   :  { %v4883_v28 = vmul.f32 0.00390625, %v4872_v1  ;;  %v4884_v27 = vmul.f32 0.00390625, %v4875_v49 }
 0xd19   :  { %v4887_v31 = vadd.f32 %v4886_v17, %v4883_v28 }
 0xd1a   :  { %v4880_v60 = vpop.xlane.xlu1 %4879 }
 0xd1b   :  { %v4888_v52 = vadd.f32 %v4887_v31, %v4884_v27  ;;  %v4885_v39 = vmul.f32 0.00390625, %v4880_v60  ;;  %v4934_v60 = vld [vmem:[%s17043_s4 + $0x20] sm:$0xff] }
 0xd1d   :  { %v4889_v6 = vsel %vm482_vm3, %v4885_v39, 0.0 }
 0xd1e   :  { %v4890_v53 = vadd.f32 %v4889_v6, %v4888_v52  ;;  %v4936_v52 = vld [vmem:[%s17043_s4 + $0x30] sm:$0xff] }
 0xd20   :  { %v4891_v55 = vrot.slane %v4890_v53, 4 }
 0xd22   :  { %v4892_v61 = vadd.f32 %v4891_v55, %v4890_v53 }
 0xd24   :  { %v4893_v62 = vrot.slane %v4892_v61, 2 }
 0xd26   :  { %v4894_v63 = vadd.f32 %v4893_v62, %v4892_v61 }
 0xd28   :  { %v4895_v57 = vrot.slane %v4894_v63, 1 }
 0xd2a   :  { %v4896_v22 = vadd.f32 %v4895_v57, %v4894_v63 }
 0xd2c   :  { %v4897_v21 = vmul.f32 0.025641026, %v4896_v22 }
 0xd2e   :  { %v4898_v34 = vadd.f32 1e-05, %v4897_v21 }
 0xd30   :  { %11548 = vrsqrt.f32 %v4898_v34 }
 0xd3a   :  { %v14524_v10 = vpop.eup %11548 }
 0xd3b   :  { %v4901_v41 = vmul.f32 %v14524_v10, %v4845_v35  ;;  %v4903_v25 = vmul.f32 %v14524_v10, %v14477_v50  ;;  %v4900_v32 = vmul.f32 %v14524_v10, %v14480_v38  ;;  %v4902_v29 = vmul.f32 %v14524_v10, %v14475_v19  ;;  %v4916_v35 = vld [vmem:[%s17117_s25 + $0x30] sm:$0xff]  ;;  %v4933_v50 = vld [vmem:[%s17043_s4 + $0x18] sm:$0xff]  ;;  %v4930_v19 = vld [vmem:[%s17043_s4] sm:$0xff] }
 0xd3c   :  { %v4932_v38 = vld [vmem:[%s17043_s4 + $0x10] sm:$0xff]  ;;  %v4905_v23 = vmul.f32 %v14524_v10, %v14490_v37  ;;  %v4907_v0 = vmul.f32 %v14524_v10, %v14485_v15  ;;  %v4904_v4 = vmul.f32 %v14524_v10, %v14488_v51  ;;  %v4906_v26 = vmul.f32 %v14524_v10, %v14483_v54  ;;  %v4937_v37 = vld [vmem:[%s17043_s4 + $0x38] sm:$0xff] }
 0xd3d   :  { %v4921_v12 = vmul.f32 %v4911_v56, %v4901_v41  ;;  %v4923_v3 = vmul.f32 %v4913_v42, %v4903_v25  ;;  %v4920_v9 = vmul.f32 %v4910_v20, %v4900_v32  ;;  %v4922_v24 = vmul.f32 %v4912_v47, %v4902_v29 }
 0xd3e   :  { %v4925_v30 = vmul.f32 %v4915_v13, %v4905_v23  ;;  %v4927_v15 = vmul.f32 %v4917_v44, %v4907_v0  ;;  %v4924_v49 = vmul.f32 %v4914_v11, %v4904_v4  ;;  %v4926_v1 = vmul.f32 %v4916_v35, %v4906_v26 }
 0xd3f   :  { %v14577_v51 = vadd.f32 %v4931_v16, %v4921_v12  ;;  %v14579_v17 = vadd.f32 %v4933_v50, %v4923_v3  ;;  %v14581_v54 = vadd.f32 %v4930_v19, %v4920_v9  ;;  %v14583_v28 = vadd.f32 %v4932_v38, %v4922_v24  ;;  %v4919_v24 = vld [vmem:[%s17117_s25 + $0x48] sm:$0x7f] }
 0xd40   :  { %v14585_v27 = vadd.f32 %v4935_v46, %v4925_v30  ;;  %v14587_v31 = vadd.f32 %v4937_v37, %v4927_v15  ;;  %v14601_v63 = vadd.f32 %v4934_v60, %v4924_v49  ;;  %v14603_v57 = vadd.f32 %v4936_v52, %v4926_v1  ;;  %v4918_v15 = vld [vmem:[%s17117_s25 + $0x40] sm:$0x7f]  ;;  %v4939_v60 = vld [vmem:[%s17043_s4 + $0x48] sm:$0x7f] }
 0xd41   :  { %v4961_v39 = vmul.f32 0.044715, %v14577_v51  ;;  %v4963_v6 = vmul.f32 0.044715, %v14579_v17  ;;  %v4960_v53 = vmul.f32 0.044715, %v14581_v54  ;;  %v4909_v30 = vmul.f32 %v14524_v10, %v14509_v45 }
 0xd42   :  { %v4962_v55 = vmul.f32 0.044715, %v14583_v28  ;;  %v4965_v34 = vmul.f32 0.044715, %v14585_v27  ;;  %v4967_v56 = vmul.f32 0.044715, %v14587_v31  ;;  %v4908_v52 = vmul.f32 %v14524_v10, %v14507_v7 }
 0xd43   :  { %v4971_v61 = vmul.f32 %v4961_v39, %v14577_v51  ;;  %v4973_v62 = vmul.f32 %v4963_v6, %v14579_v17  ;;  %v4970_v22 = vmul.f32 %v4960_v53, %v14581_v54  ;;  %v4964_v29 = vmul.f32 0.044715, %v14601_v63  ;;  %v4938_v53 = vld [vmem:[%s17043_s4 + $0x40] sm:$0x7f] }
 0xd44   :  { %v4972_v21 = vmul.f32 %v4962_v55, %v14583_v28  ;;  %v4975_v13 = vmul.f32 %v4965_v34, %v14585_v27  ;;  %v4977_v41 = vmul.f32 %v4967_v56, %v14587_v31  ;;  %v4966_v44 = vmul.f32 0.044715, %v14603_v57 }
 0xd45   :  { %v4981_v42 = vmul.f32 %v4971_v61, %v14577_v51  ;;  %v4983_v16 = vmul.f32 %v4973_v62, %v14579_v17  ;;  %v4980_v20 = vmul.f32 %v4970_v22, %v14581_v54  ;;  %v4974_v0 = vmul.f32 %v4964_v29, %v14601_v63 }
 0xd46   :  { %v4982_v47 = vmul.f32 %v4972_v21, %v14583_v28  ;;  %v4985_v50 = vmul.f32 %v4975_v13, %v14585_v27  ;;  %v4987_v19 = vmul.f32 %v4977_v41, %v14587_v31  ;;  %v4976_v4 = vmul.f32 %v4966_v44, %v14603_v57 }
 0xd47   :  { %v4991_v25 = vadd.f32 %v4981_v42, %v14577_v51  ;;  %v4993_v32 = vadd.f32 %v4983_v16, %v14579_v17  ;;  %v4990_v11 = vadd.f32 %v4980_v20, %v14581_v54  ;;  %v4984_v46 = vmul.f32 %v4974_v0, %v14601_v63 }
 0xd48   :  { %v4992_v35 = vadd.f32 %v4982_v47, %v14583_v28  ;;  %v4995_v3 = vadd.f32 %v4985_v50, %v14585_v27  ;;  %v4997_v9 = vadd.f32 %v4987_v19, %v14587_v31  ;;  %v4986_v37 = vmul.f32 %v4976_v4, %v14603_v57 }
 0xd49   :  { %v5001_v38 = vmul.f32 0.7978846, %v4991_v25  ;;  %v5003_v23 = vmul.f32 0.7978846, %v4993_v32  ;;  %v5000_v26 = vmul.f32 0.7978846, %v4990_v11  ;;  %v4994_v39 = vadd.f32 %v4984_v46, %v14601_v63 }
 0xd4a   :  { %v5002_v12 = vmul.f32 0.7978846, %v4992_v35  ;;  %v5005_v49 = vmul.f32 0.7978846, %v4995_v3  ;;  %v5007_v1 = vmul.f32 0.7978846, %v4997_v9  ;;  %v4996_v6 = vadd.f32 %v4986_v37, %v14603_v57 }
 0xd4b   :  { %11550 = vtanh.f32 %v5001_v38  ;;  %v4929_v45 = vmul.f32 %v4919_v24, %v4909_v30  ;;  %v4928_v55 = vmul.f32 %v4918_v15, %v4908_v52  ;;  %v5004_v61 = vmul.f32 0.7978846, %v4994_v39 }
 0xd4c   :  { %11552 = vtanh.f32 %v5003_v23  ;;  %v5006_v62 = vmul.f32 0.7978846, %v4996_v6  ;;  %v4951_v47 = vmul.f32 0.5, %v14577_v51  ;;  %v4953_v32 = vmul.f32 0.5, %v14579_v17 }
 0xd4d   :  { %11554 = vtanh.f32 %v5000_v26  ;;  %v4949_v22 = vadd.f32 %v4939_v60, %v4929_v45  ;;  %v4948_v21 = vadd.f32 %v4938_v53, %v4928_v55  ;;  %v4950_v44 = vmul.f32 0.5, %v14581_v54 }
 0xd4e   :  { %11556 = vtanh.f32 %v5002_v12  ;;  %v4952_v19 = vmul.f32 0.5, %v14583_v28  ;;  %v4955_v51 = vmul.f32 0.5, %v14585_v27  ;;  %v4957_v17 = vmul.f32 0.5, %v14587_v31 }
 0xd4f   :  { %11558 = vtanh.f32 %v5005_v49  ;;  %v4969_v7 = vmul.f32 0.044715, %v4949_v22  ;;  %v4968_v10 = vmul.f32 0.044715, %v4948_v21  ;;  %v4956_v39 = vmul.f32 0.5, %v14603_v57 }
 0xd50   :  { %11560 = vtanh.f32 %v5007_v1  ;;  %v4954_v1 = vmul.f32 0.5, %v14601_v63  ;;  %v5157_v63 = vld [vmem:[%s17045_s6 + $0x80] sm:$0xff] }
 0xd51   :  { %11562 = vtanh.f32 %v5004_v61  ;;  %v4979_v34 = vmul.f32 %v4969_v7, %v4949_v22  ;;  %v4978_v56 = vmul.f32 %v4968_v10, %v4948_v21  ;;  %v4959_v10 = vmul.f32 0.5, %v4949_v22 }
 0xd52   :  { %11564 = vtanh.f32 %v5006_v62  ;;  %v5158_v62 = vld [vmem:[%s17045_s6 + $0x88] sm:$0xff] }
 0xd53   :  { %v4989_v16 = vmul.f32 %v4979_v34, %v4949_v22  ;;  %v4988_v41 = vmul.f32 %v4978_v56, %v4948_v21  ;;  %v5141_v34 = vld [vmem:[%s17045_s6] sm:$0xff]  ;;  %v5142_v56 = vld [vmem:[%s17045_s6 + $0x8] sm:$0xff] }
 0xd55   :  { %v11551_v42 = vpop.eup %11550  ;;  %v4999_v11 = vadd.f32 %v4989_v16, %v4949_v22  ;;  %v4998_v23 = vadd.f32 %v4988_v41, %v4948_v21 }
 0xd56   :  { %v11553_v20 = vpop.eup %11552  ;;  %v5021_v13 = vadd.f32 1.0, %v11551_v42  ;;  %v4958_v42 = vmul.f32 0.5, %v4948_v21 }
 0xd57   :  { %v11555_v25 = vpop.eup %11554  ;;  %v5023_v29 = vadd.f32 1.0, %v11553_v20  ;;  %v5009_v12 = vmul.f32 0.7978846, %v4999_v11  ;;  %v5008_v46 = vmul.f32 0.7978846, %v4998_v23  ;;  %v5159_v20 = vld [vmem:[%s17045_s6 + $0x90] sm:$0xff] }
 0xd58   :  { %v11557_v35 = vpop.eup %11556  ;;  %v5031_v50 = vmul.f32 %v5021_v13, %v4951_v47  ;;  %v5020_v38 = vadd.f32 1.0, %v11555_v25  ;;  %v5160_v47 = vld [vmem:[%s17045_s6 + $0x98] sm:$0xff]  ;;  %v10929_v13 = vpack.c.bf16 %v5158_v62, %v5157_v63  ;;  %v5040_v25 = vld [vmem:[%s17044_s5] sm:$0xff] }
 0xd59   :  { %v11559_v0 = vpop.eup %11558  ;;  %v5033_v4 = vmul.f32 %v5023_v29, %v4953_v32  ;;  %v5022_v26 = vadd.f32 1.0, %v11557_v35  ;;  %11566 = vtanh.f32 %v5009_v12  ;;  %v10931_v32 = vpack.c.bf16 %v5142_v56, %v5141_v34  ;;  %v5143_v29 = vld [vmem:[%s17045_s6 + $0x10] sm:$0xff]  ;;  %v5161_v11 = vld [vmem:[%s17045_s6 + $0xa0] sm:$0xff]  ;;  %v5162_v35 = vld [vmem:[%s17045_s6 + $0xa8] sm:$0xff] }
 0xd5a   :  { %v11561_v3 = vpop.eup %11560  ;;  %v5030_v9 = vmul.f32 %v5020_v38, %v4950_v44  ;;  %v5025_v24 = vadd.f32 1.0, %v11559_v0  ;;  %11568 = vtanh.f32 %v5008_v46  ;;  %v10933_v21 = vpack.c.bf16 %v5160_v47, %v5159_v20  ;;  %v5144_v44 = vld [vmem:[%s17045_s6 + $0x18] sm:$0xff]  ;;  %v5145_v23 = vld [vmem:[%s17045_s6 + $0x20] sm:$0xff]  ;;  %v5146_v0 = vld [vmem:[%s17045_s6 + $0x28] sm:$0xff] }
 0xd5b   :  { %v11563_v54 = vpop.eup %11562  ;;  %v10921_v37 = vpack.c.bf16 %v5033_v4, %v5031_v50  ;;  %v5032_v30 = vmul.f32 %v5022_v26, %v4952_v19  ;;  %v5027_v15 = vadd.f32 1.0, %v11561_v3  ;;  %v5041_v50 = vld [vmem:[%s17044_s5 + $0x8] sm:$0xff]  ;;  %v10935_v19 = vpack.c.bf16 %v5144_v44, %v5143_v29  ;;  %v5163_v4 = vld [vmem:[%s17045_s6 + $0xb0] sm:$0xff]  ;;  %v5164_v26 = vld [vmem:[%s17045_s6 + $0xb8] sm:$0xff] }
 0xd5c   :  { %v11565_v28 = vpop.eup %11564  ;;  %v5035_v49 = vmul.f32 %v5025_v24, %v4955_v51  ;;  %v5024_v60 = vadd.f32 1.0, %v11563_v54  ;;  %v10937_v38 = vpack.c.bf16 %v5162_v35, %v5161_v11  ;;  %v5042_v51 = vld [vmem:[%s17044_s5 + $0x10] sm:$0x7]  ;;  %v10939_v12 = vpack.c.bf16 %v5146_v0, %v5145_v23  ;;  %v5165_v24 = vld [vmem:[%s17045_s6 + $0xc0] sm:$0xff]  ;;  %v5166_v46 = vld [vmem:[%s17045_s6 + $0xc8] sm:$0xff] }
 0xd5d   :  { %10922 = vmatprep.subr.bf16.mxu0 %v10921_v37  ;;  %v10923_v27 = vpack.c.bf16 %v5032_v30, %v5030_v9  ;;  %v5037_v52 = vmul.f32 %v5027_v15, %v4957_v17  ;;  %v5026_v6 = vadd.f32 1.0, %v11565_v28  ;;  %v10941_v3 = vpack.c.bf16 %v5164_v26, %v5163_v4  ;;  %v5147_v9 = vld [vmem:[%s17045_s6 + $0x30] sm:$0xff]  ;;  %v5148_v17 = vld [vmem:[%s17045_s6 + $0x38] sm:$0xff]  ;;  %v5149_v30 = vld [vmem:[%s17045_s6 + $0x40] sm:$0xff] }
 0xd5e   :  { %v5034_v31 = vmul.f32 %v5024_v60, %v4954_v1  ;;  %v10943_v54 = vpack.c.bf16 %v5148_v17, %v5147_v9  ;;  %v10945_v37 = vpack.c.bf16 %v5166_v46, %v5165_v24  ;;  %v5150_v15 = vld [vmem:[%s17045_s6 + $0x48] sm:$0xff]  ;;  %v5167_v28 = vld [vmem:[%s17045_s6 + $0xd0] sm:$0xff]  ;;  %v5172_v63 = vld [vmem:[%s17045_s6 + $0xf8] sm:$0xff] }
 0xd5f   :  { %10924 = vmatpush1.bf16.msra.mxu0 %v10923_v27  ;;  %v10925_v45 = vpack.c.bf16 %v5037_v52, %v5035_v49  ;;  %v5036_v53 = vmul.f32 %v5026_v6, %v4956_v39  ;;  %v5168_v49 = vld [vmem:[%s17045_s6 + $0xd8] sm:$0xff]  ;;  %v10947_v1 = vpack.c.bf16 %v5150_v15, %v5149_v30  ;;  %v5151_v27 = vld [vmem:[%s17045_s6 + $0x50] sm:$0xff]  ;;  %v5169_v39 = vld [vmem:[%s17045_s6 + $0xe0] sm:$0xff] }
 0xd60   :  { %v10949_v60 = vpack.c.bf16 %v5168_v49, %v5167_v28  ;;  %v5152_v52 = vld [vmem:[%s17045_s6 + $0x58] sm:$0xff]  ;;  %v5170_v6 = vld [vmem:[%s17045_s6 + $0xe8] sm:$0xff]  ;;  %v5313_v56 = vld [vmem:[%s17046_s7 + $0x80] sm:$0xff] }
 0xd61   :  { %10926 = vmatprep.subr.bf16.mxu0 %v10925_v45  ;;  %v10927_v55 = vpack.c.bf16 %v5036_v53, %v5034_v31  ;;  %v10951_v31 = vpack.c.bf16 %v5152_v52, %v5151_v27  ;;  %v10953_v45 = vpack.c.bf16 %v5170_v6, %v5169_v39  ;;  %v5153_v53 = vld [vmem:[%s17045_s6 + $0x60] sm:$0xff]  ;;  %v5346_v47 = vld [vmem:[%s17046_s7 + $0x188] sm:$0xff]  ;;  %v5299_v44 = vld [vmem:[%s17046_s7 + $0x10] sm:$0xff] }
 0xd62   :  { %v5300_v11 = vld [vmem:[%s17046_s7 + $0x18] sm:$0xff]  ;;  %v5301_v23 = vld [vmem:[%s17046_s7 + $0x20] sm:$0xff]  ;;  %v5302_v0 = vld [vmem:[%s17046_s7 + $0x28] sm:$0xff] }
 0xd63   :  { %10928 = vmatpush1.bf16.msra.mxu0 %v10927_v55  ;;  %v11567_v61 = vpop.eup %11566  ;;  %v5154_v55 = vld [vmem:[%s17045_s6 + $0x68] sm:$0xff]  ;;  %v10967_v35 = vpack.c.bf16 %v5300_v11, %v5299_v44  ;;  %v10971_v4 = vpack.c.bf16 %v5302_v0, %v5301_v23  ;;  %v5329_v26 = vld [vmem:[%s17046_s7 + $0x100] sm:$0xff]  ;;  %v5323_v11 = vld [vmem:[%s17046_s7 + $0xd0] sm:$0xff] }
 0xd64   :  { %v11569_v7 = vpop.eup %11568  ;;  %v5029_v57 = vadd.f32 1.0, %v11567_v61  ;;  %v5171_v61 = vld [vmem:[%s17045_s6 + $0xf0] sm:$0xff]  ;;  %v10955_v62 = vpack.c.bf16 %v5154_v55, %v5153_v53  ;;  %v5349_v30 = vld [vmem:[%s17046_s7 + $0x1a0] sm:$0xff]  ;;  %v5350_v15 = vld [vmem:[%s17046_s7 + $0x1a8] sm:$0xff] }
 0xd65   :  { %v5028_v16 = vadd.f32 1.0, %v11569_v7  ;;  %v10957_v7 = vpack.c.bf16 %v5172_v63, %v5171_v61  ;;  %v5333_v27 = vld [vmem:[%s17046_s7 + $0x120] sm:$0xff]  ;;  %v5334_v52 = vld [vmem:[%s17046_s7 + $0x128] sm:$0xff]  ;;  %v5320_v53 = vld [vmem:[%s17046_s7 + $0xb8] sm:$0xff] }
 0xd66   :  { %v5039_v22 = vmul.f32 %v5029_v57, %v4959_v10  ;;  %v5155_v10 = vld [vmem:[%s17045_s6 + $0x70] sm:$0xff]  ;;  %v5156_v57 = vld [vmem:[%s17045_s6 + $0x78] sm:$0xff]  ;;  %v11003_v6 = vpack.c.bf16 %v5334_v52, %v5333_v27  ;;  %v5338_v44 = vld [vmem:[%s17046_s7 + $0x148] sm:$0xff] }
 0xd67   :  { %v5038_v41 = vmul.f32 %v5028_v16, %v4958_v42  ;;  %v10959_v34 = vpack.c.bf16 %v5156_v57, %v5155_v10  ;;  %v5314_v42 = vld [vmem:[%s17046_s7 + $0x88] sm:$0xff]  ;;  %v5345_v16 = vld [vmem:[%s17046_s7 + $0x180] sm:$0xff]  ;;  %v5351_v55 = vld [vmem:[%s17046_s7 + $0x1b0] sm:$0xff] }
 0xd68   :  { %8875 = vmatprep.subr.msk.mxu0 %vm482_vm3, %v5039_v22  ;;  %v10961_v20 = vpack.c.bf16 %v5314_v42, %v5313_v56  ;;  %v5297_v22 = vld [vmem:[%s17046_s7] sm:$0xff]  ;;  %v5352_v63 = vld [vmem:[%s17046_s7 + $0x1b8] sm:$0xff]  ;;  %v5307_v0 = vld [vmem:[%s17046_s7 + $0x50] sm:$0xff] }
 0xd69   :  { %8876 = vmatpush1.msk.msra.mxu0 %vm482_vm3, %v5038_v41  ;;  %v10993_v41 = vpack.c.bf16 %v5346_v47, %v5345_v16  ;;  %v11005_v10 = vpack.c.bf16 %v5352_v63, %v5351_v55  ;;  %v5336_v56 = vld [vmem:[%s17046_s7 + $0x138] sm:$0xff]  ;;  %v5321_v42 = vld [vmem:[%s17046_s7 + $0xc0] sm:$0xff]  ;;  %v5359_v52 = vld [vmem:[%s17046_s7 + $0x1f0] sm:$0xff] }
 0xd6a   :  { %8877 = vmatmul.mubr.msk.f32.vlgmr.msra.gmra.mrb[60].mxu0 %vm706_vm4, %v5040_v25  ;;  %10930 = vmatprep.subr.bf16.mxu0 %v10929_v13  ;;  %v5298_v13 = vld [vmem:[%s17046_s7 + $0x8] sm:$0xff]  ;;  %v5353_v47 = vld [vmem:[%s17046_s7 + $0x1c0] sm:$0xff]  ;;  %v5356_v23 = vld [vmem:[%s17046_s7 + $0x1d8] sm:$0xff] }
 0xd6b   :  { %5128 = vmatprep.mubr.f32.mxu0 %v17154_v8  ;;  %10932 = vmatpush3.bf16.msra.mxu0 %v10931_v32  ;;  %v10963_v25 = vpack.c.bf16 %v5298_v13, %v5297_v22  ;;  %v5315_v32 = vld [vmem:[%s17046_s7 + $0x90] sm:$0xff]  ;;  %v5354_v22 = vld [vmem:[%s17046_s7 + $0x1c8] sm:$0xff]  ;;  %v5328_v27 = vld [vmem:[%s17046_s7 + $0xf8] sm:$0xff] }
 0xd6c   :  { %10934 = vmatprep.subr.bf16.mxu0 %v10933_v21  ;;  %10962 = vmatprep.subr.bf16.mxu1 %v10961_v20  ;;  %v5316_v21 = vld [vmem:[%s17046_s7 + $0x98] sm:$0xff]  ;;  %v5322_v20 = vld [vmem:[%s17046_s7 + $0xc8] sm:$0xff]  ;;  %v5343_v63 = vld [vmem:[%s17046_s7 + $0x170] sm:$0xff] }
 0xd6d   :  { %10964 = vmatpush3.bf16.msra.mxu1 %v10963_v25  ;;  %v10965_v29 = vpack.c.bf16 %v5316_v21, %v5315_v32  ;;  %v10977_v13 = vpack.c.bf16 %v5322_v20, %v5321_v42  ;;  %v5305_v25 = vld [vmem:[%s17046_s7 + $0x40] sm:$0xff]  ;;  %v5306_v32 = vld [vmem:[%s17046_s7 + $0x48] sm:$0xff]  ;;  %v5312_v55 = vld [vmem:[%s17046_s7 + $0x78] sm:$0xff] }
 0xd6e   :  { %8878 = vmatmul.mubr.msk.f32.gmra.mrb[62].mxu0 %vm706_vm4, %v5041_v50  ;;  %v5317_v50 = vld [vmem:[%s17046_s7 + $0xa0] sm:$0xff] }
 0xd6f   :  { %5134 = vmatprep.mubr.f32.mxu0 %v17154_v8  ;;  %10936 = vmatpush3.bf16.msra.mxu0 %v10935_v19  ;;  %v5318_v19 = vld [vmem:[%s17046_s7 + $0xa8] sm:$0xff]  ;;  %v5337_v21 = vld [vmem:[%s17046_s7 + $0x140] sm:$0xff] }
 0xd70   :  { %10938 = vmatprep.subr.bf16.mxu0 %v10937_v38  ;;  %10966 = vmatprep.subr.bf16.mxu1 %v10965_v29  ;;  %v10969_v38 = vpack.c.bf16 %v5318_v19, %v5317_v50  ;;  %v10979_v29 = vpack.c.bf16 %v5306_v32, %v5305_v25  ;;  %v11011_v50 = vpack.c.bf16 %v5338_v44, %v5337_v21 }
 0xd71   :  { %10968 = vmatpush3.bf16.msra.mxu1 %v10967_v35  ;;  %v5324_v35 = vld [vmem:[%s17046_s7 + $0xd8] sm:$0xff] }
 0xd72   :  { %8879 = vmatmul.mubr.msk.f32.gmra.mrb[64].mxu0 %vm706_vm4, %v5042_v51  ;;  %10970 = vmatprep.subr.bf16.mxu1 %v10969_v38  ;;  %v5330_v51 = vld [vmem:[%s17046_s7 + $0x108] sm:$0xff]  ;;  %v10981_v19 = vpack.c.bf16 %v5324_v35, %v5323_v11  ;;  %v5355_v38 = vld [vmem:[%s17046_s7 + $0x1d0] sm:$0xff] }
 0xd73   :  { %10940 = vmatpush3.bf16.msra.mxu0 %v10939_v12  ;;  %v5347_v12 = vld [vmem:[%s17046_s7 + $0x190] sm:$0xff]  ;;  %v10995_v17 = vpack.c.bf16 %v5330_v51, %v5329_v26  ;;  %v5308_v26 = vld [vmem:[%s17046_s7 + $0x58] sm:$0xff] }
 0xd74   :  { %10942 = vmatprep.subr.bf16.mxu0 %v10941_v3  ;;  %v5348_v3 = vld [vmem:[%s17046_s7 + $0x198] sm:$0xff]  ;;  %v5339_v51 = vld [vmem:[%s17046_s7 + $0x150] sm:$0xff] }
 0xd75   :  { %10972 = vmatpush3.bf16.msra.mxu1 %v10971_v4  ;;  %v10997_v46 = vpack.c.bf16 %v5348_v3, %v5347_v12  ;;  %v11013_v4 = vpack.c.bf16 %v5356_v23, %v5355_v38  ;;  %v5340_v12 = vld [vmem:[%s17046_s7 + $0x158] sm:$0xff]  ;;  %v10983_v3 = vpack.c.bf16 %v5308_v26, %v5307_v0 }
 0xd77   :  { %10944 = vmatpush3.bf16.msra.mxu0 %v10943_v54  ;;  %v5331_v54 = vld [vmem:[%s17046_s7 + $0x110] sm:$0xff] }
 0xd78   :  { %10946 = vmatprep.subr.bf16.mxu0 %v10945_v37  ;;  %v5332_v37 = vld [vmem:[%s17046_s7 + $0x118] sm:$0xff] }
 0xd79   :  { %v10999_v49 = vpack.c.bf16 %v5332_v37, %v5331_v54  ;;  %v5358_v37 = vld [vmem:[%s17046_s7 + $0x1e8] sm:$0xff] }
 0xd7b   :  { %10948 = vmatpush3.bf16.msra.mxu0 %v10947_v1 }
 0xd7c   :  { %10950 = vmatprep.subr.bf16.mxu0 %v10949_v60  ;;  %v11001_v60 = vpack.c.bf16 %v5350_v15, %v5349_v30  ;;  %v5309_v30 = vld [vmem:[%s17046_s7 + $0x60] sm:$0xff]  ;;  %v5310_v15 = vld [vmem:[%s17046_s7 + $0x68] sm:$0xff] }
 0xd7f   :  { %10952 = vmatpush3.bf16.msra.mxu0 %v10951_v31 }
 0xd80   :  { %10954 = vmatprep.subr.bf16.mxu0 %v10953_v45  ;;  %v5319_v45 = vld [vmem:[%s17046_s7 + $0xb0] sm:$0xff] }
 0xd81   :  { %v10973_v61 = vpack.c.bf16 %v5320_v53, %v5319_v45  ;;  %v5311_v53 = vld [vmem:[%s17046_s7 + $0x70] sm:$0xff] }
 0xd83   :  { %10956 = vmatpush3.bf16.msra.mxu0 %v10955_v62  ;;  %v5303_v62 = vld [vmem:[%s17046_s7 + $0x30] sm:$0xff]  ;;  %10974 = vmatprep.subr.bf16.mxu1 %v10973_v61 }
 0xd84   :  { %10958 = vmatprep.subr.bf16.mxu0 %v10957_v7  ;;  %v5304_v7 = vld [vmem:[%s17046_s7 + $0x38] sm:$0xff] }
 0xd85   :  { %v10975_v57 = vpack.c.bf16 %v5304_v7, %v5303_v62  ;;  %v5344_v62 = vld [vmem:[%s17046_s7 + $0x178] sm:$0xff]  ;;  %v10991_v7 = vpack.c.bf16 %v5312_v55, %v5311_v53 }
 0xd86   :  { %v17157_v55 = vld [vmem:[#allocation12_spill] sm:$0xff] }
 0xd87   :  { %10960 = vmatpush3.bf16.msra.mxu0 %v10959_v34  ;;  %v5335_v34 = vld [vmem:[%s17046_s7 + $0x130] sm:$0xff]  ;;  %10976 = vmatpush3.bf16.msra.mxu1 %v10975_v57  ;;  %v5377_v57 = vld [vmem:[%s17046_s7 + $0x280] sm:$0xff] }
 0xd88   :  { %10994 = vmatprep.subr.bf16.mxu0 %v10993_v41  ;;  %v11007_v16 = vpack.c.bf16 %v5336_v56, %v5335_v34  ;;  %v11009_v41 = vpack.c.bf16 %v5354_v22, %v5353_v47  ;;  %10978 = vmatprep.subr.bf16.mxu1 %v10977_v13  ;;  %v5378_v34 = vld [vmem:[%s17046_s7 + $0x288] sm:$0xff]  ;;  %v5409_v56 = vld [vmem:[%s17046_s7 + $0x380] sm:$0xff] }
 0xd89   :  { %v11025_v42 = vpack.c.bf16 %v5378_v34, %v5377_v57 }
 0xd8b   :  { %10980 = vmatpush3.bf16.msra.mxu1 %v10979_v29 }
 0xd8c   :  { %10982 = vmatprep.subr.bf16.mxu1 %v10981_v19 }
 0xd8f   :  { %10984 = vmatpush3.bf16.msra.mxu1 %v10983_v3 }
 0xe3d   :  { %v5124_v9 = vpop.f32.mrb[60].mxu0 }
 0xe3e   :  { %v5126_v24 = vpop.f32.mrb[61].mxu0 }
 0xe3f   :  { %5237 = vmatprep.mubr.f32.mxu0 %v5126_v24  ;;  %v5357_v24 = vld [vmem:[%s17046_s7 + $0x1e0] sm:$0xff] }
 0xe40   :  { %5238 = vmatmul.mubr.f32.vlgmr.msra.gmra.mrb[66].mxu0 %v5124_v9  ;;  %v5325_v9 = vld [vmem:[%s17046_s7 + $0xe0] sm:$0xff] }
 0xe41   :  { %v5130_v28 = vpop.f32.mrb[62].mxu0  ;;  %10996 = vmatpush3.bf16.msra.mxu0 %v10995_v17  ;;  %v5326_v17 = vld [vmem:[%s17046_s7 + $0xe8] sm:$0xff] }
 0xe42   :  { %v5132_v1 = vpop.f32.mrb[63].mxu0  ;;  %10998 = vmatprep.subr.bf16.mxu0 %v10997_v46  ;;  %v11015_v46 = vpack.c.bf16 %v5340_v12, %v5339_v51  ;;  %v10985_v54 = vpack.c.bf16 %v5326_v17, %v5325_v9 }
 0xe43   :  { %5242 = vmatprep.mubr.f32.mxu0 %v5132_v1  ;;  %v5342_v1 = vld [vmem:[%s17046_s7 + $0x168] sm:$0xff] }
 0xe44   :  { %5243 = vmatmul.mubr.f32.gmra.mrb[68].mxu0 %v5130_v28  ;;  %v11017_v28 = vpack.c.bf16 %v5358_v37, %v5357_v24  ;;  %10986 = vmatprep.subr.bf16.mxu1 %v10985_v54 }
 0xe45   :  { %v5136_v39 = vpop.f32.mrb[64].mxu0  ;;  %11000 = vmatpush3.bf16.msra.mxu0 %v10999_v49  ;;  %v5341_v49 = vld [vmem:[%s17046_s7 + $0x160] sm:$0xff] }
 0xe46   :  { %v5138_v31 = vpop.f32.mrb[65].mxu0  ;;  %11002 = vmatprep.subr.bf16.mxu0 %v11001_v60  ;;  %v5327_v60 = vld [vmem:[%s17046_s7 + $0xf0] sm:$0xff] }
 0xe47   :  { %5247 = vmatprep.mubr.f32.mxu0 %v5138_v31  ;;  %v11019_v31 = vpack.c.bf16 %v5342_v1, %v5341_v49  ;;  %v10989_v45 = vpack.c.bf16 %v5328_v27, %v5327_v60  ;;  %v5379_v49 = vld [vmem:[%s17046_s7 + $0x290] sm:$0xff]  ;;  %v5380_v1 = vld [vmem:[%s17046_s7 + $0x298] sm:$0xff] }
 0xe48   :  { %5248 = vmatmul.mubr.f32.gmra.mrb[70].mxu0 %v5136_v39  ;;  %v5360_v39 = vld [vmem:[%s17046_s7 + $0x1f8] sm:$0xff]  ;;  %v5411_v60 = vld [vmem:[%s17046_s7 + $0x390] sm:$0xff]  ;;  %v11029_v34 = vpack.c.bf16 %v5380_v1, %v5379_v49  ;;  %v5418_v49 = vld [vmem:[%s17046_s7 + $0x3c8] sm:$0xff] }
 0xe49   :  { %11004 = vmatpush3.bf16.msra.mxu0 %v11003_v6  ;;  %v10987_v6 = vpack.c.bf16 %v5310_v15, %v5309_v30  ;;  %v11021_v61 = vpack.c.bf16 %v5360_v39, %v5359_v52  ;;  %v5362_v30 = vld [vmem:[%s17046_s7 + $0x208] sm:$0xff]  ;;  %v5393_v15 = vld [vmem:[%s17046_s7 + $0x300] sm:$0xff]  ;;  %v5412_v27 = vld [vmem:[%s17046_s7 + $0x398] sm:$0xff] }
 0xe4a   :  { %11006 = vmatprep.subr.bf16.mxu0 %v11005_v10  ;;  %v11023_v10 = vpack.c.bf16 %v5344_v62, %v5343_v63 }
 0xe4b   :  { %10988 = vmatpush3.bf16.msra.mxu1 %v10987_v6 }
 0xe4c   :  { %10990 = vmatprep.subr.bf16.mxu1 %v10989_v45 }
 0xe4d   :  { %11008 = vmatpush3.bf16.msra.mxu0 %v11007_v16  ;;  %v5410_v16 = vld [vmem:[%s17046_s7 + $0x388] sm:$0xff] }
 0xe4e   :  { %11010 = vmatprep.subr.bf16.mxu0 %v11009_v41  ;;  %v11057_v20 = vpack.c.bf16 %v5410_v16, %v5409_v56  ;;  %v11061_v56 = vpack.c.bf16 %v5412_v27, %v5411_v60  ;;  %v5381_v16 = vld [vmem:[%s17046_s7 + $0x2a0] sm:$0xff] }
 0xe4f   :  { %10992 = vmatpush3.bf16.msra.mxu1 %v10991_v7  ;;  %v5364_v7 = vld [vmem:[%s17046_s7 + $0x218] sm:$0xff]  ;;  %v5369_v27 = vld [vmem:[%s17046_s7 + $0x240] sm:$0xff] }
 0xe50   :  { %11026 = vmatprep.subr.bf16.mxu1 %v11025_v42  ;;  %v5396_v42 = vld [vmem:[%s17046_s7 + $0x318] sm:$0xff] }
 0xe51   :  { %11012 = vmatpush3.bf16.msra.mxu0 %v11011_v50 }
 0xe52   :  { %11014 = vmatprep.subr.bf16.mxu0 %v11013_v4 }
 0xe55   :  { %11016 = vmatpush3.bf16.msra.mxu0 %v11015_v46  ;;  %v5361_v46 = vld [vmem:[%s17046_s7 + $0x200] sm:$0xff] }
 0xe56   :  { %11018 = vmatprep.subr.bf16.mxu0 %v11017_v28  ;;  %v5394_v28 = vld [vmem:[%s17046_s7 + $0x308] sm:$0xff]  ;;  %v11027_v39 = vpack.c.bf16 %v5362_v30, %v5361_v46  ;;  %v5385_v30 = vld [vmem:[%s17046_s7 + $0x2c0] sm:$0xff] }
 0xe57   :  { %v11059_v6 = vpack.c.bf16 %v5394_v28, %v5393_v15  ;;  %v5386_v15 = vld [vmem:[%s17046_s7 + $0x2c8] sm:$0xff]  ;;  %v5417_v28 = vld [vmem:[%s17046_s7 + $0x3c0] sm:$0xff] }
 0xe59   :  { %11020 = vmatpush3.bf16.msra.mxu0 %v11019_v31  ;;  %v5363_v31 = vld [vmem:[%s17046_s7 + $0x210] sm:$0xff] }
 0xe5a   :  { %11022 = vmatprep.subr.bf16.mxu0 %v11021_v61 }
 0xe5d   :  { %11024 = vmatpush3.bf16.msra.mxu0 %v11023_v10  ;;  %v5395_v10 = vld [vmem:[%s17046_s7 + $0x310] sm:$0xff] }
 0xe5e   :  { %11058 = vmatprep.subr.bf16.mxu0 %v11057_v20 }
 0xf13   :  { %v9453_v47 = vpop.f32.mrb[66].mxu0 }
 0xf14   :  { %v9454_v22 = vpop.f32.mrb[67].mxu0 }
 0xf15   :  { %v9455_v13 = vadd.f32 %v9454_v22, %v9453_v47  ;;  %v5382_v47 = vld [vmem:[%s17046_s7 + $0x2a8] sm:$0xff]  ;;  %v5413_v22 = vld [vmem:[%s17046_s7 + $0x3a0] sm:$0xff] }
 0xf17   :  { %5253 = vst [vmem:[#allocation4] sm:$0xff] %v9455_v13  ;;  %v9456_v41 = vpop.f32.mrb[68].mxu0  ;;  %v5414_v13 = vld [vmem:[%s17046_s7 + $0x3a8] sm:$0xff] }
 0xf18   :  { %v9457_v25 = vpop.f32.mrb[69].mxu0  ;;  %v11065_v19 = vpack.c.bf16 %v5414_v13, %v5413_v22  ;;  %v5389_v22 = vld [vmem:[%s17046_s7 + $0x2e0] sm:$0xff]  ;;  %v5390_v13 = vld [vmem:[%s17046_s7 + $0x2e8] sm:$0xff] }
 0xf19   :  { %v9458_v32 = vadd.f32 %v9457_v25, %v9456_v41  ;;  %v11031_v41 = vpack.c.bf16 %v5364_v7, %v5363_v31  ;;  %v11063_v25 = vpack.c.bf16 %v5396_v42, %v5395_v10  ;;  %v11073_v31 = vpack.c.bf16 %v5418_v49, %v5417_v28  ;;  %v5420_v7 = vld [vmem:[%s17046_s7 + $0x3d8] sm:$0xff]  ;;  %v5473_v28 = vld [vmem:[%s17046_s7 + $0x580] sm:$0xff]  ;;  %v5474_v49 = vld [vmem:[%s17046_s7 + $0x588] sm:$0xff] }
 0xf1b   :  { %5254 = vst [vmem:[#allocation4 + $0x8] sm:$0xff] %v9458_v32  ;;  %v9459_v21 = vpop.f32.mrb[70].mxu0  ;;  %v17158_v32 = vld [vmem:[#allocation14_spill] sm:$0xff] }
 0xf1c   :  { %v9460_v29 = vpop.f32.mrb[71].mxu0 }
 0xf1d   :  { %v9461_v44 = vadd.f32 %v9460_v29, %v9459_v21  ;;  %v17159_v29 = vld [vmem:[#allocation15_spill] sm:$0xff] }
 0xf1e   :  { %v5256_v11 = vld [vmem:[#allocation4] sm:$0x1]  ;;  %v5258_v35 = vld [vmem:[#allocation4 + $0x1] sm:$0x1]  ;;  %v5260_v50 = vld [vmem:[#allocation4 + $0x2] sm:$0x1] }
 0xf1f   :  { %5257 = vst.msk [vmem:[#allocation3] sm:$0x1] %vm12366_vm5, %v5256_v11  ;;  %5259 = vst.msk [vmem:[#allocation3 + $0x1] sm:$0x1] %vm12366_vm5, %v5258_v35  ;;  %v5262_v38 = vld [vmem:[#allocation4 + $0x3] sm:$0x1] }
 0xf20   :  { %5261 = vst.msk [vmem:[#allocation3 + $0x2] sm:$0x1] %vm12366_vm5, %v5260_v50  ;;  %v5264_v23 = vld [vmem:[#allocation4 + $0x4] sm:$0x1]  ;;  %v5266_v0 = vld [vmem:[#allocation4 + $0x5] sm:$0x1]  ;;  %v11033_v50 = vpack.c.bf16 %v5382_v47, %v5381_v16 }
 0xf21   :  { %5255 = vst [vmem:[#allocation4 + $0x10] sm:$0x7] %v9461_v44  ;;  %5263 = vst.msk [vmem:[#allocation3 + $0x3] sm:$0x1] %vm12366_vm5, %v5262_v38  ;;  %v5268_v4 = vld [vmem:[#allocation4 + $0x6] sm:$0x1] }
 0xf22   :  { %5265 = vst.msk [vmem:[#allocation3 + $0x4] sm:$0x1] %vm12366_vm5, %v5264_v23  ;;  %5267 = vst.msk [vmem:[#allocation3 + $0x5] sm:$0x1] %vm12366_vm5, %v5266_v0  ;;  %v5270_v26 = vld [vmem:[#allocation4 + $0x7] sm:$0x1] }
 0xf23   :  { %5269 = vst.msk [vmem:[#allocation3 + $0x6] sm:$0x1] %vm12366_vm5, %v5268_v4  ;;  %5271 = vst.msk [vmem:[#allocation3 + $0x7] sm:$0x1] %vm12366_vm5, %v5270_v26  ;;  %v5272_v51 = vld [vmem:[#allocation4 + $0x8] sm:$0x1] }
 0xf24   :  { %v5274_v12 = vld [vmem:[#allocation4 + $0x9] sm:$0x1]  ;;  %v5276_v3 = vld [vmem:[#allocation4 + $0xa] sm:$0x1]  ;;  %5273 = vst.msk [vmem:[#allocation3 + $0x8] sm:$0x1] %vm12366_vm5, %v5272_v51 }
 0xf25   :  { %5275 = vst.msk [vmem:[#allocation3 + $0x9] sm:$0x1] %vm12366_vm5, %v5274_v12  ;;  %5277 = vst.msk [vmem:[#allocation3 + $0xa] sm:$0x1] %vm12366_vm5, %v5276_v3  ;;  %v5278_v9 = vld [vmem:[#allocation4 + $0xb] sm:$0x1] }
 0xf26   :  { %v5280_v17 = vld [vmem:[#allocation4 + $0xc] sm:$0x1]  ;;  %v5282_v24 = vld [vmem:[#allocation4 + $0xd] sm:$0x1]  ;;  %5279 = vst.msk [vmem:[#allocation3 + $0xb] sm:$0x1] %vm12366_vm5, %v5278_v9 }
 0xf27   :  { %5281 = vst.msk [vmem:[#allocation3 + $0xc] sm:$0x1] %vm12366_vm5, %v5280_v17  ;;  %5283 = vst.msk [vmem:[#allocation3 + $0xd] sm:$0x1] %vm12366_vm5, %v5282_v24  ;;  %v5284_v54 = vld [vmem:[#allocation4 + $0xe] sm:$0x1] }
 0xf28   :  { %v5286_v37 = vld [vmem:[#allocation4 + $0xf] sm:$0x1]  ;;  %5285 = vst.msk [vmem:[#allocation3 + $0xe] sm:$0x1] %vm12366_vm5, %v5284_v54  ;;  %v5288_v45 = vld [vmem:[#allocation4 + $0x10] sm:$0x1] }
 0xf29   :  { %5287 = vst.msk [vmem:[#allocation3 + $0xf] sm:$0x1] %vm12366_vm5, %v5286_v37  ;;  %5289 = vst.msk [vmem:[#allocation3 + $0x10] sm:$0x1] %vm12366_vm5, %v5288_v45  ;;  %v5290_v57 = vld [vmem:[#allocation4 + $0x11] sm:$0x1] }
 0xf2a   :  { %v15027_v52 = vld [vmem:[#allocation3] sm:$0xff]  ;;  %5291 = vst.msk [vmem:[#allocation3 + $0x11] sm:$0x1] %vm12366_vm5, %v5290_v57  ;;  %v5365_v11 = vld [vmem:[%s17046_s7 + $0x220] sm:$0xff]  ;;  %v5366_v35 = vld [vmem:[%s17046_s7 + $0x228] sm:$0xff] }
 0xf2b   :  { %v5612_v53 = vrot.slane %v15027_v52, %v17141_v40  ;;  %v5620_v61 = vrot.slane %v15027_v52, %v17157_v55  ;;  %v5608_v63 = vrot.slane %v15027_v52, %v17139_v43  ;;  %v5616_v62 = vrot.slane %v15027_v52, %v17143_v18  ;;  %v5292_v20 = vld [vmem:[#allocation4 + $0x12] sm:$0x1]  ;;  %v5397_v38 = vld [vmem:[%s17046_s7 + $0x320] sm:$0xff]  ;;  %v5398_v23 = vld [vmem:[%s17046_s7 + $0x328] sm:$0xff] }
 0xf2c   :  { %5293 = vst.msk [vmem:[#allocation3 + $0x12] sm:$0x1] %vm12366_vm5, %v5292_v20  ;;  %v5628_v21 = vrot.slane %v15027_v52, %v17158_v32  ;;  %v5636_v44 = vrot.slane %v15027_v52, %v17159_v29  ;;  %v5383_v0 = vld [vmem:[%s17046_s7 + $0x2b0] sm:$0xff]  ;;  %v5384_v4 = vld [vmem:[%s17046_s7 + $0x2b8] sm:$0xff]  ;;  %v11035_v12 = vpack.c.bf16 %v5366_v35, %v5365_v11  ;;  %v11067_v3 = vpack.c.bf16 %v5398_v23, %v5397_v38  ;;  %v5401_v45 = vld [vmem:[%s17046_s7 + $0x340] sm:$0xff] }
 0xf2d   :  { %5764 = vmatprep.mubr.f32.mxu1 %v5612_v53  ;;  %5834 = vmatprep.mubr.f32.mxu0 %v5620_v61  ;;  %v5415_v26 = vld [vmem:[%s17046_s7 + $0x3b0] sm:$0xff]  ;;  %v5416_v51 = vld [vmem:[%s17046_s7 + $0x3b8] sm:$0xff]  ;;  %v11037_v24 = vpack.c.bf16 %v5384_v4, %v5383_v0  ;;  %v5402_v53 = vld [vmem:[%s17046_s7 + $0x348] sm:$0xff] }
 0xf2e   :  { %5765 = vmatmul.mubr.f32.vlgmr.msra.gmra.mrb[78].mxu1 %v5608_v63  ;;  %5835 = vmatmul.mubr.f32.vlgmr.msra.gmra.mrb[72].mxu0 %v5616_v62  ;;  %v5367_v9 = vld [vmem:[%s17046_s7 + $0x230] sm:$0xff]  ;;  %v5368_v17 = vld [vmem:[%s17046_s7 + $0x238] sm:$0xff]  ;;  %v11069_v46 = vpack.c.bf16 %v5416_v51, %v5415_v26  ;;  %v11075_v57 = vpack.c.bf16 %v5402_v53, %v5401_v45  ;;  %v5373_v11 = vld [vmem:[%s17046_s7 + $0x260] sm:$0xff]  ;;  %v11121_v45 = vpack.c.bf16 %v5474_v49, %v5473_v28 }
 0xf2f   :  { %11028 = vmatpush3.bf16.msra.mxu1 %v11027_v39  ;;  %11060 = vmatpush3.bf16.msra.mxu0 %v11059_v6  ;;  %v5399_v54 = vld [vmem:[%s17046_s7 + $0x330] sm:$0xff]  ;;  %v5400_v37 = vld [vmem:[%s17046_s7 + $0x338] sm:$0xff]  ;;  %v11039_v1 = vpack.c.bf16 %v5368_v17, %v5367_v9  ;;  %v5370_v39 = vld [vmem:[%s17046_s7 + $0x248] sm:$0xff]  ;;  %v11041_v6 = vpack.c.bf16 %v5386_v15, %v5385_v30 }
 0xf30   :  { %11030 = vmatprep.subr.bf16.mxu1 %v11029_v34  ;;  %11062 = vmatprep.subr.bf16.mxu0 %v11061_v56  ;;  %v11071_v60 = vpack.c.bf16 %v5400_v37, %v5399_v54  ;;  %v5387_v61 = vld [vmem:[%s17046_s7 + $0x2d0] sm:$0xff]  ;;  %v5388_v63 = vld [vmem:[%s17046_s7 + $0x2d8] sm:$0xff]  ;;  %v11043_v10 = vpack.c.bf16 %v5370_v39, %v5369_v27  ;;  %v5374_v35 = vld [vmem:[%s17046_s7 + $0x268] sm:$0xff] }
 0xf31   :  { %5904 = vmatprep.mubr.f32.mxu1 %v5628_v21  ;;  %5974 = vmatprep.mubr.f32.mxu0 %v5636_v44  ;;  %v5419_v62 = vld [vmem:[%s17046_s7 + $0x3d0] sm:$0xff]  ;;  %v5372_v56 = vld [vmem:[%s17046_s7 + $0x258] sm:$0xff]  ;;  %v11045_v42 = vpack.c.bf16 %v5388_v63, %v5387_v61  ;;  %v5405_v38 = vld [vmem:[%s17046_s7 + $0x360] sm:$0xff] }
 0xf32   :  { %v5371_v34 = vld [vmem:[%s17046_s7 + $0x250] sm:$0xff]  ;;  %v11077_v16 = vpack.c.bf16 %v5420_v7, %v5419_v62  ;;  %v5404_v47 = vld [vmem:[%s17046_s7 + $0x358] sm:$0xff]  ;;  %v5406_v23 = vld [vmem:[%s17046_s7 + $0x368] sm:$0xff] }
 0xf33   :  { %11032 = vmatpush3.bf16.msra.mxu1 %v11031_v41  ;;  %11064 = vmatpush3.bf16.msra.mxu0 %v11063_v25  ;;  %v5403_v20 = vld [vmem:[%s17046_s7 + $0x350] sm:$0xff]  ;;  %v5421_v41 = vld [vmem:[%s17046_s7 + $0x3e0] sm:$0xff]  ;;  %v5422_v25 = vld [vmem:[%s17046_s7 + $0x3e8] sm:$0xff]  ;;  %v11047_v21 = vpack.c.bf16 %v5372_v56, %v5371_v34 }
 0xf34   :  { %11034 = vmatprep.subr.bf16.mxu1 %v11033_v50  ;;  %11066 = vmatprep.subr.bf16.mxu0 %v11065_v19  ;;  %v11079_v44 = vpack.c.bf16 %v5404_v47, %v5403_v20  ;;  %v11049_v50 = vpack.c.bf16 %v5390_v13, %v5389_v22  ;;  %v11081_v19 = vpack.c.bf16 %v5422_v25, %v5421_v41  ;;  %v5391_v0 = vld [vmem:[%s17046_s7 + $0x2f0] sm:$0xff]  ;;  %v5392_v4 = vld [vmem:[%s17046_s7 + $0x2f8] sm:$0xff]  ;;  %v5441_v30 = vld [vmem:[%s17046_s7 + $0x480] sm:$0xff] }
 0xf35   :  { %v5423_v26 = vld [vmem:[%s17046_s7 + $0x3f0] sm:$0xff]  ;;  %v5424_v51 = vld [vmem:[%s17046_s7 + $0x3f8] sm:$0xff]  ;;  %v5442_v15 = vld [vmem:[%s17046_s7 + $0x488] sm:$0xff] }
 0xf36   :  { %v5375_v9 = vld [vmem:[%s17046_s7 + $0x270] sm:$0xff]  ;;  %v5376_v17 = vld [vmem:[%s17046_s7 + $0x278] sm:$0xff]  ;;  %v5425_v27 = vld [vmem:[%s17046_s7 + $0x400] sm:$0xff] }
 0xf37   :  { %11036 = vmatpush3.bf16.msra.mxu1 %v11035_v12  ;;  %11068 = vmatpush3.bf16.msra.mxu0 %v11067_v3  ;;  %v11051_v12 = vpack.c.bf16 %v5374_v35, %v5373_v11  ;;  %v11083_v3 = vpack.c.bf16 %v5406_v23, %v5405_v38  ;;  %v5407_v54 = vld [vmem:[%s17046_s7 + $0x370] sm:$0xff]  ;;  %v5408_v37 = vld [vmem:[%s17046_s7 + $0x378] sm:$0xff]  ;;  %v5426_v39 = vld [vmem:[%s17046_s7 + $0x408] sm:$0xff] }
 0xf38   :  { %11038 = vmatprep.subr.bf16.mxu1 %v11037_v24  ;;  %11070 = vmatprep.subr.bf16.mxu0 %v11069_v46  ;;  %v11053_v24 = vpack.c.bf16 %v5392_v4, %v5391_v0  ;;  %v11085_v46 = vpack.c.bf16 %v5424_v51, %v5423_v26  ;;  %v5458_v53 = vld [vmem:[%s17046_s7 + $0x508] sm:$0xff]  ;;  %v5443_v61 = vld [vmem:[%s17046_s7 + $0x490] sm:$0xff]  ;;  %v5444_v63 = vld [vmem:[%s17046_s7 + $0x498] sm:$0xff] }
 0xf39   :  { %v5475_v62 = vld [vmem:[%s17046_s7 + $0x590] sm:$0xff]  ;;  %v5476_v7 = vld [vmem:[%s17046_s7 + $0x598] sm:$0xff]  ;;  %v11093_v56 = vpack.c.bf16 %v5444_v63, %v5443_v61  ;;  %v5446_v11 = vld [vmem:[%s17046_s7 + $0x4a8] sm:$0xff] }
 0xf3a   :  { %v17160_v20 = vld [vmem:[#allocation16_spill] sm:$0xff]  ;;  %v17161_v22 = vld [vmem:[#allocation17_spill] sm:$0xff]  ;;  %v11125_v41 = vpack.c.bf16 %v5476_v7, %v5475_v62  ;;  %v5478_v35 = vld [vmem:[%s17046_s7 + $0x5a8] sm:$0xff] }
 0xf3b   :  { %11040 = vmatpush3.bf16.msra.mxu1 %v11039_v1  ;;  %11072 = vmatpush3.bf16.msra.mxu0 %v11071_v60  ;;  %v11055_v1 = vpack.c.bf16 %v5376_v17, %v5375_v9  ;;  %v11087_v60 = vpack.c.bf16 %v5408_v37, %v5407_v54  ;;  %v5624_v47 = vrot.slane %v15027_v52, %v17160_v20  ;;  %v5459_v25 = vld [vmem:[%s17046_s7 + $0x510] sm:$0xff]  ;;  %v5429_v0 = vld [vmem:[%s17046_s7 + $0x420] sm:$0xff]  ;;  %v5430_v4 = vld [vmem:[%s17046_s7 + $0x428] sm:$0xff] }
 0xf3c   :  { %11042 = vmatprep.subr.bf16.mxu1 %v11041_v6  ;;  %11074 = vmatprep.subr.bf16.mxu0 %v11073_v31  ;;  %v5457_v6 = vld [vmem:[%s17046_s7 + $0x500] sm:$0xff]  ;;  %v11089_v31 = vpack.c.bf16 %v5442_v15, %v5441_v30  ;;  %v5632_v13 = vrot.slane %v15027_v52, %v17161_v22  ;;  %v5447_v9 = vld [vmem:[%s17046_s7 + $0x4b0] sm:$0xff]  ;;  %v5448_v17 = vld [vmem:[%s17046_s7 + $0x4b8] sm:$0xff]  ;;  %v11099_v54 = vpack.c.bf16 %v5430_v4, %v5429_v0 }
 0xf3d   :  { %v11123_v34 = vpack.c.bf16 %v5458_v53, %v5457_v6  ;;  %v5477_v52 = vld [vmem:[%s17046_s7 + $0x5a0] sm:$0xff]  ;;  %v5431_v30 = vld [vmem:[%s17046_s7 + $0x430] sm:$0xff]  ;;  %v5432_v15 = vld [vmem:[%s17046_s7 + $0x438] sm:$0xff]  ;;  %v11101_v28 = vpack.c.bf16 %v5448_v17, %v5447_v9 }
 0xf3e   :  { %v11129_v51 = vpack.c.bf16 %v5478_v35, %v5477_v52  ;;  %v5481_v6 = vld [vmem:[%s17046_s7 + $0x5c0] sm:$0xff]  ;;  %v5434_v63 = vld [vmem:[%s17046_s7 + $0x448] sm:$0xff]  ;;  %v5467_v52 = vld [vmem:[%s17046_s7 + $0x550] sm:$0xff] }
 0xf3f   :  { %11044 = vmatpush3.bf16.msra.mxu1 %v11043_v10  ;;  %11076 = vmatpush3.bf16.msra.mxu0 %v11075_v57  ;;  %v15239_v10 = vld [vmem:[#allocation3 + $0x8] sm:$0xff]  ;;  %v11091_v57 = vpack.c.bf16 %v5426_v39, %v5425_v27  ;;  %v5449_v27 = vld [vmem:[%s17046_s7 + $0x4c0] sm:$0xff]  ;;  %v5450_v39 = vld [vmem:[%s17046_s7 + $0x4c8] sm:$0xff] }
 0xf40   :  { %11046 = vmatprep.subr.bf16.mxu1 %v11045_v42  ;;  %11078 = vmatprep.subr.bf16.mxu0 %v11077_v16  ;;  %v5427_v42 = vld [vmem:[%s17046_s7 + $0x410] sm:$0xff]  ;;  %v5428_v16 = vld [vmem:[%s17046_s7 + $0x418] sm:$0xff]  ;;  %v5433_v61 = vld [vmem:[%s17046_s7 + $0x440] sm:$0xff]  ;;  %v11105_v62 = vpack.c.bf16 %v5450_v39, %v5449_v27 }
 0xf41   :  { %v11095_v38 = vpack.c.bf16 %v5428_v16, %v5427_v42  ;;  %v5452_v42 = vld [vmem:[%s17046_s7 + $0x4d8] sm:$0xff]  ;;  %v5483_v16 = vld [vmem:[%s17046_s7 + $0x5d0] sm:$0xff]  ;;  %v5469_v9 = vld [vmem:[%s17046_s7 + $0x560] sm:$0xff] }
 0xf42   :  { %v5468_v35 = vld [vmem:[%s17046_s7 + $0x558] sm:$0xff]  ;;  %v5470_v17 = vld [vmem:[%s17046_s7 + $0x568] sm:$0xff]  ;;  %v5471_v27 = vld [vmem:[%s17046_s7 + $0x570] sm:$0xff] }
 0xf43   :  { %11048 = vmatpush3.bf16.msra.mxu1 %v11047_v21  ;;  %11080 = vmatpush3.bf16.msra.mxu0 %v11079_v44  ;;  %v5460_v21 = vld [vmem:[%s17046_s7 + $0x518] sm:$0xff]  ;;  %v5445_v44 = vld [vmem:[%s17046_s7 + $0x4a0] sm:$0xff]  ;;  %v11143_v4 = vpack.c.bf16 %v5468_v35, %v5467_v52  ;;  %v5640_v35 = vrot.slane %v15239_v10, %v17139_v43 }
 0xf44   :  { %11050 = vmatprep.subr.bf16.mxu1 %v11049_v50  ;;  %11082 = vmatprep.subr.bf16.mxu0 %v11081_v19  ;;  %v5644_v50 = vrot.slane %v15239_v10, %v17141_v40  ;;  %v5652_v19 = vrot.slane %v15239_v10, %v17157_v55  ;;  %v11127_v23 = vpack.c.bf16 %v5460_v21, %v5459_v25  ;;  %v5435_v25 = vld [vmem:[%s17046_s7 + $0x450] sm:$0xff]  ;;  %v5436_v21 = vld [vmem:[%s17046_s7 + $0x458] sm:$0xff] }
 0xf45   :  { %v11097_v26 = vpack.c.bf16 %v5446_v11, %v5445_v44  ;;  %v11111_v0 = vpack.c.bf16 %v5436_v21, %v5435_v25  ;;  %v5472_v39 = vld [vmem:[%s17046_s7 + $0x578] sm:$0xff] }
 0xf46   :  { %v5492_v52 = vld [vmem:[%s17046_s7 + $0x618] sm:$0xff] }
 0xf47   :  { %11052 = vmatpush3.bf16.msra.mxu1 %v11051_v12  ;;  %11084 = vmatpush3.bf16.msra.mxu0 %v11083_v3  ;;  %v5461_v12 = vld [vmem:[%s17046_s7 + $0x520] sm:$0xff]  ;;  %v5462_v3 = vld [vmem:[%s17046_s7 + $0x528] sm:$0xff] }
 0xf48   :  { %11054 = vmatprep.subr.bf16.mxu1 %v11053_v24  ;;  %11086 = vmatprep.subr.bf16.mxu0 %v11085_v46  ;;  %v5479_v24 = vld [vmem:[%s17046_s7 + $0x5b0] sm:$0xff]  ;;  %v5480_v46 = vld [vmem:[%s17046_s7 + $0x5b8] sm:$0xff]  ;;  %v11131_v37 = vpack.c.bf16 %v5462_v3, %v5461_v12 }
 0xf49   :  { %v11133_v49 = vpack.c.bf16 %v5480_v46, %v5479_v24  ;;  %v5455_v24 = vld [vmem:[%s17046_s7 + $0x4f0] sm:$0xff]  ;;  %v5456_v46 = vld [vmem:[%s17046_s7 + $0x4f8] sm:$0xff] }
 0xf4b   :  { %11056 = vmatpush3.bf16.msra.mxu1 %v11055_v1  ;;  %11088 = vmatpush3.bf16.msra.mxu0 %v11087_v60  ;;  %v5463_v1 = vld [vmem:[%s17046_s7 + $0x530] sm:$0xff]  ;;  %v5464_v60 = vld [vmem:[%s17046_s7 + $0x538] sm:$0xff] }
 0xf4c   :  { %11090 = vmatprep.subr.bf16.mxu1 %v11089_v31  ;;  %11122 = vmatprep.subr.bf16.mxu0 %v11121_v45  ;;  %v5482_v31 = vld [vmem:[%s17046_s7 + $0x5c8] sm:$0xff]  ;;  %v11103_v45 = vpack.c.bf16 %v5432_v15, %v5431_v30  ;;  %v11135_v53 = vpack.c.bf16 %v5464_v60, %v5463_v1  ;;  %v11147_v15 = vpack.c.bf16 %v5470_v17, %v5469_v9 }
 0xf4d   :  { %v11137_v7 = vpack.c.bf16 %v5482_v31, %v5481_v6  ;;  %v11117_v1 = vpack.c.bf16 %v5456_v46, %v5455_v24  ;;  %v5505_v6 = vld [vmem:[%s17046_s7 + $0x680] sm:$0xff]  ;;  %v5506_v31 = vld [vmem:[%s17046_s7 + $0x688] sm:$0xff]  ;;  %v5660_v9 = vrot.slane %v15239_v10, %v17158_v32  ;;  %v5668_v17 = vrot.slane %v15239_v10, %v17159_v29 }
 0xf4e   :  { %5905 = vmatmul.mubr.f32.vlgmr.msra.gmra.mrb[80].mxu1 %v5624_v47  ;;  %5975 = vmatmul.mubr.f32.vlgmr.msra.gmra.mrb[74].mxu0 %v5632_v13  ;;  %v5484_v47 = vld [vmem:[%s17046_s7 + $0x5d8] sm:$0xff]  ;;  %v11107_v13 = vpack.c.bf16 %v5434_v63, %v5433_v61  ;;  %v11151_v63 = vpack.c.bf16 %v5472_v39, %v5471_v27  ;;  %v5493_v24 = vld [vmem:[%s17046_s7 + $0x620] sm:$0xff]  ;;  %v5494_v46 = vld [vmem:[%s17046_s7 + $0x628] sm:$0xff] }
 0xf4f   :  { %11092 = vmatpush3.bf16.msra.mxu1 %v11091_v57  ;;  %11124 = vmatpush3.bf16.msra.mxu0 %v11123_v34  ;;  %v5465_v57 = vld [vmem:[%s17046_s7 + $0x540] sm:$0xff]  ;;  %v5466_v34 = vld [vmem:[%s17046_s7 + $0x548] sm:$0xff]  ;;  %v11141_v11 = vpack.c.bf16 %v5484_v47, %v5483_v16  ;;  %v5507_v16 = vld [vmem:[%s17046_s7 + $0x690] sm:$0xff]  ;;  %v11163_v27 = vpack.c.bf16 %v5494_v46, %v5493_v24 }
 0xf50   :  { %11094 = vmatprep.subr.bf16.mxu1 %v11093_v56  ;;  %11126 = vmatprep.subr.bf16.mxu0 %v11125_v41  ;;  %v5451_v56 = vld [vmem:[%s17046_s7 + $0x4d0] sm:$0xff]  ;;  %v11139_v41 = vpack.c.bf16 %v5466_v34, %v5465_v57  ;;  %v5521_v57 = vld [vmem:[%s17046_s7 + $0x700] sm:$0xff]  ;;  %v11153_v34 = vpack.c.bf16 %v5506_v31, %v5505_v6  ;;  %v5508_v47 = vld [vmem:[%s17046_s7 + $0x698] sm:$0xff] }
 0xf51   :  { %6044 = vmatprep.mubr.f32.mxu1 %v5644_v50  ;;  %6114 = vmatprep.mubr.f32.mxu0 %v5652_v19  ;;  %v11109_v44 = vpack.c.bf16 %v5452_v42, %v5451_v56  ;;  %v5453_v50 = vld [vmem:[%s17046_s7 + $0x4e0] sm:$0xff]  ;;  %v5454_v19 = vld [vmem:[%s17046_s7 + $0x4e8] sm:$0xff]  ;;  %v5495_v6 = vld [vmem:[%s17046_s7 + $0x630] sm:$0xff] }
 0xf52   :  { %v11113_v12 = vpack.c.bf16 %v5454_v19, %v5453_v50  ;;  %v5522_v42 = vld [vmem:[%s17046_s7 + $0x708] sm:$0xff]  ;;  %v5648_v50 = vrot.slane %v15239_v10, %v17143_v18  ;;  %v5496_v31 = vld [vmem:[%s17046_s7 + $0x638] sm:$0xff] }
 0xf53   :  { %11096 = vmatpush3.bf16.msra.mxu1 %v11095_v38  ;;  %11128 = vmatpush3.bf16.msra.mxu0 %v11127_v23  ;;  %v5485_v38 = vld [vmem:[%s17046_s7 + $0x5e0] sm:$0xff]  ;;  %v5486_v23 = vld [vmem:[%s17046_s7 + $0x5e8] sm:$0xff]  ;;  %v11187_v21 = vpack.c.bf16 %v5522_v42, %v5521_v57 }
 0xf54   :  { %11098 = vmatprep.subr.bf16.mxu1 %v11097_v26  ;;  %11130 = vmatprep.subr.bf16.mxu0 %v11129_v51  ;;  %v5437_v26 = vld [vmem:[%s17046_s7 + $0x460] sm:$0xff]  ;;  %v5438_v51 = vld [vmem:[%s17046_s7 + $0x468] sm:$0xff]  ;;  %v11145_v3 = vpack.c.bf16 %v5486_v23, %v5485_v38  ;;  %v5523_v38 = vld [vmem:[%s17046_s7 + $0x710] sm:$0xff] }
 0xf55   :  { %v11115_v30 = vpack.c.bf16 %v5438_v51, %v5437_v26  ;;  %v5524_v23 = vld [vmem:[%s17046_s7 + $0x718] sm:$0xff]  ;;  %v5541_v26 = vld [vmem:[%s17046_s7 + $0x7a0] sm:$0xff]  ;;  %v5542_v51 = vld [vmem:[%s17046_s7 + $0x7a8] sm:$0xff] }
 0xf56   :  { %v5545_v57 = vld [vmem:[%s17046_s7 + $0x7c0] sm:$0xff] }
 0xf57   :  { %11100 = vmatpush3.bf16.msra.mxu1 %v11099_v54  ;;  %11132 = vmatpush3.bf16.msra.mxu0 %v11131_v37  ;;  %v5487_v54 = vld [vmem:[%s17046_s7 + $0x5f0] sm:$0xff]  ;;  %v5488_v37 = vld [vmem:[%s17046_s7 + $0x5f8] sm:$0xff] }
 0xf58   :  { %11102 = vmatprep.subr.bf16.mxu1 %v11101_v28  ;;  %11134 = vmatprep.subr.bf16.mxu0 %v11133_v49  ;;  %v5439_v28 = vld [vmem:[%s17046_s7 + $0x470] sm:$0xff]  ;;  %v5440_v49 = vld [vmem:[%s17046_s7 + $0x478] sm:$0xff]  ;;  %v11149_v60 = vpack.c.bf16 %v5488_v37, %v5487_v54  ;;  %v11193_v37 = vpack.c.bf16 %v5542_v51, %v5541_v26 }
 0xf59   :  { %v11119_v61 = vpack.c.bf16 %v5440_v49, %v5439_v28  ;;  %v5511_v28 = vld [vmem:[%s17046_s7 + $0x6b0] sm:$0xff]  ;;  %v5512_v49 = vld [vmem:[%s17046_s7 + $0x6b8] sm:$0xff] }
 0xf5a   :  { %v5531_v26 = vld [vmem:[%s17046_s7 + $0x750] sm:$0xff]  ;;  %v5532_v51 = vld [vmem:[%s17046_s7 + $0x758] sm:$0xff] }
 0xf5b   :  { %11104 = vmatpush3.bf16.msra.mxu1 %v11103_v45  ;;  %11136 = vmatpush3.bf16.msra.mxu0 %v11135_v53  ;;  %v5537_v45 = vld [vmem:[%s17046_s7 + $0x780] sm:$0xff]  ;;  %v5538_v53 = vld [vmem:[%s17046_s7 + $0x788] sm:$0xff]  ;;  %v11207_v46 = vpack.c.bf16 %v5532_v51, %v5531_v26  ;;  %v5588_v26 = vld [vmem:[%s17046_s7 + $0x918] sm:$0xff] }
 0xf5c   :  { %11106 = vmatprep.subr.bf16.mxu1 %v11105_v62  ;;  %11138 = vmatprep.subr.bf16.mxu0 %v11137_v7  ;;  %v5489_v62 = vld [vmem:[%s17046_s7 + $0x600] sm:$0xff]  ;;  %v5490_v7 = vld [vmem:[%s17046_s7 + $0x608] sm:$0xff]  ;;  %v11185_v56 = vpack.c.bf16 %v5538_v53, %v5537_v45  ;;  %v11165_v45 = vpack.c.bf16 %v5512_v49, %v5511_v28 }
 0xf5d   :  { %v11155_v25 = vpack.c.bf16 %v5490_v7, %v5489_v62  ;;  %v5513_v62 = vld [vmem:[%s17046_s7 + $0x6c0] sm:$0xff]  ;;  %v5514_v7 = vld [vmem:[%s17046_s7 + $0x6c8] sm:$0xff] }
 0xf5e   :  { %v5533_v28 = vld [vmem:[%s17046_s7 + $0x760] sm:$0xff]  ;;  %v5534_v49 = vld [vmem:[%s17046_s7 + $0x768] sm:$0xff] }
 0xf5f   :  { %11108 = vmatpush3.bf16.msra.mxu1 %v11107_v13  ;;  %11140 = vmatpush3.bf16.msra.mxu0 %v11139_v41  ;;  %v5539_v13 = vld [vmem:[%s17046_s7 + $0x790] sm:$0xff]  ;;  %v5540_v41 = vld [vmem:[%s17046_s7 + $0x798] sm:$0xff]  ;;  %v5574_v51 = vld [vmem:[%s17046_s7 + $0x8a8] sm:$0xff] }
 0xf60   :  { %11110 = vmatprep.subr.bf16.mxu1 %v11109_v44  ;;  %11142 = vmatprep.subr.bf16.mxu0 %v11141_v11  ;;  %v11157_v44 = vpack.c.bf16 %v5508_v47, %v5507_v16  ;;  %v5491_v11 = vld [vmem:[%s17046_s7 + $0x610] sm:$0xff]  ;;  %v11189_v19 = vpack.c.bf16 %v5540_v41, %v5539_v13  ;;  %v5497_v16 = vld [vmem:[%s17046_s7 + $0x640] sm:$0xff]  ;;  %v5498_v47 = vld [vmem:[%s17046_s7 + $0x648] sm:$0xff]  ;;  %v11169_v13 = vpack.c.bf16 %v5514_v7, %v5513_v62 }
 0xf61   :  { %v5535_v62 = vld [vmem:[%s17046_s7 + $0x770] sm:$0xff]  ;;  %v5536_v7 = vld [vmem:[%s17046_s7 + $0x778] sm:$0xff] }
 0xf63   :  { %11112 = vmatpush3.bf16.msra.mxu1 %v11111_v0  ;;  %11144 = vmatpush3.bf16.msra.mxu0 %v11143_v4  ;;  %v5509_v0 = vld [vmem:[%s17046_s7 + $0x6a0] sm:$0xff]  ;;  %v5510_v4 = vld [vmem:[%s17046_s7 + $0x6a8] sm:$0xff] }
 0xf64   :  { %11114 = vmatprep.subr.bf16.mxu1 %v11113_v12  ;;  %11146 = vmatprep.subr.bf16.mxu0 %v11145_v3  ;;  %v11159_v12 = vpack.c.bf16 %v5492_v52, %v5491_v11  ;;  %v11191_v3 = vpack.c.bf16 %v5524_v23, %v5523_v38  ;;  %v11161_v54 = vpack.c.bf16 %v5510_v4, %v5509_v0  ;;  %v5516_v11 = vld [vmem:[%s17046_s7 + $0x6d8] sm:$0xff]  ;;  %v5547_v52 = vld [vmem:[%s17046_s7 + $0x7d0] sm:$0xff] }
 0xf65   :  { %v5499_v38 = vld [vmem:[%s17046_s7 + $0x650] sm:$0xff]  ;;  %v5500_v23 = vld [vmem:[%s17046_s7 + $0x658] sm:$0xff] }
 0xf66   :  { %v11175_v24 = vpack.c.bf16 %v5500_v23, %v5499_v38  ;;  %v5664_v38 = vrot.slane %v15239_v10, %v17161_v22 }
 0xf67   :  { %11116 = vmatpush3.bf16.msra.mxu1 %v11115_v30  ;;  %11148 = vmatpush3.bf16.msra.mxu0 %v11147_v15  ;;  %v5525_v30 = vld [vmem:[%s17046_s7 + $0x720] sm:$0xff]  ;;  %v5526_v15 = vld [vmem:[%s17046_s7 + $0x728] sm:$0xff] }
 0xf68   :  { %11118 = vmatprep.subr.bf16.mxu1 %v11117_v1  ;;  %11150 = vmatprep.subr.bf16.mxu0 %v11149_v60  ;;  %v5543_v1 = vld [vmem:[%s17046_s7 + $0x7b0] sm:$0xff]  ;;  %v5544_v60 = vld [vmem:[%s17046_s7 + $0x7b8] sm:$0xff]  ;;  %v11195_v39 = vpack.c.bf16 %v5526_v15, %v5525_v30 }
 0xf69   :  { %v11197_v53 = vpack.c.bf16 %v5544_v60, %v5543_v1  ;;  %v5519_v1 = vld [vmem:[%s17046_s7 + $0x6f0] sm:$0xff]  ;;  %v5520_v60 = vld [vmem:[%s17046_s7 + $0x6f8] sm:$0xff] }
 0xf6b   :  { %11120 = vmatpush3.bf16.msra.mxu1 %v11119_v61  ;;  %11152 = vmatpush3.bf16.msra.mxu0 %v11151_v63  ;;  %v5527_v61 = vld [vmem:[%s17046_s7 + $0x730] sm:$0xff]  ;;  %v5528_v63 = vld [vmem:[%s17046_s7 + $0x738] sm:$0xff] }
 0xf6c   :  { %11154 = vmatprep.subr.bf16.mxu1 %v11153_v34  ;;  %11186 = vmatprep.subr.bf16.mxu0 %v11185_v56  ;;  %v5546_v34 = vld [vmem:[%s17046_s7 + $0x7c8] sm:$0xff]  ;;  %v11167_v56 = vpack.c.bf16 %v5496_v31, %v5495_v6  ;;  %v11199_v42 = vpack.c.bf16 %v5528_v63, %v5527_v61  ;;  %v11211_v31 = vpack.c.bf16 %v5534_v49, %v5533_v28  ;;  %v5504_v63 = vld [vmem:[%s17046_s7 + $0x678] sm:$0xff]  ;;  %v5559_v49 = vld [vmem:[%s17046_s7 + $0x830] sm:$0xff] }
 0xf6d   :  { %v11201_v41 = vpack.c.bf16 %v5546_v34, %v5545_v57  ;;  %v5569_v57 = vld [vmem:[%s17046_s7 + $0x880] sm:$0xff]  ;;  %v5570_v34 = vld [vmem:[%s17046_s7 + $0x888] sm:$0xff] }
 0xf6e   :  { %6045 = vmatmul.mubr.f32.vlgmr.msra.gmra.mrb[82].mxu1 %v5640_v35  ;;  %6115 = vmatmul.mubr.f32.vlgmr.msra.gmra.mrb[76].mxu0 %v5648_v50  ;;  %v5548_v35 = vld [vmem:[%s17046_s7 + $0x7d8] sm:$0xff]  ;;  %v11171_v50 = vpack.c.bf16 %v5498_v47, %v5497_v16  ;;  %v5553_v16 = vld [vmem:[%s17046_s7 + $0x800] sm:$0xff]  ;;  %v11217_v47 = vpack.c.bf16 %v5570_v34, %v5569_v57  ;;  %v5594_v34 = vld [vmem:[%s17046_s7 + $0x948] sm:$0xff] }
 0xf6f   :  { %11156 = vmatpush3.bf16.msra.mxu1 %v11155_v25  ;;  %11188 = vmatpush3.bf16.msra.mxu0 %v11187_v21  ;;  %v5529_v25 = vld [vmem:[%s17046_s7 + $0x740] sm:$0xff]  ;;  %v5530_v21 = vld [vmem:[%s17046_s7 + $0x748] sm:$0xff]  ;;  %v11205_v4 = vpack.c.bf16 %v5548_v35, %v5547_v52  ;;  %v5555_v35 = vld [vmem:[%s17046_s7 + $0x810] sm:$0xff] }
 0xf70   :  { %11158 = vmatprep.subr.bf16.mxu1 %v11157_v44  ;;  %11190 = vmatprep.subr.bf16.mxu0 %v11189_v19  ;;  %v5515_v44 = vld [vmem:[%s17046_s7 + $0x6d0] sm:$0xff]  ;;  %v11203_v19 = vpack.c.bf16 %v5530_v21, %v5529_v25  ;;  %v5586_v25 = vld [vmem:[%s17046_s7 + $0x908] sm:$0xff]  ;;  %v5593_v57 = vld [vmem:[%s17046_s7 + $0x940] sm:$0xff] }
 0xf71   :  { %6184 = vmatprep.mubr.f32.mxu1 %v5660_v9  ;;  %6254 = vmatprep.mubr.f32.mxu0 %v5668_v17  ;;  %v11173_v0 = vpack.c.bf16 %v5516_v11, %v5515_v44  ;;  %v5549_v9 = vld [vmem:[%s17046_s7 + $0x7e0] sm:$0xff]  ;;  %v5550_v17 = vld [vmem:[%s17046_s7 + $0x7e8] sm:$0xff]  ;;  %v5571_v21 = vld [vmem:[%s17046_s7 + $0x890] sm:$0xff] }
 0xf72   :  { %v11209_v15 = vpack.c.bf16 %v5550_v17, %v5549_v9  ;;  %v5572_v44 = vld [vmem:[%s17046_s7 + $0x898] sm:$0xff]  ;;  %v15629_v11 = vld [vmem:[#allocation3 + $0x10] sm:$0x7] }
 0xf73   :  { %11160 = vmatpush3.bf16.msra.mxu1 %v11159_v12  ;;  %11192 = vmatpush3.bf16.msra.mxu0 %v11191_v3  ;;  %v5517_v12 = vld [vmem:[%s17046_s7 + $0x6e0] sm:$0xff]  ;;  %v5518_v3 = vld [vmem:[%s17046_s7 + $0x6e8] sm:$0xff]  ;;  %v11221_v23 = vpack.c.bf16 %v5572_v44, %v5571_v21  ;;  %v5595_v21 = vld [vmem:[%s17046_s7 + $0x950] sm:$0xff] }
 0xf74   :  { %11162 = vmatprep.subr.bf16.mxu1 %v11161_v54  ;;  %11194 = vmatprep.subr.bf16.mxu0 %v11193_v37  ;;  %v5501_v54 = vld [vmem:[%s17046_s7 + $0x660] sm:$0xff]  ;;  %v5502_v37 = vld [vmem:[%s17046_s7 + $0x668] sm:$0xff]  ;;  %v11177_v30 = vpack.c.bf16 %v5518_v3, %v5517_v12  ;;  %v5676_v12 = vrot.slane %v15629_v11, %v17141_v40  ;;  %v5596_v44 = vld [vmem:[%s17046_s7 + $0x958] sm:$0xff] }
 0xf75   :  { %v11179_v6 = vpack.c.bf16 %v5502_v37, %v5501_v54  ;;  %v5557_v9 = vld [vmem:[%s17046_s7 + $0x820] sm:$0xff]  ;;  %v5590_v37 = vld [vmem:[%s17046_s7 + $0x928] sm:$0xff] }
 0xf76   :  { %v5589_v54 = vld [vmem:[%s17046_s7 + $0x920] sm:$0xff] }
 0xf77   :  { %11164 = vmatpush3.bf16.msra.mxu1 %v11163_v27  ;;  %11196 = vmatpush3.bf16.msra.mxu0 %v11195_v39  ;;  %v5551_v27 = vld [vmem:[%s17046_s7 + $0x7f0] sm:$0xff]  ;;  %v5552_v39 = vld [vmem:[%s17046_s7 + $0x7f8] sm:$0xff] }
 0xf78   :  { %11166 = vmatprep.subr.bf16.mxu1 %v11165_v45  ;;  %11198 = vmatprep.subr.bf16.mxu0 %v11197_v53  ;;  %v5503_v45 = vld [vmem:[%s17046_s7 + $0x670] sm:$0xff]  ;;  %v11181_v53 = vpack.c.bf16 %v5520_v60, %v5519_v1  ;;  %v11213_v61 = vpack.c.bf16 %v5552_v39, %v5551_v27  ;;  %v11256_v1 = vpack.c.bf16 %v5590_v37, %v5589_v54  ;;  %v5560_v27 = vld [vmem:[%s17046_s7 + $0x838] sm:$0xff] }
 0xf79   :  { %v5591_v39 = vld [vmem:[%s17046_s7 + $0x930] sm:$0xff]  ;;  %v5600_v54 = vld [vmem:[%s17046_s7 + $0x978] sm:$0xff] }
 0xf7b   :  { %11168 = vmatpush3.bf16.msra.mxu1 %v11167_v56  ;;  %11200 = vmatpush3.bf16.msra.mxu0 %v11199_v42  ;;  %v11183_v56 = vpack.c.bf16 %v5504_v63, %v5503_v45  ;;  %v11215_v42 = vpack.c.bf16 %v5536_v7, %v5535_v62  ;;  %v5578_v45 = vld [vmem:[%s17046_s7 + $0x8c8] sm:$0xff] }
 0xf7c   :  { %11170 = vmatprep.subr.bf16.mxu1 %v11169_v13  ;;  %11202 = vmatprep.subr.bf16.mxu0 %v11201_v41  ;;  %v5554_v13 = vld [vmem:[%s17046_s7 + $0x808] sm:$0xff]  ;;  %v5585_v41 = vld [vmem:[%s17046_s7 + $0x900] sm:$0xff] }
 0xf7d   :  { %v11219_v52 = vpack.c.bf16 %v5554_v13, %v5553_v16  ;;  %v5562_v7 = vld [vmem:[%s17046_s7 + $0x848] sm:$0xff]  ;;  %v11262_v13 = vpack.c.bf16 %v5594_v34, %v5593_v57 }
 0xf7f   :  { %11172 = vmatpush3.bf16.msra.mxu1 %v11171_v50  ;;  %11204 = vmatpush3.bf16.msra.mxu0 %v11203_v19  ;;  %v11250_v50 = vpack.c.bf16 %v5586_v25, %v5585_v41  ;;  %v5656_v19 = vrot.slane %v15239_v10, %v17160_v20  ;;  %v5573_v10 = vld [vmem:[%s17046_s7 + $0x8a0] sm:$0xff]  ;;  %v5564_v25 = vld [vmem:[%s17046_s7 + $0x858] sm:$0xff] }
 0xf80   :  { %11174 = vmatprep.subr.bf16.mxu1 %v11173_v0  ;;  %11206 = vmatprep.subr.bf16.mxu0 %v11205_v4  ;;  %v5556_v0 = vld [vmem:[%s17046_s7 + $0x818] sm:$0xff]  ;;  %v5587_v4 = vld [vmem:[%s17046_s7 + $0x910] sm:$0xff] }
 0xf81   :  { %v11223_v3 = vpack.c.bf16 %v5556_v0, %v5555_v35  ;;  %v11253_v17 = vpack.c.bf16 %v5588_v26, %v5587_v4  ;;  %v5582_v35 = vld [vmem:[%s17046_s7 + $0x8e8] sm:$0xff]  ;;  %v5597_v4 = vld [vmem:[%s17046_s7 + $0x960] sm:$0xff] }
 0xf82   :  { %v5566_v0 = vld [vmem:[%s17046_s7 + $0x868] sm:$0xff] }
 0xf83   :  { %11176 = vmatpush3.bf16.msra.mxu1 %v11175_v24  ;;  %11208 = vmatpush3.bf16.msra.mxu0 %v11207_v46  ;;  %v11225_v24 = vpack.c.bf16 %v5574_v51, %v5573_v10  ;;  %v5558_v46 = vld [vmem:[%s17046_s7 + $0x828] sm:$0xff]  ;;  %v5583_v10 = vld [vmem:[%s17046_s7 + $0x8f0] sm:$0xff]  ;;  %v5584_v51 = vld [vmem:[%s17046_s7 + $0x8f8] sm:$0xff] }
 0xf84   :  { %11178 = vmatprep.subr.bf16.mxu1 %v11177_v30  ;;  %11210 = vmatprep.subr.bf16.mxu0 %v11209_v15  ;;  %v5575_v30 = vld [vmem:[%s17046_s7 + $0x8b0] sm:$0xff]  ;;  %v5576_v15 = vld [vmem:[%s17046_s7 + $0x8b8] sm:$0xff]  ;;  %v11227_v28 = vpack.c.bf16 %v5558_v46, %v5557_v9  ;;  %v5598_v26 = vld [vmem:[%s17046_s7 + $0x968] sm:$0xff] }
 0xf85   :  { %v11229_v60 = vpack.c.bf16 %v5576_v15, %v5575_v30  ;;  %v11268_v9 = vpack.c.bf16 %v5598_v26, %v5597_v4  ;;  %v5599_v46 = vld [vmem:[%s17046_s7 + $0x970] sm:$0xff]  ;;  %v5672_v15 = vrot.slane %v15629_v11, %v17139_v43 }
 0xf86   :  { %v11271_v30 = vpack.c.bf16 %v5600_v54, %v5599_v46 }
 0xf87   :  { %11180 = vmatpush3.bf16.msra.mxu1 %v11179_v6  ;;  %11212 = vmatpush3.bf16.msra.mxu0 %v11211_v31  ;;  %v5592_v6 = vld [vmem:[%s17046_s7 + $0x938] sm:$0xff]  ;;  %v5577_v31 = vld [vmem:[%s17046_s7 + $0x8c0] sm:$0xff] }
 0xf88   :  { %11182 = vmatprep.subr.bf16.mxu1 %v11181_v53  ;;  %11214 = vmatprep.subr.bf16.mxu0 %v11213_v61  ;;  %v11231_v53 = vpack.c.bf16 %v5560_v27, %v5559_v49  ;;  %v5561_v61 = vld [vmem:[%s17046_s7 + $0x840] sm:$0xff]  ;;  %v11259_v63 = vpack.c.bf16 %v5592_v6, %v5591_v39  ;;  %v11233_v62 = vpack.c.bf16 %v5578_v45, %v5577_v31 }
 0xf89   :  { %v11235_v16 = vpack.c.bf16 %v5562_v7, %v5561_v61 }
 0xf8b   :  { %11184 = vmatpush3.bf16.msra.mxu1 %v11183_v56  ;;  %11216 = vmatpush3.bf16.msra.mxu0 %v11215_v42  ;;  %v5579_v56 = vld [vmem:[%s17046_s7 + $0x8d0] sm:$0xff]  ;;  %v5580_v42 = vld [vmem:[%s17046_s7 + $0x8d8] sm:$0xff] }
 0xf8c   :  { %11218 = vmatprep.subr.bf16.mxu1 %v11217_v47  ;;  %11249 = vmatprep.subr.bf16.mxu0 %v17155_v59  ;;  %v5563_v47 = vld [vmem:[%s17046_s7 + $0x850] sm:$0xff]  ;;  %v11237_v41 = vpack.c.bf16 %v5580_v42, %v5579_v56 }
 0xf8e   :  { %6185 = vmatmul.mubr.f32.vlgmr.msra.gmra.mrb[84].mxu1 %v5656_v19  ;;  %6255 = vmatmul.mubr.f32.vlgmr.msra.gmra.mrb[78].mxu0 %v5664_v38  ;;  %v5565_v19 = vld [vmem:[%s17046_s7 + $0x860] sm:$0xff]  ;;  %v11265_v38 = vpack.c.bf16 %v5596_v44, %v5595_v21 }
 0xf8f   :  { %11220 = vmatpush3.bf16.msra.mxu1 %v11219_v52  ;;  %11251 = vmatpush3.bf16.msra.mxu0 %v11250_v50  ;;  %v5581_v52 = vld [vmem:[%s17046_s7 + $0x8e0] sm:$0xff]  ;;  %v11239_v50 = vpack.c.bf16 %v5564_v25, %v5563_v47 }
 0xf90   :  { %11222 = vmatprep.subr.bf16.mxu1 %v11221_v23  ;;  %11252 = vmatprep.subr.bf16.mxu0 %v17155_v59  ;;  %v11241_v23 = vpack.c.bf16 %v5582_v35, %v5581_v52 }
 0xf91   :  { %6324 = vmatprep.mubr.f32.mxu1 %v5676_v12  ;;  %10168 = vmatprep.mubr.msk.f32.mxu0 %vm11640_vm6, %v17154_v8  ;;  %v11243_v12 = vpack.c.bf16 %v5566_v0, %v5565_v19 }
 0xf93   :  { %11224 = vmatpush3.bf16.msra.mxu1 %v11223_v3  ;;  %11254 = vmatpush3.bf16.msra.mxu0 %v11253_v17  ;;  %v5567_v3 = vld [vmem:[%s17046_s7 + $0x870] sm:$0xff]  ;;  %v11245_v17 = vpack.c.bf16 %v5584_v51, %v5583_v10 }
 0xf94   :  { %11226 = vmatprep.subr.bf16.mxu1 %v11225_v24  ;;  %11255 = vmatprep.subr.bf16.mxu0 %v17155_v59  ;;  %v5568_v24 = vld [vmem:[%s17046_s7 + $0x878] sm:$0xff] }
 0xf95   :  { %v11247_v37 = vpack.c.bf16 %v5568_v24, %v5567_v3 }
 0xf97   :  { %11228 = vmatpush3.bf16.msra.mxu1 %v11227_v28  ;;  %11257 = vmatpush3.bf16.msra.mxu0 %v11256_v1  ;;  %v5680_v28 = vrot.slane %v15629_v11, %v17143_v18 }
 0xf98   :  { %11230 = vmatprep.subr.bf16.mxu1 %v11229_v60  ;;  %11258 = vmatprep.subr.bf16.mxu0 %v17155_v59  ;;  %v5601_v60 = vld [vmem:[%s17047_s8] sm:$0x1] }
 0xf9b   :  { %11232 = vmatpush3.bf16.msra.mxu1 %v11231_v53  ;;  %11260 = vmatpush3.bf16.msra.mxu0 %v11259_v63 }
 0xf9c   :  { %11234 = vmatprep.subr.bf16.mxu1 %v11233_v62  ;;  %11261 = vmatprep.subr.bf16.mxu0 %v17155_v59 }
 0xf9f   :  { %11236 = vmatpush3.bf16.msra.mxu1 %v11235_v16  ;;  %11263 = vmatpush3.bf16.msra.mxu0 %v11262_v13 }
 0xfa0   :  { %11238 = vmatprep.subr.bf16.mxu1 %v11237_v41  ;;  %11264 = vmatprep.subr.bf16.mxu0 %v17155_v59 }
 0xfa3   :  { %11240 = vmatpush3.bf16.msra.mxu1 %v11239_v50  ;;  %11266 = vmatpush3.bf16.msra.mxu0 %v11265_v38 }
 0xfa4   :  { %11242 = vmatprep.subr.bf16.mxu1 %v11241_v23  ;;  %11267 = vmatprep.subr.bf16.mxu0 %v17155_v59 }
 0xfa7   :  { %11244 = vmatpush3.bf16.msra.mxu1 %v11243_v12  ;;  %11269 = vmatpush3.bf16.msra.mxu0 %v11268_v9 }
 0xfa8   :  { %11246 = vmatprep.subr.bf16.mxu1 %v11245_v17  ;;  %11270 = vmatprep.subr.bf16.mxu0 %v17155_v59 }
 0xfab   :  { %11248 = vmatpush3.bf16.msra.mxu1 %v11247_v37  ;;  %11272 = vmatpush3.bf16.msra.mxu0 %v11271_v30 }
 0xfae   :  { %6325 = vmatmul.mubr.f32.vlgmr.msra.gmra.mrb[86].mxu1 %v5672_v15  ;;  %10169 = vmatmul.mubr.f32.vlgmr.msra.gmra.mrb[80].mxu0 %v5680_v28  ;;  %v6428_v28 = vld [vmem:[%s17050_s11 + $0x8] sm:$0xff] }
 0xfaf   :  { %6671 = vmatprep.mubr.f32.mxu1 %v17154_v8  ;;  %6742 = vmatprep.mubr.f32.mxu0 %v17154_v8 }
0x1001   :  { %v9494_v49 = vpop.f32.mrb[78].mxu1  ;;  %v9529_v1 = vpop.f32.mrb[72].mxu0 }
0x1002   :  { %v9495_v27 = vpop.f32.mrb[79].mxu1  ;;  %v9530_v39 = vpop.f32.mrb[73].mxu0 }
0x1003   :  { %v9496_v6 = vadd.f32 %v9495_v27, %v9494_v49  ;;  %v9531_v31 = vadd.f32 %v9530_v39, %v9529_v1  ;;  %v6447_v49 = vld [vmem:[%s17050_s11 + $0xa0] sm:$0xff]  ;;  %v6430_v1 = vld [vmem:[%s17050_s11 + $0x18] sm:$0xff]  ;;  %v6449_v27 = vld [vmem:[%s17050_s11 + $0xb0] sm:$0xff] }
0x1004   :  { %v6427_v39 = vld [vmem:[%s17050_s11] sm:$0xff] }
0x1005   :  { %v5767_v45 = vadd.f32 %v9496_v6, %v5601_v60  ;;  %v11273_v60 = vpack.c.bf16 %v6447_v49, %v6428_v28  ;;  %v6446_v6 = vld [vmem:[%s17050_s11 + $0x98] sm:$0xff]  ;;  %v6452_v28 = vld [vmem:[%s17050_s11 + $0xc8] sm:$0xff] }
0x1006   :  { %v6470_v49 = vld [vmem:[%s17050_s11 + $0x158] sm:$0xff] }
0x1007   :  { %v5837_v53 = vadd.f32 %v9531_v31, %v5767_v45  ;;  %v11281_v31 = vpack.c.bf16 %v6449_v27, %v6430_v1  ;;  %v11275_v45 = vpack.c.bf16 %v6446_v6, %v6427_v39  ;;  %11274 = vmatprep.subr.bf16.mxu1 %v11273_v60  ;;  %v6489_v60 = vld [vmem:[%s17050_s11 + $0x1f0] sm:$0xff]  ;;  %v6472_v27 = vld [vmem:[%s17050_s11 + $0x168] sm:$0xff]  ;;  %v6491_v39 = vld [vmem:[%s17050_s11 + $0x200] sm:$0xff] }
0x1009   :  { %11282 = vmatprep.subr.bf16.mxu0 %v11281_v31  ;;  %11276 = vmatpush1.bf16.msra.mxu1 %v11275_v45 }
0x1021   :  { %v9564_v61 = vpop.f32.mrb[80].mxu1  ;;  %v9599_v11 = vpop.f32.mrb[74].mxu0 }
0x1022   :  { %v9565_v63 = vpop.f32.mrb[81].mxu1  ;;  %v9600_v62 = vpop.f32.mrb[75].mxu0 }
0x1023   :  { %v9566_v7 = vadd.f32 %v9565_v63, %v9564_v61  ;;  %v9601_v57 = vadd.f32 %v9600_v62, %v9599_v11  ;;  %v6448_v61 = vld [vmem:[%s17050_s11 + $0xa8] sm:$0xff]  ;;  %v6466_v63 = vld [vmem:[%s17050_s11 + $0x138] sm:$0xff]  ;;  %v6485_v62 = vld [vmem:[%s17050_s11 + $0x1d0] sm:$0xff] }
0x1025   :  { %v5907_v34 = vadd.f32 %v9566_v7, %v5837_v53  ;;  %v6429_v53 = vld [vmem:[%s17050_s11 + $0x10] sm:$0xff]  ;;  %v6468_v7 = vld [vmem:[%s17050_s11 + $0x148] sm:$0xff] }
0x1026   :  { %v11283_v11 = vpack.c.bf16 %v6448_v61, %v6429_v53  ;;  %v6469_v61 = vld [vmem:[%s17050_s11 + $0x150] sm:$0xff] }
0x1027   :  { %v5977_v56 = vadd.f32 %v9601_v57, %v5907_v34  ;;  %v11277_v57 = vpack.c.bf16 %v6485_v62, %v6466_v63  ;;  %v6487_v34 = vld [vmem:[%s17050_s11 + $0x1e0] sm:$0xff]  ;;  %v11293_v62 = vpack.c.bf16 %v6489_v60, %v6470_v49  ;;  %v6458_v49 = vld [vmem:[%s17050_s11 + $0xf8] sm:$0xff] }
0x1028   :  { %11284 = vmatpush1.bf16.msra.mxu0 %v11283_v11  ;;  %v6488_v11 = vld [vmem:[%s17050_s11 + $0x1e8] sm:$0xff] }
0x1029   :  { %11278 = vmatprep.subr.bf16.mxu1 %v11277_v57  ;;  %v6471_v57 = vld [vmem:[%s17050_s11 + $0x160] sm:$0xff] }
0x1041   :  { %v9634_v42 = vpop.f32.mrb[82].mxu1  ;;  %v9669_v16 = vpop.f32.mrb[76].mxu0 }
0x1042   :  { %v9635_v47 = vpop.f32.mrb[83].mxu1  ;;  %v9670_v13 = vpop.f32.mrb[77].mxu0 }
0x1043   :  { %v9636_v41 = vadd.f32 %v9635_v47, %v9634_v42  ;;  %v9671_v25 = vadd.f32 %v9670_v13, %v9669_v16  ;;  %v6484_v42 = vld [vmem:[%s17050_s11 + $0x1c8] sm:$0xff]  ;;  %v11285_v16 = vpack.c.bf16 %v6487_v34, %v6468_v7  ;;  %v6467_v13 = vld [vmem:[%s17050_s11 + $0x140] sm:$0xff]  ;;  %v11301_v7 = vpack.c.bf16 %v6491_v39, %v6472_v27  ;;  %v6490_v34 = vld [vmem:[%s17050_s11 + $0x1f8] sm:$0xff] }
0x1044   :  { %v6441_v27 = vld [vmem:[%s17050_s11 + $0x70] sm:$0xff]  ;;  %v6460_v39 = vld [vmem:[%s17050_s11 + $0x108] sm:$0xff] }
0x1045   :  { %v6047_v21 = vadd.f32 %v9636_v41, %v5977_v56  ;;  %v6465_v56 = vld [vmem:[%s17050_s11 + $0x130] sm:$0xff]  ;;  %v6486_v41 = vld [vmem:[%s17050_s11 + $0x1d8] sm:$0xff]  ;;  %11286 = vmatprep.subr.bf16.mxu0 %v11285_v16 }
0x1046   :  { %v11279_v47 = vpack.c.bf16 %v6484_v42, %v6465_v56  ;;  %v6436_v56 = vld [vmem:[%s17050_s11 + $0x48] sm:$0xff]  ;;  %v6455_v42 = vld [vmem:[%s17050_s11 + $0xe0] sm:$0xff]  ;;  %v6438_v16 = vld [vmem:[%s17050_s11 + $0x58] sm:$0xff] }
0x1047   :  { %v6117_v44 = vadd.f32 %v9671_v25, %v6047_v21  ;;  %v6432_v25 = vld [vmem:[%s17050_s11 + $0x28] sm:$0xff]  ;;  %v11287_v21 = vpack.c.bf16 %v6486_v41, %v6467_v13  ;;  %v11295_v13 = vpack.c.bf16 %v6488_v11, %v6469_v61  ;;  %v11303_v41 = vpack.c.bf16 %v6490_v34, %v6471_v57 }
0x1048   :  { %11280 = vmatpush1.bf16.msra.mxu1 %v11279_v47  ;;  %v6457_v47 = vld [vmem:[%s17050_s11 + $0xf0] sm:$0xff]  ;;  %v11331_v11 = vpack.c.bf16 %v6460_v39, %v6441_v27  ;;  %v6496_v34 = vld [vmem:[%s17050_s11 + $0x228] sm:$0xff] }
0x1049   :  { %11288 = vmatpush1.bf16.msra.mxu0 %v11287_v21  ;;  %v6454_v21 = vld [vmem:[%s17050_s11 + $0xd8] sm:$0xff] }
0x1061   :  { %v9704_v52 = vpop.f32.mrb[84].mxu1  ;;  %v9739_v35 = vpop.f32.mrb[78].mxu0 }
0x1062   :  { %v9705_v50 = vpop.f32.mrb[85].mxu1  ;;  %v9740_v19 = vpop.f32.mrb[79].mxu0 }
0x1063   :  { %v9706_v38 = vadd.f32 %v9705_v50, %v9704_v52  ;;  %v9741_v23 = vadd.f32 %v9740_v19, %v9739_v35  ;;  %v6434_v52 = vld [vmem:[%s17050_s11 + $0x38] sm:$0xff]  ;;  %v6453_v35 = vld [vmem:[%s17050_s11 + $0xd0] sm:$0xff] }
0x1064   :  { %v11297_v19 = vpack.c.bf16 %v6453_v35, %v6434_v52  ;;  %v11313_v52 = vpack.c.bf16 %v6457_v47, %v6438_v16  ;;  %v6437_v35 = vld [vmem:[%s17050_s11 + $0x50] sm:$0xff]  ;;  %v6444_v16 = vld [vmem:[%s17050_s11 + $0x88] sm:$0xff]  ;;  %v6463_v47 = vld [vmem:[%s17050_s11 + $0x120] sm:$0xff] }
0x1065   :  { %v6187_v0 = vadd.f32 %v9706_v38, %v6117_v44  ;;  %v6451_v44 = vld [vmem:[%s17050_s11 + $0xc0] sm:$0xff] }
0x1066   :  { %v11289_v50 = vpack.c.bf16 %v6451_v44, %v6432_v25  ;;  %11298 = vmatprep.subr.bf16.mxu0 %v11297_v19  ;;  %v6435_v25 = vld [vmem:[%s17050_s11 + $0x40] sm:$0xff]  ;;  %v11305_v44 = vpack.c.bf16 %v6455_v42, %v6436_v56  ;;  %v6474_v19 = vld [vmem:[%s17050_s11 + $0x178] sm:$0xff] }
0x1067   :  { %v6257_v4 = vadd.f32 %v9741_v23, %v6187_v0  ;;  %v6479_v56 = vld [vmem:[%s17050_s11 + $0x1a0] sm:$0xff]  ;;  %v6498_v42 = vld [vmem:[%s17050_s11 + $0x238] sm:$0xff] }
0x1068   :  { %11290 = vmatprep.subr.bf16.mxu1 %v11289_v50  ;;  %v6456_v50 = vld [vmem:[%s17050_s11 + $0xe8] sm:$0xff] }
0x1081   :  { %v9774_v26 = vpop.f32.mrb[86].mxu1  ;;  %v6396_v10 = vpop.f32.mrb[80].mxu0 }
0x1082   :  { %v9775_v51 = vpop.f32.mrb[87].mxu1  ;;  %v10170_v12 = vpop.f32.mrb[81].mxu0 }
0x1083   :  { %v9776_v3 = vadd.f32 %v9775_v51, %v9774_v26  ;;  %v6413_v26 = vld [vmem:[%s17048_s9] sm:$0x1] }
0x1084   :  { %v6415_v51 = vld [vmem:[%s17049_s10] sm:$0x1] }
0x1085   :  { %v6327_v9 = vadd.f32 %v9776_v3, %v6257_v4 }
0x1087   :  { %v6397_v17 = vadd.f32 %v6396_v10, %v6327_v9 }
0x1089   :  { %v6400_v24 = vsel %vm2068_vm7, %v6397_v17, 0.0 }
0x108a   :  { %6401 = vadd.xlane.f32.xlu0 %v6400_v24 }
0x1117   :  { %v6402_v46 = vpop.xlane.xlu0 %6401 }
0x1118   :  { %v6403_v54 = vmul.f32 0.03125, %v6402_v46 }
0x111a   :  { %v6404_v37 = vsub.f32 %v6397_v17, %v6403_v54 }
0x111c   :  { %v6405_v30 = vmul.f32 %v6404_v37, %v6404_v37 }
0x111e   :  { %v6406_v15 = vsel %vm2068_vm7, %v6405_v30, 0.0  ;;  %v6431_v30 = vld [vmem:[%s17050_s11 + $0x20] sm:$0xff] }
0x111f   :  { %6407 = vadd.xlane.f32.xlu1 %v6406_v15  ;;  %v6433_v15 = vld [vmem:[%s17050_s11 + $0x30] sm:$0xff] }
0x1120   :  { %v11299_v53 = vpack.c.bf16 %v6452_v28, %v6433_v15  ;;  %v6439_v28 = vld [vmem:[%s17050_s11 + $0x60] sm:$0xff] }
0x1121   :  { %v11323_v61 = vpack.c.bf16 %v6458_v49, %v6439_v28 }
0x11ac   :  { %v6408_v38 = vpop.xlane.xlu1 %6407 }
0x11ad   :  { %v6409_v23 = vmul.f32 0.03125, %v6408_v38  ;;  %v6493_v38 = vld [vmem:[%s17050_s11 + $0x210] sm:$0xff] }
0x11af   :  { %v6410_v0 = vadd.f32 1e-05, %v6409_v23  ;;  %v6476_v23 = vld [vmem:[%s17050_s11 + $0x188] sm:$0xff] }
0x11b1   :  { %11570 = vrsqrt.f32 %v6410_v0  ;;  %v6495_v0 = vld [vmem:[%s17050_s11 + $0x220] sm:$0xff] }
0x11bb   :  { %v11571_v4 = vpop.eup %11570 }
0x11bc   :  { %v6412_v10 = vmul.f32 %v11571_v4, %v6404_v37  ;;  %v6450_v37 = vld [vmem:[%s17050_s11 + $0xb8] sm:$0xff]  ;;  %v11307_v4 = vpack.c.bf16 %v6454_v21, %v6435_v25  ;;  %v6443_v25 = vld [vmem:[%s17050_s11 + $0x80] sm:$0xff]  ;;  %v11337_v21 = vpack.c.bf16 %v6463_v47, %v6444_v16 }
0x11bd   :  { %v11291_v45 = vpack.c.bf16 %v6450_v37, %v6431_v30  ;;  %v6461_v30 = vld [vmem:[%s17050_s11 + $0x110] sm:$0xff] }
0x11be   :  { %v6414_v12 = vmul.f32 %v6413_v26, %v6412_v10  ;;  %v11315_v26 = vpack.c.bf16 %v6456_v50, %v6437_v35  ;;  %v6473_v10 = vld [vmem:[%s17050_s11 + $0x170] sm:$0xff]  ;;  %v6464_v35 = vld [vmem:[%s17050_s11 + $0x128] sm:$0xff]  ;;  %v6482_v50 = vld [vmem:[%s17050_s11 + $0x1b8] sm:$0xff] }
0x11c0   :  { %v6416_v3 = vadd.f32 %v6415_v51, %v6414_v12  ;;  %v6492_v51 = vld [vmem:[%s17050_s11 + $0x208] sm:$0xff]  ;;  %v11309_v12 = vpack.c.bf16 %v6493_v38, %v6474_v19  ;;  %v6501_v19 = vld [vmem:[%s17050_s11 + $0x250] sm:$0xff] }
0x11c1   :  { %v11311_v37 = vpack.c.bf16 %v6492_v51, %v6473_v10  ;;  %v6483_v10 = vld [vmem:[%s17050_s11 + $0x1c0] sm:$0xff]  ;;  %v6502_v51 = vld [vmem:[%s17050_s11 + $0x258] sm:$0xff] }
0x11c2   :  { %v6418_v9 = vmul.f32 0.044715, %v6416_v3  ;;  %v6417_v6 = vmul.f32 0.5, %v6416_v3 }
0x11c4   :  { %v6419_v17 = vmul.f32 %v6418_v9, %v6416_v3  ;;  %v6475_v9 = vld [vmem:[%s17050_s11 + $0x180] sm:$0xff] }
0x11c6   :  { %v6420_v24 = vmul.f32 %v6419_v17, %v6416_v3  ;;  %v6494_v17 = vld [vmem:[%s17050_s11 + $0x218] sm:$0xff] }
0x11c7   :  { %v11319_v15 = vpack.c.bf16 %v6494_v17, %v6475_v9  ;;  %v11642_v9 = vmov 0   ;;  %v6503_v17 = vld [vmem:[%s17051_s12] sm:$0xff] }
0x11c8   :  { %v6421_v46 = vadd.f32 %v6420_v24, %v6416_v3  ;;  %v11317_v3 = vpack.c.bf16 %v6495_v0, %v6476_v23  ;;  %v6440_v24 = vld [vmem:[%s17050_s11 + $0x68] sm:$0xff]  ;;  %v6481_v0 = vld [vmem:[%s17050_s11 + $0x1b0] sm:$0xff]  ;;  %11480 = vset.pattern.permute.xlu0 %v11642_v9  ;;  %11481 = vset.pattern.permute.xlu1 %v11642_v9  ;;  %v6540_v47 = vrot.slane %v6503_v17, %v17159_v29 }
0x11ca   :  { %v6422_v54 = vmul.f32 0.7978846, %v6421_v46  ;;  %v6459_v46 = vld [vmem:[%s17050_s11 + $0x100] sm:$0xff] }
0x11cc   :  { %11572 = vtanh.f32 %v6422_v54  ;;  %v6442_v54 = vld [vmem:[%s17050_s11 + $0x78] sm:$0xff] }
0x11cd   :  { %v11329_v60 = vpack.c.bf16 %v6461_v30, %v6442_v54  ;;  %v6516_v54 = vrot.slane %v6503_v17, %v17141_v40 }
0x11d6   :  { %v11573_v1 = vpop.eup %11572 }
0x11d7   :  { %v6424_v31 = vadd.f32 1.0, %v11573_v1  ;;  %v11321_v1 = vpack.c.bf16 %v6459_v46, %v6440_v24  ;;  %v6512_v24 = vrot.slane %v6503_v17, %v17139_v43  ;;  %v6520_v46 = vrot.slane %v6503_v17, %v17143_v18 }
0x11d9   :  { %v15874_v63 = vmul.f32 %v6424_v31, %v6417_v6  ;;  %v6478_v6 = vld [vmem:[%s17050_s11 + $0x198] sm:$0xff]  ;;  %v6497_v31 = vld [vmem:[%s17050_s11 + $0x230] sm:$0xff] }
0x11db   :  { %6426 = vst.msk [vmem:[#allocation6 + $0x1] sm:$0x1] %vm2068_vm7, %v15874_v63  ;;  %8880 = vmatmul.mubr.msk.f32.vlgmr.msra.gmra.mrb[88].mxu1 %vm2274_vm8, %v15874_v63  ;;  %8881 = vmatmul.mubr.msk.f32.vlgmr.msra.gmra.mrb[82].mxu0 %vm2274_vm8, %v15874_v63 }
0x11dc   :  { %11292 = vmatpush1.bf16.msra.mxu1 %v11291_v45  ;;  %11300 = vmatpush1.bf16.msra.mxu0 %v11299_v53  ;;  %v6480_v45 = vld [vmem:[%s17050_s11 + $0x1a8] sm:$0xff]  ;;  %v6499_v53 = vld [vmem:[%s17050_s11 + $0x240] sm:$0xff] }
0x11dd   :  { %11294 = vmatprep.subr.bf16.mxu1 %v11293_v62  ;;  %11302 = vmatprep.subr.bf16.mxu0 %v11301_v7  ;;  %v6477_v62 = vld [vmem:[%s17050_s11 + $0x190] sm:$0xff]  ;;  %v11325_v7 = vpack.c.bf16 %v6497_v31, %v6478_v6  ;;  %v11333_v57 = vpack.c.bf16 %v6499_v53, %v6480_v45  ;;  %v6528_v45 = vrot.slane %v6503_v17, %v17160_v20 }
0x11de   :  { %6813 = vmatprep.mubr.f32.mxu1 %v17154_v8  ;;  %6884 = vmatprep.mubr.f32.mxu0 %v17154_v8 }
0x11e0   :  { %11296 = vmatpush1.bf16.msra.mxu1 %v11295_v13  ;;  %11304 = vmatpush1.bf16.msra.mxu0 %v11303_v41  ;;  %v11327_v13 = vpack.c.bf16 %v6496_v34, %v6477_v62  ;;  %v11335_v41 = vpack.c.bf16 %v6498_v42, %v6479_v56  ;;  %v6536_v62 = vrot.slane %v6503_v17, %v17161_v22 }
0x11e1   :  { %11306 = vmatprep.subr.bf16.mxu1 %v11305_v44  ;;  %11314 = vmatprep.subr.bf16.mxu0 %v11313_v52  ;;  %v6462_v44 = vld [vmem:[%s17050_s11 + $0x118] sm:$0xff]  ;;  %v6445_v52 = vld [vmem:[%s17050_s11 + $0x90] sm:$0xff] }
0x11e2   :  { %v11339_v38 = vpack.c.bf16 %v6462_v44, %v6443_v25  ;;  %v11346_v23 = vpack.c.bf16 %v6464_v35, %v6445_v52  ;;  %v6504_v25 = vld [vmem:[%s17051_s12 + $0x8] sm:$0xff] }
0x11e3   :  { %8882 = vmatmul.mubr.msk.f32.vlgmr.msra.gmra.mrb[90].mxu1 %vm2274_vm8, %v15874_v63  ;;  %8883 = vmatmul.mubr.msk.f32.vlgmr.msra.gmra.mrb[84].mxu0 %vm2274_vm8, %v15874_v63 }
0x11e4   :  { %11308 = vmatpush1.bf16.msra.mxu1 %v11307_v4  ;;  %11316 = vmatpush1.bf16.msra.mxu0 %v11315_v26  ;;  %v11341_v4 = vpack.c.bf16 %v6501_v19, %v6482_v50  ;;  %v6500_v26 = vld [vmem:[%s17050_s11 + $0x248] sm:$0xff]  ;;  %v6544_v19 = vrot.slane %v6504_v25, %v17139_v43 }
0x11e5   :  { %11310 = vmatprep.subr.bf16.mxu1 %v11309_v12  ;;  %11318 = vmatprep.subr.bf16.mxu0 %v11317_v3  ;;  %v11343_v12 = vpack.c.bf16 %v6500_v26, %v6481_v0  ;;  %v11349_v3 = vpack.c.bf16 %v6502_v51, %v6483_v10 }
0x11e6   :  { %6955 = vmatprep.mubr.f32.mxu1 %v17154_v8  ;;  %7026 = vmatprep.mubr.f32.mxu0 %v17154_v8 }
0x11e8   :  { %11312 = vmatpush1.bf16.msra.mxu1 %v11311_v37  ;;  %11320 = vmatpush1.bf16.msra.mxu0 %v11319_v15  ;;  %v6524_v37 = vrot.slane %v6503_v17, %v17157_v55 }
0x11e9   :  { %11322 = vmatprep.subr.bf16.mxu1 %v11321_v1  ;;  %11330 = vmatprep.subr.bf16.mxu0 %v11329_v60 }
0x11eb   :  { %8884 = vmatmul.mubr.msk.f32.vlgmr.msra.gmra.mrb[92].mxu1 %vm2274_vm8, %v15874_v63  ;;  %8885 = vmatmul.mubr.msk.f32.vlgmr.msra.gmra.mrb[86].mxu0 %vm2274_vm8, %v15874_v63 }
0x11ec   :  { %11324 = vmatpush1.bf16.msra.mxu1 %v11323_v61  ;;  %11332 = vmatpush1.bf16.msra.mxu0 %v11331_v11  ;;  %v6532_v61 = vrot.slane %v6503_v17, %v17158_v32  ;;  %v6556_v17 = vrot.slane %v6504_v25, %v17157_v55 }
0x11ed   :  { %11326 = vmatprep.subr.bf16.mxu1 %v11325_v7  ;;  %11334 = vmatprep.subr.bf16.mxu0 %v11333_v57 }
0x11ee   :  { %7097 = vmatprep.mubr.f32.mxu1 %v17154_v8  ;;  %7168 = vmatprep.mubr.f32.mxu0 %v17154_v8 }
0x11f0   :  { %11328 = vmatpush1.bf16.msra.mxu1 %v11327_v13  ;;  %11336 = vmatpush1.bf16.msra.mxu0 %v11335_v41 }
0x11f1   :  { %11338 = vmatprep.subr.bf16.mxu1 %v11337_v21  ;;  %11345 = vmatprep.subr.bf16.mxu0 %v17155_v59 }
0x11f3   :  { %8886 = vmatmul.mubr.msk.f32.vlgmr.msra.gmra.mrb[94].mxu1 %vm2274_vm8, %v15874_v63  ;;  %8887 = vmatmul.mubr.msk.f32.vlgmr.msra.gmra.mrb[88].mxu0 %vm2274_vm8, %v15874_v63 }
0x11f4   :  { %11340 = vmatpush1.bf16.msra.mxu1 %v11339_v38  ;;  %11347 = vmatpush3.bf16.msra.mxu0 %v11346_v23  ;;  %v6548_v23 = vrot.slane %v6504_v25, %v17141_v40 }
0x11f5   :  { %11342 = vmatprep.subr.bf16.mxu1 %v11341_v4  ;;  %11348 = vmatprep.subr.bf16.mxu0 %v17155_v59  ;;  %v6552_v4 = vrot.slane %v6504_v25, %v17143_v18 }
0x11f6   :  { %7239 = vmatprep.mubr.f32.mxu1 %v17154_v8  ;;  %10179 = vmatprep.mubr.msk.f32.mxu0 %vm11640_vm6, %v17154_v8 }
0x11f8   :  { %11344 = vmatpush1.bf16.msra.mxu1 %v11343_v12  ;;  %11350 = vmatpush3.bf16.msra.mxu0 %v11349_v3 }
0x11f9   :  { %11351 = vmatprep.subr.bf16.mxu1 %v17155_v59  ;;  %11354 = vmatprep.subr.bf16.mxu0 %v17155_v59 }
0x11fb   :  { %8888 = vmatmul.mubr.msk.f32.vlgmr.msra.gmra.mrb[96].mxu1 %vm2274_vm8, %v15874_v63  ;;  %10180 = vmatmul.mubr.msk.f32.vlgmr.msra.gmra.mrb[90].mxu0 %vm2274_vm8, %v15874_v63 }
0x11fc   :  { %10209 = vmatprep.mubr.msk.f32.mxu0 %vm11640_vm6, %v17154_v8  ;;  %10188 = vmatprep.mubr.msk.f32.mxu1 %vm11640_vm6, %v17154_v8 }
0x12ae   :  { %v6673_v63 = vpop.f32.mrb[88].mxu1  ;;  %v6744_v30 = vpop.f32.mrb[82].mxu0 }
0x12af   :  { %v16060_v15 = vadd.f32 %v6673_v63, %v6512_v24  ;;  %v6675_v28 = vpop.f32.mrb[89].mxu1  ;;  %v6746_v49 = vpop.f32.mrb[83].mxu0  ;;  %v16062_v1 = vadd.f32 %v6744_v30, %v6520_v46 }
0x12b0   :  { %v16064_v60 = vadd.f32 %v6675_v28, %v6516_v54  ;;  %v16070_v6 = vadd.f32 %v6746_v49, %v6524_v37 }
0x12b1   :  { %v7316_v27 = vsel %vm2987_vm9, %v16060_v15, 0.0  ;;  %v7319_v53 = vsel %vm2987_vm9, %v16062_v1, 0.0 }
0x12b2   :  { %v7317_v39 = vsel %vm2987_vm9, %v16064_v60, 0.0  ;;  %v7321_v7 = vsel %vm2987_vm9, %v16070_v6, 0.0 }
0x12b3   :  { %v7318_v31 = vadd.f32 %v7317_v39, %v7316_v27  ;;  %v6560_v27 = vrot.slane %v6504_v25, %v17160_v20 }
0x12b5   :  { %v7320_v11 = vadd.f32 %v7319_v53, %v7318_v31  ;;  %v6564_v31 = vrot.slane %v6504_v25, %v17158_v32  ;;  %v6568_v53 = vrot.slane %v6504_v25, %v17161_v22 }
0x12b6   :  { %v6815_v57 = vpop.f32.mrb[90].mxu1  ;;  %v6886_v34 = vpop.f32.mrb[84].mxu0 }
0x12b7   :  { %v7322_v56 = vadd.f32 %v7321_v7, %v7320_v11  ;;  %v16079_v42 = vadd.f32 %v6815_v57, %v6528_v45  ;;  %v6817_v16 = vpop.f32.mrb[91].mxu1  ;;  %v6888_v13 = vpop.f32.mrb[85].mxu0  ;;  %v16089_v44 = vadd.f32 %v6886_v34, %v6536_v62 }
0x12b8   :  { %v16082_v41 = vadd.f32 %v6817_v16, %v6532_v61  ;;  %v16093_v50 = vadd.f32 %v6888_v13, %v6540_v47 }
0x12b9   :  { %v7323_v21 = vsel %vm2987_vm9, %v16079_v42, 0.0  ;;  %v7327_v0 = vsel %vm2987_vm9, %v16089_v44, 0.0 }
0x12ba   :  { %v7324_v52 = vadd.f32 %v7323_v21, %v7322_v56  ;;  %v7325_v35 = vsel %vm2987_vm9, %v16082_v41, 0.0  ;;  %v7329_v12 = vsel %vm2987_vm9, %v16093_v50, 0.0  ;;  %v6572_v56 = vrot.slane %v6504_v25, %v17159_v29  ;;  %v6505_v21 = vld [vmem:[%s17051_s12 + $0x10] sm:$0x7] }
0x12bb   :  { %v6576_v25 = vrot.slane %v6505_v21, %v17139_v43 }
0x12bc   :  { %v7326_v38 = vadd.f32 %v7325_v35, %v7324_v52 }
0x12be   :  { %v7328_v26 = vadd.f32 %v7327_v0, %v7326_v38  ;;  %v6957_v10 = vpop.f32.mrb[92].mxu1  ;;  %v7028_v51 = vpop.f32.mrb[86].mxu0 }
0x12bf   :  { %v16102_v3 = vadd.f32 %v6957_v10, %v6544_v19  ;;  %v6959_v9 = vpop.f32.mrb[93].mxu1  ;;  %v7030_v24 = vpop.f32.mrb[87].mxu0  ;;  %v16109_v30 = vadd.f32 %v7028_v51, %v6552_v4  ;;  %v6580_v4 = vrot.slane %v6505_v21, %v17141_v40  ;;  %v6584_v10 = vrot.slane %v6505_v21, %v17143_v18 }
0x12c0   :  { %v7330_v46 = vadd.f32 %v7329_v12, %v7328_v26  ;;  %v16105_v54 = vadd.f32 %v6959_v9, %v6548_v23  ;;  %v16113_v49 = vadd.f32 %v7030_v24, %v6556_v17 }
0x12c1   :  { %v7331_v63 = vsel %vm2987_vm9, %v16102_v3, 0.0  ;;  %v7335_v45 = vsel %vm2987_vm9, %v16109_v30, 0.0 }
0x12c2   :  { %v7332_v37 = vadd.f32 %v7331_v63, %v7330_v46  ;;  %v7333_v28 = vsel %vm2987_vm9, %v16105_v54, 0.0  ;;  %v7337_v7 = vsel %vm2987_vm9, %v16113_v49, 0.0 }
0x12c4   :  { %v7334_v39 = vadd.f32 %v7333_v28, %v7332_v37 }
0x12c6   :  { %v7336_v61 = vadd.f32 %v7335_v45, %v7334_v39  ;;  %v7099_v11 = vpop.f32.mrb[94].mxu1  ;;  %v7170_v62 = vpop.f32.mrb[88].mxu0 }
0x12c7   :  { %v16122_v57 = vadd.f32 %v7099_v11, %v6560_v27  ;;  %v7101_v34 = vpop.f32.mrb[95].mxu1  ;;  %v7172_v16 = vpop.f32.mrb[89].mxu0  ;;  %v16132_v35 = vadd.f32 %v7170_v62, %v6568_v53  ;;  %v8846_v62 = vld [vmem:[#allocation5] ss:$0 sm:$0xff] }
0x12c8   :  { %v7338_v47 = vadd.f32 %v7337_v7, %v7336_v61  ;;  %v16125_v13 = vadd.f32 %v7101_v34, %v6564_v31  ;;  %v16136_v23 = vadd.f32 %v7172_v16, %v6572_v56 }
0x12c9   :  { %v7339_v52 = vsel %vm2987_vm9, %v16122_v57, 0.0  ;;  %v7343_v26 = vsel %vm2987_vm9, %v16132_v35, 0.0 }
0x12ca   :  { %v7340_v19 = vadd.f32 %v7339_v52, %v7338_v47  ;;  %v7341_v38 = vsel %vm2987_vm9, %v16125_v13, 0.0  ;;  %v7345_v17 = vsel %vm2987_vm9, %v16136_v23, 0.0 }
0x12cc   :  { %v7342_v0 = vadd.f32 %v7341_v38, %v7340_v19 }
0x12ce   :  { %v7344_v51 = vadd.f32 %v7343_v26, %v7342_v0  ;;  %v7241_v12 = vpop.f32.mrb[96].mxu1  ;;  %v7312_v9 = vpop.f32.mrb[90].mxu0 }
0x12cf   :  { %v16145_v24 = vadd.f32 %v7241_v12, %v6576_v25  ;;  %v7243_v46 = vpop.f32.mrb[97].mxu1  ;;  %v10181_v63 = vpop.f32.mrb[91].mxu0  ;;  %v16151_v39 = vadd.f32 %v7312_v9, %v6584_v10 }
0x12d0   :  { %v7346_v37 = vadd.f32 %v7345_v17, %v7344_v51  ;;  %v16147_v28 = vadd.f32 %v7243_v46, %v6580_v4 }
0x12d1   :  { %v7347_v27 = vsel %vm2987_vm9, %v16145_v24, 0.0  ;;  %v7351_v61 = vsel %vm2987_vm9, %v16151_v39, 0.0 }
0x12d2   :  { %v7348_v31 = vadd.f32 %v7347_v27, %v7346_v37  ;;  %v7349_v45 = vsel %vm2987_vm9, %v16147_v28, 0.0 }
0x12d4   :  { %v7350_v53 = vadd.f32 %v7349_v45, %v7348_v31 }
0x12d6   :  { %v7352_v11 = vadd.f32 %v7351_v61, %v7350_v53 }
0x12d8   :  { %7353 = vadd.xlane.f32.xlu0 %v7352_v11 }
0x12ee   :  { %4397 = vperm.xlu0 %11480, %v8846_v62  }
0x1365   :  { %v7354_v7 = vpop.xlane.xlu0 %7353 }
0x1366   :  { %v16157_v34 = vmul.f32 0.0004111842, %v7354_v7 }
0x1368   :  { %v16161_v56 = vsub.f32 %v16060_v15, %v16157_v34  ;;  %v16165_v16 = vsub.f32 %v16064_v60, %v16157_v34  ;;  %v16169_v21 = vsub.f32 %v16062_v1, %v16157_v34  ;;  %v16180_v60 = vsub.f32 %v16070_v6, %v16157_v34 }
0x1369   :  { %v16220_v26 = vsub.f32 %v16089_v44, %v16157_v34  ;;  %v16234_v44 = vsub.f32 %v16102_v3, %v16157_v34  ;;  %v16248_v3 = vsub.f32 %v16109_v30, %v16157_v34  ;;  %v16262_v30 = vsub.f32 %v16122_v57, %v16157_v34 }
0x136a   :  { %v7375_v52 = vmul.f32 %v16161_v56, %v16161_v56  ;;  %v7376_v1 = vmul.f32 %v16165_v16, %v16165_v16  ;;  %v16276_v57 = vsub.f32 %v16132_v35, %v16157_v34  ;;  %v16290_v35 = vsub.f32 %v16145_v24, %v16157_v34 }
0x136b   :  { %v7381_v46 = vmul.f32 %v16220_v26, %v16220_v26  ;;  %v7383_v53 = vmul.f32 %v16234_v44, %v16234_v44  ;;  %v16304_v24 = vsub.f32 %v16151_v39, %v16157_v34 }
0x136c   :  { %v7395_v6 = vsel %vm2987_vm9, %v7376_v1, 0.0  ;;  %v7387_v1 = vmul.f32 %v16262_v30, %v16262_v30 }
0x136d   :  { %v4398_v47 = vpop.permute.xlu0 %4397  ;;  %v7405_v61 = vsel %vm2987_vm9, %v7381_v46, 0.0  ;;  %17162 = vst [vmem:[#allocation24_spill] sm:$0xff] %v16304_v24  ;;  %v7391_v46 = vmul.f32 %v16290_v35, %v16290_v35 }
0x136e   :  { %v4400_v19 = vadd.f32 %v4398_v47, %v14459_v2  ;;  %v4401_v38 = vadd.f32 %v4398_v47, %v14462_v5  ;;  %v4402_v25 = vadd.f32 %v4398_v47, %v14465_v14  ;;  %v4403_v15 = vadd.f32 %v4398_v47, %v14468_v48 }
0x136f   :  { %v4404_v0 = vadd.f32 %v4398_v47, %v14472_v36  ;;  %v16206_v2 = vsub.f32 %v16079_v42, %v16157_v34  ;;  %v7377_v5 = vmul.f32 %v16169_v21, %v16169_v21  ;;  %v7394_v14 = vsel %vm2987_vm9, %v7375_v52, 0.0 }
0x1370   :  { %4405 = vst.msk [vmem:[%s17058_s19] sm:$0xff] %vm72_vm0, %v4400_v19  ;;  %4406 = vst.msk [vmem:[%s17058_s19 + $0x8] sm:$0xff] %vm72_vm0, %v4401_v38  ;;  %v16213_v48 = vsub.f32 %v16082_v41, %v16157_v34  ;;  %v7378_v36 = vmul.f32 %v16180_v60, %v16180_v60  ;;  %v7396_v4 = vadd.f32 %v7395_v6, %v7394_v14  ;;  %v7409_v19 = vsel %vm2987_vm9, %v7383_v53, 0.0 }
0x1371   :  { %4407 = vst.msk [vmem:[%s17058_s19 + $0x10] sm:$0xff] %vm72_vm0, %v4402_v25  ;;  %4408 = vst.msk [vmem:[%s17058_s19 + $0x18] sm:$0xff] %vm72_vm0, %v4403_v15  ;;  %v7379_v42 = vmul.f32 %v16206_v2, %v16206_v2  ;;  %v7397_v10 = vsel %vm2987_vm9, %v7377_v5, 0.0  ;;  %v16227_v41 = vsub.f32 %v16093_v50, %v16157_v34  ;;  %v16241_v50 = vsub.f32 %v16105_v54, %v16157_v34 }
0x1372   :  { %4409 = vst.msk [vmem:[%s17058_s19 + $0x20] sm:$0x7f] %vm77_vm2, %v4404_v0  ;;  %v7398_v51 = vadd.f32 %v7397_v10, %v7396_v4  ;;  %v7380_v12 = vmul.f32 %v16213_v48, %v16213_v48  ;;  %v7399_v9 = vsel %vm2987_vm9, %v7378_v36, 0.0  ;;  %v16255_v54 = vsub.f32 %v16113_v49, %v16157_v34 }
0x1373   :  { %v7401_v63 = vsel %vm2987_vm9, %v7379_v42, 0.0  ;;  %v7382_v27 = vmul.f32 %v16227_v41, %v16227_v41  ;;  %v7384_v62 = vmul.f32 %v16241_v50, %v16241_v50  ;;  %v7385_v52 = vmul.f32 %v16248_v3, %v16248_v3 }
0x1374   :  { %v7400_v17 = vadd.f32 %v7399_v9, %v7398_v51  ;;  %v7403_v31 = vsel %vm2987_vm9, %v7380_v12, 0.0  ;;  %v16269_v49 = vsub.f32 %v16125_v13, %v16157_v34  ;;  %v7386_v25 = vmul.f32 %v16255_v54, %v16255_v54 }
0x1375   :  { %v7407_v7 = vsel %vm2987_vm9, %v7382_v27, 0.0  ;;  %v7411_v15 = vsel %vm2987_vm9, %v7384_v62, 0.0  ;;  %v7413_v5 = vsel %vm2987_vm9, %v7385_v52, 0.0  ;;  %v16283_v13 = vsub.f32 %v16136_v23, %v16157_v34 }
0x1376   :  { %v7402_v37 = vadd.f32 %v7401_v63, %v7400_v17  ;;  %v7388_v36 = vmul.f32 %v16269_v49, %v16269_v49  ;;  %v7415_v6 = vsel %vm2987_vm9, %v7386_v25, 0.0  ;;  %v7389_v42 = vmul.f32 %v16276_v57, %v16276_v57  ;;  %v16330_v25 = vld [vmem:[%s17053_s14] sm:$0xff] }
0x1377   :  { %v7417_v10 = vsel %vm2987_vm9, %v7387_v1, 0.0  ;;  %v16297_v23 = vsub.f32 %v16147_v28, %v16157_v34  ;;  %v7390_v12 = vmul.f32 %v16283_v13, %v16283_v13  ;;  %v7425_v53 = vsel %vm2987_vm9, %v7391_v46, 0.0 }
0x1378   :  { %v7404_v45 = vadd.f32 %v7403_v31, %v7402_v37  ;;  %v7419_v9 = vsel %vm2987_vm9, %v7388_v36, 0.0  ;;  %v7421_v63 = vsel %vm2987_vm9, %v7389_v42, 0.0 }
0x1379   :  { %v7392_v28 = vmul.f32 %v16297_v23, %v16297_v23  ;;  %v7423_v27 = vsel %vm2987_vm9, %v7390_v12, 0.0 }
0x137a   :  { %v7406_v11 = vadd.f32 %v7405_v61, %v7404_v45  ;;  %v7393_v45 = vmul.f32 %v16304_v24, %v16304_v24 }
0x137b   :  { %v7427_v39 = vsel %vm2987_vm9, %v7392_v28, 0.0 }
0x137c   :  { %v7408_v47 = vadd.f32 %v7407_v7, %v7406_v11  ;;  %v7429_v11 = vsel %vm2987_vm9, %v7393_v45, 0.0 }
0x137e   :  { %v7410_v38 = vadd.f32 %v7409_v19, %v7408_v47  ;;  %v16320_v19 = vld [vmem:[%s17052_s13] sm:$0xff] }
0x137f   :  { %v7484_v36 = vrot.slane %v16320_v19, %v17158_v32  ;;  %v7464_v28 = vrot.slane %v16320_v19, %v17139_v43 }
0x1380   :  { %v7412_v0 = vadd.f32 %v7411_v15, %v7410_v38  ;;  %v16325_v38 = vld [vmem:[%s17052_s13 + $0x8] sm:$0xff] }
0x1381   :  { %v16335_v15 = vld [vmem:[%s17053_s14 + $0x8] sm:$0xff]  ;;  %v7512_v46 = vrot.slane %v16325_v38, %v17160_v20  ;;  %v7496_v45 = vrot.slane %v16325_v38, %v17139_v43 }
0x1382   :  { %v7414_v14 = vadd.f32 %v7413_v5, %v7412_v0  ;;  %v7476_v0 = vrot.slane %v16320_v19, %v17157_v55  ;;  %v7620_v42 = vrot.slane %v16335_v15, %v17141_v40  ;;  %v7632_v12 = vrot.slane %v16335_v15, %v17160_v20 }
0x1384   :  { %v7416_v4 = vadd.f32 %v7415_v6, %v7414_v14  ;;  %v7624_v14 = vrot.slane %v16335_v15, %v17143_v18 }
0x1386   :  { %v7418_v51 = vadd.f32 %v7417_v10, %v7416_v4  ;;  %v7492_v10 = vrot.slane %v16320_v19, %v17159_v29  ;;  %v7640_v4 = vrot.slane %v16335_v15, %v17161_v22 }
0x1388   :  { %v7420_v17 = vadd.f32 %v7419_v9, %v7418_v51  ;;  %v7616_v9 = vrot.slane %v16335_v15, %v17139_v43 }
0x138a   :  { %v7422_v37 = vadd.f32 %v7421_v63, %v7420_v17  ;;  %v7480_v17 = vrot.slane %v16320_v19, %v17160_v20  ;;  %v7488_v63 = vrot.slane %v16320_v19, %v17161_v22 }
0x138c   :  { %v7424_v31 = vadd.f32 %v7423_v27, %v7422_v37  ;;  %v7520_v37 = vrot.slane %v16325_v38, %v17161_v22  ;;  %v7468_v27 = vrot.slane %v16320_v19, %v17141_v40 }
0x138e   :  { %v7426_v61 = vadd.f32 %v7425_v53, %v7424_v31  ;;  %v7472_v31 = vrot.slane %v16320_v19, %v17143_v18  ;;  %v7500_v53 = vrot.slane %v16325_v38, %v17141_v40  ;;  %v7608_v19 = vrot.slane %v16330_v25, %v17161_v22 }
0x1390   :  { %v7428_v34 = vadd.f32 %v7427_v39, %v7426_v61  ;;  %v7504_v61 = vrot.slane %v16325_v38, %v17143_v18  ;;  %v7584_v39 = vrot.slane %v16330_v25, %v17139_v43 }
0x1392   :  { %v7430_v62 = vadd.f32 %v7429_v11, %v7428_v34  ;;  %v7588_v34 = vrot.slane %v16330_v25, %v17141_v40  ;;  %v16388_v11 = vld [vmem:[%s17052_s13 + $0x10] sm:$0x7] }
0x1393   :  { %17163 = vst [vmem:[#allocation19_spill] sm:$0xff] %v16388_v11 }
0x1394   :  { %7431 = vadd.xlane.f32.xlu1 %v7430_v62  ;;  %v16393_v62 = vld [vmem:[%s17053_s14 + $0x10] sm:$0x7] }
0x1395   :  { %17164 = vst [vmem:[#allocation20_spill] sm:$0xff] %v16393_v62 }
0x1421   :  { %v7432_v7 = vpop.xlane.xlu1 %7431 }
0x1422   :  { %v7433_v47 = vmul.f32 0.0004111842, %v7432_v7 }
0x1424   :  { %v7434_v52 = vadd.f32 1e-05, %v7433_v47  ;;  %v7592_v47 = vrot.slane %v16330_v25, %v17143_v18 }
0x1426   :  { %11574 = vrsqrt.f32 %v7434_v52  ;;  %v7600_v52 = vrot.slane %v16330_v25, %v17160_v20 }
0x1430   :  { %v16395_v7 = vpop.eup %11574 }
0x1431   :  { %v7436_v59 = vmul.f32 %v16395_v7, %v16161_v56  ;;  %v7437_v20 = vmul.f32 %v16395_v7, %v16165_v16  ;;  %v7438_v51 = vmul.f32 %v16395_v7, %v16169_v21  ;;  %v7439_v6 = vmul.f32 %v16395_v7, %v16180_v60 }
0x1432   :  { %v7440_v1 = vmul.f32 %v16395_v7, %v16206_v2  ;;  %v7441_v56 = vmul.f32 %v16395_v7, %v16213_v48  ;;  %v7442_v16 = vmul.f32 %v16395_v7, %v16220_v26  ;;  %v7443_v22 = vmul.f32 %v16395_v7, %v16227_v41 }
0x1433   :  { %v7444_v5 = vmul.f32 %v16395_v7, %v16234_v44  ;;  %v7445_v21 = vmul.f32 %v16395_v7, %v16241_v50  ;;  %v7446_v60 = vmul.f32 %v16395_v7, %v16248_v3  ;;  %v7447_v2 = vmul.f32 %v16395_v7, %v16255_v54 }
0x1434   :  { %v7448_v48 = vmul.f32 %v16395_v7, %v16262_v30  ;;  %v7449_v26 = vmul.f32 %v16395_v7, %v16269_v49  ;;  %v7450_v41 = vmul.f32 %v16395_v7, %v16276_v57  ;;  %v7451_v44 = vmul.f32 %v16395_v7, %v16283_v13 }
0x1435   :  { %v7556_v8 = vmul.f32 %v7464_v28, %v7436_v59  ;;  %v7557_v50 = vmul.f32 %v7468_v27, %v7437_v20  ;;  %v7558_v33 = vmul.f32 %v7472_v31, %v7438_v51  ;;  %v7559_v58 = vmul.f32 %v7476_v0, %v7439_v6 }
0x1436   :  { %v7560_v3 = vmul.f32 %v7480_v17, %v7440_v1  ;;  %v7561_v62 = vmul.f32 %v7484_v36, %v7441_v56  ;;  %v7562_v18 = vmul.f32 %v7488_v63, %v7442_v16  ;;  %v7563_v54 = vmul.f32 %v7492_v10, %v7443_v22 }
0x1437   :  { %v7564_v40 = vmul.f32 %v7496_v45, %v7444_v5  ;;  %v7565_v43 = vmul.f32 %v7500_v53, %v7445_v21  ;;  %v7566_v30 = vmul.f32 %v7504_v61, %v7446_v60  ;;  %v17165_v49 = vrot.slane %v16325_v38, %v17157_v55 }
0x1438   :  { %v7568_v24 = vmul.f32 %v7512_v46, %v7448_v48  ;;  %v17166_v57 = vrot.slane %v16325_v38, %v17158_v32  ;;  %v7570_v59 = vmul.f32 %v7520_v37, %v7450_v41  ;;  %v17167_v0 = vrot.slane %v16325_v38, %v17159_v29 }
0x1439   :  { %v7567_v11 = vmul.f32 %v17165_v49, %v7447_v2  ;;  %v16466_v36 = vadd.f32 %v7584_v39, %v7556_v8  ;;  %v16468_v6 = vadd.f32 %v7588_v34, %v7557_v50  ;;  %v16470_v5 = vadd.f32 %v7592_v47, %v7558_v33 }
0x143a   :  { %v7569_v13 = vmul.f32 %v17166_v57, %v7449_v26  ;;  %v7571_v1 = vmul.f32 %v17167_v0, %v7451_v44  ;;  %v17168_v10 = vrot.slane %v16330_v25, %v17157_v55  ;;  %v16477_v17 = vadd.f32 %v7600_v52, %v7560_v3 }
0x143b   :  { %v17169_v46 = vrot.slane %v16330_v25, %v17158_v32  ;;  %v16484_v38 = vadd.f32 %v7608_v19, %v7562_v18  ;;  %v17170_v8 = vrot.slane %v16330_v25, %v17159_v29  ;;  %v16491_v33 = vadd.f32 %v7616_v9, %v7564_v40 }
0x143c   :  { %v16475_v51 = vadd.f32 %v17168_v10, %v7559_v58  ;;  %v16493_v28 = vadd.f32 %v7620_v42, %v7565_v43  ;;  %v16495_v58 = vadd.f32 %v7624_v14, %v7566_v30  ;;  %v17171_v27 = vrot.slane %v16335_v15, %v17157_v55 }
0x143d   :  { %v16482_v63 = vadd.f32 %v17169_v46, %v7561_v62  ;;  %v16489_v37 = vadd.f32 %v17170_v8, %v7563_v54  ;;  %v16502_v45 = vadd.f32 %v7632_v12, %v7568_v24  ;;  %v17172_v18 = vrot.slane %v16335_v15, %v17158_v32 }
0x143e   :  { %v16500_v31 = vadd.f32 %v17171_v27, %v7567_v11  ;;  %v16509_v25 = vadd.f32 %v7640_v4, %v7570_v59  ;;  %v17173_v43 = vrot.slane %v16335_v15, %v17159_v29  ;;  %v16517_v14 = vmul.f32 0.5, %v16466_v36 }
0x143f   :  { %v16507_v53 = vadd.f32 %v17172_v18, %v7569_v13  ;;  %v16520_v55 = vmul.f32 0.5, %v16468_v6  ;;  %v16523_v24 = vmul.f32 0.5, %v16470_v5  ;;  %v16526_v32 = vmul.f32 0.5, %v16475_v51 }
0x1440   :  { %v16514_v40 = vadd.f32 %v17173_v43, %v7571_v1  ;;  %v7714_v4 = vmul.f32 0.044715, %v16466_v36  ;;  %v7715_v42 = vmul.f32 0.044715, %v16468_v6  ;;  %v16531_v29 = vmul.f32 0.5, %v16477_v17 }
0x1441   :  { %v16534_v15 = vmul.f32 0.5, %v16482_v63  ;;  %v7716_v12 = vmul.f32 0.044715, %v16470_v5  ;;  %v7717_v9 = vmul.f32 0.044715, %v16475_v51  ;;  %v16539_v61 = vmul.f32 0.5, %v16484_v38 }
0x1442   :  { %v16542_v39 = vmul.f32 0.5, %v16489_v37  ;;  %v16545_v34 = vmul.f32 0.5, %v16491_v33  ;;  %v7718_v11 = vmul.f32 0.044715, %v16477_v17  ;;  %v16549_v62 = vmul.f32 0.5, %v16493_v28 }
0x1443   :  { %v16552_v47 = vmul.f32 0.5, %v16495_v58  ;;  %v7719_v52 = vmul.f32 0.044715, %v16482_v63  ;;  %v16557_v19 = vmul.f32 %v16395_v7, %v16290_v35  ;;  %v7720_v20 = vmul.f32 0.044715, %v16484_v38 }
0x1444   :  { %v7733_v22 = vmul.f32 %v7714_v4, %v16466_v36  ;;  %v7734_v56 = vmul.f32 %v7715_v42, %v16468_v6  ;;  %v16564_v16 = vmul.f32 %v16395_v7, %v16297_v23  ;;  %v7721_v21 = vmul.f32 0.044715, %v16489_v37 }
0x1445   :  { %v7722_v60 = vmul.f32 0.044715, %v16491_v33  ;;  %v7735_v2 = vmul.f32 %v7716_v12, %v16470_v5  ;;  %v7736_v48 = vmul.f32 %v7717_v9, %v16475_v51  ;;  %v7723_v35 = vmul.f32 0.044715, %v16493_v28 }
0x1446   :  { %v7724_v26 = vmul.f32 0.044715, %v16495_v58  ;;  %v7725_v41 = vmul.f32 0.044715, %v16500_v31  ;;  %v7737_v44 = vmul.f32 %v7718_v11, %v16477_v17  ;;  %v7726_v50 = vmul.f32 0.044715, %v16502_v45 }
0x1447   :  { %v7727_v23 = vmul.f32 0.044715, %v16507_v53  ;;  %v7728_v3 = vmul.f32 0.044715, %v16509_v25  ;;  %v7738_v54 = vmul.f32 %v7719_v52, %v16482_v63  ;;  %v7729_v30 = vmul.f32 0.044715, %v16514_v40 }
0x1448   :  { %v7739_v49 = vmul.f32 %v7720_v20, %v16484_v38  ;;  %v7752_v57 = vmul.f32 %v7733_v22, %v16466_v36  ;;  %v7753_v13 = vmul.f32 %v7734_v56, %v16468_v6  ;;  %v7740_v59 = vmul.f32 %v7721_v21, %v16489_v37 }
0x1449   :  { %v7741_v0 = vmul.f32 %v7722_v60, %v16491_v33  ;;  %v7754_v1 = vmul.f32 %v7735_v2, %v16470_v5  ;;  %v7755_v10 = vmul.f32 %v7736_v48, %v16475_v51  ;;  %v7742_v46 = vmul.f32 %v7723_v35, %v16493_v28 }
0x144a   :  { %v7743_v8 = vmul.f32 %v7724_v26, %v16495_v58  ;;  %v7744_v27 = vmul.f32 %v7725_v41, %v16500_v31  ;;  %v7756_v18 = vmul.f32 %v7737_v44, %v16477_v17  ;;  %v7745_v43 = vmul.f32 %v7726_v50, %v16502_v45 }
0x144b   :  { %v7746_v4 = vmul.f32 %v7727_v23, %v16507_v53  ;;  %v7747_v42 = vmul.f32 %v7728_v3, %v16509_v25  ;;  %v7757_v12 = vmul.f32 %v7738_v54, %v16482_v63  ;;  %v7748_v9 = vmul.f32 %v7729_v30, %v16514_v40 }
0x144c   :  { %v7758_v11 = vmul.f32 %v7739_v49, %v16484_v38  ;;  %v7771_v52 = vadd.f32 %v7752_v57, %v16466_v36  ;;  %v7772_v20 = vadd.f32 %v7753_v13, %v16468_v6  ;;  %v7759_v22 = vmul.f32 %v7740_v59, %v16489_v37  ;;  %v17174_v13 = vld [vmem:[#allocation24_spill] sm:$0xff] }
0x144d   :  { %v7760_v56 = vmul.f32 %v7741_v0, %v16491_v33  ;;  %v7773_v21 = vadd.f32 %v7754_v1, %v16470_v5  ;;  %v7774_v60 = vadd.f32 %v7755_v10, %v16475_v51  ;;  %v7761_v2 = vmul.f32 %v7742_v46, %v16493_v28  ;;  %v17175_v46 = vld [vmem:[#allocation19_spill] sm:$0xff] }
0x144e   :  { %v7762_v48 = vmul.f32 %v7743_v8, %v16495_v58  ;;  %v7763_v35 = vmul.f32 %v7744_v27, %v16500_v31  ;;  %v7775_v26 = vadd.f32 %v7756_v18, %v16477_v17  ;;  %v7764_v36 = vmul.f32 %v7745_v43, %v16502_v45  ;;  %v17176_v8 = vld [vmem:[#allocation9_spill] sm:$0xff]  ;;  %v17178_v18 = vld [vmem:[#allocation10_spill] sm:$0xff] }
0x144f   :  { %v7765_v6 = vmul.f32 %v7746_v4, %v16507_v53  ;;  %v7766_v41 = vmul.f32 %v7747_v42, %v16509_v25  ;;  %v7776_v44 = vadd.f32 %v7757_v12, %v16482_v63  ;;  %v7767_v5 = vmul.f32 %v7748_v9, %v16514_v40  ;;  %v17180_v42 = vld [vmem:[#allocation13_spill] sm:$0xff] }
0x1450   :  { %v7777_v51 = vadd.f32 %v7758_v11, %v16484_v38  ;;  %v7790_v50 = vmul.f32 0.7978846, %v7771_v52  ;;  %v7791_v23 = vmul.f32 0.7978846, %v7772_v20  ;;  %v7778_v3 = vadd.f32 %v7759_v22, %v16489_v37  ;;  %v17182_v20 = vld [vmem:[#allocation20_spill] sm:$0xff] }
0x1451   :  { %v7779_v54 = vadd.f32 %v7760_v56, %v16491_v33  ;;  %v7792_v30 = vmul.f32 0.7978846, %v7773_v21  ;;  %v7793_v17 = vmul.f32 0.7978846, %v7774_v60  ;;  %v7780_v49 = vadd.f32 %v7761_v2, %v16493_v28 }
0x1452   :  { %v7794_v57 = vmul.f32 0.7978846, %v7775_v26  ;;  %11576 = vtanh.f32 %v7790_v50  ;;  %v7454_v59 = vmul.f32 %v16395_v7, %v17174_v13  ;;  %v7781_v63 = vadd.f32 %v7762_v48, %v16495_v58 }
0x1453   :  { %v7782_v0 = vadd.f32 %v7763_v35, %v16500_v31  ;;  %v7795_v38 = vmul.f32 0.7978846, %v7776_v44  ;;  %11578 = vtanh.f32 %v7791_v23  ;;  %v7783_v1 = vadd.f32 %v7764_v36, %v16502_v45 }
0x1454   :  { %v7784_v37 = vadd.f32 %v7765_v6, %v16507_v53  ;;  %v7796_v33 = vmul.f32 0.7978846, %v7777_v51  ;;  %11580 = vtanh.f32 %v7792_v30  ;;  %v7785_v10 = vadd.f32 %v7766_v41, %v16509_v25 }
0x1455   :  { %v7797_v28 = vmul.f32 0.7978846, %v7778_v3  ;;  %11582 = vtanh.f32 %v7793_v17  ;;  %v17177_v7 = vrot.slane %v17175_v46, %v17176_v8  ;;  %v7798_v58 = vmul.f32 0.7978846, %v7779_v54 }
0x1456   :  { %11584 = vtanh.f32 %v7794_v57  ;;  %v17179_v43 = vrot.slane %v17175_v46, %v17178_v18  ;;  %v17181_v12 = vrot.slane %v17175_v46, %v17180_v42  ;;  %v7786_v11 = vadd.f32 %v7767_v5, %v16514_v40 }
0x1457   :  { %v7572_v27 = vmul.f32 %v17177_v7, %v16557_v19  ;;  %v7799_v52 = vmul.f32 0.7978846, %v7780_v49  ;;  %11586 = vtanh.f32 %v7795_v38  ;;  %v17183_v22 = vrot.slane %v17182_v20, %v17176_v8 }
0x1458   :  { %v7573_v4 = vmul.f32 %v17179_v43, %v16564_v16  ;;  %v7574_v9 = vmul.f32 %v17181_v12, %v7454_v59  ;;  %v7800_v19 = vmul.f32 0.7978846, %v7781_v63  ;;  %11588 = vtanh.f32 %v7796_v33 }
0x1459   :  { %v16637_v56 = vadd.f32 %v17183_v22, %v7572_v27  ;;  %v17184_v21 = vrot.slane %v17182_v20, %v17178_v18  ;;  %v17185_v16 = vrot.slane %v17182_v20, %v17180_v42  ;;  %v16650_v48 = vmul.f32 0.5, %v16500_v31  ;;  %v17186_v22 = vld [vmem:[#allocation21_spill] sm:$0xff] }
0x145a   :  { %v7801_v35 = vmul.f32 0.7978846, %v7782_v0  ;;  %11590 = vtanh.f32 %v7797_v28  ;;  %v16654_v36 = vmul.f32 0.5, %v16502_v45  ;;  %v7802_v6 = vmul.f32 0.7978846, %v7783_v1 }
0x145b   :  { %v16642_v60 = vadd.f32 %v17184_v21, %v7573_v4  ;;  %v16647_v2 = vadd.f32 %v17185_v16, %v7574_v9  ;;  %v7730_v26 = vmul.f32 0.044715, %v16637_v56  ;;  %11592 = vtanh.f32 %v7798_v58 }
0x145c   :  { %v7803_v44 = vmul.f32 0.7978846, %v7784_v37  ;;  %11594 = vtanh.f32 %v7799_v52  ;;  %v11577_v50 = vpop.eup %11576  ;;  %v7804_v31 = vmul.f32 0.7978846, %v7785_v10  ;;  %v7805_v23 = vmul.f32 0.7978846, %v7786_v11 }
0x145d   :  { %v7731_v41 = vmul.f32 0.044715, %v16642_v60  ;;  %v7732_v5 = vmul.f32 0.044715, %v16647_v2  ;;  %v7749_v51 = vmul.f32 %v7730_v26, %v16637_v56  ;;  %11596 = vtanh.f32 %v7800_v19  ;;  %v11579_v54 = vpop.eup %11578 }
0x145e   :  { %11598 = vtanh.f32 %v7801_v35  ;;  %v7828_v45 = vadd.f32 1.0, %v11577_v50  ;;  %v11581_v49 = vpop.eup %11580  ;;  %v16663_v57 = vmul.f32 0.5, %v16507_v53  ;;  %v7829_v13 = vadd.f32 1.0, %v11579_v54 }
0x145f   :  { %v7750_v3 = vmul.f32 %v7731_v41, %v16642_v60  ;;  %v7751_v30 = vmul.f32 %v7732_v5, %v16647_v2  ;;  %v7768_v17 = vmul.f32 %v7749_v51, %v16637_v56  ;;  %11600 = vtanh.f32 %v7802_v6  ;;  %v11583_v63 = vpop.eup %11582 }
0x1460   :  { %11602 = vtanh.f32 %v7803_v44  ;;  %v7830_v0 = vadd.f32 1.0, %v11581_v49  ;;  %v7847_v38 = vmul.f32 %v7828_v45, %v16517_v14  ;;  %v11585_v37 = vpop.eup %11584  ;;  %v7831_v33 = vadd.f32 1.0, %v11583_v63 }
0x1461   :  { %v7769_v59 = vmul.f32 %v7750_v3, %v16642_v60  ;;  %v7770_v1 = vmul.f32 %v7751_v30, %v16647_v2  ;;  %11604 = vtanh.f32 %v7804_v31  ;;  %v7848_v10 = vmul.f32 %v7829_v13, %v16520_v55  ;;  %v11587_v53 = vpop.eup %11586 }
0x1462   :  { %v7787_v28 = vadd.f32 %v7768_v17, %v16637_v56  ;;  %11606 = vtanh.f32 %v7805_v23  ;;  %v7832_v46 = vadd.f32 1.0, %v11585_v37  ;;  %v7849_v8 = vmul.f32 %v7830_v0, %v16523_v24  ;;  %v11589_v27 = vpop.eup %11588 }
0x1463   :  { %v7788_v7 = vadd.f32 %v7769_v59, %v16642_v60  ;;  %v7833_v58 = vadd.f32 1.0, %v11587_v53  ;;  %v7850_v14 = vmul.f32 %v7831_v33, %v16526_v32  ;;  %v7885_v18 = vcombine.low %v7847_v38, %v7848_v10 }
0x1464   :  { %v7789_v43 = vadd.f32 %v7770_v1, %v16647_v2  ;;  %v11591_v4 = vpop.eup %11590  ;;  %v7834_v42 = vadd.f32 1.0, %v11589_v27  ;;  %v7851_v55 = vmul.f32 %v7832_v46, %v16531_v29  ;;  %v7806_v12 = vmul.f32 0.7978846, %v7787_v28 }
0x1465   :  { %v7807_v9 = vmul.f32 0.7978846, %v7788_v7  ;;  %v11593_v11 = vpop.eup %11592  ;;  %v7835_v52 = vadd.f32 1.0, %v11591_v4  ;;  %v7852_v20 = vmul.f32 %v7833_v58, %v16534_v15  ;;  %v7886_v24 = vcombine.low %v7849_v8, %v7850_v14 }
0x1466   :  { %v7895_v19 = vrot.slane %v7885_v18, %v17186_v22  ;;  %v11595_v21 = vpop.eup %11594  ;;  %v7836_v16 = vadd.f32 1.0, %v11593_v11  ;;  %v7853_v32 = vmul.f32 %v7834_v42, %v16539_v61  ;;  %v7808_v35 = vmul.f32 0.7978846, %v7789_v43 }
0x1467   :  { %11608 = vtanh.f32 %v7806_v12  ;;  %v11597_v26 = vpop.eup %11596  ;;  %v7837_v6 = vadd.f32 1.0, %v11595_v21  ;;  %v7854_v41 = vmul.f32 %v7835_v52, %v16542_v39  ;;  %v7887_v29 = vcombine.low %v7851_v55, %v7852_v20 }
0x1468   :  { %v7902_v44 = vrot.slane %v7886_v24, %v17186_v22  ;;  %v11599_v5 = vpop.eup %11598  ;;  %v7709_v51 = vmul.f32 0.5, %v16509_v25  ;;  %v7838_v15 = vadd.f32 1.0, %v11597_v26  ;;  %v7855_v50 = vmul.f32 %v7836_v16, %v16545_v34 }
0x1469   :  { %11610 = vtanh.f32 %v7807_v9  ;;  %v11601_v31 = vpop.eup %11600  ;;  %v7839_v23 = vadd.f32 1.0, %v11599_v5  ;;  %v7856_v61 = vmul.f32 %v7837_v6, %v16549_v62  ;;  %v7888_v3 = vcombine.low %v7853_v32, %v7854_v41 }
0x146a   :  { %v7909_v54 = vrot.slane %v7887_v29, %v17186_v22  ;;  %v11603_v45 = vpop.eup %11602  ;;  %v7840_v30 = vadd.f32 1.0, %v11601_v31  ;;  %v7857_v39 = vmul.f32 %v7838_v15, %v16552_v47  ;;  %v7917_v17 = vcombine.low %v7895_v19, %v7902_v44 }
0x146b   :  { %11612 = vtanh.f32 %v7808_v35  ;;  %v11605_v49 = vpop.eup %11604  ;;  %v7841_v13 = vadd.f32 1.0, %v11603_v45  ;;  %v7858_v25 = vmul.f32 %v7839_v23, %v16650_v48  ;;  %v7916_v34 = vrot.slane %v7888_v3, %v17186_v22  ;;  %v8908_v23 = vld [vmem:[%s17055_s16 + $0x88] sm:$0xff]  ;;  %v8053_v45 = vld [vmem:[%s17054_s15] sm:$0xff] }
0x146c   :  { %v7934_v59 = vcombine.low %v7855_v50, %v7856_v61  ;;  %v11607_v63 = vpop.eup %11606  ;;  %v7710_v0 = vmul.f32 0.5, %v16514_v40  ;;  %v7842_v62 = vadd.f32 1.0, %v11605_v49  ;;  %v7859_v38 = vmul.f32 %v7840_v30, %v16654_v36  ;;  %v8166_v61 = vld [vmem:[%s17055_s16] sm:$0xff]  ;;  %v8167_v3 = vld [vmem:[%s17055_s16 + $0x8] sm:$0xff] }
0x146d   :  { %v7925_v1 = vrot.slane %v7917_v17, %v17186_v22  ;;  %v7843_v37 = vadd.f32 1.0, %v11607_v63  ;;  %v7860_v47 = vmul.f32 %v7841_v13, %v16663_v57  ;;  %v7918_v33 = vcombine.low %v7909_v54, %v7916_v34  ;;  %v8896_v54 = vld [vmem:[%s17054_s15 + $0x28] sm:$0xff]  ;;  %v8909_v17 = vld [vmem:[%s17055_s16 + $0x90] sm:$0xff]  ;;  %v8910_v13 = vld [vmem:[%s17055_s16 + $0x98] sm:$0xff] }
0x146e   :  { %v7935_v10 = vcombine.low %v7857_v39, %v7858_v25  ;;  %v7861_v28 = vmul.f32 %v7842_v62, %v7709_v51  ;;  %v7944_v53 = vrot.slane %v7934_v59, %v17186_v22  ;;  %v7711_v57 = vmul.f32 0.5, %v16637_v56  ;;  %v8168_v25 = vld [vmem:[%s17055_s16 + $0x10] sm:$0xff]  ;;  %v8169_v34 = vld [vmem:[%s17055_s16 + $0x18] sm:$0xff]  ;;  %v8054_v63 = vld [vmem:[%s17054_s15 + $0x8] sm:$0xff] }
0x146f   :  { %v7862_v48 = vmul.f32 %v7843_v37, %v7710_v0  ;;  %v7932_v46 = vrot.slane %v7918_v33, %v17186_v22  ;;  %v7936_v8 = vcombine.low %v7859_v38, %v7860_v47  ;;  %v7712_v42 = vmul.f32 0.5, %v16642_v60  ;;  %v8897_v59 = vld [vmem:[%s17054_s15 + $0x30] sm:$0xff]  ;;  %v8911_v38 = vld [vmem:[%s17055_s16 + $0xa0] sm:$0xff]  ;;  %v8912_v37 = vld [vmem:[%s17055_s16 + $0xa8] sm:$0xff] }
0x1470   :  { %v7951_v7 = vrot.slane %v7935_v10, %v17186_v22  ;;  %v7713_v9 = vmul.f32 0.5, %v16647_v2  ;;  %v17188_v31 = vmov 0.0   ;;  %v11382_v49 = vpack.c.bf16 %v8167_v3, %v8166_v61  ;;  %v8170_v47 = vld [vmem:[%s17055_s16 + $0x20] sm:$0xff]  ;;  %v8171_v33 = vld [vmem:[%s17055_s16 + $0x28] sm:$0xff]  ;;  %v8898_v10 = vld [vmem:[%s17054_s15 + $0x38] sm:$0xff] }
0x1471   :  { %v11609_v40 = vpop.eup %11608  ;;  %v7933_v27 = vcombine.low %v7925_v1, %v7932_v46  ;;  %v7937_v58 = vcombine.low %v7861_v28, %v7862_v48  ;;  %v7958_v36 = vrot.slane %v7936_v8, %v17186_v22  ;;  %v17189_v0 = vmov 0.0|0.0   ;;  %v8055_v28 = vld [vmem:[%s17054_s15 + $0x10] sm:$0xff]  ;;  %v8914_v8 = vld [vmem:[%s17055_s16 + $0xb8] sm:$0xff] }
0x1472   :  { %v7966_v14 = vcombine.low %v7944_v53, %v7951_v7  ;;  %v7844_v43 = vadd.f32 1.0, %v11609_v40  ;;  %v11361_v62 = vpack.c.bf16 %v8910_v13, %v8909_v17  ;;  %v11385_v1 = vpack.c.bf16 %v8169_v34, %v8168_v25  ;;  %v8913_v48 = vld [vmem:[%s17055_s16 + $0xb0] sm:$0xff]  ;;  %v8173_v40 = vld [vmem:[%s17055_s16 + $0x38] sm:$0xff] }
0x1473   :  { %v11611_v18 = vpop.eup %11610  ;;  %v7965_v4 = vrot.slane %v7937_v58, %v17186_v22  ;;  %8009 = vst [vmem:[#allocation3] sm:$0xff] %v7933_v27  ;;  %v11364_v53 = vpack.c.bf16 %v8912_v37, %v8911_v38  ;;  %v11388_v46 = vpack.c.bf16 %v8171_v33, %v8170_v47  ;;  %v8172_v7 = vld [vmem:[%s17055_s16 + $0x30] sm:$0xff]  ;;  %v8899_v27 = vld [vmem:[%s17054_s15 + $0x40] sm:$0xff]  ;;  %v8056_v58 = vld [vmem:[%s17054_s15 + $0x18] sm:$0xff] }
0x1474   :  { %v7845_v55 = vadd.f32 1.0, %v11611_v18  ;;  %v7863_v11 = vmul.f32 %v7844_v43, %v7711_v57  ;;  %v7974_v20 = vrot.slane %v7966_v14, %v17186_v22  ;;  %v8915_v14 = vld [vmem:[%s17055_s16 + $0xc0] sm:$0xff]  ;;  %v11391_v18 = vpack.c.bf16 %v8173_v40, %v8172_v7  ;;  %v8916_v57 = vld [vmem:[%s17055_s16 + $0xc8] sm:$0xff]  ;;  %v8941_v47 = vld [vmem:[%s17055_s16 + $0x138] sm:$0xff] }
0x1475   :  { %v11613_v12 = vpop.eup %11612  ;;  %v7967_v52 = vcombine.low %v7958_v36, %v7965_v4  ;;  %v11367_v36 = vpack.c.bf16 %v8914_v8, %v8913_v48  ;;  %v8174_v43 = vld [vmem:[%s17055_s16 + $0x40] sm:$0xff]  ;;  %v8175_v4 = vld [vmem:[%s17055_s16 + $0x48] sm:$0xff] }
0x1476   :  { %v7846_v24 = vadd.f32 1.0, %v11613_v12  ;;  %v7864_v19 = vmul.f32 %v7845_v55, %v7712_v42  ;;  %v8900_v42 = vld [vmem:[%s17054_s15 + $0x48] sm:$0x7f]  ;;  %v8057_v55 = vld [vmem:[%s17054_s15 + $0x20] sm:$0x7f]  ;;  %v11370_v12 = vpack.c.bf16 %v8916_v57, %v8915_v14  ;;  %v8923_v14 = vld [vmem:[%s17054_s15 + $0x50] sm:$0xff] }
0x1477   :  { %v7981_v21 = vrot.slane %v7967_v52, %v17186_v22  ;;  %v8918_v52 = vld [vmem:[%s17055_s16 + $0xd8] sm:$0xff]  ;;  %v8943_v8 = vld [vmem:[%s17055_s16 + $0x148] sm:$0xff]  ;;  %v8925_v57 = vld [vmem:[%s17054_s15 + $0x60] sm:$0xff] }
0x1478   :  { %v7865_v16 = vmul.f32 %v7846_v24, %v7713_v9  ;;  %v7983_v56 = vcombine.low %v7863_v11, %v7864_v19  ;;  %v11394_v9 = vpack.c.bf16 %v8175_v4, %v8174_v43  ;;  %v8917_v11 = vld [vmem:[%s17055_s16 + $0xd0] sm:$0xff]  ;;  %v8919_v24 = vld [vmem:[%s17055_s16 + $0xe0] sm:$0xff]  ;;  %v8920_v19 = vld [vmem:[%s17055_s16 + $0xe8] sm:$0xff] }
0x1479   :  { %v7982_v32 = vcombine.low %v7974_v20, %v7981_v21  ;;  %v11373_v20 = vpack.c.bf16 %v8918_v52, %v8917_v11  ;;  %v11376_v21 = vpack.c.bf16 %v8920_v19, %v8919_v24  ;;  %v8926_v43 = vld [vmem:[%s17054_s15 + $0x68] sm:$0xff]  ;;  %v8927_v4 = vld [vmem:[%s17054_s15 + $0x70] sm:$0x7f]  ;;  %v8949_v24 = vld [vmem:[%s17055_s16 + $0x178] sm:$0xff] }
0x147a   :  { %v7990_v35 = vrot.slane %v7983_v56, %v17186_v22  ;;  %v7997_v26 = vrot.slane %v7865_v16, %v17186_v22  ;;  %v8012_v60 = vld [vmem:[#allocation3] sm:$0xff]   ;;  %v8922_v56 = vld [vmem:[%s17055_s16 + $0xf8] sm:$0xff]  ;;  %v8947_v11 = vld [vmem:[%s17055_s16 + $0x168] sm:$0xff] }
0x147b   :  { %8010 = vst [vmem:[#allocation3 + $0x8] sm:$0xff] %v7982_v32  ;;  %8013 = vst [vmem:[#allocation4] sm:$0xff] %v8012_v60   ;;  %v8921_v16 = vld [vmem:[%s17055_s16 + $0xf0] sm:$0xff] }
0x147c   :  { %v7998_v6 = vcombine.low %v7990_v35, %v7997_v26  ;;  %v11379_v32 = vpack.c.bf16 %v8922_v56, %v8921_v16  ;;  %v8176_v35 = vld [vmem:[%s17055_s16 + $0x50] sm:$0xff]  ;;  %v8177_v26 = vld [vmem:[%s17055_s16 + $0x58] sm:$0xff] }
0x147d   :  { %v11397_v60 = vpack.c.bf16 %v8177_v26, %v8176_v35 }
0x147e   :  { %v8005_v2 = vrot.slane %v7998_v6, %v17186_v22  ;;  %v8907_v22 = vld [vmem:[%s17055_s16 + $0x80] sm:$0xff] }
0x147f   :  { %v11358_v39 = vpack.c.bf16 %v8908_v23, %v8907_v22  ;;  %v8178_v6 = vld [vmem:[%s17055_s16 + $0x60] sm:$0xff] }
0x1480   :  { %8011 = vst.msk [vmem:[#allocation3 + $0x10] sm:$0x7] %vm14051_vm10, %v8005_v2  ;;  %v8179_v2 = vld [vmem:[%s17055_s16 + $0x68] sm:$0xff] }
0x1481   :  { %v11400_v41 = vpack.c.bf16 %v8179_v2, %v8178_v6 }
0x1482   :  { %v8028_v29 = vld [vmem:[#allocation3 + $0x8] sm:$0xff]   ;;  %v8050_v51 = vld [vmem:[#allocation4] sm:$0xff] }
0x1483   :  { %8029 = vst [vmem:[#allocation4 + $0x8] sm:$0xff] %v8028_v29   ;;  %v8180_v29 = vld [vmem:[%s17055_s16 + $0x70] sm:$0xff] }
0x1487   :  { %v8044_v44 = vld [vmem:[#allocation3 + $0x10] sm:$0x3]   ;;  %v8048_v5 = vld [vmem:[#allocation3 + $0x12] sm:$0x1] }
0x1488   :  { %8045 = vst [vmem:[#allocation4 + $0x10] sm:$0x3] %v8044_v44   ;;  %8049 = vst [vmem:[#allocation4 + $0x12] sm:$0x1] %v8048_v5  ;;  %v8181_v44 = vld [vmem:[%s17055_s16 + $0x78] sm:$0xff] }
0x1489   :  { %v11403_v5 = vpack.c.bf16 %v8181_v44, %v8180_v29 }
0x148a   :  { %v8051_v15 = vld [vmem:[#allocation4 + $0x8] sm:$0xff] }
0x148b   :  { %v16706_v50 = vpack.c.bf16 %v8051_v15, %v8050_v51  ;;  %v8934_v51 = vld [vmem:[%s17055_s16 + $0x100] sm:$0xff]  ;;  %v8935_v15 = vld [vmem:[%s17055_s16 + $0x108] sm:$0xff] }
0x148c   :  { %v11409_v61 = vpack.c.bf16 %v8935_v15, %v8934_v51 }
0x148d   :  { %11353 = vmatpush3.bf16.msra.mxu1 %v16706_v50  ;;  %11356 = vmatpush3.bf16.msra.mxu0 %v16706_v50 }
0x148e   :  { %10186 = vmatprep.subr.mxu1 %v17188_v31  ;;  %10207 = vmatprep.subr.mxu0 %v17188_v31 }
0x148f   :  { %v16730_v30 = vld [vmem:[#allocation4 + $0x10] sm:$0x7] }
0x1491   :  { %10187 = vmatpush3.msk.msra.mxu1 %vm3749_vm11, %v16730_v30  ;;  %10208 = vmatpush3.msk.msra.mxu0 %vm3749_vm11, %v16730_v30 }
0x1492   :  { %10210 = vmatmul.mubr.msk.f32.vlgmr.msra.gmra.mrb[92].mxu0 %vm3733_vm12, %v8896_v54  ;;  %10189 = vmatmul.mubr.msk.f32.vlgmr.msra.gmra.mrb[98].mxu1 %vm3733_vm12, %v8053_v45  ;;  %v8936_v45 = vld [vmem:[%s17055_s16 + $0x110] sm:$0xff] }
0x1493   :  { %10212 = vmatprep.mubr.msk.f32.mxu0 %vm11640_vm6, %v17188_v31  ;;  %10191 = vmatprep.mubr.msk.f32.mxu1 %vm11640_vm6, %v17188_v31 }
0x1494   :  { %11357 = vmatprep.subr.bf16.mxu1 %v17189_v0  ;;  %11381 = vmatprep.subr.bf16.mxu0 %v17189_v0 }
0x1495   :  { %11359 = vmatpush3.bf16.msra.mxu1 %v11358_v39  ;;  %11383 = vmatpush3.bf16.msra.mxu0 %v11382_v49  ;;  %v8937_v39 = vld [vmem:[%s17055_s16 + $0x118] sm:$0xff] }
0x1496   :  { %10213 = vmatmul.mubr.msk.f32.gmra.mrb[94].mxu0 %vm3733_vm12, %v8897_v59  ;;  %10192 = vmatmul.mubr.msk.f32.gmra.mrb[100].mxu1 %vm3733_vm12, %v8054_v63  ;;  %v11412_v13 = vpack.c.bf16 %v8937_v39, %v8936_v45  ;;  %v8939_v59 = vld [vmem:[%s17055_s16 + $0x128] sm:$0xff] }
0x1497   :  { %10215 = vmatprep.mubr.msk.f32.mxu0 %vm11640_vm6, %v17188_v31  ;;  %10194 = vmatprep.mubr.msk.f32.mxu1 %vm11640_vm6, %v17188_v31 }
0x1498   :  { %11360 = vmatprep.subr.bf16.mxu1 %v17189_v0  ;;  %11384 = vmatprep.subr.bf16.mxu0 %v17189_v0 }
0x1499   :  { %11362 = vmatpush3.bf16.msra.mxu1 %v11361_v62  ;;  %11386 = vmatpush3.bf16.msra.mxu0 %v11385_v1 }
0x149a   :  { %10216 = vmatmul.mubr.msk.f32.gmra.mrb[96].mxu0 %vm3733_vm12, %v8898_v10  ;;  %10195 = vmatmul.mubr.msk.f32.gmra.mrb[102].mxu1 %vm3733_vm12, %v8055_v28 }
0x149b   :  { %10218 = vmatprep.mubr.msk.f32.mxu0 %vm11640_vm6, %v17188_v31  ;;  %10197 = vmatprep.mubr.msk.f32.mxu1 %vm11640_vm6, %v17188_v31 }
0x149c   :  { %11363 = vmatprep.subr.bf16.mxu1 %v17189_v0  ;;  %11387 = vmatprep.subr.bf16.mxu0 %v17189_v0 }
0x149d   :  { %11365 = vmatpush3.bf16.msra.mxu1 %v11364_v53  ;;  %11389 = vmatpush3.bf16.msra.mxu0 %v11388_v46  ;;  %v8942_v46 = vld [vmem:[%s17055_s16 + $0x140] sm:$0xff] }
0x149e   :  { %10219 = vmatmul.mubr.msk.f32.gmra.mrb[98].mxu0 %vm3733_vm12, %v8899_v27  ;;  %10198 = vmatmul.mubr.msk.f32.gmra.mrb[104].mxu1 %vm3733_vm12, %v8056_v58  ;;  %v11421_v27 = vpack.c.bf16 %v8943_v8, %v8942_v46 }
0x149f   :  { %10221 = vmatprep.mubr.msk.f32.mxu0 %vm11640_vm6, %v17188_v31  ;;  %10200 = vmatprep.mubr.msk.f32.mxu1 %vm11640_vm6, %v17188_v31 }
0x14a0   :  { %11366 = vmatprep.subr.bf16.mxu1 %v17189_v0  ;;  %11390 = vmatprep.subr.bf16.mxu0 %v17189_v0 }
0x14a1   :  { %11368 = vmatpush3.bf16.msra.mxu1 %v11367_v36  ;;  %11392 = vmatpush3.bf16.msra.mxu0 %v11391_v18  ;;  %v8924_v18 = vld [vmem:[%s17054_s15 + $0x58] sm:$0xff] }
0x14a2   :  { %10222 = vmatmul.mubr.msk.f32.gmra.mrb[100].mxu0 %vm3733_vm12, %v8900_v42  ;;  %10201 = vmatmul.mubr.msk.f32.gmra.mrb[106].mxu1 %vm3733_vm12, %v8057_v55  ;;  %v8944_v42 = vld [vmem:[%s17055_s16 + $0x150] sm:$0xff]  ;;  %v8945_v55 = vld [vmem:[%s17055_s16 + $0x158] sm:$0xff] }
0x14a3   :  { %11369 = vmatprep.subr.bf16.mxu1 %v17189_v0  ;;  %11393 = vmatprep.subr.bf16.mxu0 %v17189_v0 }
0x14a4   :  { %10256 = vmatprep.mubr.msk.f32.mxu1 %vm11640_vm6, %v17188_v31  ;;  %10303 = vmatprep.mubr.msk.f32.mxu0 %vm11640_vm6, %v17188_v31 }
0x14a5   :  { %11371 = vmatpush3.bf16.msra.mxu1 %v11370_v12  ;;  %11395 = vmatpush3.bf16.msra.mxu0 %v11394_v9  ;;  %v11424_v12 = vpack.c.bf16 %v8945_v55, %v8944_v42  ;;  %v8946_v9 = vld [vmem:[%s17055_s16 + $0x160] sm:$0xff] }
0x14a6   :  { %11372 = vmatprep.subr.bf16.mxu1 %v17189_v0  ;;  %11396 = vmatprep.subr.bf16.mxu0 %v17189_v0  ;;  %v11427_v52 = vpack.c.bf16 %v8947_v11, %v8946_v9 }
0x14a9   :  { %11374 = vmatpush3.bf16.msra.mxu1 %v11373_v20  ;;  %11398 = vmatpush3.bf16.msra.mxu0 %v11397_v60  ;;  %v8948_v20 = vld [vmem:[%s17055_s16 + $0x170] sm:$0xff] }
0x14aa   :  { %11375 = vmatprep.subr.bf16.mxu1 %v17189_v0  ;;  %11399 = vmatprep.subr.bf16.mxu0 %v17189_v0  ;;  %v11430_v19 = vpack.c.bf16 %v8949_v24, %v8948_v20 }
0x14ad   :  { %11377 = vmatpush3.bf16.msra.mxu1 %v11376_v21  ;;  %11401 = vmatpush3.bf16.msra.mxu0 %v11400_v41  ;;  %v8950_v21 = vld [vmem:[#allocation5] ss:$0 sm:$0xff] }
0x14ae   :  { %11378 = vmatprep.subr.bf16.mxu1 %v17189_v0  ;;  %11402 = vmatprep.subr.bf16.mxu0 %v17189_v0 }
0x14af   :  { %8716 = vperm.xlu1 %11481, %v8950_v21  }
0x14b1   :  { %11380 = vmatpush3.bf16.msra.mxu1 %v11379_v32  ;;  %11404 = vmatpush3.bf16.msra.mxu0 %v11403_v5 }
0x14b2   :  { %11405 = vmatprep.subr.bf16.mxu1 %v17189_v0  ;;  %11408 = vmatprep.subr.bf16.mxu0 %v17189_v0 }
0x1565   :  { %v8268_v22 = vpop.f32.mrb[92].mxu0  ;;  %v8142_v23 = vpop.f32.mrb[98].mxu1 }
0x1566   :  { %10257 = vmatmul.mubr.f32.vlgmr.msra.gmra.mrb[108].mxu1 %v8268_v22  ;;  %v10211_v3 = vpop.f32.mrb[93].mxu0  ;;  %10304 = vmatmul.mubr.f32.vlgmr.msra.gmra.mrb[102].mxu0 %v8142_v23  ;;  %v10190_v54 = vpop.f32.mrb[99].mxu1 }
0x1567   :  { %11407 = vmatpush3.bf16.msra.mxu1 %v16706_v50  ;;  %10259 = vmatprep.mubr.msk.f32.mxu1 %vm11640_vm6, %v17188_v31  ;;  %v8938_v50 = vld [vmem:[%s17055_s16 + $0x120] sm:$0xff] }
0x1568   :  { %10322 = vmatprep.subr.mxu1 %v17188_v31  ;;  %10306 = vmatprep.mubr.msk.f32.mxu0 %vm11640_vm6, %v17188_v31  ;;  %v11415_v38 = vpack.c.bf16 %v8939_v59, %v8938_v50 }
0x1569   :  { %v8273_v17 = vpop.f32.mrb[94].mxu0  ;;  %v8147_v49 = vpop.f32.mrb[100].mxu1  ;;  %11410 = vmatpush3.bf16.msra.mxu0 %v11409_v61 }
0x156a   :  { %10260 = vmatmul.mubr.f32.gmra.mrb[110].mxu1 %v8273_v17  ;;  %v10214_v25 = vpop.f32.mrb[95].mxu0  ;;  %10307 = vmatmul.mubr.f32.gmra.mrb[104].mxu0 %v8147_v49  ;;  %v10193_v34 = vpop.f32.mrb[101].mxu1 }
0x156b   :  { %10323 = vmatpush3.msk.msra.mxu1 %vm3749_vm11, %v16730_v30  ;;  %10262 = vmatprep.mubr.msk.f32.mxu1 %vm11640_vm6, %v17188_v31  ;;  %v8940_v30 = vld [vmem:[%s17055_s16 + $0x130] sm:$0xff]  ;;  %s11643_s16 = smov [#allocation6]  }
0x156c   :  { %10309 = vmatprep.mubr.msk.f32.mxu0 %vm11640_vm6, %v17188_v31  ;;  %11411 = vmatprep.subr.bf16.mxu0 %v17189_v0  ;;  %v11418_v28 = vpack.c.bf16 %v8941_v47, %v8940_v30  ;;  %s8736_s0 = sshll.u32 %s11643_s16, 4  ;;  %s8737_s0 = int_to_ptr.vmem [resolvable:$true] %s8736_s0 }
0x156d   :  { %v8278_v63 = vpop.f32.mrb[96].mxu0  ;;  %v8152_v62 = vpop.f32.mrb[102].mxu1  ;;  %11413 = vmatpush3.bf16.msra.mxu0 %v11412_v13  ;;  %s11614_s30 = scalar_lea.vmem %s8737_s0, 32  ;;  %p11619_p1 = scmp.lt.s32.totalorder %s8737_s0, %s8737_s0 }
0x156e   :  { %10263 = vmatmul.mubr.f32.gmra.mrb[112].mxu1 %v8278_v63  ;;  %v10217_v1 = vpop.f32.mrb[97].mxu0  ;;  %10310 = vmatmul.mubr.f32.gmra.mrb[106].mxu0 %v8152_v62  ;;  %v10196_v37 = vpop.f32.mrb[103].mxu1  ;;  %p11615_p0 = scmp.ne.s32.totalorder %s8737_s0, %s11614_s30  ;;  %p11620_p2 = scmp.lt.s32.totalorder %s11614_s30, %s11614_s30 }
0x156f   :  { %10265 = vmatprep.mubr.msk.f32.mxu1 %vm11640_vm6, %v17188_v31  ;;  %10312 = vmatprep.mubr.msk.f32.mxu0 %vm11640_vm6, %v17188_v31 }
0x1570   :  { %11414 = vmatprep.subr.bf16.mxu0 %v17189_v0  ;;  %p11621_p3 = por %p11620_p2, %p11619_p1 }
0x1571   :  { %v8283_v33 = vpop.f32.mrb[98].mxu0  ;;  %v8157_v10 = vpop.f32.mrb[104].mxu1  ;;  %11416 = vmatpush3.bf16.msra.mxu0 %v11415_v38 }
0x1572   :  { %10266 = vmatmul.mubr.f32.gmra.mrb[114].mxu1 %v8283_v33  ;;  %v10220_v53 = vpop.f32.mrb[99].mxu0  ;;  %10313 = vmatmul.mubr.f32.gmra.mrb[108].mxu0 %v8157_v10  ;;  %v10199_v48 = vpop.f32.mrb[105].mxu1  ;;  %p11622_p4 = pnand %p11621_p3, %p11615_p0 }
0x1573   :  { %10268 = vmatprep.mubr.msk.f32.mxu1 %vm11640_vm6, %v17188_v31  ;;  %10315 = vmatprep.mubr.msk.f32.mxu0 %vm11640_vm6, %v17188_v31 }
0x1574   :  { %11417 = vmatprep.subr.bf16.mxu0 %v17189_v0 }
0x1575   :  { %v8288_v7 = vpop.f32.mrb[100].mxu0  ;;  %v8162_v40 = vpop.f32.mrb[106].mxu1  ;;  %11419 = vmatpush3.bf16.msra.mxu0 %v11418_v28 }
0x1576   :  { %10269 = vmatmul.mubr.f32.gmra.mrb[116].mxu1 %v8288_v7  ;;  %v10223_v58 = vpop.f32.mrb[101].mxu0  ;;  %10316 = vmatmul.mubr.f32.gmra.mrb[110].mxu0 %v8162_v40  ;;  %v10202_v36 = vpop.f32.mrb[107].mxu1 }
0x1577   :  { %10324 = vmatprep.mubr.msk.f32.mxu1 %vm11640_vm6, %v17188_v31  ;;  %11420 = vmatprep.subr.bf16.mxu0 %v17189_v0 }
0x1578   :  { %10371 = vmatprep.mubr.msk.f32.mxu0 %vm11640_vm6, %v17188_v31 }
0x1579   :  { %11422 = vmatpush3.bf16.msra.mxu0 %v11421_v27 }
0x157a   :  { %10325 = vmatmul.mubr.msk.f32.vlgmr.msra.gmra.mrb[118].mxu1 %vm3733_vm12, %v8923_v14  ;;  %11423 = vmatprep.subr.bf16.mxu0 %v17189_v0 }
0x157b   :  { %10327 = vmatprep.mubr.msk.f32.mxu1 %vm11640_vm6, %v17188_v31 }
0x157d   :  { %11425 = vmatpush3.bf16.msra.mxu0 %v11424_v12 }
0x157e   :  { %10328 = vmatmul.mubr.msk.f32.gmra.mrb[120].mxu1 %vm3733_vm12, %v8924_v18  ;;  %11426 = vmatprep.subr.bf16.mxu0 %v17189_v0 }
0x157f   :  { %10330 = vmatprep.mubr.msk.f32.mxu1 %vm11640_vm6, %v17188_v31 }
0x1581   :  { %11428 = vmatpush3.bf16.msra.mxu0 %v11427_v52 }
0x1582   :  { %10331 = vmatmul.mubr.msk.f32.gmra.mrb[122].mxu1 %vm3733_vm12, %v8925_v57  ;;  %11429 = vmatprep.subr.bf16.mxu0 %v17189_v0 }
0x1583   :  { %10333 = vmatprep.mubr.msk.f32.mxu1 %vm11640_vm6, %v17188_v31 }
0x1585   :  { %11431 = vmatpush3.bf16.msra.mxu0 %v11430_v19 }
0x1586   :  { %10334 = vmatmul.mubr.msk.f32.gmra.mrb[124].mxu1 %vm3733_vm12, %v8926_v43 }
0x1587   :  { %10336 = vmatprep.mubr.msk.f32.mxu1 %vm11640_vm6, %v17188_v31 }
0x158a   :  { %10337 = vmatmul.mubr.msk.f32.gmra.mrb[126].mxu1 %vm3733_vm12, %v8927_v4 }
0x1639   :  { %v8374_v16 = vpop.f32.mrb[108].mxu1  ;;  %v8464_v56 = vpop.f32.mrb[102].mxu0 }
0x163a   :  { %v10258_v32 = vpop.f32.mrb[109].mxu1  ;;  %v8465_v35 = vadd.f32 %v8464_v56, %v8374_v16  ;;  %v10305_v26 = vpop.f32.mrb[103].mxu0 }
0x163d   :  { %v8379_v60 = vpop.f32.mrb[110].mxu1  ;;  %v8469_v6 = vpop.f32.mrb[104].mxu0 }
0x163e   :  { %v10261_v0 = vpop.f32.mrb[111].mxu1  ;;  %v8470_v2 = vadd.f32 %v8469_v6, %v8379_v60  ;;  %v10308_v41 = vpop.f32.mrb[105].mxu0 }
0x1641   :  { %v8384_v29 = vpop.f32.mrb[112].mxu1  ;;  %v8474_v44 = vpop.f32.mrb[106].mxu0 }
0x1642   :  { %v10264_v5 = vpop.f32.mrb[113].mxu1  ;;  %v8475_v51 = vadd.f32 %v8474_v44, %v8384_v29  ;;  %v10311_v15 = vpop.f32.mrb[107].mxu0 }
0x1645   :  { %v8389_v22 = vpop.f32.mrb[114].mxu1  ;;  %v8479_v23 = vpop.f32.mrb[108].mxu0 }
0x1646   :  { %v10267_v61 = vpop.f32.mrb[115].mxu1  ;;  %v8480_v3 = vadd.f32 %v8479_v23, %v8389_v22  ;;  %v10314_v54 = vpop.f32.mrb[109].mxu0 }
0x1649   :  { %v8394_v45 = vpop.f32.mrb[116].mxu1  ;;  %v8484_v39 = vpop.f32.mrb[110].mxu0 }
0x164a   :  { %v10270_v17 = vpop.f32.mrb[117].mxu1  ;;  %v8485_v49 = vadd.f32 %v8484_v39, %v8394_v45  ;;  %v10317_v13 = vpop.f32.mrb[111].mxu0 }
0x164d   :  { %v8574_v25 = vpop.f32.mrb[118].mxu1 }
0x164e   :  { %10372 = vmatmul.mubr.f32.vlgmr.msra.gmra.mrb[112].mxu0 %v8574_v25  ;;  %v10326_v34 = vpop.f32.mrb[119].mxu1 }
0x164f   :  { %10374 = vmatprep.mubr.msk.f32.mxu0 %vm11640_vm6, %v17188_v31 }
0x1651   :  { %v8579_v50 = vpop.f32.mrb[120].mxu1 }
0x1652   :  { %10375 = vmatmul.mubr.f32.gmra.mrb[114].mxu0 %v8579_v50  ;;  %v10329_v59 = vpop.f32.mrb[121].mxu1 }
0x1653   :  { %10377 = vmatprep.mubr.msk.f32.mxu0 %vm11640_vm6, %v17188_v31 }
0x1655   :  { %v8584_v63 = vpop.f32.mrb[122].mxu1 }
0x1656   :  { %10378 = vmatmul.mubr.f32.gmra.mrb[116].mxu0 %v8584_v63  ;;  %v10332_v62 = vpop.f32.mrb[123].mxu1 }
0x1657   :  { %10380 = vmatprep.mubr.msk.f32.mxu0 %vm11640_vm6, %v17188_v31 }
0x1659   :  { %v8589_v38 = vpop.f32.mrb[124].mxu1 }
0x165a   :  { %10381 = vmatmul.mubr.f32.gmra.mrb[118].mxu0 %v8589_v38  ;;  %v10335_v1 = vpop.f32.mrb[125].mxu1 }
0x165b   :  { %10383 = vmatprep.mubr.msk.f32.mxu0 %vm11640_vm6, %v17188_v31 }
0x165d   :  { %v8594_v37 = vpop.f32.mrb[126].mxu1 }
0x165e   :  { %10384 = vmatmul.mubr.f32.gmra.mrb[120].mxu0 %v8594_v37  ;;  %v10338_v30 = vpop.f32.mrb[127].mxu1 }
0x165f   :  { %11625 = shalt.err (!%p11622_p4)
}
0x1660   :  { %s11626_s21 = scalar_lea.hbm %s17057_s18, 32 }
0x1661   :  { %p11627_p5 = scmp.ne.s32.totalorder %s17057_s18, %s11626_s21  ;;  %p11630_p6 = scmp.lt.u32.totalorder %s11626_s21, %s17057_s18 }
0x1663   :  { %p11632_p7 = pnand %p11630_p6, %p11627_p5 }
0x1665   :  { %11635 = shalt.err (!%p11632_p7)
}
0x1666   :  { %8739 = dma.vmem_to_hbm [thread:$0]  %s8737_s0, 32, %s17057_s18, [#allocation7]   ;;  %v8717_v47 = vpop.permute.xlu1 %8716 }
0x1721   :  { %v8680_v31 = vpop.f32.mrb[112].mxu0 }
0x1722   :  { %v8704_v33 = vadd.f32 %v8680_v31, %v8465_v35  ;;  %v10373_v10 = vpop.f32.mrb[113].mxu0 }
0x1724   :  { %v8719_v28 = vadd.f32 %v8717_v47, %v8704_v33 }
0x1725   :  { %v8685_v53 = vpop.f32.mrb[114].mxu0 }
0x1726   :  { %8951 = vst.msk [vmem:[%s17058_s19 + $0x28] sm:$0xff] %vm72_vm0, %v8719_v28  ;;  %v8705_v48 = vadd.f32 %v8685_v53, %v8470_v2  ;;  %v10376_v46 = vpop.f32.mrb[115].mxu0 }
0x1728   :  { %v8720_v8 = vadd.f32 %v8717_v47, %v8705_v48 }
0x1729   :  { %v8690_v7 = vpop.f32.mrb[116].mxu0 }
0x172a   :  { %8952 = vst.msk [vmem:[%s17058_s19 + $0x30] sm:$0xff] %vm72_vm0, %v8720_v8  ;;  %v8706_v40 = vadd.f32 %v8690_v7, %v8475_v51  ;;  %v10379_v27 = vpop.f32.mrb[117].mxu0 }
0x172c   :  { %v8721_v58 = vadd.f32 %v8717_v47, %v8706_v40 }
0x172d   :  { %v8695_v36 = vpop.f32.mrb[118].mxu0 }
0x172e   :  { %8953 = vst.msk [vmem:[%s17058_s19 + $0x38] sm:$0xff] %vm72_vm0, %v8721_v58  ;;  %v8707_v14 = vadd.f32 %v8695_v36, %v8480_v3  ;;  %v10382_v18 = vpop.f32.mrb[119].mxu0 }
0x1730   :  { %v8722_v57 = vadd.f32 %v8717_v47, %v8707_v14 }
0x1731   :  { %v8700_v43 = vpop.f32.mrb[120].mxu0 }
0x1732   :  { %8954 = vst.msk [vmem:[%s17058_s19 + $0x40] sm:$0xff] %vm72_vm0, %v8722_v57  ;;  %v8708_v4 = vadd.f32 %v8700_v43, %v8485_v49  ;;  %v10385_v42 = vpop.f32.mrb[121].mxu0 }
0x1734   :  { %v8723_v55 = vadd.f32 %v8717_v47, %v8708_v4 }
0x1736   :  { %8955 = vst.msk [vmem:[%s17058_s19 + $0x48] sm:$0x7f] %vm77_vm2, %v8723_v55 }
0x1737   :  { %11636 = dma.done.wait [#allocation7], 32  }
0x1738   :  { %11637 = vsyncadd [#allocation7], 4294967264 }
0x1739   :  { %8747 = vsyncpa [#allocation7], 1 }

</bundles_post_ra>
